<compile_context>
chip_gen: v7x
topology: tpu7x:2x2x1
jax: 0.10.0
libtpu: 0.0.40
codegen_flags: <defaults>
</compile_context>

<pallas_src>
import jax
import jax.numpy as jnp
from jax.experimental import pallas as pl
from jax.experimental.pallas import tpu as pltpu


# ------------------------------- Pallas kernel -------------------------------

def _net_kernel(img_ref,
                w1a_ref, b1a_ref, w2a_ref, uy8_ref,
                w1c_ref, b1c_ref, w2c_ref, b2c_ref,
                w1p_ref, bf1_ref, w2f_ref, bf2_ref,
                logp_ref, timg_ref, attn_ref):
    """Fused forward pass for one batch tile (all intermediates in VMEM)."""
    bt = img_ref.shape[0]
    img = img_ref[...]                                      # (bt, 28, 28) f32

    def shifted_cat(x3, ho, k=5):
        """Lane-concat of the k y-shifted slabs -> (bt*ho, k*L) merged-K lhs."""
        slabs = [x3[:, ky:ky + ho, :] for ky in range(k)]
        cat = jnp.concatenate(slabs, axis=-1)               # (bt, ho, k*L)
        return cat.reshape(bt * ho, k * x3.shape[2])

    # ---- attention branch: conv_att_1 (1 -> 48, k=5) + ReLU, one K=140 matmul ----
    lhs_a = shifted_cat(img.astype(jnp.bfloat16), 24)                    # (bt*24, 140)
    h = jnp.dot(lhs_a, w1a_ref[...], preferred_element_type=jnp.float32) + b1a_ref[...]
    hb = jnp.maximum(h, 0.0).astype(jnp.bfloat16)                        # (bt*24, 1152)

    # ---- conv_att_2 (48 -> 1, k=5; BN scale + x-upsample folded into weights) ----
    # One wide matmul over all 24 rows; the 5 ky bands are combined by shifting
    # the narrow 28-lane OUTPUT (no relayout of the 1152-lane activation).
    # The scalar conv bias + BN shift is a spatial constant -> exact no-op
    # under the spatial softmax below, so it is dropped.
    d = jnp.dot(hb, w2a_ref[...], preferred_element_type=jnp.float32)    # (bt*24, 140)
    d3 = d.reshape(bt, 24, 140)
    fm = d3[:, 0:20, 0:28]
    for ky in range(1, 5):
        fm = fm + d3[:, ky:ky + 20, ky * 28:(ky + 1) * 28]               # (bt, 20, 28)

    # ---- y-direction bilinear upsample 20 -> 28 via fixed kron(eye(8), u) ----
    fmf = fm.reshape(bt * 20, 28).astype(jnp.bfloat16)
    parts = [jnp.dot(uy8_ref[...], fmf[s * 160:(s + 1) * 160, :],
                     preferred_element_type=jnp.float32)
             for s in range(bt // 8)]                                    # (224, 28) each
    fm_up = jnp.concatenate(parts, axis=0).reshape(bt, 28, 28)

    # ---- Dham: spatial softmax over pixels, gate the image ----
    # TODO(synk): `Dham` is not defined in the reference source; implemented as
    # softmax(bilinearly upsampled feature map) gating of the image.
    m = jnp.max(jnp.max(fm_up, axis=2, keepdims=True), axis=1, keepdims=True)
    e = jnp.exp(fm_up - m)
    s = jnp.sum(jnp.sum(e, axis=2, keepdims=True), axis=1, keepdims=True)
    attn = e * pl.reciprocal(s, approx=True)
    timg = img * attn * jnp.float32(28 * 28)
    attn_ref[...] = attn
    timg_ref[...] = timg

    # ---- classifier conv1 (1 -> 10, k=5) + fused 2x2 maxpool + ReLU ----
    lhs1 = shifted_cat(timg.astype(jnp.bfloat16), 24)                    # (bt*24, 140)
    c1 = jnp.dot(lhs1, w1c_ref[...], preferred_element_type=jnp.float32) + b1c_ref[...]
    c1 = jnp.maximum(c1[:, :128], c1[:, 128:])              # x-pool, 128-aligned halves
    c1 = jnp.max(c1.reshape(bt * 12, 2, 128), axis=1)       # y-pool over row pairs
    p1 = jnp.maximum(c1, 0.0).astype(jnp.bfloat16).reshape(bt, 12, 128)  # 120 valid lanes

    # ---- classifier conv2 (10 -> 20, k=5) + fused 2x2 maxpool + ReLU ----
    lhs2 = shifted_cat(p1, 8)                                            # (bt*8, 640)
    c2 = jnp.dot(lhs2, w2c_ref[...], preferred_element_type=jnp.float32) + b2c_ref[...]
    c2 = jnp.maximum(c2[:, :128], c2[:, 128:])
    c2 = jnp.max(c2.reshape(bt * 4, 2, 128), axis=1)
    p2 = jnp.maximum(c2, 0.0).astype(jnp.bfloat16).reshape(bt, 4, 128)   # 80 valid lanes

    # ---- fc1 (+ReLU); flatten folded in as 4 row-block matmuls, N padded 128 ----
    f1 = None
    for yp in range(4):
        dyp = jnp.dot(p2[:, yp, :], w1p_ref[yp], preferred_element_type=jnp.float32)
        f1 = dyp if f1 is None else f1 + dyp
    f1 = jnp.maximum(f1 + bf1_ref[...], 0.0)                # (bt, 128); cols >= 50 are 0
    # TODO(synk): F.dropout / nn.Dropout2d are inference-mode identities here.

    # ---- fc2 + log_softmax ----
    logits = jnp.dot(f1.astype(jnp.bfloat16), w2f_ref[...],
                     preferred_element_type=jnp.float32) + bf2_ref[...]
    mz = jnp.max(logits, axis=-1, keepdims=True)
    z = logits - mz
    lse = jnp.log(jnp.sum(jnp.exp(z), axis=-1, keepdims=True))
    logp_ref[...] = z - lse


# ---------------------------- weight preparation -----------------------------

def _banded_weight(w, w_in, *, pool_pad=None):
    """Banded matmul weights for a 'valid' conv, one (W_in*Cin, N) block per ky.

    w: (Cout, Cin, k, k) PyTorch layout.  Contraction index is xi*Cin + ci.
    Output lane index:
      pool_pad=None: xo*Cout + co
      pool_pad=P   : dx*P + xp*Cout + co  (xo = 2*xp + dx), each dx block zero
                     padded to P lanes so the in-kernel x-pool halves are
                     128-lane aligned.
    Returns (k, W_in*Cin, N).
    """
    cout, cin, k, _ = w.shape
    wo = w_in - k + 1
    xi = jnp.arange(w_in)[:, None]
    xo = jnp.arange(wo)[None, :]
    kx = xi - xo
    valid = ((kx >= 0) & (kx < k)).astype(w.dtype)
    kxc = jnp.clip(kx, 0, k - 1)
    wg = w[:, :, :, kxc] * valid[None, None, None]          # (Cout, Cin, k, W_in, Wo)
    wg = wg.transpose(2, 3, 1, 4, 0)                        # (k, W_in, Cin, Wo, Cout)
    if pool_pad is None:
        return wg.reshape(k, w_in * cin, wo * cout)
    wp = wo // 2
    wg = wg.reshape(k, w_in, cin, wp, 2, cout).transpose(0, 1, 2, 4, 3, 5)
    wg = wg.reshape(k, w_in * cin, 2, wp * cout)
    wg = jnp.pad(wg, ((0, 0), (0, 0), (0, 0), (0, pool_pad - wp * cout)))
    return wg.reshape(k, w_in * cin, 2 * pool_pad)


def prepare_params(params):
    """One-time (outside the per-call jit) folding / padding / bf16 cast."""
    bf16, f32 = jnp.bfloat16, jnp.float32
    eps = 1e-5  # eval-mode BatchNorm folded into conv_att_2 (scale only).
    scale = params["bn_gamma"] / jnp.sqrt(params["bn_var"] + eps)
    w_att2 = params["w_att2"] * scale[:, None, None, None]

    # Bilinear 20 -> 28 interpolation matrix (jax.image.resize 'bilinear').
    u = jax.image.resize(jnp.eye(20, dtype=f32), (28, 20), method="bilinear")  # (28, 20)

    # conv_att_1: merged-K banded weight (140, 1152).
    w1a = _banded_weight(params["w_att1"], 28).reshape(140, 1152).astype(bf16)
    b1a = jnp.tile(params["b_att1"], 24)[None].astype(f32)                     # (1, 1152)

    # conv_att_2: BN scale folded, x-upsample folded, ky bands merged on lanes.
    t2a = _banded_weight(w_att2, 24)                                           # (5, 1152, 20)
    t2a = jnp.einsum("kio,ox->kix", t2a, u.T)                                  # (5, 1152, 28)
    w2a = t2a.transpose(1, 0, 2).reshape(1152, 140).astype(bf16)

    # Fixed y-upsample operator for one 8-image row group (batch independent).
    uy8 = jnp.kron(jnp.eye(8, dtype=f32), u).astype(bf16)                      # (224, 160)

    # conv1: merged-K, pool-ordered lanes, dx blocks padded 120 -> 128.
    w1c = _banded_weight(params["w1"], 28, pool_pad=128).reshape(140, 256).astype(bf16)
    b1c_half = jnp.pad(jnp.tile(params["b1"], 12), (0, 8))
    b1c = jnp.concatenate([b1c_half, b1c_half])[None].astype(f32)              # (1, 256)

    # conv2: contraction rows padded 120 -> 128 per ky (input carries 8 zero lanes).
    t2c = _banded_weight(params["w2"], 12, pool_pad=128)                       # (5, 120, 256)
    w2c = jnp.pad(t2c, ((0, 0), (0, 8), (0, 0))).reshape(640, 256).astype(bf16)
    b2c_half = jnp.pad(jnp.tile(params["b2"], 4), (0, 48))
    b2c = jnp.concatenate([b2c_half, b2c_half])[None].astype(f32)              # (1, 256)

    # fc1: (yp, xp, c) row blocks, rows padded 80 -> 128, out features 50 -> 128.
    w1p = params["fc1_w"].reshape(50, 20, 4, 4).transpose(2, 3, 1, 0).reshape(4, 80, 50)
    w1p = jnp.pad(w1p, ((0, 0), (0, 48), (0, 78))).astype(bf16)                # (4, 128, 128)
    bf1 = jnp.pad(params["fc1_b"], (0, 78))[None].astype(f32)                  # (1, 128)
    w2f = jnp.pad(params["fc2_w"].T, ((0, 78), (0, 0))).astype(bf16)           # (128, 10)
    bf2 = params["fc2_b"][None].astype(f32)                                    # (1, 10)

    return (w1a, b1a, w2a, uy8, w1c, b1c, w2c, b2c, w1p, bf1, w2f, bf2)


# --------------------------------- forward -----------------------------------

def _pick_bt(B):
    """Fixed batch tile: multiple of 8, capped at 64 (fits v7x's 64 MiB VMEM)."""
    if B >= 64:
        return 64
    return max(8, ((B + 7) // 8) * 8)


@jax.jit
def net_forward(prepped, image):
    B = image.shape[0]
    bt = _pick_bt(B)
    Bp = ((B + bt - 1) // bt) * bt
    img = image.reshape(B, 28, 28).astype(jnp.float32)
    if Bp != B:
        img = jnp.pad(img, ((0, Bp - B), (0, 0), (0, 0)))

    weights = list(prepped)

    def full_spec(arr):
        nd = arr.ndim
        return pl.BlockSpec(arr.shape, lambda i, _nd=nd: (0,) * _nd)

    logp, timg, attn = pl.pallas_call(
        _net_kernel,
        grid=(Bp // bt,),
        out_shape=(jax.ShapeDtypeStruct((Bp, 10), jnp.float32),
                   jax.ShapeDtypeStruct((Bp, 28, 28), jnp.float32),
                   jax.ShapeDtypeStruct((Bp, 28, 28), jnp.float32)),
        in_specs=[pl.BlockSpec((bt, 28, 28), lambda i: (i, 0, 0))]
                 + [full_spec(w) for w in weights],
        out_specs=(pl.BlockSpec((bt, 10), lambda i: (i, 0)),
                   pl.BlockSpec((bt, 28, 28), lambda i: (i, 0, 0)),
                   pl.BlockSpec((bt, 28, 28), lambda i: (i, 0, 0))),
        compiler_params=pltpu.CompilerParams(
            dimension_semantics=("parallel",),
            vmem_limit_bytes=48 * 1024 * 1024),
    )(img, *weights)

    logp = logp[:B]
    timg = timg[:B].reshape(B, 1, 28, 28)
    attn = attn[:B].reshape(B, 1, 28, 28)
    return logp, timg, attn


# ----------------------------- parameter init --------------------------------

def init_params(key):
    ks = jax.random.split(key, 12)

    def u(k, shape, fan_in):
        bound = 1.0 / float(fan_in) ** 0.5
        return jax.random.uniform(k, shape, jnp.float32, -bound, bound)

    p = {}
    p["w_att1"] = u(ks[0], (48, 1, 5, 5), 1 * 25)
    p["b_att1"] = u(ks[1], (48,), 1 * 25)
    p["w_att2"] = u(ks[2], (1, 48, 5, 5), 48 * 25)
    p["b_att2"] = u(ks[3], (1,), 48 * 25)
    # BatchNorm2d(1) eval defaults: gamma=1, beta=0, running_mean=0, running_var=1.
    p["bn_gamma"] = jnp.ones((1,), jnp.float32)
    p["bn_beta"] = jnp.zeros((1,), jnp.float32)
    p["bn_mean"] = jnp.zeros((1,), jnp.float32)
    p["bn_var"] = jnp.ones((1,), jnp.float32)
    p["w1"] = u(ks[4], (10, 1, 5, 5), 1 * 25)
    p["b1"] = u(ks[5], (10,), 1 * 25)
    p["w2"] = u(ks[6], (20, 10, 5, 5), 10 * 25)
    p["b2"] = u(ks[7], (20,), 10 * 25)
    p["fc1_w"] = u(ks[8], (50, 320), 320)
    p["fc1_b"] = u(ks[9], (50,), 320)
    p["fc2_w"] = u(ks[10], (10, 50), 50)
    p["fc2_b"] = u(ks[11], (10,), 50)
    return p


if __name__ == "__main__":
    key = jax.random.PRNGKey(0)
    pkey, xkey = jax.random.split(key)
    params = init_params(pkey)
    prepped = prepare_params(params)          # one-time prep, outside the jitted call
    image = jax.random.normal(xkey, (2, 1, 28, 28), jnp.float32)  # MNIST-like NCHW

    logp, timg, attn = net_forward(prepped, image)
    jax.block_until_ready((logp, timg, attn))

    assert logp.shape == (2, 10)
    assert timg.shape == (2, 1, 28, 28)
    assert attn.shape == (2, 1, 28, 28)
    assert bool(jnp.all(jnp.isfinite(logp)))
    assert bool(jnp.all(jnp.isfinite(timg)))
    # log_softmax rows normalize; attention map normalizes over pixels
    # (loose tolerance: approx reciprocal + bf16 matmul inputs).
    assert float(jnp.max(jnp.abs(jnp.exp(logp).sum(-1) - 1.0))) < 1e-3
    assert float(jnp.max(jnp.abs(attn.sum(axis=(1, 2, 3)) - 1.0))) < 5e-3
    print("KERNEL_OK")
</pallas_src>

<mosaic_0001>
module attributes {stable_mosaic.version = 11 : i64} {
  func.func @_net_kernel(%arg0: i32, %arg1: memref<8x28x28xf32, #tpu.memory_space<vmem>>, %arg2: memref<140x1152xbf16, #tpu.memory_space<vmem>>, %arg3: memref<1x1152xf32, #tpu.memory_space<vmem>>, %arg4: memref<1152x140xbf16, #tpu.memory_space<vmem>>, %arg5: memref<224x160xbf16, #tpu.memory_space<vmem>>, %arg6: memref<140x256xbf16, #tpu.memory_space<vmem>>, %arg7: memref<1x256xf32, #tpu.memory_space<vmem>>, %arg8: memref<640x256xbf16, #tpu.memory_space<vmem>>, %arg9: memref<1x256xf32, #tpu.memory_space<vmem>>, %arg10: memref<4x128x128xbf16, #tpu.memory_space<vmem>>, %arg11: memref<1x128xf32, #tpu.memory_space<vmem>>, %arg12: memref<128x10xbf16, #tpu.memory_space<vmem>>, %arg13: memref<1x10xf32, #tpu.memory_space<vmem>>, %arg14: memref<8x10xf32, #tpu.memory_space<vmem>>, %arg15: memref<8x28x28xf32, #tpu.memory_space<vmem>>, %arg16: memref<8x28x28xf32, #tpu.memory_space<vmem>>) attributes {dimension_semantics = [#tpu.dimension_semantics<parallel>], iteration_bounds = array<i64: 1>, scalar_prefetch = 0 : i64, scratch_operands = 0 : i64, tpu.core_type = #tpu.core_type<tc>, window_params = [{transform_indices = @transform_0, window_bounds = array<i64: 8, 28, 28>}, {pipeline_mode = #tpu.pipeline_mode<synchronous>, transform_indices = @transform_1, window_bounds = array<i64: 140, 1152>}, {pipeline_mode = #tpu.pipeline_mode<synchronous>, transform_indices = @transform_2, window_bounds = array<i64: 1, 1152>}, {pipeline_mode = #tpu.pipeline_mode<synchronous>, transform_indices = @transform_3, window_bounds = array<i64: 1152, 140>}, {pipeline_mode = #tpu.pipeline_mode<synchronous>, transform_indices = @transform_4, window_bounds = array<i64: 224, 160>}, {pipeline_mode = #tpu.pipeline_mode<synchronous>, transform_indices = @transform_5, window_bounds = array<i64: 140, 256>}, {pipeline_mode = #tpu.pipeline_mode<synchronous>, transform_indices = @transform_6, window_bounds = array<i64: 1, 256>}, {pipeline_mode = #tpu.pipeline_mode<synchronous>, transform_indices = @transform_7, window_bounds = array<i64: 640, 256>}, {pipeline_mode = #tpu.pipeline_mode<synchronous>, transform_indices = @transform_8, window_bounds = array<i64: 1, 256>}, {pipeline_mode = #tpu.pipeline_mode<synchronous>, transform_indices = @transform_9, window_bounds = array<i64: 4, 128, 128>}, {pipeline_mode = #tpu.pipeline_mode<synchronous>, transform_indices = @transform_10, window_bounds = array<i64: 1, 128>}, {pipeline_mode = #tpu.pipeline_mode<synchronous>, transform_indices = @transform_11, window_bounds = array<i64: 128, 10>}, {pipeline_mode = #tpu.pipeline_mode<synchronous>, transform_indices = @transform_12, window_bounds = array<i64: 1, 10>}, {transform_indices = @transform_13, window_bounds = array<i64: 8, 10>}, {transform_indices = @transform_14, window_bounds = array<i64: 8, 28, 28>}, {transform_indices = @transform_15, window_bounds = array<i64: 8, 28, 28>}]} {
    %c0 = arith.constant 0 : index
    %c0_0 = arith.constant 0 : index
    %c0_1 = arith.constant 0 : index
    %0 = vector.load %arg1[%c0, %c0_0, %c0_1] : memref<8x28x28xf32, #tpu.memory_space<vmem>>, vector<8x28x28xf32>
    %1 = arith.truncf %0 : vector<8x28x28xf32> to vector<8x28x28xbf16>
    %2 = vector.extract_strided_slice %1 {offsets = [0, 0, 0], sizes = [8, 24, 28], strides = [1, 1, 1]} : vector<8x28x28xbf16> to vector<8x24x28xbf16>
    %3 = vector.extract_strided_slice %1 {offsets = [0, 1, 0], sizes = [8, 24, 28], strides = [1, 1, 1]} : vector<8x28x28xbf16> to vector<8x24x28xbf16>
    %4 = vector.extract_strided_slice %1 {offsets = [0, 2, 0], sizes = [8, 24, 28], strides = [1, 1, 1]} : vector<8x28x28xbf16> to vector<8x24x28xbf16>
    %5 = vector.extract_strided_slice %1 {offsets = [0, 3, 0], sizes = [8, 24, 28], strides = [1, 1, 1]} : vector<8x28x28xbf16> to vector<8x24x28xbf16>
    %6 = vector.extract_strided_slice %1 {offsets = [0, 4, 0], sizes = [8, 24, 28], strides = [1, 1, 1]} : vector<8x28x28xbf16> to vector<8x24x28xbf16>
    %7 = tpu.concatenate %2, %3, %4, %5, %6 in 2 : vector<8x24x28xbf16>, vector<8x24x28xbf16>, vector<8x24x28xbf16>, vector<8x24x28xbf16>, vector<8x24x28xbf16> -> vector<8x24x140xbf16>
    %8 = vector.shape_cast %7 : vector<8x24x140xbf16> to vector<192x140xbf16>
    %c0_2 = arith.constant 0 : index
    %c0_3 = arith.constant 0 : index
    %9 = vector.load %arg2[%c0_2, %c0_3] : memref<140x1152xbf16, #tpu.memory_space<vmem>>, vector<140x1152xbf16>
    %cst = arith.constant dense<0.000000e+00> : vector<192x1152xf32>
    %10 = tpu.matmul %8, %9, %cst {dimension_numbers = #tpu.dot_dimension_numbers<[1], [0], [0], [1], [0, 0, 1, 1], [], []>} : vector<192x140xbf16>, vector<140x1152xbf16>, vector<192x1152xf32> -> vector<192x1152xf32>
    %c0_4 = arith.constant 0 : index
    %c0_5 = arith.constant 0 : index
    %11 = vector.load %arg3[%c0_4, %c0_5] : memref<1x1152xf32, #tpu.memory_space<vmem>>, vector<1x1152xf32>
    %12 = vector.broadcast %11 : vector<1x1152xf32> to vector<192x1152xf32>
    %13 = arith.addf %10, %12 : vector<192x1152xf32>
    %cst_6 = arith.constant 0.000000e+00 : f32
    %14 = vector.broadcast %cst_6 : f32 to vector<192x1152xf32>
    %15 = arith.maximumf %13, %14 : vector<192x1152xf32>
    %16 = arith.truncf %15 : vector<192x1152xf32> to vector<192x1152xbf16>
    %c0_7 = arith.constant 0 : index
    %c0_8 = arith.constant 0 : index
    %17 = vector.load %arg4[%c0_7, %c0_8] : memref<1152x140xbf16, #tpu.memory_space<vmem>>, vector<1152x140xbf16>
    %cst_9 = arith.constant dense<0.000000e+00> : vector<192x140xf32>
    %18 = tpu.matmul %16, %17, %cst_9 {dimension_numbers = #tpu.dot_dimension_numbers<[1], [0], [0], [1], [0, 0, 1, 1], [], []>} : vector<192x1152xbf16>, vector<1152x140xbf16>, vector<192x140xf32> -> vector<192x140xf32>
    %19 = vector.shape_cast %18 : vector<192x140xf32> to vector<8x24x140xf32>
    %20 = vector.extract_strided_slice %19 {offsets = [0, 0, 0], sizes = [8, 20, 28], strides = [1, 1, 1]} : vector<8x24x140xf32> to vector<8x20x28xf32>
    %21 = vector.extract_strided_slice %19 {offsets = [0, 1, 28], sizes = [8, 20, 28], strides = [1, 1, 1]} : vector<8x24x140xf32> to vector<8x20x28xf32>
    %22 = arith.addf %20, %21 : vector<8x20x28xf32>
    %23 = vector.extract_strided_slice %19 {offsets = [0, 2, 56], sizes = [8, 20, 28], strides = [1, 1, 1]} : vector<8x24x140xf32> to vector<8x20x28xf32>
    %24 = arith.addf %22, %23 : vector<8x20x28xf32>
    %25 = vector.extract_strided_slice %19 {offsets = [0, 3, 84], sizes = [8, 20, 28], strides = [1, 1, 1]} : vector<8x24x140xf32> to vector<8x20x28xf32>
    %26 = arith.addf %24, %25 : vector<8x20x28xf32>
    %27 = vector.extract_strided_slice %19 {offsets = [0, 4, 112], sizes = [8, 20, 28], strides = [1, 1, 1]} : vector<8x24x140xf32> to vector<8x20x28xf32>
    %28 = arith.addf %26, %27 : vector<8x20x28xf32>
    %29 = vector.shape_cast %28 : vector<8x20x28xf32> to vector<160x28xf32>
    %30 = arith.truncf %29 : vector<160x28xf32> to vector<160x28xbf16>
    %c0_10 = arith.constant 0 : index
    %c0_11 = arith.constant 0 : index
    %31 = vector.load %arg5[%c0_10, %c0_11] : memref<224x160xbf16, #tpu.memory_space<vmem>>, vector<224x160xbf16>
    %cst_12 = arith.constant dense<0.000000e+00> : vector<224x28xf32>
    %32 = tpu.matmul %31, %30, %cst_12 {dimension_numbers = #tpu.dot_dimension_numbers<[1], [0], [0], [1], [0, 0, 1, 1], [], []>} : vector<224x160xbf16>, vector<160x28xbf16>, vector<224x28xf32> -> vector<224x28xf32>
    %33 = vector.shape_cast %32 : vector<224x28xf32> to vector<8x28x28xf32>
    %cst_13 = arith.constant dense<0xFF800000> : vector<8x28xf32>
    %34 = vector.multi_reduction <maximumf>, %33, %cst_13 [2] : vector<8x28x28xf32> to vector<8x28xf32>
    %35 = vector.shape_cast %34 : vector<8x28xf32> to vector<8x28x1xf32>
    %cst_14 = arith.constant dense<0xFF800000> : vector<8x1xf32>
    %36 = vector.multi_reduction <maximumf>, %35, %cst_14 [1] : vector<8x28x1xf32> to vector<8x1xf32>
    %37 = vector.shape_cast %36 : vector<8x1xf32> to vector<8x1x1xf32>
    %38 = vector.broadcast %37 : vector<8x1x1xf32> to vector<8x28x28xf32>
    %39 = arith.subf %33, %38 : vector<8x28x28xf32>
    %40 = math.exp %39 : vector<8x28x28xf32>
    %cst_15 = arith.constant dense<0.000000e+00> : vector<8x28xf32>
    %41 = vector.multi_reduction <add>, %40, %cst_15 [2] : vector<8x28x28xf32> to vector<8x28xf32>
    %42 = vector.shape_cast %41 : vector<8x28xf32> to vector<8x28x1xf32>
    %cst_16 = arith.constant dense<0.000000e+00> : vector<8x1xf32>
    %43 = vector.multi_reduction <add>, %42, %cst_16 [1] : vector<8x28x1xf32> to vector<8x1xf32>
    %44 = vector.shape_cast %43 : vector<8x1xf32> to vector<8x1x1xf32>
    %45 = tpu.reciprocal %44 {approx = true} : vector<8x1x1xf32> -> vector<8x1x1xf32>
    %46 = vector.broadcast %45 : vector<8x1x1xf32> to vector<8x28x28xf32>
    %47 = arith.mulf %40, %46 : vector<8x28x28xf32>
    %48 = arith.mulf %0, %47 : vector<8x28x28xf32>
    %cst_17 = arith.constant 7.840000e+02 : f32
    %49 = vector.broadcast %cst_17 : f32 to vector<8x28x28xf32>
    %50 = arith.mulf %48, %49 : vector<8x28x28xf32>
    %c0_18 = arith.constant 0 : index
    %c0_19 = arith.constant 0 : index
    %c0_20 = arith.constant 0 : index
    %51 = vector.load %arg16[%c0_18, %c0_19, %c0_20] : memref<8x28x28xf32, #tpu.memory_space<vmem>>, vector<8x28x28xf32>
    tpu.vector_store %arg16[%c0_18, %c0_19, %c0_20], %47 {strides = array<i32>} : memref<8x28x28xf32, #tpu.memory_space<vmem>>, vector<8x28x28xf32>,
    %c0_21 = arith.constant 0 : index
    %c0_22 = arith.constant 0 : index
    %c0_23 = arith.constant 0 : index
    %52 = vector.load %arg15[%c0_21, %c0_22, %c0_23] : memref<8x28x28xf32, #tpu.memory_space<vmem>>, vector<8x28x28xf32>
    tpu.vector_store %arg15[%c0_21, %c0_22, %c0_23], %50 {strides = array<i32>} : memref<8x28x28xf32, #tpu.memory_space<vmem>>, vector<8x28x28xf32>,
    %53 = arith.truncf %50 : vector<8x28x28xf32> to vector<8x28x28xbf16>
    %54 = vector.extract_strided_slice %53 {offsets = [0, 0, 0], sizes = [8, 24, 28], strides = [1, 1, 1]} : vector<8x28x28xbf16> to vector<8x24x28xbf16>
    %55 = vector.extract_strided_slice %53 {offsets = [0, 1, 0], sizes = [8, 24, 28], strides = [1, 1, 1]} : vector<8x28x28xbf16> to vector<8x24x28xbf16>
    %56 = vector.extract_strided_slice %53 {offsets = [0, 2, 0], sizes = [8, 24, 28], strides = [1, 1, 1]} : vector<8x28x28xbf16> to vector<8x24x28xbf16>
    %57 = vector.extract_strided_slice %53 {offsets = [0, 3, 0], sizes = [8, 24, 28], strides = [1, 1, 1]} : vector<8x28x28xbf16> to vector<8x24x28xbf16>
    %58 = vector.extract_strided_slice %53 {offsets = [0, 4, 0], sizes = [8, 24, 28], strides = [1, 1, 1]} : vector<8x28x28xbf16> to vector<8x24x28xbf16>
    %59 = tpu.concatenate %54, %55, %56, %57, %58 in 2 : vector<8x24x28xbf16>, vector<8x24x28xbf16>, vector<8x24x28xbf16>, vector<8x24x28xbf16>, vector<8x24x28xbf16> -> vector<8x24x140xbf16>
    %60 = vector.shape_cast %59 : vector<8x24x140xbf16> to vector<192x140xbf16>
    %c0_24 = arith.constant 0 : index
    %c0_25 = arith.constant 0 : index
    %61 = vector.load %arg6[%c0_24, %c0_25] : memref<140x256xbf16, #tpu.memory_space<vmem>>, vector<140x256xbf16>
    %cst_26 = arith.constant dense<0.000000e+00> : vector<192x256xf32>
    %62 = tpu.matmul %60, %61, %cst_26 {dimension_numbers = #tpu.dot_dimension_numbers<[1], [0], [0], [1], [0, 0, 1, 1], [], []>} : vector<192x140xbf16>, vector<140x256xbf16>, vector<192x256xf32> -> vector<192x256xf32>
    %c0_27 = arith.constant 0 : index
    %c0_28 = arith.constant 0 : index
    %63 = vector.load %arg7[%c0_27, %c0_28] : memref<1x256xf32, #tpu.memory_space<vmem>>, vector<1x256xf32>
    %64 = vector.broadcast %63 : vector<1x256xf32> to vector<192x256xf32>
    %65 = arith.addf %62, %64 : vector<192x256xf32>
    %66 = vector.extract_strided_slice %65 {offsets = [0, 0], sizes = [192, 128], strides = [1, 1]} : vector<192x256xf32> to vector<192x128xf32>
    %67 = vector.extract_strided_slice %65 {offsets = [0, 128], sizes = [192, 128], strides = [1, 1]} : vector<192x256xf32> to vector<192x128xf32>
    %68 = arith.maximumf %66, %67 : vector<192x128xf32>
    %69 = vector.shape_cast %68 : vector<192x128xf32> to vector<96x2x128xf32>
    %cst_29 = arith.constant dense<0xFF800000> : vector<96x128xf32>
    %70 = vector.multi_reduction <maximumf>, %69, %cst_29 [1] : vector<96x2x128xf32> to vector<96x128xf32>
    %cst_30 = arith.constant 0.000000e+00 : f32
    %71 = vector.broadcast %cst_30 : f32 to vector<96x128xf32>
    %72 = arith.maximumf %70, %71 : vector<96x128xf32>
    %73 = arith.truncf %72 : vector<96x128xf32> to vector<96x128xbf16>
    %74 = vector.shape_cast %73 : vector<96x128xbf16> to vector<8x12x128xbf16>
    %75 = vector.extract_strided_slice %74 {offsets = [0, 0, 0], sizes = [8, 8, 128], strides = [1, 1, 1]} : vector<8x12x128xbf16> to vector<8x8x128xbf16>
    %76 = vector.extract_strided_slice %74 {offsets = [0, 1, 0], sizes = [8, 8, 128], strides = [1, 1, 1]} : vector<8x12x128xbf16> to vector<8x8x128xbf16>
    %77 = vector.extract_strided_slice %74 {offsets = [0, 2, 0], sizes = [8, 8, 128], strides = [1, 1, 1]} : vector<8x12x128xbf16> to vector<8x8x128xbf16>
    %78 = vector.extract_strided_slice %74 {offsets = [0, 3, 0], sizes = [8, 8, 128], strides = [1, 1, 1]} : vector<8x12x128xbf16> to vector<8x8x128xbf16>
    %79 = vector.extract_strided_slice %74 {offsets = [0, 4, 0], sizes = [8, 8, 128], strides = [1, 1, 1]} : vector<8x12x128xbf16> to vector<8x8x128xbf16>
    %80 = tpu.concatenate %75, %76, %77, %78, %79 in 2 : vector<8x8x128xbf16>, vector<8x8x128xbf16>, vector<8x8x128xbf16>, vector<8x8x128xbf16>, vector<8x8x128xbf16> -> vector<8x8x640xbf16>
    %81 = vector.shape_cast %80 : vector<8x8x640xbf16> to vector<64x640xbf16>
    %c0_31 = arith.constant 0 : index
    %c0_32 = arith.constant 0 : index
    %82 = vector.load %arg8[%c0_31, %c0_32] : memref<640x256xbf16, #tpu.memory_space<vmem>>, vector<640x256xbf16>
    %cst_33 = arith.constant dense<0.000000e+00> : vector<64x256xf32>
    %83 = tpu.matmul %81, %82, %cst_33 {dimension_numbers = #tpu.dot_dimension_numbers<[1], [0], [0], [1], [0, 0, 1, 1], [], []>} : vector<64x640xbf16>, vector<640x256xbf16>, vector<64x256xf32> -> vector<64x256xf32>
    %c0_34 = arith.constant 0 : index
    %c0_35 = arith.constant 0 : index
    %84 = vector.load %arg9[%c0_34, %c0_35] : memref<1x256xf32, #tpu.memory_space<vmem>>, vector<1x256xf32>
    %85 = vector.broadcast %84 : vector<1x256xf32> to vector<64x256xf32>
    %86 = arith.addf %83, %85 : vector<64x256xf32>
    %87 = vector.extract_strided_slice %86 {offsets = [0, 0], sizes = [64, 128], strides = [1, 1]} : vector<64x256xf32> to vector<64x128xf32>
    %88 = vector.extract_strided_slice %86 {offsets = [0, 128], sizes = [64, 128], strides = [1, 1]} : vector<64x256xf32> to vector<64x128xf32>
    %89 = arith.maximumf %87, %88 : vector<64x128xf32>
    %90 = vector.shape_cast %89 : vector<64x128xf32> to vector<32x2x128xf32>
    %cst_36 = arith.constant dense<0xFF800000> : vector<32x128xf32>
    %91 = vector.multi_reduction <maximumf>, %90, %cst_36 [1] : vector<32x2x128xf32> to vector<32x128xf32>
    %cst_37 = arith.constant 0.000000e+00 : f32
    %92 = vector.broadcast %cst_37 : f32 to vector<32x128xf32>
    %93 = arith.maximumf %91, %92 : vector<32x128xf32>
    %94 = arith.truncf %93 : vector<32x128xf32> to vector<32x128xbf16>
    %95 = vector.shape_cast %94 : vector<32x128xbf16> to vector<8x4x128xbf16>
    %96 = vector.extract_strided_slice %95 {offsets = [0, 0, 0], sizes = [8, 1, 128], strides = [1, 1, 1]} : vector<8x4x128xbf16> to vector<8x1x128xbf16>
    %97 = vector.shape_cast %96 : vector<8x1x128xbf16> to vector<8x128xbf16>
    %c0_38 = arith.constant 0 : index
    %c0_39 = arith.constant 0 : index
    %c0_40 = arith.constant 0 : index
    %98 = vector.load %arg10[%c0_38, %c0_39, %c0_40] : memref<4x128x128xbf16, #tpu.memory_space<vmem>>, vector<1x128x128xbf16>
    %99 = vector.shape_cast %98 : vector<1x128x128xbf16> to vector<128x128xbf16>
    %cst_41 = arith.constant dense<0.000000e+00> : vector<8x128xf32>
    %100 = tpu.matmul %97, %99, %cst_41 {dimension_numbers = #tpu.dot_dimension_numbers<[1], [0], [0], [1], [0, 0, 1, 1], [], []>} : vector<8x128xbf16>, vector<128x128xbf16>, vector<8x128xf32> -> vector<8x128xf32>
    %101 = vector.extract_strided_slice %95 {offsets = [0, 1, 0], sizes = [8, 1, 128], strides = [1, 1, 1]} : vector<8x4x128xbf16> to vector<8x1x128xbf16>
    %102 = vector.shape_cast %101 : vector<8x1x128xbf16> to vector<8x128xbf16>
    %c1 = arith.constant 1 : index
    %c0_42 = arith.constant 0 : index
    %c0_43 = arith.constant 0 : index
    %103 = vector.load %arg10[%c1, %c0_42, %c0_43] : memref<4x128x128xbf16, #tpu.memory_space<vmem>>, vector<1x128x128xbf16>
    %104 = vector.shape_cast %103 : vector<1x128x128xbf16> to vector<128x128xbf16>
    %cst_44 = arith.constant dense<0.000000e+00> : vector<8x128xf32>
    %105 = tpu.matmul %102, %104, %cst_44 {dimension_numbers = #tpu.dot_dimension_numbers<[1], [0], [0], [1], [0, 0, 1, 1], [], []>} : vector<8x128xbf16>, vector<128x128xbf16>, vector<8x128xf32> -> vector<8x128xf32>
    %106 = arith.addf %100, %105 : vector<8x128xf32>
    %107 = vector.extract_strided_slice %95 {offsets = [0, 2, 0], sizes = [8, 1, 128], strides = [1, 1, 1]} : vector<8x4x128xbf16> to vector<8x1x128xbf16>
    %108 = vector.shape_cast %107 : vector<8x1x128xbf16> to vector<8x128xbf16>
    %c2 = arith.constant 2 : index
    %c0_45 = arith.constant 0 : index
    %c0_46 = arith.constant 0 : index
    %109 = vector.load %arg10[%c2, %c0_45, %c0_46] : memref<4x128x128xbf16, #tpu.memory_space<vmem>>, vector<1x128x128xbf16>
    %110 = vector.shape_cast %109 : vector<1x128x128xbf16> to vector<128x128xbf16>
    %cst_47 = arith.constant dense<0.000000e+00> : vector<8x128xf32>
    %111 = tpu.matmul %108, %110, %cst_47 {dimension_numbers = #tpu.dot_dimension_numbers<[1], [0], [0], [1], [0, 0, 1, 1], [], []>} : vector<8x128xbf16>, vector<128x128xbf16>, vector<8x128xf32> -> vector<8x128xf32>
    %112 = arith.addf %106, %111 : vector<8x128xf32>
    %113 = vector.extract_strided_slice %95 {offsets = [0, 3, 0], sizes = [8, 1, 128], strides = [1, 1, 1]} : vector<8x4x128xbf16> to vector<8x1x128xbf16>
    %114 = vector.shape_cast %113 : vector<8x1x128xbf16> to vector<8x128xbf16>
    %c3 = arith.constant 3 : index
    %c0_48 = arith.constant 0 : index
    %c0_49 = arith.constant 0 : index
    %115 = vector.load %arg10[%c3, %c0_48, %c0_49] : memref<4x128x128xbf16, #tpu.memory_space<vmem>>, vector<1x128x128xbf16>
    %116 = vector.shape_cast %115 : vector<1x128x128xbf16> to vector<128x128xbf16>
    %cst_50 = arith.constant dense<0.000000e+00> : vector<8x128xf32>
    %117 = tpu.matmul %114, %116, %cst_50 {dimension_numbers = #tpu.dot_dimension_numbers<[1], [0], [0], [1], [0, 0, 1, 1], [], []>} : vector<8x128xbf16>, vector<128x128xbf16>, vector<8x128xf32> -> vector<8x128xf32>
    %118 = arith.addf %112, %117 : vector<8x128xf32>
    %c0_51 = arith.constant 0 : index
    %c0_52 = arith.constant 0 : index
    %119 = vector.load %arg11[%c0_51, %c0_52] : memref<1x128xf32, #tpu.memory_space<vmem>>, vector<1x128xf32>
    %120 = vector.broadcast %119 : vector<1x128xf32> to vector<8x128xf32>
    %121 = arith.addf %118, %120 : vector<8x128xf32>
    %cst_53 = arith.constant 0.000000e+00 : f32
    %122 = vector.broadcast %cst_53 : f32 to vector<8x128xf32>
    %123 = arith.maximumf %121, %122 : vector<8x128xf32>
    %124 = arith.truncf %123 : vector<8x128xf32> to vector<8x128xbf16>
    %c0_54 = arith.constant 0 : index
    %c0_55 = arith.constant 0 : index
    %125 = vector.load %arg12[%c0_54, %c0_55] : memref<128x10xbf16, #tpu.memory_space<vmem>>, vector<128x10xbf16>
    %cst_56 = arith.constant dense<0.000000e+00> : vector<8x10xf32>
    %126 = tpu.matmul %124, %125, %cst_56 {dimension_numbers = #tpu.dot_dimension_numbers<[1], [0], [0], [1], [0, 0, 1, 1], [], []>} : vector<8x128xbf16>, vector<128x10xbf16>, vector<8x10xf32> -> vector<8x10xf32>
    %c0_57 = arith.constant 0 : index
    %c0_58 = arith.constant 0 : index
    %127 = vector.load %arg13[%c0_57, %c0_58] : memref<1x10xf32, #tpu.memory_space<vmem>>, vector<1x10xf32>
    %128 = vector.broadcast %127 : vector<1x10xf32> to vector<8x10xf32>
    %129 = arith.addf %126, %128 : vector<8x10xf32>
    %cst_59 = arith.constant dense<0xFF800000> : vector<8xf32>
    %130 = vector.multi_reduction <maximumf>, %129, %cst_59 [1] : vector<8x10xf32> to vector<8xf32>
    %131 = vector.shape_cast %130 : vector<8xf32> to vector<8x1xf32>
    %132 = vector.broadcast %131 : vector<8x1xf32> to vector<8x10xf32>
    %133 = arith.subf %129, %132 : vector<8x10xf32>
    %134 = math.exp %133 : vector<8x10xf32>
    %cst_60 = arith.constant dense<0.000000e+00> : vector<8xf32>
    %135 = vector.multi_reduction <add>, %134, %cst_60 [1] : vector<8x10xf32> to vector<8xf32>
    %136 = vector.shape_cast %135 : vector<8xf32> to vector<8x1xf32>
    %137 = math.log %136 : vector<8x1xf32>
    %138 = vector.broadcast %137 : vector<8x1xf32> to vector<8x10xf32>
    %139 = arith.subf %133, %138 : vector<8x10xf32>
    %c0_61 = arith.constant 0 : index
    %c0_62 = arith.constant 0 : index
    %140 = vector.load %arg14[%c0_61, %c0_62] : memref<8x10xf32, #tpu.memory_space<vmem>>, vector<8x10xf32>
    tpu.vector_store %arg14[%c0_61, %c0_62], %139 {strides = array<i32>} : memref<8x10xf32, #tpu.memory_space<vmem>>, vector<8x10xf32>,
    return
  }
  func.func @transform_0(%arg0: i32) -> (i32, i32, i32) {
    %c0_i32 = arith.constant 0 : i32
    %c0_i32_0 = arith.constant 0 : i32
    %c0_i32_1 = arith.constant 0 : i32
    return %arg0, %c0_i32, %c0_i32_0 : i32, i32, i32
  }
  func.func @transform_1(%arg0: i32) -> (i32, i32) {
    %c0_i32 = arith.constant 0 : i32
    %c0_i32_0 = arith.constant 0 : i32
    %c0_i32_1 = arith.constant 0 : i32
    return %c0_i32, %c0_i32_0 : i32, i32
  }
  func.func @transform_2(%arg0: i32) -> (i32, i32) {
    %c0_i32 = arith.constant 0 : i32
    %c0_i32_0 = arith.constant 0 : i32
    %c0_i32_1 = arith.constant 0 : i32
    return %c0_i32, %c0_i32_0 : i32, i32
  }
  func.func @transform_3(%arg0: i32) -> (i32, i32) {
    %c0_i32 = arith.constant 0 : i32
    %c0_i32_0 = arith.constant 0 : i32
    %c0_i32_1 = arith.constant 0 : i32
    return %c0_i32, %c0_i32_0 : i32, i32
  }
  func.func @transform_4(%arg0: i32) -> (i32, i32) {
    %c0_i32 = arith.constant 0 : i32
    %c0_i32_0 = arith.constant 0 : i32
    %c0_i32_1 = arith.constant 0 : i32
    return %c0_i32, %c0_i32_0 : i32, i32
  }
  func.func @transform_5(%arg0: i32) -> (i32, i32) {
    %c0_i32 = arith.constant 0 : i32
    %c0_i32_0 = arith.constant 0 : i32
    %c0_i32_1 = arith.constant 0 : i32
    return %c0_i32, %c0_i32_0 : i32, i32
  }
  func.func @transform_6(%arg0: i32) -> (i32, i32) {
    %c0_i32 = arith.constant 0 : i32
    %c0_i32_0 = arith.constant 0 : i32
    %c0_i32_1 = arith.constant 0 : i32
    return %c0_i32, %c0_i32_0 : i32, i32
  }
  func.func @transform_7(%arg0: i32) -> (i32, i32) {
    %c0_i32 = arith.constant 0 : i32
    %c0_i32_0 = arith.constant 0 : i32
    %c0_i32_1 = arith.constant 0 : i32
    return %c0_i32, %c0_i32_0 : i32, i32
  }
  func.func @transform_8(%arg0: i32) -> (i32, i32) {
    %c0_i32 = arith.constant 0 : i32
    %c0_i32_0 = arith.constant 0 : i32
    %c0_i32_1 = arith.constant 0 : i32
    return %c0_i32, %c0_i32_0 : i32, i32
  }
  func.func @transform_9(%arg0: i32) -> (i32, i32, i32) {
    %c0_i32 = arith.constant 0 : i32
    %c0_i32_0 = arith.constant 0 : i32
    %c0_i32_1 = arith.constant 0 : i32
    %c0_i32_2 = arith.constant 0 : i32
    return %c0_i32, %c0_i32_0, %c0_i32_1 : i32, i32, i32
  }
  func.func @transform_10(%arg0: i32) -> (i32, i32) {
    %c0_i32 = arith.constant 0 : i32
    %c0_i32_0 = arith.constant 0 : i32
    %c0_i32_1 = arith.constant 0 : i32
    return %c0_i32, %c0_i32_0 : i32, i32
  }
  func.func @transform_11(%arg0: i32) -> (i32, i32) {
    %c0_i32 = arith.constant 0 : i32
    %c0_i32_0 = arith.constant 0 : i32
    %c0_i32_1 = arith.constant 0 : i32
    return %c0_i32, %c0_i32_0 : i32, i32
  }
  func.func @transform_12(%arg0: i32) -> (i32, i32) {
    %c0_i32 = arith.constant 0 : i32
    %c0_i32_0 = arith.constant 0 : i32
    %c0_i32_1 = arith.constant 0 : i32
    return %c0_i32, %c0_i32_0 : i32, i32
  }
  func.func @transform_13(%arg0: i32) -> (i32, i32) {
    %c0_i32 = arith.constant 0 : i32
    %c0_i32_0 = arith.constant 0 : i32
    return %arg0, %c0_i32 : i32, i32
  }
  func.func @transform_14(%arg0: i32) -> (i32, i32, i32) {
    %c0_i32 = arith.constant 0 : i32
    %c0_i32_0 = arith.constant 0 : i32
    %c0_i32_1 = arith.constant 0 : i32
    return %arg0, %c0_i32, %c0_i32_0 : i32, i32, i32
  }
  func.func @transform_15(%arg0: i32) -> (i32, i32, i32) {
    %c0_i32 = arith.constant 0 : i32
    %c0_i32_0 = arith.constant 0 : i32
    %c0_i32_1 = arith.constant 0 : i32
    return %arg0, %c0_i32, %c0_i32_0 : i32, i32, i32
  }
}

</mosaic_0001>

<bundles_post_ra>
// kernel: net_forward.1
= control target key start
LH: loop header
LB: loop body
LE: loop exit
PB: predicated region body
PF: predicated region fallthrough
CT: control target
= control target key end

     0   :  { %vm411_vm0 = vcmask 1045504   ;;  %vm265_vm1 = vcmask 1046528   ;;  %s12564_s19 = smov 112   ;;  %s12565_s20 = smov 56   ;;  %vm322_vm2 = vsmask.f32 6400  ;;  %s18607_s0 = inlined_call_operand.vmem [shape: f32[8,28,28], index: 0, kind: input, shape index: {}]   ;;  %s18608_s1 = inlined_call_operand.vmem [shape: bf16[140,1152], index: 1, kind: input, shape index: {}]   ;;  %s18609_s3 = inlined_call_operand.vmem [shape: bf16[1152,140], index: 3, kind: input, shape index: {}]   ;;  %s18610_s2 = inlined_call_operand.vmem [shape: f32[1,1152], index: 2, kind: input, shape index: {}]   ;;  %s18611_s4 = inlined_call_operand.vmem [shape: bf16[224,160], index: 4, kind: input, shape index: {}]   ;;  %s18612_s5 = inlined_call_operand.vmem [shape: bf16[140,256], index: 5, kind: input, shape index: {}]   ;;  %s18613_s15 = inlined_call_operand.vmem [shape: f32[8,28,28], index: 15, kind: output, shape index: {2}]   ;;  %s18614_s14 = inlined_call_operand.vmem [shape: f32[8,28,28], index: 14, kind: output, shape index: {1}]   ;;  %s18615_s7 = inlined_call_operand.vmem [shape: bf16[640,256], index: 7, kind: input, shape index: {}]   ;;  %s18616_s6 = inlined_call_operand.vmem [shape: f32[1,256], index: 6, kind: input, shape index: {}]   ;;  %s18617_s9 = inlined_call_operand.vmem [shape: bf16[4,128,128], index: 9, kind: input, shape index: {}]   ;;  %s18618_s8 = inlined_call_operand.vmem [shape: f32[1,256], index: 8, kind: input, shape index: {}]   ;;  %s18619_s11 = inlined_call_operand.vmem [shape: bf16[128,10], index: 11, kind: input, shape index: {}]   ;;  %s18620_s10 = inlined_call_operand.vmem [shape: f32[1,128], index: 10, kind: input, shape index: {}]   ;;  %s18621_s12 = inlined_call_operand.vmem [shape: f32[1,10], index: 12, kind: input, shape index: {}]   ;;  %s18622_s13 = inlined_call_operand.vmem [shape: f32[8,10], index: 13, kind: output, shape index: {0}]  }
   0x1   :  { %v48_v0 = vld [vmem:[%s18607_s0] sm:$0xff]  ;;  %v49_v1 = vld [vmem:[%s18607_s0 + $0x8] sm:$0xff]  ;;  %v50_v2 = vld [vmem:[%s18607_s0 + $0x10] sm:$0xff]  ;;  %vm96_vm3 = vsmask.f32 7424  ;;  %s12566_s23 = smov 28  }
   0x2   :  { %v51_v3 = vld [vmem:[%s18607_s0 + $0x18] sm:$0xf]  ;;  %v12668_v4 = vpack.c.bf16 %v49_v1, %v48_v0  ;;  %v52_v5 = vld [vmem:[%s18607_s0 + $0x20] sm:$0xff]  ;;  %v53_v6 = vld [vmem:[%s18607_s0 + $0x28] sm:$0xff]  ;;  %s12567_s26 = smov 84   ;;  %vm1244_vm4 = vcmask 97280  }
   0x3   :  { %v12676_v7 = vpack.c.bf16 %v51_v3, %v50_v2  ;;  %v54_v8 = vld [vmem:[%s18607_s0 + $0x30] sm:$0xff]  ;;  %v55_v9 = vld [vmem:[%s18607_s0 + $0x38] sm:$0xf]  ;;  %v12684_v10 = vpack.c.bf16 %v53_v6, %v52_v5  ;;  %v11838_v38 = vld [vmem:[%s18608_s1 + $0x4] ss:$36 sps:$4 sm:$0xff]   ;;  %vm501_vm5 = vcmask 457728  }
   0x4   :  { %v412_v11 = vrot.slane %v12668_v4, 2  ;;  %v266_v12 = vrot.slane %v12668_v4, 1  ;;  %v98_v13 = vshrl.u32 %v12668_v4, 16  ;;  %v100_v14 = vshll.u32 %v12668_v4, 16  ;;  %v11840_v43 = vld [vmem:[%s18608_s1 + $0xc] ss:$36 sps:$4 sm:$0xff]   ;;  %1309 = vmatprep.subr.bf16.mxu0 %v11838_v38 }
   0x5   :  { %v413_v15 = vrot.slane %v12676_v7, 2  ;;  %v267_v16 = vrot.slane %v12676_v7, 1  ;;  %v105_v17 = vshll.u32 %v12676_v7, 16  ;;  %v109_v18 = vshrl.u32 %v12676_v7, 16  ;;  %v11842_v47 = vld [vmem:[%s18608_s1] ss:$36 sps:$4 sm:$0xff]   ;;  %1462 = vmatprep.subr.bf16.mxu1 %v11840_v43 }
   0x6   :  { %v323_v19 = vrot.slane %v98_v13, 1  ;;  %v324_v20 = vrot.slane %v100_v14, 2  ;;  %v12694_v21 = vpack.c.bf16 %v55_v9, %v54_v8  ;;  %v113_v22 = vshrl.u32 %v12684_v10, 16  ;;  %v11843_v48 = vld [vmem:[%s18608_s1 + $0x8] ss:$36 sps:$4 sm:$0xff]   ;;  %1310 = vmatpush1.bf16.msra.mxu0 %v11842_v47  ;;  %v56_v59 = vld [vmem:[%s18607_s0 + $0x40] sm:$0xff] }
   0x7   :  { %v414_v23 = vsel %vm411_vm0, %v412_v11, %v413_v15  ;;  %v268_v24 = vsel %vm265_vm1, %v266_v12, %v267_v16  ;;  %v107_v25 = vrot.slane %v105_v17, 1  ;;  %v326_v26 = vrot.slane %v109_v18, 1  ;;  %v11844_v52 = vld [vmem:[%s18608_s1 + $0x4c] ss:$36 sps:$4 sm:$0xff]   ;;  %v11846_v53 = vld [vmem:[%s18608_s1 + $0x54] ss:$36 sps:$4 sm:$0xff]   ;;  %1463 = vmatpush1.bf16.msra.mxu1 %v11843_v48 }
   0x8   :  { %436 = vrot.lane.b32.xlu1 %v414_v23, %s12564_s19  ;;  %290 = vrot.lane.b32.xlu0 %v268_v24, %s12565_s20  ;;  %v325_v27 = vor.u32 %v324_v20, %v323_v19  ;;  %v327_v28 = vrot.slane %v105_v17, 2  ;;  %v115_v29 = vshll.u32 %v12684_v10, 16  ;;  %v120_v30 = vshll.u32 %v12694_v21, 16  ;;  %v11848_v54 = vld [vmem:[%s18608_s1 + $0x48] ss:$36 sps:$4 sm:$0xff]   ;;  %v58_v61 = vld [vmem:[%s18607_s0 + $0x50] sm:$0xff] }
   0x9   :  { %v111_v31 = vor.u32 %v109_v18, %v107_v25  ;;  %v102_v32 = vrot.slane %v100_v14, 1  ;;  %v124_v36 = vshrl.u32 %v12694_v21, 16  ;;  %v269_v41 = vrot.slane %v12684_v10, 1  ;;  %v11849_v55 = vld [vmem:[%s18608_s1 + $0x50] ss:$36 sps:$4 sm:$0xff]   ;;  %1311 = vmatprep.subr.bf16.mxu0 %v11844_v52  ;;  %v57_v60 = vld [vmem:[%s18607_s0 + $0x48] sm:$0xff]  ;;  %1464 = vmatprep.subr.bf16.mxu1 %v11846_v53 }
   0xa   :  { %v328_v33 = vor.u32 %v327_v28, %v326_v26  ;;  %v117_v34 = vrot.slane %v115_v29, 1  ;;  %v12707_v35 = vrot.slane %v120_v30, 1  ;;  %v270_v42 = vrot.slane %v12694_v21, 1  ;;  %1312 = vmatpush1.bf16.msra.mxu0 %v11848_v54  ;;  %v11850_v62 = vld [vmem:[%s18608_s1 + $0x94] ss:$36 sps:$4 sm:$0xff]   ;;  %v60_v18 = vld [vmem:[%s18607_s0 + $0x60] sm:$0xff] }
   0xb   :  { %v103_v37 = vor.u32 %v102_v32, %v98_v13  ;;  %v330_v45 = vrot.slane %v113_v22, 1  ;;  %v331_v46 = vrot.slane %v115_v29, 2  ;;  %v333_v50 = vrot.slane %v124_v36, 1  ;;  %1465 = vmatpush1.bf16.msra.mxu1 %v11849_v55  ;;  %v11852_v63 = vld [vmem:[%s18608_s1 + $0x9c] ss:$36 sps:$4 sm:$0xff]   ;;  %1313 = vmatprep.subr.bf16.mxu0 %v11850_v62  ;;  %v61_v19 = vld [vmem:[%s18607_s0 + $0x68] sm:$0xff] }
   0xc   :  { %219 = vrot.lane.b32.xlu0 %v111_v31, %s12566_s23  ;;  %v329_v39 = vsel %vm322_vm2, %v325_v27, %v328_v33  ;;  %v118_v40 = vor.u32 %v117_v34, %v113_v22  ;;  %v334_v51 = vrot.slane %v120_v30, 2  ;;  %v271_v56 = vsel %vm265_vm1, %v269_v41, %v270_v42  ;;  %v59_v0 = vld [vmem:[%s18607_s0 + $0x58] sm:$0xf]  ;;  %v11854_v2 = vld [vmem:[%s18608_s1 + $0x90] ss:$36 sps:$4 sm:$0xff]   ;;  %1466 = vmatprep.subr.bf16.mxu1 %v11852_v63  ;;  %s12570_s21 = smov 100  }
   0xd   :  { %379 = vrot.lane.b32.xlu1 %v329_v39, %s12567_s26  ;;  %v108_v44 = vsel %vm96_vm3, %v103_v37, %v107_v25  ;;  %v332_v57 = vor.u32 %v331_v46, %v330_v45  ;;  %v12773_v1 = vpack.c.bf16 %v57_v60, %v56_v59  ;;  %v415_v5 = vrot.slane %v12684_v10, 2  ;;  %v11855_v8 = vld [vmem:[%s18608_s1 + $0x98] ss:$36 sps:$4 sm:$0xff]   ;;  %v11858_v12 = vld [vmem:[%s18608_s1 + $0xe4] ss:$36 sps:$4 sm:$0xff]   ;;  %v62_v27 = vld [vmem:[%s18607_s0 + $0x70] sm:$0xff] }
   0xe   :  { %v123_v49 = vsel %vm96_vm3, %v118_v40, %v12707_v35  ;;  %v12749_v58 = vor.u32 %v334_v51, %v333_v50  ;;  %v416_v6 = vrot.slane %v12694_v21, 2  ;;  %1314 = vmatpush1.bf16.msra.mxu0 %v11854_v2  ;;  %v11856_v9 = vld [vmem:[%s18608_s1 + $0xdc] ss:$36 sps:$4 sm:$0xff]   ;;  %v12789_v11 = vpack.c.bf16 %v59_v0, %v58_v61  ;;  %v11862_v20 = vld [vmem:[%s18608_s1 + $0x124] ss:$36 sps:$4 sm:$0xff]   ;;  %s12571_s22 = smov 16  }
   0xf   :  { %1467 = vmatpush1.bf16.msra.mxu1 %v11855_v8  ;;  %v130_v13 = vshll.u32 %v12773_v1, 16  ;;  %1315 = vmatprep.subr.bf16.mxu0 %v11856_v9  ;;  %v11860_v14 = vld [vmem:[%s18608_s1 + $0xd8] ss:$36 sps:$4 sm:$0xff]   ;;  %v126_v22 = vor.u32 %v124_v36, %v12707_v35  ;;  %v128_v24 = vshrl.u32 %v12773_v1, 16  ;;  %v12831_v29 = vpack.c.bf16 %v61_v19, %v60_v18  ;;  %v11866_v30 = vld [vmem:[%s18608_s1 + $0x120] ss:$36 sps:$4 sm:$0xff]  }
  0x10   :  { %217 = vrot.lane.b32.xlu0 %v108_v44, %s12566_s23  ;;  %v336_v3 = vsel %vm322_vm2, %v332_v57, %v12749_v58  ;;  %v417_v17 = vsel %vm411_vm0, %v415_v5, %v416_v6  ;;  %1468 = vmatprep.subr.bf16.mxu1 %v11858_v12  ;;  %v135_v23 = vshll.u32 %v12789_v11, 16  ;;  %v139_v26 = vshrl.u32 %v12789_v11, 16  ;;  %v63_v28 = vld [vmem:[%s18607_s0 + $0x78] sm:$0xf]  ;;  %v11867_v31 = vld [vmem:[%s18608_s1 + $0x128] ss:$36 sps:$4 sm:$0xff]  }
  0x11   :  { %221 = vrot.lane.b32.xlu1 %v123_v49, %s12566_s23  ;;  %v132_v25 = vrot.slane %v130_v13, 1  ;;  %v338_v34 = vrot.slane %v130_v13, 2  ;;  %v11868_v36 = vld [vmem:[%s18608_s1 + $0x16c] ss:$36 sps:$4 sm:$0xff]   ;;  %v12848_v39 = vpack.c.bf16 %v63_v28, %v62_v27  ;;  %v11870_v40 = vld [vmem:[%s18608_s1 + $0x174] ss:$36 sps:$4 sm:$0xff]  }
  0x12   :  { %1316 = vmatpush1.bf16.msra.mxu0 %v11860_v14  ;;  %v137_v32 = vrot.slane %v135_v23, 1  ;;  %v341_v35 = vrot.slane %v135_v23, 2  ;;  %v340_v38 = vrot.slane %v139_v26, 1  ;;  %v11872_v41 = vld [vmem:[%s18608_s1 + $0x168] ss:$36 sps:$4 sm:$0xff]   ;;  %v272_v43 = vrot.slane %v12773_v1, 1 }
  0x13   :  { %1317 = vmatprep.subr.bf16.mxu0 %v11862_v20  ;;  %v133_v37 = vor.u32 %v132_v25, %v128_v24  ;;  %v273_v44 = vrot.slane %v12789_v11, 1  ;;  %v11873_v45 = vld [vmem:[%s18608_s1 + $0x170] ss:$36 sps:$4 sm:$0xff]   ;;  %v418_v47 = vrot.slane %v12773_v1, 2  ;;  %v419_v48 = vrot.slane %v12789_v11, 2  ;;  %v64_v20 = vld [vmem:[%s18607_s0 + $0x80] sm:$0xff] }
  0x14   :  { %292 = vrot.lane.b32.xlu0 %v267_v16, %s12565_s20  ;;  %v11861_v16 = vld [vmem:[%s18608_s1 + $0xe0] ss:$36 sps:$4 sm:$0xff]   ;;  %v11874_v46 = vld [vmem:[%s18608_s1 + $0x1b4] ss:$36 sps:$4 sm:$0xff]   ;;  %v12874_v52 = vor.u32 %v341_v35, %v340_v38  ;;  %v143_v53 = vshrl.u32 %v12831_v29, 16  ;;  %v150_v54 = vshll.u32 %v12848_v39, 16  ;;  %v141_v8 = vor.u32 %v139_v26, %v137_v32 }
  0x15   :  { %294 = vrot.lane.b32.xlu1 %v271_v56, %s12565_s20  ;;  %1469 = vmatpush1.bf16.msra.mxu1 %v11861_v16  ;;  %v11876_v50 = vld [vmem:[%s18608_s1 + $0x1bc] ss:$36 sps:$4 sm:$0xff]   ;;  %v138_v51 = vsel %vm96_vm3, %v133_v37, %v137_v32  ;;  %v11878_v55 = vld [vmem:[%s18608_s1 + $0x1b0] ss:$36 sps:$4 sm:$0xff]   ;;  %v274_v56 = vsel %vm265_vm1, %v272_v43, %v273_v44  ;;  %v11882_v60 = vld [vmem:[%s18608_s1 + $0x204] ss:$36 sps:$4 sm:$0xff]   ;;  %v420_v0 = vsel %vm411_vm0, %v418_v47, %v419_v48 }
  0x16   :  { %1318 = vmatpush1.bf16.msra.mxu0 %v11866_v30  ;;  %v11880_v59 = vld [vmem:[%s18608_s1 + $0x1fc] ss:$36 sps:$4 sm:$0xff]   ;;  %v154_v5 = vshrl.u32 %v12848_v39, 16  ;;  %v275_v9 = vrot.slane %v12831_v29, 1  ;;  %v276_v12 = vrot.slane %v12848_v39, 1  ;;  %v344_v13 = vrot.slane %v143_v53, 1 }
  0x17   :  { %1319 = vmatprep.subr.bf16.mxu0 %v11868_v36  ;;  %v11884_v61 = vld [vmem:[%s18608_s1 + $0x1f8] ss:$36 sps:$4 sm:$0xff]   ;;  %v11885_v63 = vld [vmem:[%s18608_s1 + $0x200] ss:$36 sps:$4 sm:$0xff]   ;;  %v348_v19 = vrot.slane %v150_v54, 2  ;;  %v421_v35 = vrot.slane %v12831_v29, 2 }
  0x18   :  { %381 = vrot.lane.b32.xlu0 %v328_v33, %s12567_s26  ;;  %v337_v33 = vrot.slane %v128_v24, 1  ;;  %v11888_v14 = vld [vmem:[%s18608_s1 + $0x24c] ss:$36 sps:$4 sm:$0x3f]   ;;  %v347_v18 = vrot.slane %v154_v5, 1  ;;  %v277_v27 = vsel %vm265_vm1, %v275_v9, %v276_v12  ;;  %v422_v36 = vrot.slane %v12848_v39, 2 }
  0x19   :  { %383 = vrot.lane.b32.xlu1 %v336_v3, %s12567_s26  ;;  %v152_v3 = vrot.slane %v150_v54, 1  ;;  %v11890_v23 = vld [vmem:[%s18608_s1 + $0x240] ss:$36 sps:$4 sm:$0x3f]   ;;  %v66_v24 = vld [vmem:[%s18607_s0 + $0x90] sm:$0xff]  ;;  %vm468_vm6 = vcmask 228352  }
  0x1a   :  { %v339_v49 = vor.u32 %v338_v34, %v337_v33  ;;  %1320 = vmatpush1.bf16.msra.mxu0 %v11872_v41  ;;  %v67_v25 = vld [vmem:[%s18607_s0 + $0x98] sm:$0xf]  ;;  %v11891_v26 = vld [vmem:[%s18608_s1 + $0x248] ss:$36 sps:$4 sm:$0x3f]   ;;  %v349_v28 = vor.u32 %v348_v19, %v347_v18  ;;  %v68_v43 = vld [vmem:[%s18607_s0 + $0xa0] sm:$0xff] }
  0x1b   :  { %1321 = vmatprep.subr.bf16.mxu0 %v11874_v46  ;;  %v1289_v32 = vsel %vm411_vm0, %v11891_v26, 0  ;;  %v12951_v33 = vpack.c.bf16 %v67_v25, %v66_v24  ;;  %v156_v46 = vor.u32 %v154_v5, %v152_v3  ;;  %v70_v47 = vld [vmem:[%s18607_s0 + $0xb0] sm:$0xff]  ;;  %vm534_vm7 = vcmask 687104   ;;  %s12572_s24 = smov 72  }
  0x1c   :  { %438 = vrot.lane.b32.xlu0 %v413_v15, %s12564_s19  ;;  %v11864_v15 = vld [vmem:[%s18608_s1 + $0x12c] ss:$36 sps:$4 sm:$0xff]   ;;  %v343_v62 = vsel %vm322_vm2, %v339_v49, %v12874_v52  ;;  %v71_v49 = vld [vmem:[%s18607_s0 + $0xb8] sm:$0xf]  ;;  %vm567_vm8 = vcmask 916480   ;;  %vm4300_vm9 = vcmask 1044480  }
  0x1d   :  { %440 = vrot.lane.b32.xlu1 %v417_v17, %s12564_s19  ;;  %1470 = vmatprep.subr.bf16.mxu1 %v11864_v15  ;;  %v169_v41 = vshrl.u32 %v12951_v33, 16  ;;  %vm4461_vm10 = vcmask 1043456   ;;  %vm4638_vm11 = vcmask 130048   ;;  %vm4955_vm12 = vcmask 261120  }
  0x1e   :  { %1471 = vmatpush1.bf16.msra.mxu1 %v11867_v31  ;;  %1322 = vmatpush1.bf16.msra.mxu0 %v11878_v55  ;;  %v1283_v31 = vsel %vm411_vm0, %v11890_v23, 0  ;;  %vm5284_vm13 = vcmask 224256   ;;  %vm7657_vm14 = vcmask 1041408   ;;  %vm8650_vm15 = vcmask 1041409  }
  0x1f   :  { %1472 = vmatprep.subr.bf16.mxu1 %v11870_v40  ;;  %1323 = vmatprep.subr.bf16.mxu0 %v11880_v59  ;;  %v165_v40 = vshll.u32 %v12951_v33, 16  ;;  %v354_v54 = vrot.slane %v169_v41, 1 }
  0x20   :  { %223 = vrot.lane.b32.xlu0 %v126_v22, %s12566_s23  ;;  %v65_v22 = vld [vmem:[%s18607_s0 + $0x88] sm:$0xff] }
  0x21   :  { %296 = vrot.lane.b32.xlu1 %v270_v42, %s12565_s20  ;;  %v145_v42 = vshll.u32 %v12831_v29, 16  ;;  %v12943_v30 = vpack.c.bf16 %v65_v22, %v64_v20  ;;  %v355_v55 = vrot.slane %v165_v40, 2 }
  0x22   :  { %1473 = vmatpush1.bf16.msra.mxu1 %v11873_v45  ;;  %1324 = vmatpush1.bf16.msra.mxu0 %v11884_v61 }
  0x23   :  { %v147_v57 = vrot.slane %v145_v42, 1  ;;  %1474 = vmatprep.subr.bf16.mxu1 %v11876_v50  ;;  %v345_v17 = vrot.slane %v145_v42, 2  ;;  %v160_v37 = vshll.u32 %v12943_v30, 16  ;;  %v158_v38 = vshrl.u32 %v12943_v30, 16 }
  0x24   :  { %385 = vrot.lane.b32.xlu0 %v12749_v58, %s12567_s26  ;;  %v11879_v58 = vld [vmem:[%s18608_s1 + $0x1b8] ss:$36 sps:$4 sm:$0xff]   ;;  %v423_v42 = vsel %vm411_vm0, %v421_v35, %v422_v36 }
  0x25   :  { %442 = vrot.lane.b32.xlu1 %v416_v6, %s12564_s19  ;;  %v148_v2 = vor.u32 %v147_v57, %v143_v53  ;;  %v11886_v6 = vld [vmem:[%s18608_s1 + $0x244] ss:$36 sps:$4 sm:$0x3f]   ;;  %v346_v15 = vor.u32 %v345_v17, %v344_v13  ;;  %v162_v45 = vrot.slane %v160_v37, 1  ;;  %v352_v53 = vrot.slane %v160_v37, 2 }
  0x26   :  { %1475 = vmatpush1.bf16.msra.mxu1 %v11879_v58  ;;  %10982 = vmatprep.subr.msk.bf16.mxu0 %vm411_vm0, %v11886_v6  ;;  %v279_v57 = vrot.slane %v12951_v33, 1  ;;  %v12986_v58 = vpack.c.bf16 %v71_v49, %v70_v47 }
  0x27   :  { %1476 = vmatprep.subr.bf16.mxu1 %v11882_v60  ;;  %v153_v16 = vsel %vm96_vm3, %v148_v2, %v152_v3  ;;  %1326 = vmatpush1.bf16.msra.mxu0 %v1283_v31  ;;  %v350_v34 = vsel %vm322_vm2, %v346_v15, %v349_v28  ;;  %v424_v60 = vrot.slane %v12943_v30, 2  ;;  %v73_v31 = vld [vmem:[%s18607_s0 + $0xc8] sm:$0xff] }
  0x28   :  { %225 = vrot.lane.b32.xlu0 %v138_v51, %s12566_s23  ;;  %v167_v51 = vrot.slane %v165_v40, 1  ;;  %v180_v6 = vshll.u32 %v12986_v58, 16  ;;  %v282_v19 = vrot.slane %v12986_v58, 1 }
  0x29   :  { %298 = vrot.lane.b32.xlu1 %v274_v56, %s12565_s20  ;;  %v278_v56 = vrot.slane %v12943_v30, 1 }
  0x2a   :  { %1477 = vmatpush1.bf16.msra.mxu1 %v11885_v63  ;;  %v171_v17 = vor.u32 %v169_v41, %v167_v51  ;;  %v362_v25 = vrot.slane %v180_v6, 2 }
  0x2b   :  { %10995 = vmatprep.subr.msk.bf16.mxu1 %vm411_vm0, %v11888_v14  ;;  %v280_v2 = vsel %vm265_vm1, %v278_v56, %v279_v57  ;;  %v182_v14 = vrot.slane %v180_v6, 1  ;;  %v11903_v56 = vld [vmem:[%s18608_s1 + $0x14] ss:$36 sps:$4 sm:$0xff]  }
  0x2c   :  { %387 = vrot.lane.b32.xlu0 %v343_v62, %s12567_s26  ;;  %v425_v62 = vrot.slane %v12951_v33, 2  ;;  %1615 = vmatprep.subr.bf16.mxu0 %v11903_v56 }
  0x2d   :  { %444 = vrot.lane.b32.xlu1 %v420_v0, %s12564_s19  ;;  %v356_v0 = vor.u32 %v355_v55, %v354_v54 }
  0x2e   :  { %1479 = vmatpush1.bf16.msra.mxu1 %v1289_v32  ;;  %v74_v32 = vld [vmem:[%s18607_s0 + $0xd0] sm:$0xff] }
  0x30   :  { %227 = vrot.lane.b32.xlu0 %v141_v8, %s12566_s23  ;;  %v11894_v8 = vld [vmem:[%s18608_s1 + $0x1c] ss:$36 sps:$4 sm:$0xff]  }
  0x31   :  { %229 = vrot.lane.b32.xlu1 %v153_v16, %s12566_s23  ;;  %v184_v16 = vshrl.u32 %v12986_v58, 16  ;;  %1768 = vmatprep.subr.bf16.mxu1 %v11894_v8 }
  0x33   :  { %v361_v24 = vrot.slane %v184_v16, 1 }
  0x34   :  { %300 = vrot.lane.b32.xlu0 %v273_v44, %s12565_s20  ;;  %v69_v44 = vld [vmem:[%s18607_s0 + $0xa8] sm:$0xff] }
  0x35   :  { %302 = vrot.lane.b32.xlu1 %v277_v27, %s12565_s20  ;;  %v12980_v50 = vpack.c.bf16 %v69_v44, %v68_v43  ;;  %v363_v15 = vor.u32 %v362_v25, %v361_v24  ;;  %v76_v44 = vld [vmem:[%s18607_s0 + $0xe0] sm:$0xff] }
  0x37   :  { %v175_v59 = vshll.u32 %v12980_v50, 16  ;;  %v173_v3 = vshrl.u32 %v12980_v50, 16  ;;  %v281_v18 = vrot.slane %v12980_v50, 1  ;;  %v427_v37 = vrot.slane %v12980_v50, 2 }
  0x38   :  { %389 = vrot.lane.b32.xlu0 %v12874_v52, %s12567_s26  ;;  %v351_v52 = vrot.slane %v158_v38, 1 }
  0x39   :  { %391 = vrot.lane.b32.xlu1 %v350_v34, %s12567_s26  ;;  %v177_v5 = vrot.slane %v175_v59, 1  ;;  %v358_v20 = vrot.slane %v173_v3, 1  ;;  %v359_v23 = vrot.slane %v175_v59, 2  ;;  %v283_v26 = vsel %vm265_vm1, %v281_v18, %v282_v19  ;;  %v75_v34 = vld [vmem:[%s18607_s0 + $0xd8] sm:$0xf] }
  0x3a   :  { %v353_v63 = vor.u32 %v352_v53, %v351_v52  ;;  %v13033_v40 = vpack.c.bf16 %v75_v34, %v74_v32  ;;  %v79_v53 = vld [vmem:[%s18607_s0 + $0xf8] sm:$0xf] }
  0x3b   :  { %v178_v13 = vor.u32 %v177_v5, %v173_v3  ;;  %v360_v27 = vor.u32 %v359_v23, %v358_v20 }
  0x3c   :  { %446 = vrot.lane.b32.xlu0 %v419_v48, %s12564_s19  ;;  %v163_v48 = vor.u32 %v162_v45, %v158_v38  ;;  %v357_v9 = vsel %vm322_vm2, %v353_v63, %v356_v0  ;;  %v428_v38 = vrot.slane %v12986_v58, 2  ;;  %v186_v45 = vor.u32 %v184_v16, %v182_v14 }
  0x3d   :  { %448 = vrot.lane.b32.xlu1 %v423_v42, %s12564_s19  ;;  %v183_v22 = vsel %vm96_vm3, %v178_v13, %v182_v14  ;;  %v77_v42 = vld [vmem:[%s18607_s0 + $0xe8] sm:$0xff]  ;;  %v285_v63 = vrot.slane %v13033_v40, 1  ;;  %v431_v6 = vrot.slane %v13033_v40, 2 }
  0x3e   :  { %v168_v61 = vsel %vm96_vm3, %v163_v48, %v167_v51  ;;  %v429_v43 = vsel %vm411_vm0, %v427_v37, %v428_v38  ;;  %v199_v51 = vshrl.u32 %v13033_v40, 16  ;;  %v13049_v52 = vpack.c.bf16 %v77_v42, %v76_v44  ;;  %v78_v48 = vld [vmem:[%s18607_s0 + $0xf0] sm:$0xff] }
  0x40   :  { %231 = vrot.lane.b32.xlu0 %v156_v46, %s12566_s23  ;;  %v195_v46 = vshll.u32 %v13033_v40, 16  ;;  %v203_v13 = vshrl.u32 %v13049_v52, 16  ;;  %v287_v24 = vrot.slane %v13049_v52, 1 }
  0x41   :  { %304 = vrot.lane.b32.xlu1 %v276_v12, %s12565_s20  ;;  %v426_v12 = vsel %vm411_vm0, %v424_v60, %v425_v62  ;;  %v368_v60 = vrot.slane %v199_v51, 1 }
  0x42   :  { %v197_v54 = vrot.slane %v195_v46, 1 }
  0x44   :  { %393 = vrot.lane.b32.xlu0 %v349_v28, %s12567_s26  ;;  %v72_v28 = vld [vmem:[%s18607_s0 + $0xc0] sm:$0xff]  ;;  %v201_v23 = vor.u32 %v199_v51, %v197_v54 }
  0x45   :  { %450 = vrot.lane.b32.xlu1 %v422_v36, %s12564_s19  ;;  %v13027_v35 = vpack.c.bf16 %v73_v31, %v72_v28  ;;  %v364_v36 = vsel %vm322_vm2, %v360_v27, %v363_v15 }
  0x47   :  { %v190_v41 = vshll.u32 %v13027_v35, 16  ;;  %v188_v47 = vshrl.u32 %v13027_v35, 16  ;;  %v430_v3 = vrot.slane %v13027_v35, 2 }
  0x48   :  { %233 = vrot.lane.b32.xlu0 %v168_v61, %s12566_s23  ;;  %v369_v61 = vrot.slane %v195_v46, 2 }
  0x49   :  { %306 = vrot.lane.b32.xlu1 %v280_v2, %s12565_s20  ;;  %v192_v49 = vrot.slane %v190_v41, 1  ;;  %v365_v55 = vrot.slane %v188_v47, 1  ;;  %v366_v59 = vrot.slane %v190_v41, 2  ;;  %v205_v2 = vshll.u32 %v13049_v52, 16 }
  0x4a   :  { %v432_v18 = vsel %vm411_vm0, %v430_v3, %v431_v6  ;;  %v11912_v3 = vld [vmem:[%s18608_s1 + $0xa4] ss:$36 sps:$4 sm:$0xff]  }
  0x4b   :  { %v367_v8 = vor.u32 %v366_v59, %v365_v55  ;;  %v207_v14 = vrot.slane %v205_v2, 1  ;;  %v11901_v55 = vld [vmem:[%s18608_s1 + $0x10] ss:$36 sps:$4 sm:$0xff]  }
  0x4c   :  { %395 = vrot.lane.b32.xlu0 %v357_v9, %s12567_s26  ;;  %v370_v9 = vor.u32 %v369_v61, %v368_v60 }
  0x4d   :  { %452 = vrot.lane.b32.xlu1 %v426_v12, %s12564_s19 }
  0x50   :  { %235 = vrot.lane.b32.xlu0 %v171_v17, %s12566_s23  ;;  %v371_v17 = vsel %vm322_vm2, %v367_v8, %v370_v9 }
  0x51   :  { %237 = vrot.lane.b32.xlu1 %v183_v22, %s12566_s23 }
  0x54   :  { %308 = vrot.lane.b32.xlu0 %v279_v57, %s12565_s20  ;;  %v193_v57 = vor.u32 %v192_v49, %v188_v47 }
  0x55   :  { %310 = vrot.lane.b32.xlu1 %v283_v26, %s12565_s20  ;;  %v372_v26 = vrot.slane %v203_v13, 1 }
  0x56   :  { %v198_v5 = vsel %vm96_vm3, %v193_v57, %v197_v54  ;;  %v11892_v54 = vld [vmem:[%s18608_s1 + $0x18] ss:$36 sps:$4 sm:$0xff]  }
  0x57   :  { %v11906_v57 = vld [vmem:[%s18608_s1 + $0x5c] ss:$36 sps:$4 sm:$0xff]  }
  0x58   :  { %397 = vrot.lane.b32.xlu0 %v356_v0, %s12567_s26  ;;  %v13064_v0 = vpack.c.bf16 %v79_v53, %v78_v48 }
  0x59   :  { %399 = vrot.lane.b32.xlu1 %v364_v36, %s12567_s26 }
  0x5a   :  { %v210_v16 = vshll.u32 %v13064_v0, 16  ;;  %v214_v22 = vshrl.u32 %v13064_v0, 16  ;;  %v288_v25 = vrot.slane %v13064_v0, 1  ;;  %v434_v41 = vrot.slane %v13064_v0, 2 }
  0x5c   :  { %454 = vrot.lane.b32.xlu0 %v425_v62, %s12564_s19  ;;  %v284_v62 = vrot.slane %v13027_v35, 1  ;;  %v212_v20 = vrot.slane %v210_v16, 1  ;;  %v375_v28 = vrot.slane %v214_v22, 1  ;;  %v376_v31 = vrot.slane %v210_v16, 2  ;;  %v11915_v16 = vld [vmem:[%s18608_s1 + $0xec] ss:$36 sps:$4 sm:$0xff]  }
  0x5d   :  { %456 = vrot.lane.b32.xlu1 %v429_v43, %s12564_s19  ;;  %v289_v32 = vsel %vm265_vm1, %v287_v24, %v288_v25 }
  0x5e   :  { %v286_v12 = vsel %vm265_vm1, %v284_v62, %v285_v63  ;;  %v377_v36 = vor.u32 %v376_v31, %v375_v28  ;;  %v11895_v62 = vld [vmem:[%s18608_s1 + $0x60] ss:$36 sps:$4 sm:$0xff]  }
  0x5f   :  { %v11921_v28 = vld [vmem:[%s18608_s1 + $0x13c] ss:$36 sps:$4 sm:$0xff]  }
  0x60   :  { %239 = vrot.lane.b32.xlu0 %v186_v45, %s12566_s23  ;;  %v216_v45 = vor.u32 %v214_v22, %v212_v20 }
  0x61   :  { %312 = vrot.lane.b32.xlu1 %v282_v19, %s12565_s20  ;;  %v208_v19 = vor.u32 %v207_v14, %v203_v13 }
  0x63   :  { %v213_v27 = vsel %vm96_vm3, %v208_v19, %v212_v20 }
  0x64   :  { %401 = vrot.lane.b32.xlu0 %v363_v15, %s12567_s26  ;;  %v373_v15 = vrot.slane %v205_v2, 2  ;;  %v11900_v2 = vld [vmem:[%s18608_s1 + $0xac] ss:$36 sps:$4 sm:$0xff]  }
  0x65   :  { %458 = vrot.lane.b32.xlu1 %v428_v38, %s12564_s19  ;;  %v433_v38 = vrot.slane %v13049_v52, 2 }
  0x66   :  { %v374_v34 = vor.u32 %v373_v15, %v372_v26  ;;  %v11913_v26 = vld [vmem:[%s18608_s1 + $0xe8] ss:$36 sps:$4 sm:$0xff]   ;;  %v11918_v15 = vld [vmem:[%s18608_s1 + $0x134] ss:$36 sps:$4 sm:$0xff]  }
  0x67   :  { %v435_v42 = vsel %vm411_vm0, %v433_v38, %v434_v41  ;;  %v11924_v38 = vld [vmem:[%s18608_s1 + $0x17c] ss:$36 sps:$4 sm:$0xff]  }
  0x68   :  { %241 = vrot.lane.b32.xlu0 %v198_v5, %s12566_s23  ;;  %v378_v37 = vsel %vm322_vm2, %v374_v34, %v377_v36 }
  0x69   :  { %314 = vrot.lane.b32.xlu1 %v286_v12, %s12565_s20  ;;  %v11910_v12 = vld [vmem:[%s18608_s1 + $0xa0] ss:$36 sps:$4 sm:$0xff]  }
  0x6c   :  { %403 = vrot.lane.b32.xlu0 %v371_v17, %s12567_s26 }
  0x6d   :  { %460 = vrot.lane.b32.xlu1 %v432_v18, %s12564_s19 }
  0x70   :  { %243 = vrot.lane.b32.xlu0 %v201_v23, %s12566_s23 }
  0x71   :  { %245 = vrot.lane.b32.xlu1 %v213_v27, %s12566_s23 }
  0x74   :  { %316 = vrot.lane.b32.xlu0 %v285_v63, %s12565_s20  ;;  %v11904_v63 = vld [vmem:[%s18608_s1 + $0x58] ss:$36 sps:$4 sm:$0xff]  }
  0x75   :  { %318 = vrot.lane.b32.xlu1 %v289_v32, %s12565_s20 }
  0x78   :  { %405 = vrot.lane.b32.xlu0 %v370_v9, %s12567_s26  ;;  %v11898_v9 = vld [vmem:[%s18608_s1 + $0xa8] ss:$36 sps:$4 sm:$0xff]  }
  0x79   :  { %407 = vrot.lane.b32.xlu1 %v378_v37, %s12567_s26  ;;  %v11919_v37 = vld [vmem:[%s18608_s1 + $0x138] ss:$36 sps:$4 sm:$0xff]  }
  0x7a   :  { %v13095_v43 = vpop.permute.xlu1 %436  ;;  %v291_v44 = vpop.permute.xlu0 %290 }
  0x7b   :  { %10983 = vmatprep.mubr.msk.bf16.mxu0 %vm1244_vm4, %v13095_v43  ;;  %10996 = vmatprep.mubr.msk.bf16.mxu1 %vm1244_vm4, %v13095_v43 }
  0x7c   :  { %462 = vrot.lane.b32.xlu0 %v431_v6, %s12564_s19 }
  0x7d   :  { %464 = vrot.lane.b32.xlu1 %v435_v42, %s12564_s19 }
  0x7e   :  { %v220_v46 = vpop.permute.xlu0 %219 }
  0x7f   :  { %v380_v47 = vpop.permute.xlu1 %379  ;;  %v472_v8 = vsel %vm468_vm6, %v12676_v7, %v220_v46  ;;  %v11909_v7 = vld [vmem:[%s18608_s1 + $0xf4] ss:$36 sps:$4 sm:$0xff]  }
  0x80   :  { %247 = vrot.lane.b32.xlu0 %v216_v45, %s12566_s23 }
  0x81   :  { %320 = vrot.lane.b32.xlu1 %v288_v25, %s12565_s20  ;;  %v11907_v25 = vld [vmem:[%s18608_s1 + $0xf0] ss:$36 sps:$4 sm:$0xff]  }
  0x82   :  { %v218_v49 = vpop.permute.xlu0 %217 }
  0x83   :  { %v222_v51 = vpop.permute.xlu1 %221  ;;  %v470_v48 = vsel %vm468_vm6, %v12668_v4, %v218_v49  ;;  %v11897_v4 = vld [vmem:[%s18608_s1 + $0x64] ss:$36 sps:$4 sm:$0xff]  }
  0x84   :  { %v503_v53 = vsel %vm501_vm5, %v470_v48, %v291_v44  ;;  %409 = vrot.lane.b32.xlu0 %v377_v36, %s12567_s26  ;;  %v474_v13 = vsel %vm468_vm6, %v12684_v10, %v222_v51  ;;  %v11916_v36 = vld [vmem:[%s18608_s1 + $0x130] ss:$36 sps:$4 sm:$0xff]  }
  0x85   :  { %v536_v56 = vsel %vm534_vm7, %v503_v53, %v380_v47  ;;  %466 = vrot.lane.b32.xlu1 %v434_v41, %s12564_s19 }
  0x86   :  { %v293_v59 = vpop.permute.xlu0 %292  ;;  %v13126_v60 = vsel %vm567_vm8, %v536_v56, %v13095_v43  ;;  %v11925_v56 = vld [vmem:[%s18608_s1 + $0x180] ss:$36 sps:$4 sm:$0xff]  }
  0x87   :  { %v295_v61 = vpop.permute.xlu1 %294  ;;  %1342 = vmatmul.mubr.bf16.vlgmr.msra.gmra.mrb[0].mxu0 %v13126_v60  ;;  %1495 = vmatmul.mubr.bf16.vlgmr.msra.gmra.mrb[0].mxu1 %v13126_v60  ;;  %v505_v14 = vsel %vm501_vm5, %v472_v8, %v293_v59  ;;  %v11930_v59 = vld [vmem:[%s18608_s1 + $0x1c4] ss:$36 sps:$4 sm:$0xff]  }
  0x88   :  { %1769 = vmatpush1.bf16.msra.mxu1 %v11892_v54  ;;  %1616 = vmatpush1.bf16.msra.mxu0 %v11901_v55  ;;  %v507_v17 = vsel %vm501_vm5, %v474_v13, %v295_v61  ;;  %v11922_v55 = vld [vmem:[%s18608_s1 + $0x178] ss:$36 sps:$4 sm:$0xff]   ;;  %v11933_v61 = vld [vmem:[%s18608_s1 + $0x1cc] ss:$36 sps:$4 sm:$0xff]  }
  0x89   :  { %1770 = vmatprep.subr.bf16.mxu1 %v11897_v4  ;;  %1617 = vmatprep.subr.bf16.mxu0 %v11906_v57  ;;  %v11937_v13 = vld [vmem:[%s18608_s1 + $0x210] ss:$36 sps:$4 sm:$0xff]  }
  0x8a   :  { %v382_v5 = vpop.permute.xlu0 %381 }
  0x8b   :  { %v384_v6 = vpop.permute.xlu1 %383  ;;  %v538_v18 = vsel %vm534_vm7, %v505_v14, %v382_v5 }
  0x8c   :  { %1771 = vmatpush1.bf16.msra.mxu1 %v11895_v62  ;;  %1618 = vmatpush1.bf16.msra.mxu0 %v11904_v63  ;;  %v540_v20 = vsel %vm534_vm7, %v507_v17, %v384_v6  ;;  %v11939_v6 = vld [vmem:[%s18608_s1 + $0x214] ss:$36 sps:$4 sm:$0xff]  }
  0x8d   :  { %1772 = vmatprep.subr.bf16.mxu1 %v11900_v2  ;;  %1619 = vmatprep.subr.bf16.mxu0 %v11912_v3  ;;  %v11928_v2 = vld [vmem:[%s18608_s1 + $0x1c0] ss:$36 sps:$4 sm:$0xff]   ;;  %v11931_v3 = vld [vmem:[%s18608_s1 + $0x1c8] ss:$36 sps:$4 sm:$0xff]  }
  0x8e   :  { %v439_v19 = vpop.permute.xlu0 %438 }
  0x8f   :  { %v441_v10 = vpop.permute.xlu1 %440  ;;  %v571_v22 = vsel %vm567_vm8, %v538_v18, %v439_v19  ;;  %v11944_v18 = vld [vmem:[%s18608_s1 + $0x250] ss:$36 sps:$4 sm:$0x3f]  }
  0x90   :  { %v573_v23 = vsel %vm567_vm8, %v540_v20, %v441_v10  ;;  %v13164_v24 = vcombine.low %v439_v19, %v441_v10  ;;  %1773 = vmatpush1.bf16.msra.mxu1 %v11898_v9  ;;  %1620 = vmatpush1.bf16.msra.mxu0 %v11910_v12  ;;  %v625_v46 = vunpack.c.h.b16 %v441_v10  ;;  %v11934_v12 = vld [vmem:[%s18608_s1 + $0x208] ss:$36 sps:$4 sm:$0xff]   ;;  %v11945_v19 = vld [vmem:[%s18608_s1 + $0x258] ss:$36 sps:$4 sm:$0x3f]  }
  0x91   :  { %v13172_v27 = vcombine.low %v571_v22, %v573_v23  ;;  %1774 = vmatprep.subr.bf16.mxu1 %v11909_v7  ;;  %1621 = vmatprep.subr.bf16.mxu0 %v11915_v16  ;;  %v624_v51 = vunpack.c.h.b16 %v573_v23  ;;  %v11940_v7 = vld [vmem:[%s18608_s1 + $0x254] ss:$36 sps:$4 sm:$0x3f]   ;;  %v11942_v16 = vld [vmem:[%s18608_s1 + $0x25c] ss:$36 sps:$4 sm:$0x3f]  }
  0x92   :  { %10984 = vmatprep.mubr.msk.bf16.mxu0 %vm1244_vm4, %v13164_v24  ;;  %10997 = vmatprep.mubr.msk.bf16.mxu1 %vm1244_vm4, %v13164_v24  ;;  %v224_v31 = vpop.permute.xlu0 %223  ;;  %v11948_v22 = vld [vmem:[%s18609_s3 + $0x4] ss:$8 sps:$4 sm:$0xff]  }
  0x93   :  { %v297_v32 = vpop.permute.xlu1 %296  ;;  %1352 = vmatmul.mubr.bf16.gmra.mrb[4].mxu0 %v13172_v27  ;;  %1505 = vmatmul.mubr.bf16.gmra.mrb[4].mxu1 %v13172_v27  ;;  %v476_v34 = vsel %vm468_vm6, %v12694_v21, %v224_v31  ;;  %v11927_v21 = vld [vmem:[%s18608_s1 + $0x184] ss:$36 sps:$4 sm:$0xff]  }
  0x94   :  { %1775 = vmatpush1.bf16.msra.mxu1 %v11907_v25  ;;  %1622 = vmatpush1.bf16.msra.mxu0 %v11913_v26  ;;  %v509_v41 = vsel %vm501_vm5, %v476_v34, %v297_v32  ;;  %v1295_v25 = vsel %vm411_vm0, %v11944_v18, 0  ;;  %v1301_v26 = vsel %vm411_vm0, %v11945_v19, 0 }
  0x95   :  { %1623 = vmatprep.subr.bf16.mxu0 %v11918_v15  ;;  %1776 = vmatprep.subr.bf16.mxu1 %v11921_v28 }
  0x96   :  { %v386_v44 = vpop.permute.xlu0 %385 }
  0x97   :  { %v443_v42 = vpop.permute.xlu1 %442  ;;  %v542_v45 = vsel %vm534_vm7, %v509_v41, %v386_v44 }
  0x98   :  { %v627_v47 = vunpack.c.l.b16 %v443_v42  ;;  %v575_v49 = vsel %vm567_vm8, %v542_v45, %v443_v42  ;;  %1624 = vmatpush1.bf16.msra.mxu0 %v11916_v36  ;;  %1777 = vmatpush1.bf16.msra.mxu1 %v11919_v37 }
  0x99   :  { %v626_v48 = vunpack.c.l.b16 %v575_v49  ;;  %1625 = vmatprep.subr.bf16.mxu0 %v11924_v38  ;;  %1778 = vmatprep.subr.bf16.mxu1 %v11927_v21 }
  0x9a   :  { %v13203_v53 = vpack.c.b16 %v627_v47, %v625_v46  ;;  %v226_v54 = vpop.permute.xlu0 %225 }
  0x9b   :  { %v13211_v4 = vpack.c.b16 %v626_v48, %v624_v51  ;;  %v299_v57 = vpop.permute.xlu1 %298  ;;  %v478_v62 = vsel %vm468_vm6, %v12773_v1, %v226_v54  ;;  %v11936_v1 = vld [vmem:[%s18608_s1 + $0x20c] ss:$36 sps:$4 sm:$0xff]  }
  0x9c   :  { %10985 = vmatprep.mubr.msk.bf16.mxu0 %vm1244_vm4, %v13203_v53  ;;  %10998 = vmatprep.mubr.msk.bf16.mxu1 %vm1244_vm4, %v13203_v53  ;;  %v511_v8 = vsel %vm501_vm5, %v478_v62, %v299_v57 }
  0x9d   :  { %1362 = vmatmul.mubr.bf16.gmra.mrb[8].mxu0 %v13211_v4  ;;  %1515 = vmatmul.mubr.bf16.gmra.mrb[8].mxu1 %v13211_v4 }
  0x9e   :  { %v388_v63 = vpop.permute.xlu0 %387  ;;  %1626 = vmatpush1.bf16.msra.mxu0 %v11922_v55  ;;  %1779 = vmatpush1.bf16.msra.mxu1 %v11925_v56 }
  0x9f   :  { %v13233_v5 = vpop.permute.xlu1 %444  ;;  %1627 = vmatprep.subr.bf16.mxu0 %v11930_v59  ;;  %1780 = vmatprep.subr.bf16.mxu1 %v11933_v61  ;;  %v544_v9 = vsel %vm534_vm7, %v511_v8, %v388_v63  ;;  %v18623_v8 = vmov 0  }
  0xa0   :  { %10986 = vmatprep.mubr.msk.bf16.mxu0 %vm1244_vm4, %v13233_v5  ;;  %10999 = vmatprep.mubr.msk.bf16.mxu1 %vm1244_vm4, %v13233_v5  ;;  %v13267_v20 = vsel %vm567_vm8, %v544_v9, %v13233_v5 }
  0xa2   :  { %v228_v14 = vpop.permute.xlu0 %227  ;;  %1628 = vmatpush1.bf16.msra.mxu0 %v11928_v2  ;;  %1781 = vmatpush1.bf16.msra.mxu1 %v11931_v3 }
  0xa3   :  { %v230_v17 = vpop.permute.xlu1 %229  ;;  %1629 = vmatprep.subr.bf16.mxu0 %v11936_v1  ;;  %1782 = vmatprep.subr.bf16.mxu1 %v11939_v6  ;;  %v480_v31 = vsel %vm468_vm6, %v12789_v11, %v228_v14 }
  0xa4   :  { %v482_v32 = vsel %vm468_vm6, %v12831_v29, %v230_v17 }
  0xa5   :  { %1372 = vmatmul.mubr.bf16.gmra.mrb[12].mxu0 %v13267_v20  ;;  %1525 = vmatmul.mubr.bf16.gmra.mrb[12].mxu1 %v13267_v20 }
  0xa6   :  { %v301_v10 = vpop.permute.xlu0 %300  ;;  %1630 = vmatpush1.bf16.msra.mxu0 %v11934_v12  ;;  %1783 = vmatpush1.bf16.msra.mxu1 %v11937_v13 }
  0xa7   :  { %v303_v23 = vpop.permute.xlu1 %302  ;;  %11008 = vmatprep.subr.msk.bf16.mxu0 %vm411_vm0, %v11940_v7  ;;  %11021 = vmatprep.subr.msk.bf16.mxu1 %vm411_vm0, %v11942_v16  ;;  %v513_v34 = vsel %vm501_vm5, %v480_v31, %v301_v10 }
  0xa8   :  { %v515_v36 = vsel %vm501_vm5, %v482_v32, %v303_v23 }
  0xaa   :  { %v390_v15 = vpop.permute.xlu0 %389  ;;  %1632 = vmatpush1.bf16.msra.mxu0 %v1295_v25  ;;  %1785 = vmatpush1.bf16.msra.mxu1 %v1301_v26 }
  0xab   :  { %v392_v28 = vpop.permute.xlu1 %391  ;;  %3238 = vmatprep.subr.bf16.mxu1 %v11948_v22  ;;  %v546_v37 = vsel %vm534_vm7, %v513_v34, %v390_v15  ;;  %1921 = vmatprep.subr.bf16.mxu0 %v18623_v8 }
  0xac   :  { %v548_v21 = vsel %vm534_vm7, %v515_v36, %v392_v28 }
  0xae   :  { %v447_v38 = vpop.permute.xlu0 %446 }
  0xaf   :  { %v449_v41 = vpop.permute.xlu1 %448  ;;  %v579_v44 = vsel %vm567_vm8, %v546_v37, %v447_v38 }
  0xb0   :  { %v581_v42 = vsel %vm567_vm8, %v548_v21, %v449_v41  ;;  %v13288_v45 = vcombine.low %v447_v38, %v449_v41  ;;  %v637_v55 = vunpack.c.h.b16 %v449_v41 }
  0xb1   :  { %v13290_v11 = vcombine.low %v579_v44, %v581_v42  ;;  %v636_v59 = vunpack.c.h.b16 %v581_v42 }
  0xb2   :  { %10987 = vmatprep.mubr.msk.bf16.mxu0 %vm1244_vm4, %v13288_v45  ;;  %11000 = vmatprep.mubr.msk.bf16.mxu1 %vm1244_vm4, %v13288_v45  ;;  %v232_v29 = vpop.permute.xlu0 %231 }
  0xb3   :  { %v305_v46 = vpop.permute.xlu1 %304  ;;  %1382 = vmatmul.mubr.bf16.gmra.mrb[16].mxu0 %v13290_v11  ;;  %1535 = vmatmul.mubr.bf16.gmra.mrb[16].mxu1 %v13290_v11  ;;  %v484_v47 = vsel %vm468_vm6, %v12848_v39, %v232_v29 }
  0xb4   :  { %v517_v49 = vsel %vm501_vm5, %v484_v47, %v305_v46 }
  0xb6   :  { %v394_v51 = vpop.permute.xlu0 %393 }
  0xb7   :  { %v451_v48 = vpop.permute.xlu1 %450  ;;  %v550_v54 = vsel %vm534_vm7, %v517_v49, %v394_v51 }
  0xb8   :  { %v639_v56 = vunpack.c.l.b16 %v451_v48  ;;  %v583_v57 = vsel %vm567_vm8, %v550_v54, %v451_v48 }
  0xb9   :  { %v638_v61 = vunpack.c.l.b16 %v583_v57 }
  0xba   :  { %v13303_v62 = vpack.c.b16 %v639_v56, %v637_v55  ;;  %v234_v63 = vpop.permute.xlu0 %233 }
  0xbb   :  { %v13305_v2 = vpack.c.b16 %v638_v61, %v636_v59  ;;  %v307_v3 = vpop.permute.xlu1 %306  ;;  %v486_v39 = vsel %vm468_vm6, %v12943_v30, %v234_v63 }
  0xbc   :  { %10988 = vmatprep.mubr.msk.bf16.mxu0 %vm1244_vm4, %v13303_v62  ;;  %11001 = vmatprep.mubr.msk.bf16.mxu1 %vm1244_vm4, %v13303_v62  ;;  %v519_v9 = vsel %vm501_vm5, %v486_v39, %v307_v3 }
  0xbd   :  { %1392 = vmatmul.mubr.bf16.gmra.mrb[20].mxu0 %v13305_v2  ;;  %1545 = vmatmul.mubr.bf16.gmra.mrb[20].mxu1 %v13305_v2 }
  0xbe   :  { %v396_v1 = vpop.permute.xlu0 %395 }
  0xbf   :  { %v13315_v6 = vpop.permute.xlu1 %452  ;;  %v552_v30 = vsel %vm534_vm7, %v519_v9, %v396_v1 }
  0xc0   :  { %10989 = vmatprep.mubr.msk.bf16.mxu0 %vm1244_vm4, %v13315_v6  ;;  %11002 = vmatprep.mubr.msk.bf16.mxu1 %vm1244_vm4, %v13315_v6  ;;  %v13326_v14 = vsel %vm567_vm8, %v552_v30, %v13315_v6 }
  0xc2   :  { %v236_v12 = vpop.permute.xlu0 %235 }
  0xc3   :  { %v238_v13 = vpop.permute.xlu1 %237  ;;  %v488_v19 = vsel %vm468_vm6, %v12951_v33, %v236_v12 }
  0xc4   :  { %v490_v10 = vsel %vm468_vm6, %v12980_v50, %v238_v13 }
  0xc5   :  { %1402 = vmatmul.mubr.bf16.gmra.mrb[24].mxu0 %v13326_v14  ;;  %1555 = vmatmul.mubr.bf16.gmra.mrb[24].mxu1 %v13326_v14 }
  0xc6   :  { %v309_v7 = vpop.permute.xlu0 %308 }
  0xc7   :  { %v311_v16 = vpop.permute.xlu1 %310  ;;  %v521_v22 = vsel %vm501_vm5, %v488_v19, %v309_v7 }
  0xc8   :  { %v523_v23 = vsel %vm501_vm5, %v490_v10, %v311_v16 }
  0xca   :  { %v398_v17 = vpop.permute.xlu0 %397 }
  0xcb   :  { %v400_v18 = vpop.permute.xlu1 %399  ;;  %v554_v25 = vsel %vm534_vm7, %v521_v22, %v398_v17 }
  0xcc   :  { %v556_v15 = vsel %vm534_vm7, %v523_v23, %v400_v18 }
  0xce   :  { %v455_v26 = vpop.permute.xlu0 %454 }
  0xcf   :  { %v457_v28 = vpop.permute.xlu1 %456  ;;  %v587_v31 = vsel %vm567_vm8, %v554_v25, %v455_v26 }
  0xd0   :  { %v589_v32 = vsel %vm567_vm8, %v556_v15, %v457_v28  ;;  %v13340_v34 = vcombine.low %v455_v26, %v457_v28  ;;  %v649_v42 = vunpack.c.h.b16 %v457_v28 }
  0xd1   :  { %v13342_v33 = vcombine.low %v587_v31, %v589_v32  ;;  %v648_v47 = vunpack.c.h.b16 %v589_v32 }
  0xd2   :  { %10990 = vmatprep.mubr.msk.bf16.mxu0 %vm1244_vm4, %v13340_v34  ;;  %11003 = vmatprep.mubr.msk.bf16.mxu1 %vm1244_vm4, %v13340_v34  ;;  %v240_v50 = vpop.permute.xlu0 %239 }
  0xd3   :  { %v313_v36 = vpop.permute.xlu1 %312  ;;  %1412 = vmatmul.mubr.bf16.gmra.mrb[28].mxu0 %v13342_v33  ;;  %1565 = vmatmul.mubr.bf16.gmra.mrb[28].mxu1 %v13342_v33  ;;  %v492_v37 = vsel %vm468_vm6, %v12986_v58, %v240_v50 }
  0xd4   :  { %v525_v38 = vsel %vm501_vm5, %v492_v37, %v313_v36 }
  0xd6   :  { %v402_v21 = vpop.permute.xlu0 %401 }
  0xd7   :  { %v459_v41 = vpop.permute.xlu1 %458  ;;  %v558_v44 = vsel %vm534_vm7, %v525_v38, %v402_v21 }
  0xd8   :  { %v651_v29 = vunpack.c.l.b16 %v459_v41  ;;  %v591_v46 = vsel %vm567_vm8, %v558_v44, %v459_v41 }
  0xd9   :  { %v650_v49 = vunpack.c.l.b16 %v591_v46  ;;  %v11951_v46 = vld [vmem:[%s18609_s3 + $0x14] ss:$8 sps:$4 sm:$0xff]  }
  0xda   :  { %v13355_v51 = vpack.c.b16 %v651_v29, %v649_v42  ;;  %v242_v48 = vpop.permute.xlu0 %241  ;;  %v11970_v29 = vld [vmem:[%s18608_s1 + $0x20] ss:$36 sps:$4 sm:$0xff]  }
  0xdb   :  { %v13357_v54 = vpack.c.b16 %v650_v49, %v648_v47  ;;  %v315_v55 = vpop.permute.xlu1 %314  ;;  %v494_v58 = vsel %vm468_vm6, %v13027_v35, %v242_v48  ;;  %v11949_v47 = vld [vmem:[%s18609_s3 + $0x10] ss:$8 sps:$4 sm:$0xff]   ;;  %v11974_v49 = vld [vmem:[%s18608_s1 + $0x68] ss:$36 sps:$4 sm:$0xff]  }
  0xdc   :  { %10991 = vmatprep.mubr.msk.bf16.mxu0 %vm1244_vm4, %v13355_v51  ;;  %11004 = vmatprep.mubr.msk.bf16.mxu1 %vm1244_vm4, %v13355_v51  ;;  %v527_v59 = vsel %vm501_vm5, %v494_v58, %v315_v55  ;;  %v11954_v48 = vld [vmem:[%s18609_s3 + $0x24] ss:$8 sps:$4 sm:$0xff]   ;;  %v11952_v55 = vld [vmem:[%s18609_s3 + $0x20] ss:$8 sps:$4 sm:$0xff]   ;;  %v11978_v58 = vld [vmem:[%s18608_s1 + $0xb0] ss:$36 sps:$4 sm:$0xff]  }
  0xdd   :  { %1422 = vmatmul.mubr.bf16.gmra.mrb[32].mxu0 %v13357_v54  ;;  %1575 = vmatmul.mubr.bf16.gmra.mrb[32].mxu1 %v13357_v54 }
  0xde   :  { %v404_v56 = vpop.permute.xlu0 %403 }
  0xdf   :  { %v13367_v57 = vpop.permute.xlu1 %460  ;;  %v560_v61 = vsel %vm534_vm7, %v527_v59, %v404_v56  ;;  %v11957_v56 = vld [vmem:[%s18609_s3 + $0x34] ss:$8 sps:$4 sm:$0xff]   ;;  %v11955_v59 = vld [vmem:[%s18609_s3 + $0x30] ss:$8 sps:$4 sm:$0xff]  }
  0xe0   :  { %10992 = vmatprep.mubr.msk.bf16.mxu0 %vm1244_vm4, %v13367_v57  ;;  %11005 = vmatprep.mubr.msk.bf16.mxu1 %vm1244_vm4, %v13367_v57  ;;  %v13377_v35 = vsel %vm567_vm8, %v560_v61, %v13367_v57  ;;  %v11982_v61 = vld [vmem:[%s18608_s1 + $0xf8] ss:$36 sps:$4 sm:$0xff]  }
  0xe2   :  { %v244_v63 = vpop.permute.xlu0 %243 }
  0xe3   :  { %v246_v3 = vpop.permute.xlu1 %245  ;;  %v496_v12 = vsel %vm468_vm6, %v13033_v40, %v244_v63  ;;  %v11960_v63 = vld [vmem:[%s18609_s3 + $0x44] ss:$8 sps:$4 sm:$0xff]  }
  0xe4   :  { %v498_v13 = vsel %vm468_vm6, %v13049_v52, %v246_v3  ;;  %v11958_v3 = vld [vmem:[%s18609_s3 + $0x40] ss:$8 sps:$4 sm:$0xff]  }
  0xe5   :  { %1432 = vmatmul.mubr.bf16.gmra.mrb[36].mxu0 %v13377_v35  ;;  %1585 = vmatmul.mubr.bf16.gmra.mrb[36].mxu1 %v13377_v35 }
  0xe6   :  { %v317_v39 = vpop.permute.xlu0 %316 }
  0xe7   :  { %v319_v1 = vpop.permute.xlu1 %318  ;;  %v529_v7 = vsel %vm501_vm5, %v496_v12, %v317_v39  ;;  %v11986_v39 = vld [vmem:[%s18608_s1 + $0x140] ss:$36 sps:$4 sm:$0xff]  }
  0xe8   :  { %v531_v16 = vsel %vm501_vm5, %v498_v13, %v319_v1  ;;  %v11963_v1 = vld [vmem:[%s18609_s3 + $0x54] ss:$8 sps:$4 sm:$0xff]   ;;  %v11966_v12 = vld [vmem:[%s18609_s3 + $0x64] ss:$8 sps:$4 sm:$0xff]   ;;  %v11964_v13 = vld [vmem:[%s18609_s3 + $0x60] ss:$8 sps:$4 sm:$0xff]  }
  0xea   :  { %v406_v9 = vpop.permute.xlu0 %405 }
  0xeb   :  { %v408_v30 = vpop.permute.xlu1 %407  ;;  %v562_v17 = vsel %vm534_vm7, %v529_v7, %v406_v9  ;;  %v11961_v9 = vld [vmem:[%s18609_s3 + $0x50] ss:$8 sps:$4 sm:$0xff]  }
  0xec   :  { %v564_v19 = vsel %vm534_vm7, %v531_v16, %v408_v30  ;;  %v11990_v30 = vld [vmem:[%s18608_s1 + $0x188] ss:$36 sps:$4 sm:$0xff]   ;;  %v11994_v7 = vld [vmem:[%s18608_s1 + $0x1d0] ss:$36 sps:$4 sm:$0xff]  }
  0xed   :  { %v11969_v16 = vld [vmem:[%s18609_s3 + $0x74] ss:$8 sps:$4 sm:$0xff]  }
  0xee   :  { %v463_v18 = vpop.permute.xlu0 %462 }
  0xef   :  { %v465_v10 = vpop.permute.xlu1 %464  ;;  %v595_v22 = vsel %vm567_vm8, %v562_v17, %v463_v18  ;;  %v11967_v17 = vld [vmem:[%s18609_s3 + $0x70] ss:$8 sps:$4 sm:$0xff]  }
  0xf0   :  { %v597_v23 = vsel %vm567_vm8, %v564_v19, %v465_v10  ;;  %v13391_v25 = vcombine.low %v463_v18, %v465_v10  ;;  %v661_v36 = vunpack.c.h.b16 %v465_v10  ;;  %v11998_v18 = vld [vmem:[%s18608_s1 + $0x218] ss:$36 sps:$4 sm:$0xff]   ;;  %v11973_v19 = vld [vmem:[%s18609_s3 + $0x84] ss:$8 sps:$4 sm:$0xff]  }
  0xf1   :  { %v13393_v40 = vcombine.low %v595_v22, %v597_v23  ;;  %v660_v21 = vunpack.c.h.b16 %v597_v23  ;;  %v12002_v10 = vld [vmem:[%s18608_s1 + $0x260] ss:$36 sps:$4 sm:$0x3f]   ;;  %v11977_v23 = vld [vmem:[%s18609_s3 + $0x94] ss:$8 sps:$4 sm:$0xff]  }
  0xf2   :  { %10993 = vmatprep.mubr.msk.bf16.mxu0 %vm1244_vm4, %v13391_v25  ;;  %11006 = vmatprep.mubr.msk.bf16.mxu1 %vm1244_vm4, %v13391_v25  ;;  %v248_v52 = vpop.permute.xlu0 %247  ;;  %v11971_v22 = vld [vmem:[%s18609_s3 + $0x80] ss:$8 sps:$4 sm:$0xff]  }
  0xf3   :  { %v321_v26 = vpop.permute.xlu1 %320  ;;  %1442 = vmatmul.mubr.bf16.gmra.mrb[40].mxu0 %v13393_v40  ;;  %1595 = vmatmul.mubr.bf16.gmra.mrb[40].mxu1 %v13393_v40  ;;  %v500_v15 = vsel %vm468_vm6, %v13064_v0, %v248_v52  ;;  %v11946_v0 = vld [vmem:[%s18609_s3] ss:$8 sps:$4 sm:$0xff]   ;;  %v1307_v52 = vsel %vm411_vm0, %v12002_v10, 0 }
  0xf4   :  { %v533_v28 = vsel %vm501_vm5, %v500_v15, %v321_v26  ;;  %v11975_v26 = vld [vmem:[%s18609_s3 + $0x90] ss:$8 sps:$4 sm:$0xff]   ;;  %v11981_v15 = vld [vmem:[%s18609_s3 + $0xa4] ss:$8 sps:$4 sm:$0xff]  }
  0xf6   :  { %v410_v31 = vpop.permute.xlu0 %409 }
  0xf7   :  { %v467_v32 = vpop.permute.xlu1 %466  ;;  %v566_v50 = vsel %vm534_vm7, %v533_v28, %v410_v31  ;;  %v11979_v28 = vld [vmem:[%s18609_s3 + $0xa0] ss:$8 sps:$4 sm:$0xff]   ;;  %v11985_v31 = vld [vmem:[%s18609_s3 + $0xb4] ss:$8 sps:$4 sm:$0xff]  }
  0xf8   :  { %v663_v37 = vunpack.c.l.b16 %v467_v32  ;;  %v599_v38 = vsel %vm567_vm8, %v566_v50, %v467_v32  ;;  %v11983_v32 = vld [vmem:[%s18609_s3 + $0xb0] ss:$8 sps:$4 sm:$0xff]   ;;  %v11989_v50 = vld [vmem:[%s18609_s3 + $0xc4] ss:$8 sps:$4 sm:$0xff]  }
  0xf9   :  { %v662_v41 = vunpack.c.l.b16 %v599_v38  ;;  %v11991_v38 = vld [vmem:[%s18609_s3 + $0xd0] ss:$8 sps:$4 sm:$0xff]  }
  0xfa   :  { %v13406_v44 = vpack.c.b16 %v663_v37, %v661_v36  ;;  %v11987_v36 = vld [vmem:[%s18609_s3 + $0xc0] ss:$8 sps:$4 sm:$0xff]   ;;  %v11993_v37 = vld [vmem:[%s18609_s3 + $0xd4] ss:$8 sps:$4 sm:$0xff]  }
  0xfb   :  { %v13408_v42 = vpack.c.b16 %v662_v41, %v660_v21  ;;  %v11997_v21 = vld [vmem:[%s18609_s3 + $0xe4] ss:$8 sps:$4 sm:$0xff]   ;;  %v11995_v41 = vld [vmem:[%s18609_s3 + $0xe0] ss:$8 sps:$4 sm:$0xff]  }
  0xfc   :  { %10994 = vmatprep.mubr.msk.bf16.mxu0 %vm1244_vm4, %v13406_v44  ;;  %11007 = vmatprep.mubr.msk.bf16.mxu1 %vm1244_vm4, %v13406_v44 }
  0xfd   :  { %1452 = vmatmul.mubr.bf16.gmra.mrb[44].mxu0 %v13408_v42  ;;  %1605 = vmatmul.mubr.bf16.gmra.mrb[44].mxu1 %v13408_v42 }
  0xfe   :  { %11009 = vmatprep.mubr.msk.bf16.mxu0 %vm1244_vm4, %v13095_v43  ;;  %11022 = vmatprep.mubr.msk.bf16.mxu1 %vm1244_vm4, %v13095_v43 }
 0x105   :  { %1648 = vmatmul.mubr.bf16.vlgmr.msra.gmra.mrb[48].mxu0 %v13126_v60  ;;  %1801 = vmatmul.mubr.bf16.vlgmr.msra.gmra.mrb[48].mxu1 %v13126_v60 }
 0x106   :  { %11010 = vmatprep.mubr.msk.bf16.mxu0 %vm1244_vm4, %v13164_v24  ;;  %11023 = vmatprep.mubr.msk.bf16.mxu1 %vm1244_vm4, %v13164_v24 }
 0x107   :  { %3239 = vmatpush1.bf16.msra.mxu1 %v11946_v0  ;;  %1922 = vmatpush1.bf16.msra.mxu0 %v11970_v29  ;;  %v12001_v0 = vld [vmem:[%s18609_s3 + $0xf4] ss:$8 sps:$4 sm:$0xff]   ;;  %v11999_v29 = vld [vmem:[%s18609_s3 + $0xf0] ss:$8 sps:$4 sm:$0xff]  }
 0x108   :  { %3240 = vmatprep.subr.bf16.mxu1 %v11951_v46  ;;  %1923 = vmatprep.subr.bf16.mxu0 %v18623_v8  ;;  %v12005_v46 = vld [vmem:[%s18609_s3 + $0x104] ss:$8 sps:$4 sm:$0xff]  }
 0x10b   :  { %3241 = vmatpush1.bf16.msra.mxu1 %v11949_v47  ;;  %1924 = vmatpush1.bf16.msra.mxu0 %v11974_v49  ;;  %v758_v47 = vlaneseq }
 0x10c   :  { %3242 = vmatprep.subr.bf16.mxu1 %v11954_v48  ;;  %1925 = vmatprep.subr.bf16.mxu0 %v18623_v8 }
 0x10d   :  { %1658 = vmatmul.mubr.bf16.gmra.mrb[52].mxu0 %v13172_v27  ;;  %1811 = vmatmul.mubr.bf16.gmra.mrb[52].mxu1 %v13172_v27  ;;  %v13613_v49 = vshrl.u32 %v758_v47, 7  ;;  %v12008_v47 = vld [vmem:[%s18609_s3 + $0x114] ss:$8 sps:$4 sm:$0xff]  }
 0x10e   :  { %11011 = vmatprep.mubr.msk.bf16.mxu0 %vm1244_vm4, %v13203_v53  ;;  %11024 = vmatprep.mubr.msk.bf16.mxu1 %vm1244_vm4, %v13203_v53 }
 0x10f   :  { %3243 = vmatpush1.bf16.msra.mxu1 %v11952_v55  ;;  %1926 = vmatpush1.bf16.msra.mxu0 %v11978_v58  ;;  %18776 = vst [vmem:[#allocation2_spill] sm:$0xff] %v13613_v49  ;;  %v13616_v48 = vsub.s32 0, %v13613_v49  ;;  %v768_v55 = vsub.s32 2, %v13613_v49  ;;  %v13622_v58 = vld [vmem:[%s18610_s2] sm:$0xff] }
 0x110   :  { %3244 = vmatprep.subr.bf16.mxu1 %v11957_v56  ;;  %1927 = vmatprep.subr.bf16.mxu0 %v18623_v8  ;;  %v772_v56 = vsub.s32 3, %v13613_v49 }
 0x111   :  { %18777 = vst [vmem:[#allocation3_spill] sm:$0xff] %v13616_v48 }
 0x113   :  { %3245 = vmatpush1.bf16.msra.mxu1 %v11955_v59  ;;  %1928 = vmatpush1.bf16.msra.mxu0 %v11982_v61  ;;  %v13626_v59 = vsub.s32 1, %v13613_v49  ;;  %v13636_v61 = vrot.slane %v13622_v58, %v13616_v48 }
 0x114   :  { %3246 = vmatprep.subr.bf16.mxu1 %v11960_v63  ;;  %1929 = vmatprep.subr.bf16.mxu0 %v18623_v8  ;;  %v13639_v63 = vrot.slane %v13622_v58, %v768_v55 }
 0x115   :  { %1668 = vmatmul.mubr.bf16.gmra.mrb[56].mxu0 %v13211_v4  ;;  %1821 = vmatmul.mubr.bf16.gmra.mrb[56].mxu1 %v13211_v4  ;;  %18778 = vst [vmem:[#allocation4_spill] sm:$0xff] %v13626_v59 }
 0x116   :  { %11012 = vmatprep.mubr.msk.bf16.mxu0 %vm1244_vm4, %v13233_v5  ;;  %11025 = vmatprep.mubr.msk.bf16.mxu1 %vm1244_vm4, %v13233_v5 }
 0x117   :  { %3247 = vmatpush1.bf16.msra.mxu1 %v11958_v3  ;;  %1930 = vmatpush1.bf16.msra.mxu0 %v11986_v39  ;;  %v13642_v3 = vrot.slane %v13622_v58, %v772_v56  ;;  %v13646_v39 = vrot.slane %v13622_v58, %v13626_v59 }
 0x118   :  { %3248 = vmatprep.subr.bf16.mxu1 %v11963_v1  ;;  %1931 = vmatprep.subr.bf16.mxu0 %v18623_v8 }
 0x11b   :  { %3249 = vmatpush1.bf16.msra.mxu1 %v11961_v9  ;;  %1932 = vmatpush1.bf16.msra.mxu0 %v11990_v30 }
 0x11c   :  { %3250 = vmatprep.subr.bf16.mxu1 %v11966_v12  ;;  %1933 = vmatprep.subr.bf16.mxu0 %v18623_v8 }
 0x11d   :  { %1678 = vmatmul.mubr.bf16.gmra.mrb[60].mxu0 %v13267_v20  ;;  %1831 = vmatmul.mubr.bf16.gmra.mrb[60].mxu1 %v13267_v20 }
 0x11e   :  { %11013 = vmatprep.mubr.msk.bf16.mxu0 %vm1244_vm4, %v13288_v45  ;;  %11026 = vmatprep.mubr.msk.bf16.mxu1 %vm1244_vm4, %v13288_v45 }
 0x11f   :  { %3251 = vmatpush1.bf16.msra.mxu1 %v11964_v13  ;;  %1934 = vmatpush1.bf16.msra.mxu0 %v11994_v7 }
 0x120   :  { %3252 = vmatprep.subr.bf16.mxu1 %v11969_v16  ;;  %1935 = vmatprep.subr.bf16.mxu0 %v18623_v8 }
 0x123   :  { %3253 = vmatpush1.bf16.msra.mxu1 %v11967_v17  ;;  %1936 = vmatpush1.bf16.msra.mxu0 %v11998_v18 }
 0x124   :  { %3254 = vmatprep.subr.bf16.mxu1 %v11973_v19  ;;  %1937 = vmatprep.subr.bf16.mxu0 %v18623_v8 }
 0x125   :  { %1688 = vmatmul.mubr.bf16.gmra.mrb[64].mxu0 %v13290_v11  ;;  %1841 = vmatmul.mubr.bf16.gmra.mrb[64].mxu1 %v13290_v11 }
 0x126   :  { %11014 = vmatprep.mubr.msk.bf16.mxu0 %vm1244_vm4, %v13303_v62  ;;  %11027 = vmatprep.mubr.msk.bf16.mxu1 %vm1244_vm4, %v13303_v62 }
 0x127   :  { %3255 = vmatpush1.bf16.msra.mxu1 %v11971_v22  ;;  %1938 = vmatpush1.bf16.msra.mxu0 %v1307_v52 }
 0x128   :  { %3256 = vmatprep.subr.bf16.mxu1 %v11977_v23  ;;  %4998 = vmatprep.subr.bf16.mxu0 %v18623_v8 }
 0x12b   :  { %3257 = vmatpush1.bf16.msra.mxu1 %v11975_v26 }
 0x12c   :  { %3258 = vmatprep.subr.bf16.mxu1 %v11981_v15 }
 0x12d   :  { %1698 = vmatmul.mubr.bf16.gmra.mrb[68].mxu0 %v13305_v2  ;;  %1851 = vmatmul.mubr.bf16.gmra.mrb[68].mxu1 %v13305_v2 }
 0x12e   :  { %11015 = vmatprep.mubr.msk.bf16.mxu0 %vm1244_vm4, %v13315_v6  ;;  %11028 = vmatprep.mubr.msk.bf16.mxu1 %vm1244_vm4, %v13315_v6 }
 0x12f   :  { %3259 = vmatpush1.bf16.msra.mxu1 %v11979_v28 }
 0x130   :  { %3260 = vmatprep.subr.bf16.mxu1 %v11985_v31 }
 0x133   :  { %3261 = vmatpush1.bf16.msra.mxu1 %v11983_v32 }
 0x134   :  { %3262 = vmatprep.subr.bf16.mxu1 %v11989_v50 }
 0x135   :  { %1708 = vmatmul.mubr.bf16.gmra.mrb[72].mxu0 %v13326_v14  ;;  %1861 = vmatmul.mubr.bf16.gmra.mrb[72].mxu1 %v13326_v14 }
 0x136   :  { %11016 = vmatprep.mubr.msk.bf16.mxu0 %vm1244_vm4, %v13340_v34  ;;  %11029 = vmatprep.mubr.msk.bf16.mxu1 %vm1244_vm4, %v13340_v34 }
 0x137   :  { %3263 = vmatpush1.bf16.msra.mxu1 %v11987_v36 }
 0x138   :  { %3264 = vmatprep.subr.bf16.mxu1 %v11993_v37 }
 0x13b   :  { %3265 = vmatpush1.bf16.msra.mxu1 %v11991_v38 }
 0x13c   :  { %3266 = vmatprep.subr.bf16.mxu1 %v11997_v21 }
 0x13d   :  { %1718 = vmatmul.mubr.bf16.gmra.mrb[76].mxu0 %v13342_v33  ;;  %1871 = vmatmul.mubr.bf16.gmra.mrb[76].mxu1 %v13342_v33 }
 0x13e   :  { %11017 = vmatprep.mubr.msk.bf16.mxu0 %vm1244_vm4, %v13355_v51  ;;  %11030 = vmatprep.mubr.msk.bf16.mxu1 %vm1244_vm4, %v13355_v51 }
 0x13f   :  { %3267 = vmatpush1.bf16.msra.mxu1 %v11995_v41 }
 0x140   :  { %3268 = vmatprep.subr.bf16.mxu1 %v12001_v0 }
 0x143   :  { %3269 = vmatpush1.bf16.msra.mxu1 %v11999_v29 }
 0x144   :  { %3391 = vmatprep.subr.bf16.mxu1 %v12005_v46 }
 0x145   :  { %1728 = vmatmul.mubr.bf16.gmra.mrb[80].mxu0 %v13357_v54  ;;  %1881 = vmatmul.mubr.bf16.gmra.mrb[80].mxu1 %v13357_v54 }
 0x146   :  { %11018 = vmatprep.mubr.msk.bf16.mxu0 %vm1244_vm4, %v13367_v57  ;;  %11031 = vmatprep.mubr.msk.bf16.mxu1 %vm1244_vm4, %v13367_v57 }
 0x14d   :  { %1738 = vmatmul.mubr.bf16.gmra.mrb[84].mxu0 %v13377_v35  ;;  %1891 = vmatmul.mubr.bf16.gmra.mrb[84].mxu1 %v13377_v35 }
 0x14e   :  { %11019 = vmatprep.mubr.msk.bf16.mxu0 %vm1244_vm4, %v13391_v25  ;;  %11032 = vmatprep.mubr.msk.bf16.mxu1 %vm1244_vm4, %v13391_v25 }
 0x155   :  { %1748 = vmatmul.mubr.bf16.gmra.mrb[88].mxu0 %v13393_v40  ;;  %1901 = vmatmul.mubr.bf16.gmra.mrb[88].mxu1 %v13393_v40 }
 0x156   :  { %11020 = vmatprep.mubr.msk.bf16.mxu0 %vm1244_vm4, %v13406_v44  ;;  %11033 = vmatprep.mubr.msk.bf16.mxu1 %vm1244_vm4, %v13406_v44 }
 0x15a   :  { %v1343_v1 = vpop.f32.mrb[0].mxu0  ;;  %v1496_v9 = vpop.f32.mrb[0].mxu1 }
 0x15b   :  { %v1344_v30 = vadd.f32 %v1343_v1, %v13636_v61  ;;  %v1497_v12 = vadd.f32 %v1496_v9, %v13639_v63  ;;  %v1345_v13 = vpop.f32.mrb[1].mxu0  ;;  %v1498_v7 = vpop.f32.mrb[1].mxu1  ;;  %v12006_v1 = vld [vmem:[%s18609_s3 + $0x110] ss:$8 sps:$4 sm:$0xff]  }
 0x15c   :  { %v1499_v16 = vadd.f32 %v1498_v7, %v13642_v3  ;;  %v1347_v17 = vpop.f32.mrb[2].mxu0  ;;  %v1500_v18 = vpop.f32.mrb[2].mxu1  ;;  %v1346_v19 = vadd.f32 %v1345_v13, %v13646_v39 }
 0x15d   :  { %v1348_v10 = vadd.f32 %v1347_v17, %v13636_v61  ;;  %v1501_v22 = vadd.f32 %v1500_v18, %v13639_v63  ;;  %v1349_v23 = vpop.f32.mrb[3].mxu0  ;;  %v1502_v52 = vpop.f32.mrb[3].mxu1  ;;  %1758 = vmatmul.mubr.bf16.gmra.mrb[92].mxu0 %v13408_v42  ;;  %1911 = vmatmul.mubr.bf16.gmra.mrb[92].mxu1 %v13408_v42  ;;  %v2050_v28 = vmax.f32 %v1344_v30, 0.0  ;;  %v2052_v31 = vmax.f32 %v1497_v12, 0.0 }
 0x15e   :  { %v1503_v26 = vadd.f32 %v1502_v52, %v13642_v3  ;;  %11034 = vmatprep.mubr.msk.bf16.mxu0 %vm1244_vm4, %v13095_v43  ;;  %v1350_v15 = vadd.f32 %v1349_v23, %v13646_v39  ;;  %v2053_v36 = vmax.f32 %v1499_v16, 0.0  ;;  %v2051_v38 = vmax.f32 %v1346_v19, 0.0  ;;  %v12003_v43 = vld [vmem:[%s18609_s3 + $0x100] ss:$8 sps:$4 sm:$0xff]  }
 0x15f   :  { %v2059_v32 = vmax.f32 %v1348_v10, 0.0  ;;  %v2061_v50 = vmax.f32 %v1501_v22, 0.0 }
 0x160   :  { %v2062_v37 = vmax.f32 %v1503_v26, 0.0  ;;  %v2060_v21 = vmax.f32 %v1350_v15, 0.0  ;;  %v12009_v26 = vld [vmem:[%s18609_s3 + $0x120] ss:$8 sps:$4 sm:$0xff]  }
 0x161   :  { %v2266_v41 = vpack.c.bf16 %v2059_v32, %v2050_v28  ;;  %v13660_v0 = vpack.c.bf16 %v2061_v50, %v2052_v31  ;;  %v12014_v50 = vld [vmem:[%s18609_s3 + $0x134] ss:$8 sps:$4 sm:$0xff]  }
 0x162   :  { %v13662_v29 = vpack.c.bf16 %v2062_v37, %v2053_v36  ;;  %v2267_v46 = vpack.c.bf16 %v2060_v21, %v2051_v38 }
 0x164   :  { %3270 = vmatprep.mubr.bf16.mxu1 %v2267_v46 }
 0x165   :  { %1954 = vmatmul.mubr.bf16.vlgmr.msra.gmra.mrb[96].mxu0 %v13126_v60  ;;  %3271 = vmatmul.mubr.bf16.vlgmr.msra.gmra.mrb[96].mxu1 %v2266_v41  ;;  %v12011_v60 = vld [vmem:[%s18609_s3 + $0x124] ss:$8 sps:$4 sm:$0xff]  }
 0x166   :  { %v1353_v55 = vpop.f32.mrb[4].mxu0  ;;  %v1506_v56 = vpop.f32.mrb[4].mxu1  ;;  %11035 = vmatprep.mubr.msk.bf16.mxu0 %vm1244_vm4, %v13164_v24  ;;  %3392 = vmatpush1.bf16.msra.mxu1 %v12003_v43 }
 0x167   :  { %v1507_v9 = vadd.f32 %v1506_v56, %v13639_v63  ;;  %v1355_v30 = vpop.f32.mrb[5].mxu0  ;;  %v1508_v12 = vpop.f32.mrb[5].mxu1  ;;  %v1354_v13 = vadd.f32 %v1353_v55, %v13636_v61  ;;  %3393 = vmatprep.subr.bf16.mxu1 %v12008_v47  ;;  %v12012_v55 = vld [vmem:[%s18609_s3 + $0x130] ss:$8 sps:$4 sm:$0xff]   ;;  %v12017_v56 = vld [vmem:[%s18609_s3 + $0x144] ss:$8 sps:$4 sm:$0xff]  }
 0x168   :  { %v1509_v7 = vadd.f32 %v1508_v12, %v13642_v3  ;;  %v1357_v16 = vpop.f32.mrb[6].mxu0  ;;  %v1510_v24 = vpop.f32.mrb[6].mxu1  ;;  %v1356_v17 = vadd.f32 %v1355_v30, %v13646_v39 }
 0x169   :  { %v1511_v18 = vadd.f32 %v1510_v24, %v13639_v63  ;;  %v1359_v19 = vpop.f32.mrb[7].mxu0  ;;  %v1512_v10 = vpop.f32.mrb[7].mxu1  ;;  %v1358_v22 = vadd.f32 %v1357_v16, %v13636_v61  ;;  %v2070_v15 = vmax.f32 %v1507_v9, 0.0  ;;  %v2068_v31 = vmax.f32 %v1354_v13, 0.0  ;;  %v12015_v24 = vld [vmem:[%s18609_s3 + $0x140] ss:$8 sps:$4 sm:$0xff]  }
 0x16a   :  { %v1513_v23 = vadd.f32 %v1512_v10, %v13642_v3  ;;  %v1360_v52 = vadd.f32 %v1359_v19, %v13646_v39  ;;  %3394 = vmatpush1.bf16.msra.mxu1 %v12006_v1  ;;  %v2071_v36 = vmax.f32 %v1509_v7, 0.0  ;;  %v2069_v38 = vmax.f32 %v1356_v17, 0.0 }
 0x16b   :  { %v2079_v28 = vmax.f32 %v1511_v18, 0.0  ;;  %v2077_v32 = vmax.f32 %v1358_v22, 0.0  ;;  %3395 = vmatprep.subr.bf16.mxu1 %v12011_v60  ;;  %v12020_v22 = vld [vmem:[%s18609_s3 + $0x154] ss:$8 sps:$4 sm:$0xff]  }
 0x16c   :  { %v2080_v37 = vmax.f32 %v1513_v23, 0.0  ;;  %v2078_v21 = vmax.f32 %v1360_v52, 0.0 }
 0x16d   :  { %v13693_v41 = vpack.c.bf16 %v2079_v28, %v2070_v15  ;;  %1962 = vmatmul.mubr.bf16.gmra.mrb[100].mxu0 %v13172_v27  ;;  %v2275_v46 = vpack.c.bf16 %v2077_v32, %v2068_v31 }
 0x16e   :  { %v13696_v43 = vpack.c.bf16 %v2080_v37, %v2071_v36  ;;  %11036 = vmatprep.mubr.msk.bf16.mxu0 %vm1244_vm4, %v13203_v53  ;;  %v2276_v47 = vpack.c.bf16 %v2078_v21, %v2069_v38  ;;  %3396 = vmatpush1.bf16.msra.mxu1 %v12009_v26  ;;  %v12018_v38 = vld [vmem:[%s18609_s3 + $0x150] ss:$8 sps:$4 sm:$0xff]  }
 0x16f   :  { %3397 = vmatprep.subr.bf16.mxu1 %v12014_v50 }
 0x170   :  { %3280 = vmatprep.mubr.bf16.mxu1 %v2276_v47  ;;  %v1363_v1 = vpop.f32.mrb[8].mxu0  ;;  %v1516_v27 = vpop.f32.mrb[8].mxu1 }
 0x171   :  { %v1364_v9 = vadd.f32 %v1363_v1, %v13636_v61  ;;  %v1517_v30 = vadd.f32 %v1516_v27, %v13639_v63  ;;  %3281 = vmatmul.mubr.bf16.gmra.mrb[100].mxu1 %v2275_v46  ;;  %v1365_v53 = vpop.f32.mrb[9].mxu0  ;;  %v1518_v12 = vpop.f32.mrb[9].mxu1 }
 0x172   :  { %v1366_v13 = vadd.f32 %v1365_v53, %v13646_v39  ;;  %v1519_v60 = vadd.f32 %v1518_v12, %v13642_v3  ;;  %v1367_v7 = vpop.f32.mrb[10].mxu0  ;;  %v1520_v16 = vpop.f32.mrb[10].mxu1  ;;  %3398 = vmatpush1.bf16.msra.mxu1 %v12012_v55 }
 0x173   :  { %v1368_v17 = vadd.f32 %v1367_v7, %v13636_v61  ;;  %v1521_v18 = vadd.f32 %v1520_v16, %v13639_v63  ;;  %v1369_v19 = vpop.f32.mrb[11].mxu0  ;;  %v1522_v10 = vpop.f32.mrb[11].mxu1  ;;  %3399 = vmatprep.subr.bf16.mxu1 %v12017_v56  ;;  %v2086_v26 = vmax.f32 %v1364_v9, 0.0  ;;  %v2088_v15 = vmax.f32 %v1517_v30, 0.0  ;;  %v12021_v7 = vld [vmem:[%s18609_s3 + $0x160] ss:$8 sps:$4 sm:$0xff]  }
 0x174   :  { %v1370_v23 = vadd.f32 %v1369_v19, %v13646_v39  ;;  %v1523_v52 = vadd.f32 %v1522_v10, %v13642_v3  ;;  %v2087_v32 = vmax.f32 %v1366_v13, 0.0  ;;  %v2089_v50 = vmax.f32 %v1519_v60, 0.0  ;;  %v12026_v19 = vld [vmem:[%s18609_s3 + $0x174] ss:$8 sps:$4 sm:$0xff]  }
 0x175   :  { %v2095_v28 = vmax.f32 %v1368_v17, 0.0  ;;  %v2097_v31 = vmax.f32 %v1521_v18, 0.0  ;;  %1970 = vmatmul.mubr.bf16.gmra.mrb[104].mxu0 %v13211_v4  ;;  %v12023_v4 = vld [vmem:[%s18609_s3 + $0x164] ss:$8 sps:$4 sm:$0xff]  }
 0x176   :  { %v2096_v36 = vmax.f32 %v1370_v23, 0.0  ;;  %v2098_v37 = vmax.f32 %v1523_v52, 0.0  ;;  %11037 = vmatprep.mubr.msk.bf16.mxu0 %vm1244_vm4, %v13233_v5  ;;  %3400 = vmatpush1.bf16.msra.mxu1 %v12015_v24 }
 0x177   :  { %v13726_v21 = vpack.c.bf16 %v2097_v31, %v2088_v15  ;;  %v2284_v46 = vpack.c.bf16 %v2095_v28, %v2086_v26  ;;  %3401 = vmatprep.subr.bf16.mxu1 %v12020_v22 }
 0x178   :  { %v13731_v47 = vpack.c.bf16 %v2098_v37, %v2089_v50  ;;  %v1373_v55 = vpop.f32.mrb[12].mxu0  ;;  %v1526_v56 = vpop.f32.mrb[12].mxu1  ;;  %v2285_v1 = vpack.c.bf16 %v2096_v36, %v2087_v32  ;;  %v12024_v36 = vld [vmem:[%s18609_s3 + $0x170] ss:$8 sps:$4 sm:$0xff]  }
 0x179   :  { %v1374_v5 = vadd.f32 %v1373_v55, %v13636_v61  ;;  %v1527_v27 = vadd.f32 %v1526_v56, %v13639_v63  ;;  %v1375_v9 = vpop.f32.mrb[13].mxu0  ;;  %v1528_v30 = vpop.f32.mrb[13].mxu1  ;;  %v12032_v55 = vld [vmem:[%s18609_s3 + $0x194] ss:$8 sps:$4 sm:$0xff]  }
 0x17a   :  { %v1376_v53 = vadd.f32 %v1375_v9, %v13646_v39  ;;  %v1529_v12 = vadd.f32 %v1528_v30, %v13642_v3  ;;  %v1377_v13 = vpop.f32.mrb[14].mxu0  ;;  %v1530_v60 = vpop.f32.mrb[14].mxu1  ;;  %3290 = vmatprep.mubr.bf16.mxu1 %v2285_v1  ;;  %3402 = vmatpush1.bf16.msra.mxu1 %v12018_v38 }
 0x17b   :  { %v1378_v16 = vadd.f32 %v1377_v13, %v13636_v61  ;;  %v1531_v24 = vadd.f32 %v1530_v60, %v13639_v63  ;;  %v1379_v17 = vpop.f32.mrb[15].mxu0  ;;  %v1532_v18 = vpop.f32.mrb[15].mxu1  ;;  %3291 = vmatmul.mubr.bf16.gmra.mrb[104].mxu1 %v2284_v46  ;;  %3403 = vmatprep.subr.bf16.mxu1 %v12023_v4  ;;  %v2104_v23 = vmax.f32 %v1374_v5, 0.0  ;;  %v2106_v52 = vmax.f32 %v1527_v27, 0.0  ;;  %v12030_v5 = vld [vmem:[%s18609_s3 + $0x190] ss:$8 sps:$4 sm:$0xff]  }
 0x17c   :  { %v1380_v10 = vadd.f32 %v1379_v17, %v13646_v39  ;;  %v1533_v22 = vadd.f32 %v1532_v18, %v13642_v3  ;;  %v2105_v28 = vmax.f32 %v1376_v53, 0.0  ;;  %v2107_v31 = vmax.f32 %v1529_v12, 0.0 }
 0x17d   :  { %v2113_v26 = vmax.f32 %v1378_v16, 0.0  ;;  %v2115_v15 = vmax.f32 %v1531_v24, 0.0  ;;  %1978 = vmatmul.mubr.bf16.gmra.mrb[108].mxu0 %v13267_v20  ;;  %v12029_v20 = vld [vmem:[%s18609_s3 + $0x184] ss:$8 sps:$4 sm:$0xff]  }
 0x17e   :  { %v2114_v32 = vmax.f32 %v1380_v10, 0.0  ;;  %v2116_v50 = vmax.f32 %v1533_v22, 0.0  ;;  %11038 = vmatprep.mubr.msk.bf16.mxu0 %vm1244_vm4, %v13288_v45  ;;  %3404 = vmatpush1.bf16.msra.mxu1 %v12021_v7  ;;  %v12027_v45 = vld [vmem:[%s18609_s3 + $0x180] ss:$8 sps:$4 sm:$0xff]  }
 0x17f   :  { %v13753_v37 = vpack.c.bf16 %v2115_v15, %v2106_v52  ;;  %v2293_v38 = vpack.c.bf16 %v2113_v26, %v2104_v23  ;;  %3405 = vmatprep.subr.bf16.mxu1 %v12026_v19  ;;  %v12033_v10 = vld [vmem:[%s18609_s3 + $0x1a0] ss:$8 sps:$4 sm:$0xff]   ;;  %v12038_v15 = vld [vmem:[%s18609_s3 + $0x1b4] ss:$8 sps:$4 sm:$0xff]  }
 0x180   :  { %v13758_v46 = vpack.c.bf16 %v2116_v50, %v2107_v31  ;;  %v2294_v4 = vpack.c.bf16 %v2114_v32, %v2105_v28 }
 0x182   :  { %3300 = vmatprep.mubr.bf16.mxu1 %v2294_v4  ;;  %3406 = vmatpush1.bf16.msra.mxu1 %v12024_v36 }
 0x183   :  { %3301 = vmatmul.mubr.bf16.gmra.mrb[108].mxu1 %v2293_v38  ;;  %3407 = vmatprep.subr.bf16.mxu1 %v12029_v20 }
 0x185   :  { %1986 = vmatmul.mubr.bf16.gmra.mrb[112].mxu0 %v13290_v11  ;;  %v12035_v11 = vld [vmem:[%s18609_s3 + $0x1a4] ss:$8 sps:$4 sm:$0xff]  }
 0x186   :  { %v1383_v56 = vpop.f32.mrb[16].mxu0  ;;  %v1536_v1 = vpop.f32.mrb[16].mxu1  ;;  %11039 = vmatprep.mubr.msk.bf16.mxu0 %vm1244_vm4, %v13303_v62  ;;  %3408 = vmatpush1.bf16.msra.mxu1 %v12027_v45  ;;  %v12036_v45 = vld [vmem:[%s18609_s3 + $0x1b0] ss:$8 sps:$4 sm:$0xff]  }
 0x187   :  { %v1384_v27 = vadd.f32 %v1383_v56, %v13636_v61  ;;  %v1537_v9 = vadd.f32 %v1536_v1, %v13639_v63  ;;  %v1385_v30 = vpop.f32.mrb[17].mxu0  ;;  %v1538_v53 = vpop.f32.mrb[17].mxu1  ;;  %3409 = vmatprep.subr.bf16.mxu1 %v12032_v55  ;;  %v12041_v55 = vld [vmem:[%s18609_s3 + $0x1c4] ss:$8 sps:$4 sm:$0xff]  }
 0x188   :  { %v1386_v12 = vadd.f32 %v1385_v30, %v13646_v39  ;;  %v1539_v62 = vadd.f32 %v1538_v53, %v13642_v3  ;;  %v1387_v13 = vpop.f32.mrb[18].mxu0  ;;  %v1540_v60 = vpop.f32.mrb[18].mxu1 }
 0x189   :  { %v1388_v7 = vadd.f32 %v1387_v13, %v13636_v61  ;;  %v1541_v16 = vadd.f32 %v1540_v60, %v13639_v63  ;;  %v1389_v24 = vpop.f32.mrb[19].mxu0  ;;  %v1542_v17 = vpop.f32.mrb[19].mxu1  ;;  %v2122_v22 = vmax.f32 %v1384_v27, 0.0  ;;  %v2124_v23 = vmax.f32 %v1537_v9, 0.0 }
 0x18a   :  { %v1390_v18 = vadd.f32 %v1389_v24, %v13646_v39  ;;  %v1543_v19 = vadd.f32 %v1542_v17, %v13642_v3  ;;  %3410 = vmatpush1.bf16.msra.mxu1 %v12030_v5  ;;  %v2123_v28 = vmax.f32 %v1386_v12, 0.0  ;;  %v2125_v31 = vmax.f32 %v1539_v62, 0.0  ;;  %v12039_v12 = vld [vmem:[%s18609_s3 + $0x1c0] ss:$8 sps:$4 sm:$0xff]  }
 0x18b   :  { %v2131_v52 = vmax.f32 %v1388_v7, 0.0  ;;  %v2133_v26 = vmax.f32 %v1541_v16, 0.0  ;;  %3411 = vmatprep.subr.bf16.mxu1 %v12035_v11  ;;  %v12044_v16 = vld [vmem:[%s18609_s3 + $0x1d4] ss:$8 sps:$4 sm:$0xff]  }
 0x18c   :  { %v2132_v32 = vmax.f32 %v1390_v18, 0.0  ;;  %v2134_v50 = vmax.f32 %v1543_v19, 0.0 }
 0x18d   :  { %v13789_v36 = vpack.c.bf16 %v2133_v26, %v2124_v23  ;;  %1994 = vmatmul.mubr.bf16.gmra.mrb[116].mxu0 %v13305_v2  ;;  %v2302_v38 = vpack.c.bf16 %v2131_v52, %v2122_v22 }
 0x18e   :  { %v13792_v20 = vpack.c.bf16 %v2134_v50, %v2125_v31  ;;  %11040 = vmatprep.mubr.msk.bf16.mxu0 %vm1244_vm4, %v13315_v6  ;;  %v2303_v4 = vpack.c.bf16 %v2132_v32, %v2123_v28  ;;  %3412 = vmatpush1.bf16.msra.mxu1 %v12033_v10  ;;  %v12042_v28 = vld [vmem:[%s18609_s3 + $0x1d0] ss:$8 sps:$4 sm:$0xff]  }
 0x18f   :  { %3413 = vmatprep.subr.bf16.mxu1 %v12038_v15 }
 0x190   :  { %3310 = vmatprep.mubr.bf16.mxu1 %v2303_v4  ;;  %v1393_v56 = vpop.f32.mrb[20].mxu0  ;;  %v1546_v2 = vpop.f32.mrb[20].mxu1 }
 0x191   :  { %v1394_v1 = vadd.f32 %v1393_v56, %v13636_v61  ;;  %v1547_v5 = vadd.f32 %v1546_v2, %v13639_v63  ;;  %3311 = vmatmul.mubr.bf16.gmra.mrb[112].mxu1 %v2302_v38  ;;  %v1395_v6 = vpop.f32.mrb[21].mxu0  ;;  %v1548_v27 = vpop.f32.mrb[21].mxu1 }
 0x192   :  { %v1396_v9 = vadd.f32 %v1395_v6, %v13646_v39  ;;  %v1549_v30 = vadd.f32 %v1548_v27, %v13642_v3  ;;  %v1397_v53 = vpop.f32.mrb[22].mxu0  ;;  %v1550_v11 = vpop.f32.mrb[22].mxu1  ;;  %3414 = vmatpush1.bf16.msra.mxu1 %v12036_v45 }
 0x193   :  { %v1398_v62 = vadd.f32 %v1397_v53, %v13636_v61  ;;  %v1551_v13 = vadd.f32 %v1550_v11, %v13639_v63  ;;  %v1399_v60 = vpop.f32.mrb[23].mxu0  ;;  %v1552_v7 = vpop.f32.mrb[23].mxu1  ;;  %3415 = vmatprep.subr.bf16.mxu1 %v12041_v55  ;;  %v2140_v18 = vmax.f32 %v1394_v1, 0.0  ;;  %v2142_v19 = vmax.f32 %v1547_v5, 0.0 }
 0x194   :  { %v1400_v24 = vadd.f32 %v1399_v60, %v13646_v39  ;;  %v1553_v17 = vadd.f32 %v1552_v7, %v13642_v3  ;;  %v2141_v23 = vmax.f32 %v1396_v9, 0.0  ;;  %v2143_v52 = vmax.f32 %v1549_v30, 0.0  ;;  %v12045_v9 = vld [vmem:[%s18609_s3 + $0x1e0] ss:$8 sps:$4 sm:$0xff]  }
 0x195   :  { %v2149_v10 = vmax.f32 %v1398_v62, 0.0  ;;  %v2151_v22 = vmax.f32 %v1551_v13, 0.0  ;;  %2002 = vmatmul.mubr.bf16.gmra.mrb[120].mxu0 %v13326_v14  ;;  %v12047_v14 = vld [vmem:[%s18609_s3 + $0x1e4] ss:$8 sps:$4 sm:$0xff]   ;;  %v12050_v62 = vld [vmem:[%s18609_s3 + $0x1f4] ss:$8 sps:$4 sm:$0xff]  }
 0x196   :  { %v2150_v26 = vmax.f32 %v1400_v24, 0.0  ;;  %v2152_v15 = vmax.f32 %v1553_v17, 0.0  ;;  %11041 = vmatprep.mubr.msk.bf16.mxu0 %vm1244_vm4, %v13340_v34  ;;  %3416 = vmatpush1.bf16.msra.mxu1 %v12039_v12 }
 0x197   :  { %v2311_v31 = vpack.c.bf16 %v2149_v10, %v2140_v18  ;;  %v13822_v32 = vpack.c.bf16 %v2151_v22, %v2142_v19  ;;  %3417 = vmatprep.subr.bf16.mxu1 %v12044_v16 }
 0x198   :  { %v2312_v50 = vpack.c.bf16 %v2150_v26, %v2141_v23  ;;  %v13827_v38 = vpack.c.bf16 %v2152_v15, %v2143_v52  ;;  %v1403_v4 = vpop.f32.mrb[24].mxu0  ;;  %v1556_v45 = vpop.f32.mrb[24].mxu1  ;;  %v12048_v23 = vld [vmem:[%s18609_s3 + $0x1f0] ss:$8 sps:$4 sm:$0xff]  }
 0x199   :  { %v1404_v34 = vadd.f32 %v1403_v4, %v13636_v61  ;;  %v1557_v55 = vadd.f32 %v1556_v45, %v13639_v63  ;;  %v1405_v56 = vpop.f32.mrb[25].mxu0  ;;  %v1558_v2 = vpop.f32.mrb[25].mxu1 }
 0x19a   :  { %v1406_v1 = vadd.f32 %v1405_v56, %v13646_v39  ;;  %v1559_v5 = vadd.f32 %v1558_v2, %v13642_v3  ;;  %v1407_v6 = vpop.f32.mrb[26].mxu0  ;;  %v1560_v27 = vpop.f32.mrb[26].mxu1  ;;  %3320 = vmatprep.mubr.bf16.mxu1 %v2312_v50  ;;  %3418 = vmatpush1.bf16.msra.mxu1 %v12042_v28 }
 0x19b   :  { %v1408_v30 = vadd.f32 %v1407_v6, %v13636_v61  ;;  %v1561_v53 = vadd.f32 %v1560_v27, %v13639_v63  ;;  %v1409_v11 = vpop.f32.mrb[27].mxu0  ;;  %v1562_v12 = vpop.f32.mrb[27].mxu1  ;;  %3321 = vmatmul.mubr.bf16.gmra.mrb[116].mxu1 %v2311_v31  ;;  %3419 = vmatprep.subr.bf16.mxu1 %v12047_v14  ;;  %v2158_v7 = vmax.f32 %v1404_v34, 0.0  ;;  %v2160_v16 = vmax.f32 %v1557_v55, 0.0 }
 0x19c   :  { %v1410_v13 = vadd.f32 %v1409_v11, %v13646_v39  ;;  %v1563_v60 = vadd.f32 %v1562_v12, %v13642_v3  ;;  %v2159_v18 = vmax.f32 %v1406_v1, 0.0  ;;  %v2161_v19 = vmax.f32 %v1559_v5, 0.0 }
 0x19d   :  { %v2167_v24 = vmax.f32 %v1408_v30, 0.0  ;;  %v2169_v17 = vmax.f32 %v1561_v53, 0.0  ;;  %2010 = vmatmul.mubr.bf16.gmra.mrb[124].mxu0 %v13342_v33  ;;  %v12053_v33 = vld [vmem:[%s18609_s3 + $0x204] ss:$8 sps:$4 sm:$0xff]  }
 0x19e   :  { %v2168_v10 = vmax.f32 %v1410_v13, 0.0  ;;  %v2170_v22 = vmax.f32 %v1563_v60, 0.0  ;;  %11042 = vmatprep.mubr.msk.bf16.mxu0 %vm1244_vm4, %v13355_v51  ;;  %3420 = vmatpush1.bf16.msra.mxu1 %v12045_v9 }
 0x19f   :  { %v2320_v52 = vpack.c.bf16 %v2167_v24, %v2158_v7  ;;  %v13849_v26 = vpack.c.bf16 %v2169_v17, %v2160_v16  ;;  %3421 = vmatprep.subr.bf16.mxu1 %v12050_v62 }
 0x1a0   :  { %v2321_v15 = vpack.c.bf16 %v2168_v10, %v2159_v18  ;;  %v13854_v28 = vpack.c.bf16 %v2170_v22, %v2161_v19 }
 0x1a2   :  { %3330 = vmatprep.mubr.bf16.mxu1 %v2321_v15  ;;  %3422 = vmatpush1.bf16.msra.mxu1 %v12048_v23 }
 0x1a3   :  { %3331 = vmatmul.mubr.bf16.gmra.mrb[120].mxu1 %v2320_v52  ;;  %3544 = vmatprep.subr.bf16.mxu1 %v12053_v33 }
 0x1a5   :  { %2018 = vmatmul.mubr.bf16.gmra.mrb[128].mxu0 %v13357_v54 }
 0x1a6   :  { %v1413_v51 = vpop.f32.mrb[28].mxu0  ;;  %v1566_v31 = vpop.f32.mrb[28].mxu1  ;;  %11043 = vmatprep.mubr.msk.bf16.mxu0 %vm1244_vm4, %v13367_v57 }
 0x1a7   :  { %v1414_v14 = vadd.f32 %v1413_v51, %v13636_v61  ;;  %v1567_v50 = vadd.f32 %v1566_v31, %v13639_v63  ;;  %v1415_v4 = vpop.f32.mrb[29].mxu0  ;;  %v1568_v45 = vpop.f32.mrb[29].mxu1 }
 0x1a8   :  { %v1416_v34 = vadd.f32 %v1415_v4, %v13646_v39  ;;  %v1569_v55 = vadd.f32 %v1568_v45, %v13642_v3  ;;  %v1417_v56 = vpop.f32.mrb[30].mxu0  ;;  %v1570_v2 = vpop.f32.mrb[30].mxu1 }
 0x1a9   :  { %v1418_v1 = vadd.f32 %v1417_v56, %v13636_v61  ;;  %v1571_v54 = vadd.f32 %v1570_v2, %v13639_v63  ;;  %v1419_v5 = vpop.f32.mrb[31].mxu0  ;;  %v1572_v6 = vpop.f32.mrb[31].mxu1  ;;  %v2176_v9 = vmax.f32 %v1414_v14, 0.0  ;;  %v2178_v30 = vmax.f32 %v1567_v50, 0.0 }
 0x1aa   :  { %v1420_v57 = vadd.f32 %v1419_v5, %v13646_v39  ;;  %v1573_v27 = vadd.f32 %v1572_v6, %v13642_v3  ;;  %v2177_v12 = vmax.f32 %v1416_v34, 0.0  ;;  %v2179_v62 = vmax.f32 %v1569_v55, 0.0 }
 0x1ab   :  { %v2185_v53 = vmax.f32 %v1418_v1, 0.0  ;;  %v2187_v11 = vmax.f32 %v1571_v54, 0.0 }
 0x1ac   :  { %v2186_v13 = vmax.f32 %v1420_v57, 0.0  ;;  %v2188_v60 = vmax.f32 %v1573_v27, 0.0 }
 0x1ad   :  { %v2329_v7 = vpack.c.bf16 %v2185_v53, %v2176_v9  ;;  %v13867_v16 = vpack.c.bf16 %v2187_v11, %v2178_v30  ;;  %2026 = vmatmul.mubr.bf16.gmra.mrb[132].mxu0 %v13377_v35 }
 0x1ae   :  { %v2330_v24 = vpack.c.bf16 %v2186_v13, %v2177_v12  ;;  %v13870_v17 = vpack.c.bf16 %v2188_v60, %v2179_v62  ;;  %11044 = vmatprep.mubr.msk.bf16.mxu0 %vm1244_vm4, %v13391_v25 }
 0x1b0   :  { %3340 = vmatprep.mubr.bf16.mxu1 %v2330_v24  ;;  %v1423_v18 = vpop.f32.mrb[32].mxu0  ;;  %v1576_v19 = vpop.f32.mrb[32].mxu1 }
 0x1b1   :  { %v1424_v10 = vadd.f32 %v1423_v18, %v13636_v61  ;;  %v1577_v22 = vadd.f32 %v1576_v19, %v13639_v63  ;;  %3341 = vmatmul.mubr.bf16.gmra.mrb[124].mxu1 %v2329_v7  ;;  %v1425_v23 = vpop.f32.mrb[33].mxu0  ;;  %v1578_v52 = vpop.f32.mrb[33].mxu1 }
 0x1b2   :  { %v1426_v33 = vadd.f32 %v1425_v23, %v13646_v39  ;;  %v1579_v35 = vadd.f32 %v1578_v52, %v13642_v3  ;;  %v1427_v15 = vpop.f32.mrb[34].mxu0  ;;  %v1580_v51 = vpop.f32.mrb[34].mxu1 }
 0x1b3   :  { %v1428_v31 = vadd.f32 %v1427_v15, %v13636_v61  ;;  %v1581_v25 = vadd.f32 %v1580_v51, %v13639_v63  ;;  %v1429_v14 = vpop.f32.mrb[35].mxu0  ;;  %v1582_v50 = vpop.f32.mrb[35].mxu1  ;;  %v2194_v34 = vmax.f32 %v1424_v10, 0.0  ;;  %v2196_v55 = vmax.f32 %v1577_v22, 0.0 }
 0x1b4   :  { %v1430_v4 = vadd.f32 %v1429_v14, %v13646_v39  ;;  %v1583_v45 = vadd.f32 %v1582_v50, %v13642_v3  ;;  %v2195_v1 = vmax.f32 %v1426_v33, 0.0  ;;  %v2197_v54 = vmax.f32 %v1579_v35, 0.0 }
 0x1b5   :  { %v2203_v56 = vmax.f32 %v1428_v31, 0.0  ;;  %v2205_v2 = vmax.f32 %v1581_v25, 0.0  ;;  %2034 = vmatmul.mubr.bf16.gmra.mrb[136].mxu0 %v13393_v40 }
 0x1b6   :  { %v2204_v5 = vmax.f32 %v1430_v4, 0.0  ;;  %v2206_v6 = vmax.f32 %v1583_v45, 0.0  ;;  %11045 = vmatprep.mubr.msk.bf16.mxu0 %vm1244_vm4, %v13406_v44 }
 0x1b7   :  { %v2338_v57 = vpack.c.bf16 %v2203_v56, %v2194_v34  ;;  %v13885_v27 = vpack.c.bf16 %v2205_v2, %v2196_v55 }
 0x1b8   :  { %v2339_v9 = vpack.c.bf16 %v2204_v5, %v2195_v1  ;;  %v13887_v30 = vpack.c.bf16 %v2206_v6, %v2197_v54  ;;  %v1433_v53 = vpop.f32.mrb[36].mxu0  ;;  %v1586_v11 = vpop.f32.mrb[36].mxu1 }
 0x1b9   :  { %v1434_v12 = vadd.f32 %v1433_v53, %v13636_v61  ;;  %v1587_v62 = vadd.f32 %v1586_v11, %v13639_v63  ;;  %v1435_v40 = vpop.f32.mrb[37].mxu0  ;;  %v1588_v13 = vpop.f32.mrb[37].mxu1 }
 0x1ba   :  { %v1436_v60 = vadd.f32 %v1435_v40, %v13646_v39  ;;  %v1589_v7 = vadd.f32 %v1588_v13, %v13642_v3  ;;  %v1437_v24 = vpop.f32.mrb[38].mxu0  ;;  %v1590_v44 = vpop.f32.mrb[38].mxu1  ;;  %3350 = vmatprep.mubr.bf16.mxu1 %v2339_v9 }
 0x1bb   :  { %v1438_v18 = vadd.f32 %v1437_v24, %v13636_v61  ;;  %v1591_v19 = vadd.f32 %v1590_v44, %v13639_v63  ;;  %v1439_v10 = vpop.f32.mrb[39].mxu0  ;;  %v1592_v22 = vpop.f32.mrb[39].mxu1  ;;  %3351 = vmatmul.mubr.bf16.gmra.mrb[128].mxu1 %v2338_v57  ;;  %v2212_v33 = vmax.f32 %v1434_v12, 0.0  ;;  %v2214_v35 = vmax.f32 %v1587_v62, 0.0 }
 0x1bc   :  { %v1440_v23 = vadd.f32 %v1439_v10, %v13646_v39  ;;  %v1593_v52 = vadd.f32 %v1592_v22, %v13642_v3  ;;  %v2213_v31 = vmax.f32 %v1436_v60, 0.0  ;;  %v2215_v25 = vmax.f32 %v1589_v7, 0.0 }
 0x1bd   :  { %v2221_v15 = vmax.f32 %v1438_v18, 0.0  ;;  %v2223_v51 = vmax.f32 %v1591_v19, 0.0  ;;  %2042 = vmatmul.mubr.bf16.gmra.mrb[140].mxu0 %v13408_v42 }
 0x1be   :  { %v2222_v14 = vmax.f32 %v1440_v23, 0.0  ;;  %v2224_v50 = vmax.f32 %v1593_v52, 0.0 }
 0x1bf   :  { %v2347_v4 = vpack.c.bf16 %v2221_v15, %v2212_v33  ;;  %v13898_v45 = vpack.c.bf16 %v2223_v51, %v2214_v35  ;;  %v776_v51 = vsub.s32 4, %v13613_v49 }
 0x1c0   :  { %v2348_v34 = vpack.c.bf16 %v2222_v14, %v2213_v31  ;;  %v13900_v55 = vpack.c.bf16 %v2224_v50, %v2215_v25  ;;  %v784_v31 = vsub.s32 6, %v13613_v49  ;;  %v780_v50 = vsub.s32 5, %v13613_v49 }
 0x1c2   :  { %3360 = vmatprep.mubr.bf16.mxu1 %v2348_v34 }
 0x1c3   :  { %3361 = vmatmul.mubr.bf16.gmra.mrb[132].mxu1 %v2347_v4  ;;  %v788_v4 = vsub.s32 7, %v13613_v49 }
 0x1c6   :  { %v1443_v56 = vpop.f32.mrb[40].mxu0  ;;  %v1596_v2 = vpop.f32.mrb[40].mxu1 }
 0x1c7   :  { %v1444_v1 = vadd.f32 %v1443_v56, %v13636_v61  ;;  %v1597_v54 = vadd.f32 %v1596_v2, %v13639_v63  ;;  %v1445_v5 = vpop.f32.mrb[41].mxu0  ;;  %v1598_v42 = vpop.f32.mrb[41].mxu1 }
 0x1c8   :  { %v1446_v6 = vadd.f32 %v1445_v5, %v13646_v39  ;;  %v1599_v57 = vadd.f32 %v1598_v42, %v13642_v3  ;;  %v1447_v9 = vpop.f32.mrb[42].mxu0  ;;  %v1600_v53 = vpop.f32.mrb[42].mxu1 }
 0x1c9   :  { %v1448_v11 = vadd.f32 %v1447_v9, %v13636_v61  ;;  %v1601_v12 = vadd.f32 %v1600_v53, %v13639_v63  ;;  %v1449_v62 = vpop.f32.mrb[43].mxu0  ;;  %v1602_v40 = vpop.f32.mrb[43].mxu1  ;;  %v2230_v7 = vmax.f32 %v1444_v1, 0.0  ;;  %v2232_v24 = vmax.f32 %v1597_v54, 0.0 }
 0x1ca   :  { %v1450_v13 = vadd.f32 %v1449_v62, %v13646_v39  ;;  %v1603_v60 = vadd.f32 %v1602_v40, %v13642_v3  ;;  %v2231_v19 = vmax.f32 %v1446_v6, 0.0  ;;  %v2233_v10 = vmax.f32 %v1599_v57, 0.0 }
 0x1cb   :  { %v2239_v44 = vmax.f32 %v1448_v11, 0.0  ;;  %v2241_v18 = vmax.f32 %v1601_v12, 0.0  ;;  %v13925_v12 = vrot.slane %v13622_v58, %v776_v51  ;;  %v13928_v62 = vrot.slane %v13622_v58, %v784_v31 }
 0x1cc   :  { %v2240_v22 = vmax.f32 %v1450_v13, 0.0  ;;  %v2242_v23 = vmax.f32 %v1603_v60, 0.0  ;;  %v13933_v60 = vrot.slane %v13622_v58, %v780_v50 }
 0x1cd   :  { %v2356_v52 = vpack.c.bf16 %v2239_v44, %v2230_v7  ;;  %v13910_v33 = vpack.c.bf16 %v2241_v18, %v2232_v24  ;;  %v13936_v7 = vrot.slane %v13622_v58, %v788_v4 }
 0x1ce   :  { %v2357_v35 = vpack.c.bf16 %v2240_v22, %v2231_v19  ;;  %v13912_v15 = vpack.c.bf16 %v2242_v23, %v2233_v10 }
 0x1d0   :  { %3370 = vmatprep.mubr.bf16.mxu1 %v2357_v35  ;;  %v1453_v25 = vpop.f32.mrb[44].mxu0  ;;  %v1606_v14 = vpop.f32.mrb[44].mxu1 }
 0x1d1   :  { %v1454_v34 = vadd.f32 %v1453_v25, %v13636_v61  ;;  %v1607_v56 = vadd.f32 %v1606_v14, %v13639_v63  ;;  %3371 = vmatmul.mubr.bf16.gmra.mrb[136].mxu1 %v2356_v52  ;;  %v1455_v2 = vpop.f32.mrb[45].mxu0  ;;  %v1608_v1 = vpop.f32.mrb[45].mxu1 }
 0x1d2   :  { %v1456_v54 = vadd.f32 %v1455_v2, %v13646_v39  ;;  %v1609_v5 = vadd.f32 %v1608_v1, %v13642_v3  ;;  %v1457_v42 = vpop.f32.mrb[46].mxu0  ;;  %v1610_v6 = vpop.f32.mrb[46].mxu1 }
 0x1d3   :  { %v1458_v57 = vadd.f32 %v1457_v42, %v13636_v61  ;;  %v1611_v9 = vadd.f32 %v1610_v6, %v13639_v63  ;;  %v1459_v53 = vpop.f32.mrb[47].mxu0  ;;  %v1612_v11 = vpop.f32.mrb[47].mxu1  ;;  %v2248_v61 = vmax.f32 %v1454_v34, 0.0  ;;  %v2250_v63 = vmax.f32 %v1607_v56, 0.0 }
 0x1d4   :  { %v1460_v40 = vadd.f32 %v1459_v53, %v13646_v39  ;;  %v1613_v13 = vadd.f32 %v1612_v11, %v13642_v3  ;;  %v2249_v18 = vmax.f32 %v1456_v54, 0.0  ;;  %v2251_v19 = vmax.f32 %v1609_v5, 0.0 }
 0x1d5   :  { %v2257_v24 = vmax.f32 %v1458_v57, 0.0  ;;  %v2259_v44 = vmax.f32 %v1611_v9, 0.0 }
 0x1d6   :  { %v2258_v10 = vmax.f32 %v1460_v40, 0.0  ;;  %v2260_v22 = vmax.f32 %v1613_v13, 0.0 }
 0x1d7   :  { %v2365_v23 = vpack.c.bf16 %v2257_v24, %v2248_v61  ;;  %v13938_v52 = vpack.c.bf16 %v2259_v44, %v2250_v63 }
 0x1d8   :  { %v2366_v39 = vpack.c.bf16 %v2258_v10, %v2249_v18  ;;  %v13940_v35 = vpack.c.bf16 %v2260_v22, %v2251_v19  ;;  %v1649_v3 = vpop.f32.mrb[48].mxu0  ;;  %v1802_v51 = vpop.f32.mrb[48].mxu1 }
 0x1d9   :  { %v1650_v31 = vadd.f32 %v1649_v3, %v13925_v12  ;;  %v1803_v58 = vadd.f32 %v1802_v51, %v13928_v62  ;;  %v1651_v25 = vpop.f32.mrb[49].mxu0  ;;  %v1804_v14 = vpop.f32.mrb[49].mxu1 }
 0x1da   :  { %v1652_v50 = vadd.f32 %v1651_v25, %v13933_v60  ;;  %v1805_v4 = vadd.f32 %v1804_v14, %v13936_v7  ;;  %v1653_v34 = vpop.f32.mrb[50].mxu0  ;;  %v1806_v56 = vpop.f32.mrb[50].mxu1  ;;  %3380 = vmatprep.mubr.bf16.mxu1 %v2366_v39 }
 0x1db   :  { %v1654_v2 = vadd.f32 %v1653_v34, %v13925_v12  ;;  %v1807_v1 = vadd.f32 %v1806_v56, %v13928_v62  ;;  %v1655_v54 = vpop.f32.mrb[51].mxu0  ;;  %v1808_v5 = vpop.f32.mrb[51].mxu1  ;;  %3381 = vmatmul.mubr.bf16.gmra.mrb[140].mxu1 %v2365_v23  ;;  %v2054_v57 = vmax.f32 %v1650_v31, 0.0  ;;  %v2056_v9 = vmax.f32 %v1803_v58, 0.0  ;;  %v12056_v31 = vld [vmem:[%s18609_s3 + $0x214] ss:$8 sps:$4 sm:$0xff]  }
 0x1dc   :  { %v1656_v42 = vadd.f32 %v1655_v54, %v13933_v60  ;;  %v1809_v6 = vadd.f32 %v1808_v5, %v13936_v7  ;;  %3423 = vmatprep.mubr.bf16.mxu1 %v13662_v29  ;;  %v2055_v40 = vmax.f32 %v1652_v50, 0.0  ;;  %v2057_v13 = vmax.f32 %v1805_v4, 0.0  ;;  %v12051_v29 = vld [vmem:[%s18609_s3 + $0x200] ss:$8 sps:$4 sm:$0xff]   ;;  %v12054_v5 = vld [vmem:[%s18609_s3 + $0x210] ss:$8 sps:$4 sm:$0xff]  }
 0x1dd   :  { %v2063_v53 = vmax.f32 %v1654_v2, 0.0  ;;  %v2065_v11 = vmax.f32 %v1807_v1, 0.0 }
 0x1de   :  { %v2064_v61 = vmax.f32 %v1656_v42, 0.0  ;;  %v2066_v63 = vmax.f32 %v1809_v6, 0.0 }
 0x1df   :  { %v13951_v24 = vpack.c.bf16 %v2063_v53, %v2054_v57  ;;  %v13953_v44 = vpack.c.bf16 %v2065_v11, %v2056_v9 }
 0x1e0   :  { %v13955_v18 = vpack.c.bf16 %v2064_v61, %v2055_v40  ;;  %v13957_v19 = vpack.c.bf16 %v2066_v63, %v2057_v13  ;;  %v1659_v10 = vpop.f32.mrb[52].mxu0  ;;  %v1812_v22 = vpop.f32.mrb[52].mxu1 }
 0x1e1   :  { %v1660_v23 = vadd.f32 %v1659_v10, %v13925_v12  ;;  %v1813_v39 = vadd.f32 %v1812_v22, %v13928_v62  ;;  %v1661_v3 = vpop.f32.mrb[53].mxu0  ;;  %v1814_v51 = vpop.f32.mrb[53].mxu1 }
 0x1e2   :  { %v1662_v58 = vadd.f32 %v1661_v3, %v13933_v60  ;;  %v1815_v25 = vadd.f32 %v1814_v51, %v13936_v7  ;;  %v1663_v14 = vpop.f32.mrb[54].mxu0  ;;  %v1816_v50 = vpop.f32.mrb[54].mxu1 }
 0x1e3   :  { %v1664_v4 = vadd.f32 %v1663_v14, %v13925_v12  ;;  %v1817_v34 = vadd.f32 %v1816_v50, %v13928_v62  ;;  %v1665_v56 = vpop.f32.mrb[55].mxu0  ;;  %v1818_v2 = vpop.f32.mrb[55].mxu1  ;;  %3424 = vmatmul.mubr.bf16.vlgmr.msra.gmra.mrb[96].mxu1 %v13660_v0  ;;  %v2072_v42 = vmax.f32 %v1660_v23, 0.0  ;;  %v2074_v6 = vmax.f32 %v1813_v39, 0.0  ;;  %v12059_v0 = vld [vmem:[%s18609_s3 + $0x224] ss:$8 sps:$4 sm:$0xff]  }
 0x1e4   :  { %v1666_v1 = vadd.f32 %v1665_v56, %v13933_v60  ;;  %v1819_v54 = vadd.f32 %v1818_v2, %v13936_v7  ;;  %3433 = vmatprep.mubr.bf16.mxu1 %v13696_v43  ;;  %3545 = vmatpush1.bf16.msra.mxu1 %v12051_v29  ;;  %v2073_v53 = vmax.f32 %v1662_v58, 0.0  ;;  %v2075_v11 = vmax.f32 %v1815_v25, 0.0  ;;  %v12057_v23 = vld [vmem:[%s18609_s3 + $0x220] ss:$8 sps:$4 sm:$0xff]   ;;  %v12062_v58 = vld [vmem:[%s18609_s3 + $0x234] ss:$8 sps:$4 sm:$0xff]  }
 0x1e5   :  { %v2081_v57 = vmax.f32 %v1664_v4, 0.0  ;;  %v2083_v9 = vmax.f32 %v1817_v34, 0.0  ;;  %3546 = vmatprep.subr.bf16.mxu1 %v12056_v31 }
 0x1e6   :  { %v2082_v40 = vmax.f32 %v1666_v1, 0.0  ;;  %v2084_v13 = vmax.f32 %v1819_v54, 0.0 }
 0x1e7   :  { %v13981_v61 = vpack.c.bf16 %v2081_v57, %v2072_v42  ;;  %v13983_v43 = vpack.c.bf16 %v2083_v9, %v2074_v6  ;;  %v12060_v42 = vld [vmem:[%s18609_s3 + $0x230] ss:$8 sps:$4 sm:$0xff]  }
 0x1e8   :  { %v13985_v63 = vpack.c.bf16 %v2082_v40, %v2073_v53  ;;  %v13987_v10 = vpack.c.bf16 %v2084_v13, %v2075_v11  ;;  %v1669_v22 = vpop.f32.mrb[56].mxu0  ;;  %v1822_v29 = vpop.f32.mrb[56].mxu1  ;;  %3547 = vmatpush1.bf16.msra.mxu1 %v12054_v5 }
 0x1e9   :  { %v1670_v39 = vadd.f32 %v1669_v22, %v13925_v12  ;;  %v1823_v3 = vadd.f32 %v1822_v29, %v13928_v62  ;;  %v1671_v51 = vpop.f32.mrb[57].mxu0  ;;  %v1824_v31 = vpop.f32.mrb[57].mxu1  ;;  %3548 = vmatprep.subr.bf16.mxu1 %v12059_v0 }
 0x1ea   :  { %v1672_v25 = vadd.f32 %v1671_v51, %v13933_v60  ;;  %v1825_v14 = vadd.f32 %v1824_v31, %v13936_v7  ;;  %v1673_v50 = vpop.f32.mrb[58].mxu0  ;;  %v1826_v4 = vpop.f32.mrb[58].mxu1  ;;  %v12063_v51 = vld [vmem:[%s18609_s3 + $0x240] ss:$8 sps:$4 sm:$0xff]  }
 0x1eb   :  { %v1674_v34 = vadd.f32 %v1673_v50, %v13925_v12  ;;  %v1827_v56 = vadd.f32 %v1826_v4, %v13928_v62  ;;  %v1675_v2 = vpop.f32.mrb[59].mxu0  ;;  %v1828_v1 = vpop.f32.mrb[59].mxu1  ;;  %3434 = vmatmul.mubr.bf16.gmra.mrb[100].mxu1 %v13693_v41  ;;  %v2090_v6 = vmax.f32 %v1670_v39, 0.0  ;;  %v2092_v57 = vmax.f32 %v1823_v3, 0.0  ;;  %v12065_v41 = vld [vmem:[%s18609_s3 + $0x244] ss:$8 sps:$4 sm:$0xff]  }
 0x1ec   :  { %v1676_v54 = vadd.f32 %v1675_v2, %v13933_v60  ;;  %v1829_v5 = vadd.f32 %v1828_v1, %v13936_v7  ;;  %3443 = vmatprep.mubr.bf16.mxu1 %v13731_v47  ;;  %3549 = vmatpush1.bf16.msra.mxu1 %v12057_v23  ;;  %v2091_v53 = vmax.f32 %v1672_v25, 0.0  ;;  %v2093_v11 = vmax.f32 %v1825_v14, 0.0  ;;  %v12068_v50 = vld [vmem:[%s18609_s3 + $0x254] ss:$8 sps:$4 sm:$0xff]  }
 0x1ed   :  { %v2099_v9 = vmax.f32 %v1674_v34, 0.0  ;;  %v2101_v0 = vmax.f32 %v1827_v56, 0.0  ;;  %3550 = vmatprep.subr.bf16.mxu1 %v12062_v58 }
 0x1ee   :  { %v2100_v40 = vmax.f32 %v1676_v54, 0.0  ;;  %v2102_v13 = vmax.f32 %v1829_v5, 0.0 }
 0x1ef   :  { %v14011_v22 = vpack.c.bf16 %v2099_v9, %v2090_v6  ;;  %v14013_v47 = vpack.c.bf16 %v2101_v0, %v2092_v57  ;;  %v12066_v9 = vld [vmem:[%s18609_s3 + $0x250] ss:$8 sps:$4 sm:$0xff]  }
 0x1f0   :  { %v14015_v29 = vpack.c.bf16 %v2100_v40, %v2091_v53  ;;  %v14017_v23 = vpack.c.bf16 %v2102_v13, %v2093_v11  ;;  %v1679_v39 = vpop.f32.mrb[60].mxu0  ;;  %v1832_v3 = vpop.f32.mrb[60].mxu1  ;;  %3551 = vmatpush1.bf16.msra.mxu1 %v12060_v42 }
 0x1f1   :  { %v1680_v31 = vadd.f32 %v1679_v39, %v13925_v12  ;;  %v1833_v58 = vadd.f32 %v1832_v3, %v13928_v62  ;;  %v1681_v25 = vpop.f32.mrb[61].mxu0  ;;  %v1834_v14 = vpop.f32.mrb[61].mxu1  ;;  %3552 = vmatprep.subr.bf16.mxu1 %v12065_v41 }
 0x1f2   :  { %v1682_v4 = vadd.f32 %v1681_v25, %v13933_v60  ;;  %v1835_v34 = vadd.f32 %v1834_v14, %v13936_v7  ;;  %v1683_v56 = vpop.f32.mrb[62].mxu0  ;;  %v1836_v2 = vpop.f32.mrb[62].mxu1 }
 0x1f3   :  { %v1684_v1 = vadd.f32 %v1683_v56, %v13925_v12  ;;  %v1837_v54 = vadd.f32 %v1836_v2, %v13928_v62  ;;  %v1685_v5 = vpop.f32.mrb[63].mxu0  ;;  %v1838_v42 = vpop.f32.mrb[63].mxu1  ;;  %3444 = vmatmul.mubr.bf16.gmra.mrb[104].mxu1 %v13726_v21  ;;  %v2108_v0 = vmax.f32 %v1680_v31, 0.0  ;;  %v2110_v41 = vmax.f32 %v1833_v58, 0.0  ;;  %v12071_v21 = vld [vmem:[%s18609_s3 + $0x264] ss:$8 sps:$4 sm:$0xff]  }
 0x1f4   :  { %v1686_v6 = vadd.f32 %v1685_v5, %v13933_v60  ;;  %v1839_v57 = vadd.f32 %v1838_v42, %v13936_v7  ;;  %3453 = vmatprep.mubr.bf16.mxu1 %v13758_v46  ;;  %3553 = vmatpush1.bf16.msra.mxu1 %v12063_v51  ;;  %v2109_v40 = vmax.f32 %v1682_v4, 0.0  ;;  %v2111_v13 = vmax.f32 %v1835_v34, 0.0 }
 0x1f5   :  { %v2117_v53 = vmax.f32 %v1684_v1, 0.0  ;;  %v2119_v11 = vmax.f32 %v1837_v54, 0.0  ;;  %3554 = vmatprep.subr.bf16.mxu1 %v12068_v50  ;;  %v12069_v50 = vld [vmem:[%s18609_s3 + $0x260] ss:$8 sps:$4 sm:$0xff]   ;;  %v12074_v1 = vld [vmem:[%s18609_s3 + $0x274] ss:$8 sps:$4 sm:$0xff]  }
 0x1f6   :  { %v2118_v39 = vmax.f32 %v1686_v6, 0.0  ;;  %v2120_v3 = vmax.f32 %v1839_v57, 0.0 }
 0x1f7   :  { %v14041_v25 = vpack.c.bf16 %v2117_v53, %v2108_v0  ;;  %v14043_v46 = vpack.c.bf16 %v2119_v11, %v2110_v41 }
 0x1f8   :  { %v14045_v51 = vpack.c.bf16 %v2118_v39, %v2109_v40  ;;  %v14047_v14 = vpack.c.bf16 %v2120_v3, %v2111_v13  ;;  %v1689_v31 = vpop.f32.mrb[64].mxu0  ;;  %v1842_v58 = vpop.f32.mrb[64].mxu1  ;;  %3555 = vmatpush1.bf16.msra.mxu1 %v12066_v9 }
 0x1f9   :  { %v1690_v4 = vadd.f32 %v1689_v31, %v13925_v12  ;;  %v1843_v34 = vadd.f32 %v1842_v58, %v13928_v62  ;;  %v1691_v56 = vpop.f32.mrb[65].mxu0  ;;  %v1844_v2 = vpop.f32.mrb[65].mxu1  ;;  %3556 = vmatprep.subr.bf16.mxu1 %v12071_v21  ;;  %v12072_v21 = vld [vmem:[%s18609_s3 + $0x270] ss:$8 sps:$4 sm:$0xff]  }
 0x1fa   :  { %v1692_v54 = vadd.f32 %v1691_v56, %v13933_v60  ;;  %v1845_v5 = vadd.f32 %v1844_v2, %v13936_v7  ;;  %v1693_v42 = vpop.f32.mrb[66].mxu0  ;;  %v1846_v6 = vpop.f32.mrb[66].mxu1 }
 0x1fb   :  { %v1694_v57 = vadd.f32 %v1693_v42, %v13925_v12  ;;  %v1847_v9 = vadd.f32 %v1846_v6, %v13928_v62  ;;  %v1695_v0 = vpop.f32.mrb[67].mxu0  ;;  %v1848_v41 = vpop.f32.mrb[67].mxu1  ;;  %3454 = vmatmul.mubr.bf16.gmra.mrb[108].mxu1 %v13753_v37  ;;  %v2126_v40 = vmax.f32 %v1690_v4, 0.0  ;;  %v2128_v13 = vmax.f32 %v1843_v34, 0.0  ;;  %v12077_v37 = vld [vmem:[%s18609_s3 + $0x284] ss:$8 sps:$4 sm:$0xff]  }
 0x1fc   :  { %v1696_v53 = vadd.f32 %v1695_v0, %v13933_v60  ;;  %v1849_v11 = vadd.f32 %v1848_v41, %v13936_v7  ;;  %3463 = vmatprep.mubr.bf16.mxu1 %v13792_v20  ;;  %3557 = vmatpush1.bf16.msra.mxu1 %v12069_v50  ;;  %v2127_v31 = vmax.f32 %v1692_v54, 0.0  ;;  %v2129_v58 = vmax.f32 %v1845_v5, 0.0  ;;  %v12080_v0 = vld [vmem:[%s18609_s3 + $0x294] ss:$8 sps:$4 sm:$0xff]  }
 0x1fd   :  { %v2135_v39 = vmax.f32 %v1694_v57, 0.0  ;;  %v2137_v3 = vmax.f32 %v1847_v9, 0.0  ;;  %3558 = vmatprep.subr.bf16.mxu1 %v12074_v1  ;;  %v12075_v1 = vld [vmem:[%s18609_s3 + $0x280] ss:$8 sps:$4 sm:$0xff]  }
 0x1fe   :  { %v2136_v56 = vmax.f32 %v1696_v53, 0.0  ;;  %v2138_v2 = vmax.f32 %v1849_v11, 0.0 }
 0x1ff   :  { %v14071_v42 = vpack.c.bf16 %v2135_v39, %v2126_v40  ;;  %v14073_v20 = vpack.c.bf16 %v2137_v3, %v2128_v13 }
 0x200   :  { %v14075_v50 = vpack.c.bf16 %v2136_v56, %v2127_v31  ;;  %v14077_v6 = vpack.c.bf16 %v2138_v2, %v2129_v58  ;;  %v1699_v4 = vpop.f32.mrb[68].mxu0  ;;  %v1852_v34 = vpop.f32.mrb[68].mxu1  ;;  %3559 = vmatpush1.bf16.msra.mxu1 %v12072_v21  ;;  %v12078_v58 = vld [vmem:[%s18609_s3 + $0x290] ss:$8 sps:$4 sm:$0xff]  }
 0x201   :  { %v1700_v54 = vadd.f32 %v1699_v4, %v13925_v12  ;;  %v1853_v5 = vadd.f32 %v1852_v34, %v13928_v62  ;;  %v1701_v57 = vpop.f32.mrb[69].mxu0  ;;  %v1854_v9 = vpop.f32.mrb[69].mxu1  ;;  %3560 = vmatprep.subr.bf16.mxu1 %v12077_v37 }
 0x202   :  { %v1702_v41 = vadd.f32 %v1701_v57, %v13933_v60  ;;  %v1855_v53 = vadd.f32 %v1854_v9, %v13936_v7  ;;  %v1703_v11 = vpop.f32.mrb[70].mxu0  ;;  %v1856_v21 = vpop.f32.mrb[70].mxu1 }
 0x203   :  { %v1704_v40 = vadd.f32 %v1703_v11, %v13925_v12  ;;  %v1857_v13 = vadd.f32 %v1856_v21, %v13928_v62  ;;  %v1705_v39 = vpop.f32.mrb[71].mxu0  ;;  %v1858_v3 = vpop.f32.mrb[71].mxu1  ;;  %3464 = vmatmul.mubr.bf16.gmra.mrb[112].mxu1 %v13789_v36  ;;  %v2144_v56 = vmax.f32 %v1700_v54, 0.0  ;;  %v2146_v2 = vmax.f32 %v1853_v5, 0.0  ;;  %v12083_v36 = vld [vmem:[%s18609_s3 + $0x2a4] ss:$8 sps:$4 sm:$0xff]  }
 0x204   :  { %v1706_v37 = vadd.f32 %v1705_v39, %v13933_v60  ;;  %v1859_v31 = vadd.f32 %v1858_v3, %v13936_v7  ;;  %3473 = vmatprep.mubr.bf16.mxu1 %v13827_v38  ;;  %3561 = vmatpush1.bf16.msra.mxu1 %v12075_v1  ;;  %v2145_v57 = vmax.f32 %v1702_v41, 0.0  ;;  %v2147_v9 = vmax.f32 %v1855_v53, 0.0 }
 0x205   :  { %v2153_v4 = vmax.f32 %v1704_v40, 0.0  ;;  %v2155_v34 = vmax.f32 %v1857_v13, 0.0  ;;  %3562 = vmatprep.subr.bf16.mxu1 %v12080_v0  ;;  %v12081_v0 = vld [vmem:[%s18609_s3 + $0x2a0] ss:$8 sps:$4 sm:$0xff]  }
 0x206   :  { %v2154_v11 = vmax.f32 %v1706_v37, 0.0  ;;  %v2156_v21 = vmax.f32 %v1859_v31, 0.0  ;;  %v12086_v37 = vld [vmem:[%s18609_s3 + $0x2b4] ss:$8 sps:$4 sm:$0xff]  }
 0x207   :  { %v14101_v39 = vpack.c.bf16 %v2153_v4, %v2144_v56  ;;  %v14103_v38 = vpack.c.bf16 %v2155_v34, %v2146_v2 }
 0x208   :  { %v14105_v1 = vpack.c.bf16 %v2154_v11, %v2145_v57  ;;  %v14107_v3 = vpack.c.bf16 %v2156_v21, %v2147_v9  ;;  %v1709_v54 = vpop.f32.mrb[72].mxu0  ;;  %v1862_v5 = vpop.f32.mrb[72].mxu1  ;;  %3563 = vmatpush1.bf16.msra.mxu1 %v12078_v58  ;;  %v12084_v21 = vld [vmem:[%s18609_s3 + $0x2b0] ss:$8 sps:$4 sm:$0xff]  }
 0x209   :  { %v1710_v41 = vadd.f32 %v1709_v54, %v13925_v12  ;;  %v1863_v53 = vadd.f32 %v1862_v5, %v13928_v62  ;;  %v1711_v40 = vpop.f32.mrb[73].mxu0  ;;  %v1864_v13 = vpop.f32.mrb[73].mxu1  ;;  %3564 = vmatprep.subr.bf16.mxu1 %v12083_v36 }
 0x20a   :  { %v1712_v31 = vadd.f32 %v1711_v40, %v13933_v60  ;;  %v1865_v56 = vadd.f32 %v1864_v13, %v13936_v7  ;;  %v1713_v58 = vpop.f32.mrb[74].mxu0  ;;  %v1866_v2 = vpop.f32.mrb[74].mxu1 }
 0x20b   :  { %v1714_v4 = vadd.f32 %v1713_v58, %v13925_v12  ;;  %v1867_v34 = vadd.f32 %v1866_v2, %v13928_v62  ;;  %v1715_v57 = vpop.f32.mrb[75].mxu0  ;;  %v1868_v9 = vpop.f32.mrb[75].mxu1  ;;  %3474 = vmatmul.mubr.bf16.gmra.mrb[116].mxu1 %v13822_v32  ;;  %v2162_v54 = vmax.f32 %v1710_v41, 0.0  ;;  %v2164_v5 = vmax.f32 %v1863_v53, 0.0  ;;  %v12089_v32 = vld [vmem:[%s18609_s3 + $0x2c4] ss:$8 sps:$4 sm:$0xff]  }
 0x20c   :  { %v1716_v36 = vadd.f32 %v1715_v57, %v13933_v60  ;;  %v1869_v11 = vadd.f32 %v1868_v9, %v13936_v7  ;;  %3483 = vmatprep.mubr.bf16.mxu1 %v13854_v28  ;;  %3565 = vmatpush1.bf16.msra.mxu1 %v12081_v0  ;;  %v2163_v58 = vmax.f32 %v1712_v31, 0.0  ;;  %v2165_v2 = vmax.f32 %v1865_v56, 0.0 }
 0x20d   :  { %v2171_v40 = vmax.f32 %v1714_v4, 0.0  ;;  %v2173_v13 = vmax.f32 %v1867_v34, 0.0  ;;  %3566 = vmatprep.subr.bf16.mxu1 %v12086_v37  ;;  %v12087_v37 = vld [vmem:[%s18609_s3 + $0x2c0] ss:$8 sps:$4 sm:$0xff]  }
 0x20e   :  { %v2172_v57 = vmax.f32 %v1716_v36, 0.0  ;;  %v2174_v9 = vmax.f32 %v1869_v11, 0.0  ;;  %v12092_v36 = vld [vmem:[%s18609_s3 + $0x2d4] ss:$8 sps:$4 sm:$0xff]  }
 0x20f   :  { %v14131_v8 = vpack.c.bf16 %v2171_v40, %v2162_v54  ;;  %v14133_v28 = vpack.c.bf16 %v2173_v13, %v2164_v5 }
 0x210   :  { %v14135_v0 = vpack.c.bf16 %v2172_v57, %v2163_v58  ;;  %v14137_v49 = vpack.c.bf16 %v2174_v9, %v2165_v2  ;;  %v1719_v41 = vpop.f32.mrb[76].mxu0  ;;  %v1872_v53 = vpop.f32.mrb[76].mxu1  ;;  %3567 = vmatpush1.bf16.msra.mxu1 %v12084_v21  ;;  %v12090_v9 = vld [vmem:[%s18609_s3 + $0x2d0] ss:$8 sps:$4 sm:$0xff]  }
 0x211   :  { %v1720_v31 = vadd.f32 %v1719_v41, %v13925_v12  ;;  %v1873_v56 = vadd.f32 %v1872_v53, %v13928_v62  ;;  %v1721_v4 = vpop.f32.mrb[77].mxu0  ;;  %v1874_v34 = vpop.f32.mrb[77].mxu1  ;;  %3568 = vmatprep.subr.bf16.mxu1 %v12089_v32 }
 0x212   :  { %v1722_v11 = vadd.f32 %v1721_v4, %v13933_v60  ;;  %v1875_v54 = vadd.f32 %v1874_v34, %v13936_v7  ;;  %v1723_v21 = vpop.f32.mrb[78].mxu0  ;;  %v1876_v5 = vpop.f32.mrb[78].mxu1 }
 0x213   :  { %v1724_v40 = vadd.f32 %v1723_v21, %v13925_v12  ;;  %v1877_v13 = vadd.f32 %v1876_v5, %v13928_v62  ;;  %v1725_v58 = vpop.f32.mrb[79].mxu0  ;;  %v1878_v2 = vpop.f32.mrb[79].mxu1  ;;  %3484 = vmatmul.mubr.bf16.gmra.mrb[120].mxu1 %v13849_v26  ;;  %v2180_v41 = vmax.f32 %v1720_v31, 0.0  ;;  %v2182_v53 = vmax.f32 %v1873_v56, 0.0  ;;  %v12095_v26 = vld [vmem:[%s18609_s3 + $0x2e4] ss:$8 sps:$4 sm:$0xff]  }
 0x214   :  { %v1726_v32 = vadd.f32 %v1725_v58, %v13933_v60  ;;  %v1879_v57 = vadd.f32 %v1878_v2, %v13936_v7  ;;  %3493 = vmatprep.mubr.bf16.mxu1 %v13870_v17  ;;  %3569 = vmatpush1.bf16.msra.mxu1 %v12087_v37  ;;  %v2181_v21 = vmax.f32 %v1722_v11, 0.0  ;;  %v2183_v5 = vmax.f32 %v1875_v54, 0.0 }
 0x215   :  { %v2189_v4 = vmax.f32 %v1724_v40, 0.0  ;;  %v2191_v34 = vmax.f32 %v1877_v13, 0.0  ;;  %3570 = vmatprep.subr.bf16.mxu1 %v12092_v36  ;;  %v12093_v36 = vld [vmem:[%s18609_s3 + $0x2e0] ss:$8 sps:$4 sm:$0xff]  }
 0x216   :  { %v2190_v58 = vmax.f32 %v1726_v32, 0.0  ;;  %v2192_v2 = vmax.f32 %v1879_v57, 0.0  ;;  %v12098_v32 = vld [vmem:[%s18609_s3 + $0x2f4] ss:$8 sps:$4 sm:$0xff]  }
 0x217   :  { %v14161_v59 = vpack.c.bf16 %v2189_v4, %v2180_v41  ;;  %v14163_v17 = vpack.c.bf16 %v2191_v34, %v2182_v53 }
 0x218   :  { %v14165_v37 = vpack.c.bf16 %v2190_v58, %v2181_v21  ;;  %v14167_v48 = vpack.c.bf16 %v2192_v2, %v2183_v5  ;;  %v1729_v31 = vpop.f32.mrb[80].mxu0  ;;  %v1882_v56 = vpop.f32.mrb[80].mxu1  ;;  %3571 = vmatpush1.bf16.msra.mxu1 %v12090_v9  ;;  %v12096_v2 = vld [vmem:[%s18609_s3 + $0x2f0] ss:$8 sps:$4 sm:$0xff]  }
 0x219   :  { %18779 = vst [vmem:[#allocation5_spill] sm:$0xff] %v14163_v17  ;;  %v1730_v11 = vadd.f32 %v1729_v31, %v13925_v12  ;;  %v1883_v54 = vadd.f32 %v1882_v56, %v13928_v62  ;;  %v1731_v40 = vpop.f32.mrb[81].mxu0  ;;  %v1884_v13 = vpop.f32.mrb[81].mxu1  ;;  %3572 = vmatprep.subr.bf16.mxu1 %v12095_v26 }
 0x21a   :  { %18780 = vst [vmem:[#allocation6_spill] sm:$0xff] %v14167_v48  ;;  %v1732_v57 = vadd.f32 %v1731_v40, %v13933_v60  ;;  %v1885_v41 = vadd.f32 %v1884_v13, %v13936_v7  ;;  %v1733_v9 = vpop.f32.mrb[82].mxu0  ;;  %v1886_v53 = vpop.f32.mrb[82].mxu1 }
 0x21b   :  { %v1734_v4 = vadd.f32 %v1733_v9, %v13925_v12  ;;  %v1887_v34 = vadd.f32 %v1886_v53, %v13928_v62  ;;  %v1735_v21 = vpop.f32.mrb[83].mxu0  ;;  %v1888_v5 = vpop.f32.mrb[83].mxu1  ;;  %3494 = vmatmul.mubr.bf16.gmra.mrb[124].mxu1 %v13867_v16  ;;  %v2198_v31 = vmax.f32 %v1730_v11, 0.0  ;;  %v2200_v56 = vmax.f32 %v1883_v54, 0.0  ;;  %v12101_v16 = vld [vmem:[%s18609_s3 + $0x304] ss:$8 sps:$4 sm:$0xff]  }
 0x21c   :  { %v1736_v26 = vadd.f32 %v1735_v21, %v13933_v60  ;;  %v1889_v58 = vadd.f32 %v1888_v5, %v13936_v7  ;;  %3503 = vmatprep.mubr.bf16.mxu1 %v13887_v30  ;;  %3573 = vmatpush1.bf16.msra.mxu1 %v12093_v36  ;;  %v2199_v9 = vmax.f32 %v1732_v57, 0.0  ;;  %v2201_v53 = vmax.f32 %v1885_v41, 0.0 }
 0x21d   :  { %v2207_v40 = vmax.f32 %v1734_v4, 0.0  ;;  %v2209_v13 = vmax.f32 %v1887_v34, 0.0  ;;  %3574 = vmatprep.subr.bf16.mxu1 %v12098_v32 }
 0x21e   :  { %v2208_v21 = vmax.f32 %v1736_v26, 0.0  ;;  %v2210_v5 = vmax.f32 %v1889_v58, 0.0 }
 0x21f   :  { %v14191_v17 = vpack.c.bf16 %v2207_v40, %v2198_v31  ;;  %v14193_v30 = vpack.c.bf16 %v2209_v13, %v2200_v56 }
 0x220   :  { %v14195_v36 = vpack.c.bf16 %v2208_v21, %v2199_v9  ;;  %v14197_v48 = vpack.c.bf16 %v2210_v5, %v2201_v53  ;;  %v1739_v11 = vpop.f32.mrb[84].mxu0  ;;  %v1892_v54 = vpop.f32.mrb[84].mxu1  ;;  %3575 = vmatpush1.bf16.msra.mxu1 %v12096_v2 }
 0x221   :  { %18781 = vst [vmem:[#allocation7_spill] sm:$0xff] %v14193_v30  ;;  %v1740_v32 = vadd.f32 %v1739_v11, %v13925_v12  ;;  %v1893_v4 = vadd.f32 %v1892_v54, %v13928_v62  ;;  %v1741_v34 = vpop.f32.mrb[85].mxu0  ;;  %v1894_v57 = vpop.f32.mrb[85].mxu1  ;;  %3697 = vmatprep.subr.bf16.mxu1 %v12101_v16 }
 0x222   :  { %18782 = vst [vmem:[#allocation8_spill] sm:$0xff] %v14197_v48  ;;  %v1742_v41 = vadd.f32 %v1741_v34, %v13933_v60  ;;  %v1895_v26 = vadd.f32 %v1894_v57, %v13936_v7  ;;  %v1743_v58 = vpop.f32.mrb[86].mxu0  ;;  %v1896_v31 = vpop.f32.mrb[86].mxu1 }
 0x223   :  { %v1744_v56 = vadd.f32 %v1743_v58, %v13925_v12  ;;  %v1897_v40 = vadd.f32 %v1896_v31, %v13928_v62  ;;  %v1745_v13 = vpop.f32.mrb[87].mxu0  ;;  %v1898_v9 = vpop.f32.mrb[87].mxu1  ;;  %3504 = vmatmul.mubr.bf16.gmra.mrb[128].mxu1 %v13885_v27  ;;  %v2216_v16 = vmax.f32 %v1740_v32, 0.0  ;;  %v2218_v21 = vmax.f32 %v1893_v4, 0.0 }
 0x224   :  { %v1746_v2 = vadd.f32 %v1745_v13, %v13933_v60  ;;  %v1899_v53 = vadd.f32 %v1898_v9, %v13936_v7  ;;  %3513 = vmatprep.mubr.bf16.mxu1 %v13900_v55  ;;  %v2217_v54 = vmax.f32 %v1742_v41, 0.0  ;;  %v2219_v34 = vmax.f32 %v1895_v26, 0.0 }
 0x225   :  { %v2225_v5 = vmax.f32 %v1744_v56, 0.0  ;;  %v2227_v11 = vmax.f32 %v1897_v40, 0.0 }
 0x226   :  { %v2226_v57 = vmax.f32 %v1746_v2, 0.0  ;;  %v2228_v58 = vmax.f32 %v1899_v53, 0.0 }
 0x227   :  { %v14209_v30 = vpack.c.bf16 %v2225_v5, %v2216_v16  ;;  %v14211_v31 = vpack.c.bf16 %v2227_v11, %v2218_v21 }
 0x228   :  { %v14213_v48 = vpack.c.bf16 %v2226_v57, %v2217_v54  ;;  %v14215_v27 = vpack.c.bf16 %v2228_v58, %v2219_v34  ;;  %v1749_v13 = vpop.f32.mrb[88].mxu0  ;;  %v1902_v9 = vpop.f32.mrb[88].mxu1 }
 0x229   :  { %18783 = vst [vmem:[#allocation9_spill] sm:$0xff] %v14211_v31  ;;  %v1750_v55 = vadd.f32 %v1749_v13, %v13925_v12  ;;  %v1903_v32 = vadd.f32 %v1902_v9, %v13928_v62  ;;  %v1751_v4 = vpop.f32.mrb[89].mxu0  ;;  %v1904_v56 = vpop.f32.mrb[89].mxu1 }
 0x22a   :  { %18784 = vst [vmem:[#allocation10_spill] sm:$0xff] %v14215_v27  ;;  %v1752_v41 = vadd.f32 %v1751_v4, %v13933_v60  ;;  %v1905_v26 = vadd.f32 %v1904_v56, %v13936_v7  ;;  %v1753_v40 = vpop.f32.mrb[90].mxu0  ;;  %v1906_v2 = vpop.f32.mrb[90].mxu1 }
 0x22b   :  { %v1754_v53 = vadd.f32 %v1753_v40, %v13925_v12  ;;  %v1907_v16 = vadd.f32 %v1906_v2, %v13928_v62  ;;  %v1755_v21 = vpop.f32.mrb[91].mxu0  ;;  %v1908_v5 = vpop.f32.mrb[91].mxu1  ;;  %3514 = vmatmul.mubr.bf16.gmra.mrb[132].mxu1 %v13898_v45  ;;  %v2234_v34 = vmax.f32 %v1750_v55, 0.0  ;;  %v2236_v57 = vmax.f32 %v1903_v32, 0.0 }
 0x22c   :  { %v1756_v11 = vadd.f32 %v1755_v21, %v13933_v60  ;;  %v1909_v54 = vadd.f32 %v1908_v5, %v13936_v7  ;;  %3523 = vmatprep.mubr.bf16.mxu1 %v13912_v15  ;;  %v2235_v9 = vmax.f32 %v1752_v41, 0.0  ;;  %v2237_v4 = vmax.f32 %v1905_v26, 0.0 }
 0x22d   :  { %v2243_v58 = vmax.f32 %v1754_v53, 0.0  ;;  %v2245_v13 = vmax.f32 %v1907_v16, 0.0 }
 0x22e   :  { %v2244_v56 = vmax.f32 %v1756_v11, 0.0  ;;  %v2246_v40 = vmax.f32 %v1909_v54, 0.0 }
 0x22f   :  { %v14227_v31 = vpack.c.bf16 %v2243_v58, %v2234_v34  ;;  %v14229_v2 = vpack.c.bf16 %v2245_v13, %v2236_v57 }
 0x230   :  { %v14231_v27 = vpack.c.bf16 %v2244_v56, %v2235_v9  ;;  %v14233_v45 = vpack.c.bf16 %v2246_v40, %v2237_v4  ;;  %v1759_v21 = vpop.f32.mrb[92].mxu0  ;;  %v1912_v5 = vpop.f32.mrb[92].mxu1 }
 0x231   :  { %v1760_v15 = vadd.f32 %v1759_v21, %v13925_v12  ;;  %v1913_v55 = vadd.f32 %v1912_v5, %v13928_v62  ;;  %v1761_v32 = vpop.f32.mrb[93].mxu0  ;;  %v1914_v53 = vpop.f32.mrb[93].mxu1 }
 0x232   :  { %v1762_v41 = vadd.f32 %v1761_v32, %v13933_v60  ;;  %v1915_v26 = vadd.f32 %v1914_v53, %v13936_v7  ;;  %v1763_v16 = vpop.f32.mrb[94].mxu0  ;;  %v1916_v11 = vpop.f32.mrb[94].mxu1 }
 0x233   :  { %v1764_v54 = vadd.f32 %v1763_v16, %v13925_v12  ;;  %v1917_v34 = vadd.f32 %v1916_v11, %v13928_v62  ;;  %v1765_v57 = vpop.f32.mrb[95].mxu0  ;;  %v1918_v58 = vpop.f32.mrb[95].mxu1  ;;  %3524 = vmatmul.mubr.bf16.gmra.mrb[136].mxu1 %v13910_v33  ;;  %v2252_v4 = vmax.f32 %v1760_v15, 0.0  ;;  %v2254_v56 = vmax.f32 %v1913_v55, 0.0  ;;  %v14248_v62 = vld [vmem:[%s18610_s2 + $0x8] ss:$0 sm:$0xff] }
 0x234   :  { %v1766_v13 = vadd.f32 %v1765_v57, %v13933_v60  ;;  %v1919_v9 = vadd.f32 %v1918_v58, %v13936_v7  ;;  %3533 = vmatprep.mubr.bf16.mxu1 %v13940_v35  ;;  %v2253_v5 = vmax.f32 %v1762_v41, 0.0  ;;  %v2255_v32 = vmax.f32 %v1915_v26, 0.0 }
 0x235   :  { %v2261_v40 = vmax.f32 %v1764_v54, 0.0  ;;  %v2263_v21 = vmax.f32 %v1917_v34, 0.0 }
 0x236   :  { %v2262_v53 = vmax.f32 %v1766_v13, 0.0  ;;  %v2264_v12 = vmax.f32 %v1919_v9, 0.0  ;;  %v12099_v13 = vld [vmem:[%s18609_s3 + $0x300] ss:$8 sps:$4 sm:$0xff]  }
 0x237   :  { %v14250_v33 = vpack.c.bf16 %v2261_v40, %v2252_v4  ;;  %v14252_v60 = vpack.c.bf16 %v2263_v21, %v2254_v56  ;;  %v12104_v56 = vld [vmem:[%s18609_s3 + $0x314] ss:$8 sps:$4 sm:$0xff]   ;;  %v12102_v21 = vld [vmem:[%s18609_s3 + $0x310] ss:$8 sps:$4 sm:$0xff]  }
 0x238   :  { %v14254_v7 = vpack.c.bf16 %v2262_v53, %v2253_v5  ;;  %v14256_v35 = vpack.c.bf16 %v2264_v12, %v2255_v32  ;;  %v1955_v15 = vpop.f32.mrb[96].mxu0  ;;  %v12107_v53 = vld [vmem:[%s18609_s3 + $0x324] ss:$8 sps:$4 sm:$0xff]  }
 0x239   :  { %v1956_v55 = vadd.f32 %v14248_v62, %v1955_v15  ;;  %v1957_v41 = vpop.f32.mrb[97].mxu0 }
 0x23a   :  { %v1958_v26 = vpop.f32.mrb[98].mxu0  ;;  %v12110_v41 = vld [vmem:[%s18609_s3 + $0x334] ss:$8 sps:$4 sm:$0xff]  }
 0x23b   :  { %v1959_v16 = vadd.f32 %v14248_v62, %v1958_v26  ;;  %v1960_v11 = vpop.f32.mrb[99].mxu0  ;;  %3534 = vmatmul.mubr.bf16.gmra.mrb[140].mxu1 %v13938_v52  ;;  %v2058_v54 = vmax.f32 %v1956_v55, 0.0 }
 0x23c   :  { %3576 = vmatprep.mubr.bf16.mxu1 %v13955_v18 }
 0x23d   :  { %v2067_v34 = vmax.f32 %v1959_v16, 0.0 }
 0x23f   :  { %v14262_v57 = vpack.c.bf16 %v2067_v34, %v2058_v54  ;;  %v12108_v54 = vld [vmem:[%s18609_s3 + $0x330] ss:$8 sps:$4 sm:$0xff]  }
 0x240   :  { %v1963_v58 = vpop.f32.mrb[100].mxu0 }
 0x241   :  { %v1964_v9 = vadd.f32 %v14248_v62, %v1963_v58  ;;  %v1965_v4 = vpop.f32.mrb[101].mxu0 }
 0x242   :  { %v1966_v40 = vpop.f32.mrb[102].mxu0 }
 0x243   :  { %v1967_v52 = vadd.f32 %v14248_v62, %v1966_v40  ;;  %v1968_v18 = vpop.f32.mrb[103].mxu0  ;;  %3577 = vmatmul.mubr.bf16.vlgmr.msra.gmra.mrb[96].mxu1 %v13951_v24  ;;  %v2076_v5 = vmax.f32 %v1964_v9, 0.0  ;;  %v12105_v24 = vld [vmem:[%s18609_s3 + $0x320] ss:$8 sps:$4 sm:$0xff]   ;;  %v12116_v40 = vld [vmem:[%s18609_s3 + $0x354] ss:$8 sps:$4 sm:$0xff]  }
 0x244   :  { %3586 = vmatprep.mubr.bf16.mxu1 %v13985_v63  ;;  %3698 = vmatpush1.bf16.msra.mxu1 %v12099_v13  ;;  %v12113_v13 = vld [vmem:[%s18609_s3 + $0x344] ss:$8 sps:$4 sm:$0xff]  }
 0x245   :  { %v2085_v32 = vmax.f32 %v1967_v52, 0.0  ;;  %3699 = vmatprep.subr.bf16.mxu1 %v12104_v56 }
 0x247   :  { %v14280_v12 = vpack.c.bf16 %v2085_v32, %v2076_v5  ;;  %v12114_v5 = vld [vmem:[%s18609_s3 + $0x350] ss:$8 sps:$4 sm:$0xff]  }
 0x248   :  { %v1971_v15 = vpop.f32.mrb[104].mxu0  ;;  %3700 = vmatpush1.bf16.msra.mxu1 %v12102_v21 }
 0x249   :  { %v1972_v63 = vadd.f32 %v14248_v62, %v1971_v15  ;;  %v1973_v55 = vpop.f32.mrb[105].mxu0  ;;  %3701 = vmatprep.subr.bf16.mxu1 %v12107_v53  ;;  %v12119_v15 = vld [vmem:[%s18609_s3 + $0x364] ss:$8 sps:$4 sm:$0xff]  }
 0x24a   :  { %v1974_v26 = vpop.f32.mrb[106].mxu0 }
 0x24b   :  { %v1975_v16 = vadd.f32 %v14248_v62, %v1974_v26  ;;  %v1976_v11 = vpop.f32.mrb[107].mxu0  ;;  %3587 = vmatmul.mubr.bf16.gmra.mrb[100].mxu1 %v13981_v61  ;;  %v2094_v34 = vmax.f32 %v1972_v63, 0.0  ;;  %v12111_v61 = vld [vmem:[%s18609_s3 + $0x340] ss:$8 sps:$4 sm:$0xff]  }
 0x24c   :  { %3596 = vmatprep.mubr.bf16.mxu1 %v14015_v29  ;;  %3702 = vmatpush1.bf16.msra.mxu1 %v12105_v24 }
 0x24d   :  { %v2103_v58 = vmax.f32 %v1975_v16, 0.0  ;;  %3703 = vmatprep.subr.bf16.mxu1 %v12110_v41  ;;  %v12122_v41 = vld [vmem:[%s18609_s3 + $0x374] ss:$8 sps:$4 sm:$0xff]  }
 0x24f   :  { %v14298_v9 = vpack.c.bf16 %v2103_v58, %v2094_v34 }
 0x250   :  { %v1979_v4 = vpop.f32.mrb[108].mxu0  ;;  %3704 = vmatpush1.bf16.msra.mxu1 %v12108_v54  ;;  %v12120_v54 = vld [vmem:[%s18609_s3 + $0x370] ss:$8 sps:$4 sm:$0xff]  }
 0x251   :  { %v1980_v29 = vadd.f32 %v14248_v62, %v1979_v4  ;;  %v1981_v56 = vpop.f32.mrb[109].mxu0  ;;  %3705 = vmatprep.subr.bf16.mxu1 %v12113_v13  ;;  %v12125_v13 = vld [vmem:[%s18609_s3 + $0x384] ss:$8 sps:$4 sm:$0xff]  }
 0x252   :  { %v1982_v52 = vpop.f32.mrb[110].mxu0  ;;  %v12128_v56 = vld [vmem:[%s18609_s3 + $0x394] ss:$8 sps:$4 sm:$0xff]  }
 0x253   :  { %v1983_v18 = vadd.f32 %v14248_v62, %v1982_v52  ;;  %v1984_v21 = vpop.f32.mrb[111].mxu0  ;;  %3597 = vmatmul.mubr.bf16.gmra.mrb[104].mxu1 %v14011_v22  ;;  %v2112_v32 = vmax.f32 %v1980_v29, 0.0  ;;  %v12117_v22 = vld [vmem:[%s18609_s3 + $0x360] ss:$8 sps:$4 sm:$0xff]  }
 0x254   :  { %3606 = vmatprep.mubr.bf16.mxu1 %v14045_v51  ;;  %3706 = vmatpush1.bf16.msra.mxu1 %v12111_v61  ;;  %v12126_v21 = vld [vmem:[%s18609_s3 + $0x390] ss:$8 sps:$4 sm:$0xff]  }
 0x255   :  { %v2121_v53 = vmax.f32 %v1983_v18, 0.0  ;;  %3707 = vmatprep.subr.bf16.mxu1 %v12116_v40 }
 0x257   :  { %v14316_v24 = vpack.c.bf16 %v2121_v53, %v2112_v32  ;;  %v12131_v53 = vld [vmem:[%s18609_s3 + $0x3a4] ss:$8 sps:$4 sm:$0xff]  }
 0x258   :  { %v1987_v63 = vpop.f32.mrb[112].mxu0  ;;  %3708 = vmatpush1.bf16.msra.mxu1 %v12114_v5 }
 0x259   :  { %v1988_v51 = vadd.f32 %v14248_v62, %v1987_v63  ;;  %v1989_v55 = vpop.f32.mrb[113].mxu0  ;;  %3709 = vmatprep.subr.bf16.mxu1 %v12119_v15 }
 0x25a   :  { %v1990_v26 = vpop.f32.mrb[114].mxu0 }
 0x25b   :  { %v1991_v16 = vadd.f32 %v14248_v62, %v1990_v26  ;;  %v1992_v11 = vpop.f32.mrb[115].mxu0  ;;  %3607 = vmatmul.mubr.bf16.gmra.mrb[108].mxu1 %v14041_v25  ;;  %v2130_v34 = vmax.f32 %v1988_v51, 0.0  ;;  %v12123_v25 = vld [vmem:[%s18609_s3 + $0x380] ss:$8 sps:$4 sm:$0xff]   ;;  %v12134_v51 = vld [vmem:[%s18609_s3 + $0x3b4] ss:$8 sps:$4 sm:$0xff]  }
 0x25c   :  { %3616 = vmatprep.mubr.bf16.mxu1 %v14075_v50  ;;  %3710 = vmatpush1.bf16.msra.mxu1 %v12117_v22 }
 0x25d   :  { %v2139_v58 = vmax.f32 %v1991_v16, 0.0  ;;  %3711 = vmatprep.subr.bf16.mxu1 %v12122_v41  ;;  %v12132_v16 = vld [vmem:[%s18609_s3 + $0x3b0] ss:$8 sps:$4 sm:$0xff]  }
 0x25f   :  { %v14334_v4 = vpack.c.bf16 %v2139_v58, %v2130_v34  ;;  %v12137_v34 = vld [vmem:[%s18609_s3 + $0x3c4] ss:$8 sps:$4 sm:$0xff]  }
 0x260   :  { %v1995_v61 = vpop.f32.mrb[116].mxu0  ;;  %3712 = vmatpush1.bf16.msra.mxu1 %v12120_v54 }
 0x261   :  { %v1996_v50 = vadd.f32 %v14248_v62, %v1995_v61  ;;  %v1997_v29 = vpop.f32.mrb[117].mxu0  ;;  %3713 = vmatprep.subr.bf16.mxu1 %v12125_v13 }
 0x262   :  { %v1998_v40 = vpop.f32.mrb[118].mxu0 }
 0x263   :  { %v1999_v52 = vadd.f32 %v14248_v62, %v1998_v40  ;;  %v2000_v18 = vpop.f32.mrb[119].mxu0  ;;  %3617 = vmatmul.mubr.bf16.gmra.mrb[112].mxu1 %v14071_v42  ;;  %v2148_v5 = vmax.f32 %v1996_v50, 0.0  ;;  %v12129_v42 = vld [vmem:[%s18609_s3 + $0x3a0] ss:$8 sps:$4 sm:$0xff]   ;;  %v12138_v40 = vld [vmem:[%s18609_s3 + $0x3d0] ss:$8 sps:$4 sm:$0xff]  }
 0x264   :  { %3626 = vmatprep.mubr.bf16.mxu1 %v14105_v1  ;;  %3714 = vmatpush1.bf16.msra.mxu1 %v12123_v25  ;;  %v12140_v25 = vld [vmem:[%s18609_s3 + $0x3d4] ss:$8 sps:$4 sm:$0xff]  }
 0x265   :  { %v2157_v32 = vmax.f32 %v1999_v52, 0.0  ;;  %3715 = vmatprep.subr.bf16.mxu1 %v12128_v56 }
 0x267   :  { %v14352_v15 = vpack.c.bf16 %v2157_v32, %v2148_v5 }
 0x268   :  { %v2003_v63 = vpop.f32.mrb[120].mxu0  ;;  %3716 = vmatpush1.bf16.msra.mxu1 %v12126_v21  ;;  %v12143_v21 = vld [vmem:[%s18609_s3 + $0x3e4] ss:$8 sps:$4 sm:$0xff]  }
 0x269   :  { %v2004_v1 = vadd.f32 %v14248_v62, %v2003_v63  ;;  %v2005_v22 = vpop.f32.mrb[121].mxu0  ;;  %3717 = vmatprep.subr.bf16.mxu1 %v12131_v53  ;;  %v12146_v63 = vld [vmem:[%s18609_s3 + $0x3f4] ss:$8 sps:$4 sm:$0xff]  }
 0x26a   :  { %v2006_v55 = vpop.f32.mrb[122].mxu0 }
 0x26b   :  { %v2007_v41 = vadd.f32 %v14248_v62, %v2006_v55  ;;  %v2008_v26 = vpop.f32.mrb[123].mxu0  ;;  %3627 = vmatmul.mubr.bf16.gmra.mrb[116].mxu1 %v14101_v39  ;;  %v2166_v11 = vmax.f32 %v2004_v1, 0.0  ;;  %v12135_v39 = vld [vmem:[%s18609_s3 + $0x3c0] ss:$8 sps:$4 sm:$0xff]  }
 0x26c   :  { %3636 = vmatprep.mubr.bf16.mxu1 %v14135_v0  ;;  %3718 = vmatpush1.bf16.msra.mxu1 %v12129_v42  ;;  %v12149_v26 = vld [vmem:[%s18609_s3 + $0x404] ss:$8 sps:$4 sm:$0xff]  }
 0x26d   :  { %v2175_v54 = vmax.f32 %v2007_v41, 0.0  ;;  %3719 = vmatprep.subr.bf16.mxu1 %v12134_v51  ;;  %v12144_v51 = vld [vmem:[%s18609_s3 + $0x3f0] ss:$8 sps:$4 sm:$0xff]  }
 0x26f   :  { %v14370_v58 = vpack.c.bf16 %v2175_v54, %v2166_v11 }
 0x270   :  { %v2011_v13 = vpop.f32.mrb[124].mxu0  ;;  %3720 = vmatpush1.bf16.msra.mxu1 %v12132_v16 }
 0x271   :  { %v2012_v0 = vadd.f32 %v14248_v62, %v2011_v13  ;;  %v2013_v61 = vpop.f32.mrb[125].mxu0  ;;  %3721 = vmatprep.subr.bf16.mxu1 %v12137_v34 }
 0x272   :  { %v2014_v50 = vpop.f32.mrb[126].mxu0 }
 0x273   :  { %v2015_v29 = vadd.f32 %v14248_v62, %v2014_v50  ;;  %v2016_v56 = vpop.f32.mrb[127].mxu0  ;;  %3637 = vmatmul.mubr.bf16.gmra.mrb[120].mxu1 %v14131_v8  ;;  %v2184_v52 = vmax.f32 %v2012_v0, 0.0  ;;  %v12141_v8 = vld [vmem:[%s18609_s3 + $0x3e0] ss:$8 sps:$4 sm:$0xff]  }
 0x274   :  { %3646 = vmatprep.mubr.bf16.mxu1 %v14165_v37  ;;  %3722 = vmatpush1.bf16.msra.mxu1 %v12135_v39 }
 0x275   :  { %v2193_v18 = vmax.f32 %v2015_v29, 0.0  ;;  %3723 = vmatprep.subr.bf16.mxu1 %v12140_v25 }
 0x277   :  { %v14388_v5 = vpack.c.bf16 %v2193_v18, %v2184_v52 }
 0x278   :  { %v2019_v32 = vpop.f32.mrb[128].mxu0  ;;  %3724 = vmatpush1.bf16.msra.mxu1 %v12138_v40 }
 0x279   :  { %v2020_v37 = vadd.f32 %v14248_v62, %v2019_v32  ;;  %v2021_v53 = vpop.f32.mrb[129].mxu0  ;;  %3725 = vmatprep.subr.bf16.mxu1 %v12143_v21 }
 0x27a   :  { %v2022_v42 = vpop.f32.mrb[130].mxu0 }
 0x27b   :  { %v2023_v1 = vadd.f32 %v14248_v62, %v2022_v42  ;;  %v2024_v22 = vpop.f32.mrb[131].mxu0  ;;  %3647 = vmatmul.mubr.bf16.gmra.mrb[124].mxu1 %v14161_v59  ;;  %v2202_v55 = vmax.f32 %v2020_v37, 0.0 }
 0x27c   :  { %3656 = vmatprep.mubr.bf16.mxu1 %v14195_v36  ;;  %3726 = vmatpush1.bf16.msra.mxu1 %v12141_v8  ;;  %v12159_v22 = vld [vmem:[%s18609_s3 + $0x440] ss:$8 sps:$4 sm:$0xff]  }
 0x27d   :  { %v2211_v41 = vmax.f32 %v2023_v1, 0.0  ;;  %3727 = vmatprep.subr.bf16.mxu1 %v12146_v63 }
 0x27f   :  { %v14406_v16 = vpack.c.bf16 %v2211_v41, %v2202_v55  ;;  %v12165_v55 = vld [vmem:[%s18609_s3 + $0x460] ss:$8 sps:$4 sm:$0xff]   ;;  %v18787_v41 = vld [vmem:[#allocation8_spill] sm:$0xff] }
 0x280   :  { %v2027_v11 = vpop.f32.mrb[132].mxu0  ;;  %3728 = vmatpush1.bf16.msra.mxu1 %v12144_v51  ;;  %v12167_v51 = vld [vmem:[%s18609_s3 + $0x464] ss:$8 sps:$4 sm:$0xff]  }
 0x281   :  { %v2028_v59 = vadd.f32 %v14248_v62, %v2027_v11  ;;  %v2029_v54 = vpop.f32.mrb[133].mxu0  ;;  %3850 = vmatprep.subr.bf16.mxu1 %v12149_v26  ;;  %v18788_v26 = vld [vmem:[#allocation7_spill] sm:$0xff]  ;;  %v18789_v11 = vld [vmem:[#allocation10_spill] sm:$0xff] }
 0x282   :  { %v2030_v36 = vpop.f32.mrb[134].mxu0 }
 0x283   :  { %v2031_v34 = vadd.f32 %v14248_v62, %v2030_v36  ;;  %v2032_v13 = vpop.f32.mrb[135].mxu0  ;;  %3657 = vmatmul.mubr.bf16.gmra.mrb[128].mxu1 %v14191_v17  ;;  %v2220_v39 = vmax.f32 %v2028_v59, 0.0  ;;  %v18790_v59 = vld [vmem:[#allocation9_spill] sm:$0xff] }
 0x284   :  { %3666 = vmatprep.mubr.bf16.mxu1 %v14213_v48 }
 0x285   :  { %v2229_v0 = vmax.f32 %v2031_v34, 0.0 }
 0x287   :  { %v14412_v61 = vpack.c.bf16 %v2229_v0, %v2220_v39 }
 0x288   :  { %v2035_v25 = vpop.f32.mrb[136].mxu0 }
 0x289   :  { %v2036_v50 = vadd.f32 %v14248_v62, %v2035_v25  ;;  %v2037_v29 = vpop.f32.mrb[137].mxu0 }
 0x28a   :  { %v2038_v56 = vpop.f32.mrb[138].mxu0 }
 0x28b   :  { %v2039_v40 = vadd.f32 %v14248_v62, %v2038_v56  ;;  %v2040_v52 = vpop.f32.mrb[139].mxu0  ;;  %3667 = vmatmul.mubr.bf16.gmra.mrb[132].mxu1 %v14209_v30  ;;  %v2238_v18 = vmax.f32 %v2036_v50, 0.0 }
 0x28c   :  { %3676 = vmatprep.mubr.bf16.mxu1 %v14231_v27  ;;  %v12147_v27 = vld [vmem:[%s18609_s3 + $0x400] ss:$8 sps:$4 sm:$0xff]  }
 0x28d   :  { %v2247_v17 = vmax.f32 %v2039_v40, 0.0 }
 0x28f   :  { %v14418_v21 = vpack.c.bf16 %v2247_v17, %v2238_v18 }
 0x290   :  { %v2043_v48 = vpop.f32.mrb[140].mxu0 }
 0x291   :  { %v2044_v32 = vadd.f32 %v14248_v62, %v2043_v48  ;;  %v2045_v8 = vpop.f32.mrb[141].mxu0 }
 0x292   :  { %v2046_v37 = vpop.f32.mrb[142].mxu0 }
 0x293   :  { %v2047_v53 = vadd.f32 %v14248_v62, %v2046_v37  ;;  %v2048_v63 = vpop.f32.mrb[143].mxu0  ;;  %3677 = vmatmul.mubr.bf16.gmra.mrb[136].mxu1 %v14227_v31  ;;  %v2256_v42 = vmax.f32 %v2044_v32, 0.0  ;;  %v12152_v62 = vld [vmem:[%s18609_s3 + $0x414] ss:$8 sps:$4 sm:$0xff]   ;;  %v12150_v31 = vld [vmem:[%s18609_s3 + $0x410] ss:$8 sps:$4 sm:$0xff]  }
 0x294   :  { %3686 = vmatprep.mubr.bf16.mxu1 %v14254_v7  ;;  %v12161_v7 = vld [vmem:[%s18609_s3 + $0x444] ss:$8 sps:$4 sm:$0xff]  }
 0x295   :  { %v2265_v30 = vmax.f32 %v2047_v53, 0.0 }
 0x297   :  { %v14424_v1 = vpack.c.bf16 %v2265_v30, %v2256_v42 }
 0x29b   :  { %3687 = vmatmul.mubr.bf16.gmra.mrb[140].mxu1 %v14250_v33  ;;  %v12153_v33 = vld [vmem:[%s18609_s3 + $0x420] ss:$8 sps:$4 sm:$0xff]  }
 0x29c   :  { %3729 = vmatprep.mubr.bf16.mxu1 %v13957_v19  ;;  %v12155_v19 = vld [vmem:[%s18609_s3 + $0x424] ss:$8 sps:$4 sm:$0xff]  }
 0x2a3   :  { %3730 = vmatmul.mubr.bf16.vlgmr.msra.gmra.mrb[96].mxu1 %v13953_v44  ;;  %v12158_v44 = vld [vmem:[%s18609_s3 + $0x434] ss:$8 sps:$4 sm:$0xff]  }
 0x2a4   :  { %3739 = vmatprep.mubr.bf16.mxu1 %v13987_v10  ;;  %3851 = vmatpush1.bf16.msra.mxu1 %v12147_v27  ;;  %v12156_v10 = vld [vmem:[%s18609_s3 + $0x430] ss:$8 sps:$4 sm:$0xff]  }
 0x2a5   :  { %3852 = vmatprep.subr.bf16.mxu1 %v12152_v62 }
 0x2a8   :  { %3853 = vmatpush1.bf16.msra.mxu1 %v12150_v31 }
 0x2a9   :  { %3854 = vmatprep.subr.bf16.mxu1 %v12155_v19 }
 0x2ab   :  { %3740 = vmatmul.mubr.bf16.gmra.mrb[100].mxu1 %v13983_v43  ;;  %v12164_v43 = vld [vmem:[%s18609_s3 + $0x454] ss:$8 sps:$4 sm:$0xff]  }
 0x2ac   :  { %3749 = vmatprep.mubr.bf16.mxu1 %v14017_v23  ;;  %3855 = vmatpush1.bf16.msra.mxu1 %v12153_v33  ;;  %v12162_v23 = vld [vmem:[%s18609_s3 + $0x450] ss:$8 sps:$4 sm:$0xff]  }
 0x2ad   :  { %3856 = vmatprep.subr.bf16.mxu1 %v12158_v44 }
 0x2b0   :  { %3857 = vmatpush1.bf16.msra.mxu1 %v12156_v10 }
 0x2b1   :  { %3858 = vmatprep.subr.bf16.mxu1 %v12161_v7 }
 0x2b3   :  { %3750 = vmatmul.mubr.bf16.gmra.mrb[104].mxu1 %v14013_v47  ;;  %v12170_v47 = vld [vmem:[%s18609_s3 + $0x474] ss:$8 sps:$4 sm:$0xff]  }
 0x2b4   :  { %3759 = vmatprep.mubr.bf16.mxu1 %v14047_v14  ;;  %3859 = vmatpush1.bf16.msra.mxu1 %v12159_v22  ;;  %v12168_v14 = vld [vmem:[%s18609_s3 + $0x470] ss:$8 sps:$4 sm:$0xff]   ;;  %s12569_s3 = smov 44  }
 0x2b5   :  { %3860 = vmatprep.subr.bf16.mxu1 %v12164_v43 }
 0x2b8   :  { %3861 = vmatpush1.bf16.msra.mxu1 %v12162_v23 }
 0x2b9   :  { %3862 = vmatprep.subr.bf16.mxu1 %v12167_v51 }
 0x2bb   :  { %3760 = vmatmul.mubr.bf16.gmra.mrb[108].mxu1 %v14043_v46  ;;  %v18785_v46 = vld [vmem:[#allocation6_spill] sm:$0xff] }
 0x2bc   :  { %3769 = vmatprep.mubr.bf16.mxu1 %v14077_v6  ;;  %3863 = vmatpush1.bf16.msra.mxu1 %v12165_v55  ;;  %v18786_v6 = vld [vmem:[#allocation5_spill] sm:$0xff] }
 0x2bd   :  { %3864 = vmatprep.subr.bf16.mxu1 %v12170_v47 }
 0x2c0   :  { %3865 = vmatpush1.bf16.msra.mxu1 %v12168_v14 }
 0x2c3   :  { %3770 = vmatmul.mubr.bf16.gmra.mrb[112].mxu1 %v14073_v20 }
 0x2c4   :  { %3779 = vmatprep.mubr.bf16.mxu1 %v14107_v3 }
 0x2cb   :  { %3780 = vmatmul.mubr.bf16.gmra.mrb[116].mxu1 %v14103_v38 }
 0x2cc   :  { %3789 = vmatprep.mubr.bf16.mxu1 %v14137_v49  ;;  %v18791_v49 = vmov 0  }
 0x2d3   :  { %3790 = vmatmul.mubr.bf16.gmra.mrb[120].mxu1 %v14133_v28 }
 0x2d4   :  { %3799 = vmatprep.mubr.bf16.mxu1 %v18785_v46 }
 0x2db   :  { %3800 = vmatmul.mubr.bf16.gmra.mrb[124].mxu1 %v18786_v6 }
 0x2dc   :  { %3809 = vmatprep.mubr.bf16.mxu1 %v18787_v41 }
 0x2e3   :  { %3810 = vmatmul.mubr.bf16.gmra.mrb[128].mxu1 %v18788_v26 }
 0x2e4   :  { %3819 = vmatprep.mubr.bf16.mxu1 %v18789_v11 }
 0x2eb   :  { %3820 = vmatmul.mubr.bf16.gmra.mrb[132].mxu1 %v18790_v59 }
 0x2ec   :  { %3829 = vmatprep.mubr.bf16.mxu1 %v14233_v45 }
 0x2f3   :  { %3830 = vmatmul.mubr.bf16.gmra.mrb[136].mxu1 %v14229_v2 }
 0x2f4   :  { %3839 = vmatprep.mubr.bf16.mxu1 %v14256_v35 }
 0x2fb   :  { %3840 = vmatmul.mubr.bf16.gmra.mrb[140].mxu1 %v14252_v60 }
 0x2fc   :  { %3882 = vmatprep.mubr.bf16.mxu1 %v18791_v49 }
 0x303   :  { %3883 = vmatmul.mubr.bf16.vlgmr.msra.gmra.mrb[96].mxu1 %v14262_v57 }
 0x304   :  { %3892 = vmatprep.mubr.bf16.mxu1 %v18791_v49 }
 0x30b   :  { %3893 = vmatmul.mubr.bf16.gmra.mrb[100].mxu1 %v14280_v12 }
 0x30c   :  { %3902 = vmatprep.mubr.bf16.mxu1 %v18791_v49 }
 0x313   :  { %3903 = vmatmul.mubr.bf16.gmra.mrb[104].mxu1 %v14298_v9 }
 0x314   :  { %3912 = vmatprep.mubr.bf16.mxu1 %v18791_v49 }
 0x31b   :  { %3913 = vmatmul.mubr.bf16.gmra.mrb[108].mxu1 %v14316_v24 }
 0x31c   :  { %3922 = vmatprep.mubr.bf16.mxu1 %v18791_v49 }
 0x323   :  { %3923 = vmatmul.mubr.bf16.gmra.mrb[112].mxu1 %v14334_v4 }
 0x324   :  { %3932 = vmatprep.mubr.bf16.mxu1 %v18791_v49 }
 0x32b   :  { %3933 = vmatmul.mubr.bf16.gmra.mrb[116].mxu1 %v14352_v15 }
 0x32c   :  { %3942 = vmatprep.mubr.bf16.mxu1 %v18791_v49 }
 0x333   :  { %3943 = vmatmul.mubr.bf16.gmra.mrb[120].mxu1 %v14370_v58 }
 0x334   :  { %3952 = vmatprep.mubr.bf16.mxu1 %v18791_v49 }
 0x33b   :  { %3953 = vmatmul.mubr.bf16.gmra.mrb[124].mxu1 %v14388_v5 }
 0x33c   :  { %3962 = vmatprep.mubr.bf16.mxu1 %v18791_v49 }
 0x343   :  { %3963 = vmatmul.mubr.bf16.gmra.mrb[128].mxu1 %v14406_v16 }
 0x344   :  { %3972 = vmatprep.mubr.bf16.mxu1 %v18791_v49 }
 0x34b   :  { %3973 = vmatmul.mubr.bf16.gmra.mrb[132].mxu1 %v14412_v61 }
 0x34c   :  { %3982 = vmatprep.mubr.bf16.mxu1 %v18791_v49 }
 0x353   :  { %3983 = vmatmul.mubr.bf16.gmra.mrb[136].mxu1 %v14418_v21 }
 0x354   :  { %3992 = vmatprep.mubr.bf16.mxu1 %v18791_v49 }
 0x35b   :  { %3993 = vmatmul.mubr.bf16.gmra.mrb[140].mxu1 %v14424_v1 }
 0x3d6   :  { %v14520_v20 = vpop.f32.mrb[96].mxu1 }
 0x3d7   :  { %v3886_v38 = vpop.f32.mrb[97].mxu1  ;;  %v4301_v28 = vrot.slane %v14520_v20, 3  ;;  %v4028_v2 = vrot.slane %v14520_v20, 1  ;;  %v4462_v45 = vrot.slane %v14520_v20, 4  ;;  %v4164_v60 = vrot.slane %v14520_v20, 2 }
 0x3d8   :  { %v14522_v3 = vpop.f32.mrb[98].mxu1  ;;  %v4465_v4 = vrot.slane %v3886_v38, 4 }
 0x3d9   :  { %v3890_v35 = vpop.f32.mrb[99].mxu1  ;;  %v4302_v57 = vrot.slane %v14522_v3, 3  ;;  %v4029_v12 = vrot.slane %v14522_v3, 1  ;;  %v4463_v9 = vrot.slane %v14522_v3, 4  ;;  %v4165_v24 = vrot.slane %v14522_v3, 2 }
 0x3da   :  { %v4466_v15 = vrot.slane %v3890_v35, 4 }
 0x3db   :  { %v4303_v58 = vsel %vm4300_vm9, %v4301_v28, %v4302_v57  ;;  %v4030_v5 = vsel %vm265_vm1, %v4028_v2, %v4029_v12  ;;  %v4464_v16 = vsel %vm4461_vm10, %v4462_v45, %v4463_v9  ;;  %v4166_v54 = vsel %vm411_vm0, %v4164_v60, %v4165_v24 }
 0x3dc   :  { %4341 = vrot.lane.b32.xlu1 %v4303_v58, %s12569_s3  ;;  %4068 = vrot.lane.b32.xlu0 %v4030_v5, %s12570_s21  ;;  %v4467_v36 = vsel %vm4461_vm10, %v4465_v4, %v4466_v15 }
 0x3de   :  { %v14539_v34 = vpop.f32.mrb[100].mxu1 }
 0x3df   :  { %v14541_v13 = vpop.f32.mrb[101].mxu1  ;;  %v4031_v39 = vrot.slane %v14539_v34, 1  ;;  %v4304_v0 = vrot.slane %v14539_v34, 3  ;;  %v4167_v61 = vrot.slane %v14539_v34, 2  ;;  %v4468_v25 = vrot.slane %v14539_v34, 4 }
 0x3e0   :  { %v4470_v50 = vrot.slane %v14541_v13, 4  ;;  %4542 = vrot.lane.b32.xlu1 %v4464_v16, %s12571_s22  ;;  %4204 = vrot.lane.b32.xlu0 %v4166_v54, %s12572_s24  ;;  %v14550_v29 = vpop.f32.mrb[102].mxu1 }
 0x3e1   :  { %v3900_v56 = vpop.f32.mrb[103].mxu1  ;;  %v4032_v40 = vsel %vm265_vm1, %v4029_v12, %v4031_v39  ;;  %v4305_v52 = vsel %vm4300_vm9, %v4302_v57, %v4304_v0  ;;  %v4168_v18 = vsel %vm411_vm0, %v4165_v24, %v4167_v61  ;;  %v4469_v17 = vsel %vm4461_vm10, %v4463_v9, %v4468_v25 }
 0x3e2   :  { %v4471_v21 = vsel %vm4461_vm10, %v4466_v15, %v4470_v50  ;;  %v4033_v32 = vrot.slane %v14550_v29, 1  ;;  %v4169_v8 = vrot.slane %v14550_v29, 2  ;;  %v4472_v37 = vrot.slane %v14550_v29, 4 }
 0x3e3   :  { %v4306_v53 = vrot.slane %v14550_v29, 3  ;;  %v4475_v62 = vrot.slane %v3900_v56, 4 }
 0x3e4   :  { %4544 = vrot.lane.b32.xlu0 %v4467_v36, %s12571_s22  ;;  %4072 = vrot.lane.b32.xlu1 %v4031_v39, %s12570_s21 }
 0x3e6   :  { %v14561_v48 = vpop.f32.mrb[104].mxu1 }
 0x3e7   :  { %v3906_v63 = vpop.f32.mrb[105].mxu1  ;;  %v4034_v42 = vrot.slane %v14561_v48, 1  ;;  %v4170_v30 = vrot.slane %v14561_v48, 2  ;;  %v4473_v1 = vrot.slane %v14561_v48, 4  ;;  %v4307_v27 = vrot.slane %v14561_v48, 3 }
 0x3e8   :  { %v4476_v31 = vrot.slane %v3906_v63, 4  ;;  %4345 = vrot.lane.b32.xlu0 %v4304_v0, %s12569_s3  ;;  %4208 = vrot.lane.b32.xlu1 %v4167_v61, %s12572_s24  ;;  %v14573_v19 = vpop.f32.mrb[106].mxu1 }
 0x3e9   :  { %v14575_v33 = vpop.f32.mrb[107].mxu1  ;;  %v4035_v44 = vsel %vm265_vm1, %v4033_v32, %v4034_v42  ;;  %v4171_v10 = vsel %vm411_vm0, %v4169_v8, %v4170_v30  ;;  %v4474_v7 = vsel %vm4461_vm10, %v4472_v37, %v4473_v1  ;;  %v14581_v22 = vsel %vm4300_vm9, %v4306_v53, %v4307_v27 }
 0x3ea   :  { %v4480_v43 = vrot.slane %v14575_v33, 4  ;;  %v4036_v23 = vrot.slane %v14573_v19, 1  ;;  %v14586_v51 = vsel %vm4461_vm10, %v4475_v62, %v4476_v31  ;;  %v4309_v55 = vrot.slane %v14573_v19, 3 }
 0x3eb   :  { %v4172_v47 = vrot.slane %v14573_v19, 2  ;;  %v4478_v14 = vrot.slane %v14573_v19, 4 }
 0x3ec   :  { %4550 = vrot.lane.b32.xlu0 %v4468_v25, %s12571_s22  ;;  %4070 = vrot.lane.b32.xlu1 %v4032_v40, %s12570_s21  ;;  %v14596_v46 = vsel %vm265_vm1, %v4034_v42, %v4036_v23  ;;  %v14601_v6 = vsel %vm4300_vm9, %v4307_v27, %v4309_v55  ;;  %v14606_v41 = vsel %vm4461_vm10, %v4476_v31, %v4480_v43 }
 0x3ed   :  { %v14611_v26 = vsel %vm411_vm0, %v4170_v30, %v4172_v47  ;;  %v14616_v11 = vsel %vm4461_vm10, %v4473_v1, %v4478_v14 }
 0x3ee   :  { %v14618_v59 = vpop.f32.mrb[108].mxu1 }
 0x3ef   :  { %18792 = vst [vmem:[#allocation6_spill] sm:$0xff] %v14618_v59  ;;  %v3916_v38 = vpop.f32.mrb[109].mxu1  ;;  %v4174_v2 = vrot.slane %v14618_v59, 2  ;;  %v4038_v45 = vrot.slane %v14618_v59, 1  ;;  %v4482_v60 = vrot.slane %v14618_v59, 4  ;;  %v4311_v35 = vrot.slane %v14618_v59, 3 }
 0x3f0   :  { %4343 = vrot.lane.b32.xlu0 %v4305_v52, %s12569_s3  ;;  %4206 = vrot.lane.b32.xlu1 %v4168_v18, %s12572_s24  ;;  %v14622_v28 = vpop.f32.mrb[110].mxu1  ;;  %v4485_v15 = vrot.slane %v3916_v38, 4 }
 0x3f1   :  { %18793 = vst [vmem:[#allocation5_spill] sm:$0xff] %v14622_v28  ;;  %v3920_v57 = vpop.f32.mrb[111].mxu1  ;;  %v4175_v12 = vrot.slane %v14622_v28, 2  ;;  %v4039_v9 = vrot.slane %v14622_v28, 1  ;;  %v4483_v24 = vrot.slane %v14622_v28, 4  ;;  %v4312_v4 = vrot.slane %v14622_v28, 3 }
 0x3f2   :  { %v4486_v58 = vrot.slane %v3920_v57, 4 }
 0x3f3   :  { %v14633_v5 = vsel %vm411_vm0, %v4174_v2, %v4175_v12  ;;  %v14636_v16 = vsel %vm265_vm1, %v4038_v45, %v4039_v9  ;;  %v14639_v54 = vsel %vm4461_vm10, %v4482_v60, %v4483_v24  ;;  %v14642_v36 = vsel %vm4300_vm9, %v4311_v35, %v4312_v4 }
 0x3f4   :  { %4546 = vrot.lane.b32.xlu1 %v4469_v17, %s12571_s22  ;;  %4548 = vrot.lane.b32.xlu0 %v4471_v21, %s12571_s22  ;;  %v14647_v39 = vsel %vm4461_vm10, %v4485_v15, %v4486_v58 }
 0x3f6   :  { %v14649_v0 = vpop.f32.mrb[112].mxu1 }
 0x3f7   :  { %18794 = vst [vmem:[#allocation8_spill] sm:$0xff] %v14649_v0  ;;  %v14651_v61 = vpop.f32.mrb[113].mxu1  ;;  %v18644_v25 = vrot.slane %v14649_v0, 1  ;;  %v18638_v56 = vrot.slane %v14649_v0, 2  ;;  %v18637_v40 = vrot.slane %v14649_v0, 3  ;;  %v18636_v52 = vrot.slane %v14649_v0, 4 }
 0x3f8   :  { %v18635_v18 = vrot.slane %v14651_v61, 4  ;;  %4552 = vrot.lane.b32.xlu1 %v4470_v50, %s12571_s22  ;;  %4074 = vrot.lane.b32.xlu0 %v4035_v44, %s12570_s21  ;;  %v14662_v17 = vpop.f32.mrb[114].mxu1 }
 0x3f9   :  { %18795 = vst [vmem:[#allocation7_spill] sm:$0xff] %v14662_v17  ;;  %v3930_v21 = vpop.f32.mrb[115].mxu1  ;;  %v14667_v32 = vsel %vm265_vm1, %v4039_v9, %v18644_v25  ;;  %v14672_v8 = vsel %vm411_vm0, %v4175_v12, %v18638_v56  ;;  %v14677_v13 = vsel %vm4300_vm9, %v4312_v4, %v18637_v40  ;;  %v14682_v50 = vsel %vm4461_vm10, %v4483_v24, %v18636_v52 }
 0x3fa   :  { %v14687_v37 = vsel %vm4461_vm10, %v4486_v58, %v18635_v18  ;;  %v4179_v63 = vrot.slane %v14662_v17, 2  ;;  %v4492_v42 = vrot.slane %v14662_v17, 4  ;;  %v4043_v30 = vrot.slane %v14662_v17, 1 }
 0x3fb   :  { %v4316_v1 = vrot.slane %v14662_v17, 3 }
 0x3fc   :  { %4210 = vrot.lane.b32.xlu1 %v4171_v10, %s12572_s24  ;;  %4554 = vrot.lane.b32.xlu0 %v4474_v7, %s12571_s22  ;;  %v4495_v7 = vrot.slane %v3930_v21, 4 }
 0x3fe   :  { %v14691_v53 = vpop.f32.mrb[116].mxu1 }
 0x3ff   :  { %18796 = vst [vmem:[#allocation10_spill] sm:$0xff] %v14691_v53  ;;  %v3936_v27 = vpop.f32.mrb[117].mxu1  ;;  %v4180_v62 = vrot.slane %v14691_v53, 2  ;;  %v4493_v31 = vrot.slane %v14691_v53, 4  ;;  %v4044_v44 = vrot.slane %v14691_v53, 1  ;;  %v4317_v10 = vrot.slane %v14691_v53, 3 }
 0x400   :  { %v4496_v38 = vrot.slane %v3936_v27, 4  ;;  %4347 = vrot.lane.b32.xlu1 %v14581_v22, %s12569_s3  ;;  %4078 = vrot.lane.b32.xlu0 %v4036_v23, %s12570_s21  ;;  %v14706_v2 = vpop.f32.mrb[118].mxu1 }
 0x401   :  { %v14708_v45 = vpop.f32.mrb[119].mxu1  ;;  %v14711_v60 = vsel %vm411_vm0, %v4179_v63, %v4180_v62  ;;  %v14714_v35 = vsel %vm4461_vm10, %v4492_v42, %v4493_v31  ;;  %v14717_v57 = vsel %vm265_vm1, %v4043_v30, %v4044_v44  ;;  %v14720_v12 = vsel %vm4300_vm9, %v4316_v1, %v4317_v10 }
 0x402   :  { %v18630_v22 = vrot.slane %v14708_v45, 4  ;;  %v18634_v23 = vrot.slane %v14706_v2, 1  ;;  %v14725_v9 = vsel %vm4461_vm10, %v4495_v7, %v4496_v38  ;;  %v18633_v24 = vrot.slane %v14706_v2, 2 }
 0x403   :  { %v18632_v4 = vrot.slane %v14706_v2, 4  ;;  %v18631_v15 = vrot.slane %v14706_v2, 3 }
 0x404   :  { %4556 = vrot.lane.b32.xlu1 %v14586_v51, %s12571_s22  ;;  %4351 = vrot.lane.b32.xlu0 %v4309_v55, %s12569_s3  ;;  %v14738_v58 = vsel %vm411_vm0, %v4180_v62, %v18633_v24  ;;  %v14743_v21 = vsel %vm265_vm1, %v4044_v44, %v18634_v23  ;;  %v14748_v63 = vsel %vm4461_vm10, %v4496_v38, %v18630_v22 }
 0x405   :  { %v14753_v51 = vsel %vm4300_vm9, %v4317_v10, %v18631_v15  ;;  %v14758_v55 = vsel %vm4461_vm10, %v4493_v31, %v18632_v4 }
 0x406   :  { %v14760_v42 = vpop.f32.mrb[120].mxu1 }
 0x407   :  { %18797 = vst [vmem:[#allocation9_spill] sm:$0xff] %v14760_v42  ;;  %v3946_v30 = vpop.f32.mrb[121].mxu1  ;;  %v4048_v27 = vrot.slane %v14760_v42, 1  ;;  %v4184_v62 = vrot.slane %v14760_v42, 2  ;;  %v4321_v44 = vrot.slane %v14760_v42, 3  ;;  %v4502_v31 = vrot.slane %v14760_v42, 4 }
 0x408   :  { %4214 = vrot.lane.b32.xlu1 %v4172_v47, %s12572_s24  ;;  %4076 = vrot.lane.b32.xlu0 %v14596_v46, %s12570_s21  ;;  %v14767_v1 = vpop.f32.mrb[122].mxu1  ;;  %v4505_v46 = vrot.slane %v3946_v30, 4 }
 0x409   :  { %18798 = vst [vmem:[#allocation11_spill] sm:$0xff] %v14767_v1  ;;  %v3950_v10 = vpop.f32.mrb[123].mxu1  ;;  %v4049_v7 = vrot.slane %v14767_v1, 1  ;;  %v4185_v38 = vrot.slane %v14767_v1, 2  ;;  %v4322_v47 = vrot.slane %v14767_v1, 3  ;;  %v4503_v22 = vrot.slane %v14767_v1, 4 }
 0x40a   :  { %v4506_v15 = vrot.slane %v3950_v10, 4 }
 0x40b   :  { %v14778_v4 = vsel %vm265_vm1, %v4048_v27, %v4049_v7  ;;  %v14781_v24 = vsel %vm411_vm0, %v4184_v62, %v4185_v38  ;;  %v14784_v23 = vsel %vm4300_vm9, %v4321_v44, %v4322_v47  ;;  %v14787_v18 = vsel %vm4461_vm10, %v4502_v31, %v4503_v22 }
 0x40c   :  { %4562 = vrot.lane.b32.xlu1 %v4478_v14, %s12571_s22  ;;  %4212 = vrot.lane.b32.xlu0 %v14611_v26, %s12572_s24  ;;  %v14795_v30 = vsel %vm4461_vm10, %v4505_v46, %v4506_v15 }
 0x40e   :  { %v14797_v27 = vpop.f32.mrb[124].mxu1 }
 0x40f   :  { %v14799_v62 = vpop.f32.mrb[125].mxu1  ;;  %v18643_v44 = vrot.slane %v14797_v27, 3  ;;  %v18641_v10 = vrot.slane %v14797_v27, 4  ;;  %v18640_v31 = vrot.slane %v14797_v27, 1  ;;  %v18639_v52 = vrot.slane %v14797_v27, 2 }
 0x410   :  { %v18642_v14 = vrot.slane %v14799_v62, 4  ;;  %4349 = vrot.lane.b32.xlu1 %v14601_v6, %s12569_s3  ;;  %4558 = vrot.lane.b32.xlu0 %v14616_v11, %s12571_s22  ;;  %v14810_v26 = vpop.f32.mrb[126].mxu1 }
 0x411   :  { %18799 = vst [vmem:[#allocation12_spill] sm:$0xff] %v14810_v26  ;;  %v3960_v46 = vpop.f32.mrb[127].mxu1  ;;  %v14815_v40 = vsel %vm265_vm1, %v4049_v7, %v18640_v31  ;;  %v14820_v56 = vsel %vm411_vm0, %v4185_v38, %v18639_v52  ;;  %v14825_v6 = vsel %vm4300_vm9, %v4322_v47, %v18643_v44  ;;  %v14830_v11 = vsel %vm4461_vm10, %v4503_v22, %v18641_v10 }
 0x412   :  { %v14835_v7 = vsel %vm4461_vm10, %v4506_v15, %v18642_v14  ;;  %v4053_v47 = vrot.slane %v14810_v26, 1  ;;  %v4189_v52 = vrot.slane %v14810_v26, 2  ;;  %v4512_v22 = vrot.slane %v14810_v26, 4 }
 0x413   :  { %v4326_v31 = vrot.slane %v14810_v26, 3 }
 0x414   :  { %4564 = vrot.lane.b32.xlu0 %v4480_v43, %s12571_s22  ;;  %4560 = vrot.lane.b32.xlu1 %v14606_v41, %s12571_s22  ;;  %v4515_v41 = vrot.slane %v3960_v46, 4 }
 0x416   :  { %v14842_v38 = vpop.f32.mrb[128].mxu1 }
 0x417   :  { %18800 = vst [vmem:[#allocation13_spill] sm:$0xff] %v14842_v38  ;;  %v3966_v10 = vpop.f32.mrb[129].mxu1  ;;  %v4054_v15 = vrot.slane %v14842_v38, 1  ;;  %v4190_v14 = vrot.slane %v14842_v38, 2  ;;  %v4513_v33 = vrot.slane %v14842_v38, 4  ;;  %v4327_v43 = vrot.slane %v14842_v38, 3 }
 0x418   :  { %v4516_v44 = vrot.slane %v3966_v10, 4  ;;  %4216 = vrot.lane.b32.xlu1 %v14633_v5, %s12572_s24  ;;  %4080 = vrot.lane.b32.xlu0 %v14636_v16, %s12570_s21  ;;  %v14856_v25 = vpop.f32.mrb[130].mxu1 }
 0x419   :  { %v14858_v26 = vpop.f32.mrb[131].mxu1  ;;  %v14861_v1 = vsel %vm265_vm1, %v4053_v47, %v4054_v15  ;;  %v14864_v42 = vsel %vm411_vm0, %v4189_v52, %v4190_v14  ;;  %v14867_v38 = vsel %vm4461_vm10, %v4512_v22, %v4513_v33  ;;  %v14870_v10 = vsel %vm4300_vm9, %v4326_v31, %v4327_v43 }
 0x41a   :  { %18801 = vst [vmem:[#allocation14_spill] sm:$0xff] %v14858_v26  ;;  %v18651_v5 = vrot.slane %v14858_v26, 4  ;;  %v18650_v16 = vrot.slane %v14856_v25, 1  ;;  %v14875_v46 = vsel %vm4461_vm10, %v4515_v41, %v4516_v44  ;;  %v18654_v53 = vrot.slane %v14856_v25, 3 }
 0x41b   :  { %v18652_v47 = vrot.slane %v14856_v25, 2  ;;  %v18653_v52 = vrot.slane %v14856_v25, 4 }
 0x41c   :  { %4566 = vrot.lane.b32.xlu1 %v14639_v54, %s12571_s22  ;;  %4353 = vrot.lane.b32.xlu0 %v14642_v36, %s12569_s3  ;;  %v14887_v31 = vsel %vm265_vm1, %v4054_v15, %v18650_v16  ;;  %v14892_v22 = vsel %vm4300_vm9, %v4327_v43, %v18654_v53  ;;  %v14897_v41 = vsel %vm4461_vm10, %v4516_v44, %v18651_v5  ;;  %v18806_v44 = vrot.slane %v14649_v0, 1 }
 0x41d   :  { %18802 = vst [vmem:[#allocation15_spill] sm:$0xff] %v14892_v22  ;;  %18803 = vst [vmem:[#allocation16_spill] sm:$0xff] %v14897_v41  ;;  %v14902_v54 = vsel %vm411_vm0, %v4190_v14, %v18652_v47  ;;  %v14907_v36 = vsel %vm4461_vm10, %v4513_v33, %v18653_v52  ;;  %v18810_v22 = vrot.slane %v14649_v0, 2 }
 0x41e   :  { %18804 = vst [vmem:[#allocation17_spill] sm:$0xff] %v14907_v36  ;;  %v14909_v15 = vpop.f32.mrb[132].mxu1 }
 0x41f   :  { %18805 = vst [vmem:[#allocation18_spill] sm:$0xff] %v14909_v15  ;;  %v3976_v16 = vpop.f32.mrb[133].mxu1  ;;  %v4194_v14 = vrot.slane %v14909_v15, 2  ;;  %v4058_v5 = vrot.slane %v14909_v15, 1  ;;  %v4522_v47 = vrot.slane %v14909_v15, 4  ;;  %v4331_v33 = vrot.slane %v14909_v15, 3 }
 0x420   :  { %4568 = vrot.lane.b32.xlu0 %v14647_v39, %s12571_s22  ;;  %4084 = vrot.lane.b32.xlu1 %v18806_v44, %s12570_s21  ;;  %v14916_v43 = vpop.f32.mrb[134].mxu1  ;;  %v4525_v44 = vrot.slane %v3976_v16, 4  ;;  %v18811_v16 = vrot.slane %v14649_v0, 3 }
 0x421   :  { %18807 = vst [vmem:[#allocation19_spill] sm:$0xff] %v14916_v43  ;;  %v3980_v52 = vpop.f32.mrb[135].mxu1  ;;  %v4195_v53 = vrot.slane %v14916_v43, 2  ;;  %v4059_v17 = vrot.slane %v14916_v43, 1  ;;  %v4523_v39 = vrot.slane %v14916_v43, 4  ;;  %v4332_v28 = vrot.slane %v14916_v43, 3 }
 0x422   :  { %v4526_v26 = vrot.slane %v3980_v52, 4 }
 0x423   :  { %v14927_v41 = vsel %vm411_vm0, %v4194_v14, %v4195_v53  ;;  %v14930_v59 = vsel %vm265_vm1, %v4058_v5, %v4059_v17  ;;  %v14933_v36 = vsel %vm4461_vm10, %v4522_v47, %v4523_v39  ;;  %v14936_v15 = vsel %vm4300_vm9, %v4331_v33, %v4332_v28 }
 0x424   :  { %18808 = vst [vmem:[#allocation20_spill] sm:$0xff] %v14933_v36  ;;  %18809 = vst [vmem:[#allocation21_spill] sm:$0xff] %v14936_v15  ;;  %4220 = vrot.lane.b32.xlu0 %v18810_v22, %s12572_s24  ;;  %4357 = vrot.lane.b32.xlu1 %v18811_v16, %s12569_s3  ;;  %v14945_v52 = vsel %vm4461_vm10, %v4525_v44, %v4526_v26  ;;  %v18814_v16 = vrot.slane %v14649_v0, 4 }
 0x425   :  { %18812 = vst [vmem:[#allocation22_spill] sm:$0xff] %v14945_v52 }
 0x426   :  { %v14947_v14 = vpop.f32.mrb[136].mxu1 }
 0x427   :  { %v14949_v5 = vpop.f32.mrb[137].mxu1  ;;  %v18662_v47 = vrot.slane %v14947_v14, 1  ;;  %v18816_v43 = vrot.slane %v14947_v14, 2  ;;  %v18818_v22 = vrot.slane %v14947_v14, 3 }
 0x428   :  { %18813 = vst [vmem:[#allocation23_spill] sm:$0xff] %v14949_v5  ;;  %4574 = vrot.lane.b32.xlu1 %v18814_v16, %s12571_s22  ;;  %4082 = vrot.lane.b32.xlu0 %v14667_v32, %s12570_s21  ;;  %v14961_v44 = vpop.f32.mrb[138].mxu1  ;;  %v18820_v32 = vrot.slane %v14947_v14, 4  ;;  %v18822_v36 = vrot.slane %v14949_v5, 4  ;;  %v18825_v5 = vrot.slane %v14651_v61, 4 }
 0x429   :  { %18815 = vst [vmem:[#allocation24_spill] sm:$0xff] %v14961_v44  ;;  %v3990_v52 = vpop.f32.mrb[139].mxu1  ;;  %v14966_v33 = vsel %vm265_vm1, %v4059_v17, %v18662_v47  ;;  %v14971_v15 = vsel %vm411_vm0, %v4195_v53, %v18816_v43  ;;  %v14976_v16 = vsel %vm4300_vm9, %v4332_v28, %v18818_v22  ;;  %v4199_v28 = vrot.slane %v14961_v44, 2 }
 0x42a   :  { %18817 = vst [vmem:[#allocation25_spill] sm:$0xff] %v14971_v15  ;;  %18819 = vst [vmem:[#allocation26_spill] sm:$0xff] %v14976_v16  ;;  %v14981_v0 = vsel %vm4461_vm10, %v4523_v39, %v18820_v32  ;;  %v14986_v17 = vsel %vm4461_vm10, %v4526_v26, %v18822_v36  ;;  %v4532_v43 = vrot.slane %v14961_v44, 4  ;;  %v4063_v39 = vrot.slane %v14961_v44, 1 }
 0x42b   :  { %18821 = vst [vmem:[#allocation27_spill] sm:$0xff] %v14981_v0  ;;  %18823 = vst [vmem:[#allocation28_spill] sm:$0xff] %v14986_v17  ;;  %v4336_v22 = vrot.slane %v14961_v44, 3 }
 0x42c   :  { %4218 = vrot.lane.b32.xlu1 %v14672_v8, %s12572_s24  ;;  %4355 = vrot.lane.b32.xlu0 %v14677_v13, %s12569_s3  ;;  %v4535_v13 = vrot.slane %v3990_v52, 4 }
 0x42e   :  { %v14992_v53 = vpop.f32.mrb[140].mxu1 }
 0x42f   :  { %18824 = vst [vmem:[#allocation29_spill] sm:$0xff] %v14992_v53  ;;  %v3996_v32 = vpop.f32.mrb[141].mxu1  ;;  %v4200_v26 = vrot.slane %v14992_v53, 2  ;;  %v4533_v36 = vrot.slane %v14992_v53, 4  ;;  %v4064_v8 = vrot.slane %v14992_v53, 1  ;;  %v4337_v47 = vrot.slane %v14992_v53, 3 }
 0x430   :  { %v4536_v17 = vrot.slane %v3996_v32, 4  ;;  %4570 = vrot.lane.b32.xlu1 %v14682_v50, %s12571_s22  ;;  %4576 = vrot.lane.b32.xlu0 %v18825_v5, %s12571_s22  ;;  %v15007_v0 = vpop.f32.mrb[142].mxu1 }
 0x431   :  { %v15009_v44 = vpop.f32.mrb[143].mxu1  ;;  %v15012_v16 = vsel %vm411_vm0, %v4199_v28, %v4200_v26  ;;  %v15015_v15 = vsel %vm4461_vm10, %v4532_v43, %v4533_v36  ;;  %v15018_v52 = vsel %vm265_vm1, %v4063_v39, %v4064_v8  ;;  %v15021_v32 = vsel %vm4300_vm9, %v4336_v22, %v4337_v47 }
 0x432   :  { %v4540_v50 = vrot.slane %v15009_v44, 4  ;;  %v4066_v61 = vrot.slane %v15007_v0, 1  ;;  %v15026_v5 = vsel %vm4461_vm10, %v4535_v13, %v4536_v17  ;;  %v4202_v53 = vrot.slane %v15007_v0, 2 }
 0x433   :  { %v4339_v28 = vrot.slane %v15007_v0, 3  ;;  %v4538_v43 = vrot.slane %v15007_v0, 4 }
 0x434   :  { %4572 = vrot.lane.b32.xlu0 %v14687_v37, %s12571_s22  ;;  %4222 = vrot.lane.b32.xlu1 %v14711_v60, %s12572_s24  ;;  %v15038_v39 = vsel %vm411_vm0, %v4200_v26, %v4202_v53  ;;  %v15043_v22 = vsel %vm265_vm1, %v4064_v8, %v4066_v61  ;;  %v15048_v13 = vsel %vm4461_vm10, %v4536_v17, %v4540_v50  ;;  %v18826_v17 = vrot.slane %v14706_v2, 1 }
 0x435   :  { %v15053_v37 = vsel %vm4300_vm9, %v4337_v47, %v4339_v28  ;;  %v15058_v60 = vsel %vm4461_vm10, %v4533_v36, %v4538_v43  ;;  %v18827_v47 = vrot.slane %v14706_v2, 2  ;;  %v18830_v26 = vrot.slane %v14708_v45, 4 }
 0x436   :  { %v18831_v45 = vrot.slane %v14797_v27, 3 }
 0x438   :  { %4578 = vrot.lane.b32.xlu1 %v14714_v35, %s12571_s22  ;;  %4086 = vrot.lane.b32.xlu0 %v14717_v57, %s12570_s21  ;;  %v18828_v35 = vrot.slane %v14706_v2, 4  ;;  %v18829_v57 = vrot.slane %v14706_v2, 3 }
 0x43c   :  { %4359 = vrot.lane.b32.xlu0 %v14720_v12, %s12569_s3  ;;  %4090 = vrot.lane.b32.xlu1 %v18826_v17, %s12570_s21 }
 0x440   :  { %4580 = vrot.lane.b32.xlu0 %v14725_v9, %s12571_s22  ;;  %4226 = vrot.lane.b32.xlu1 %v18827_v47, %s12572_s24 }
 0x444   :  { %4586 = vrot.lane.b32.xlu0 %v18828_v35, %s12571_s22  ;;  %4363 = vrot.lane.b32.xlu1 %v18829_v57, %s12569_s3 }
 0x448   :  { %4224 = vrot.lane.b32.xlu0 %v14738_v58, %s12572_s24  ;;  %4088 = vrot.lane.b32.xlu1 %v14743_v21, %s12570_s21 }
 0x44c   :  { %4361 = vrot.lane.b32.xlu0 %v14753_v51, %s12569_s3  ;;  %4582 = vrot.lane.b32.xlu1 %v14758_v55, %s12571_s22 }
 0x44e   :  { %v4342_v12 = vpop.permute.xlu1 %4341  ;;  %v4069_v9 = vpop.permute.xlu0 %4068 }
 0x44f   :  { %v4140_v55 = vadd.f32 %v4069_v9, %v14520_v20 }
 0x450   :  { %4588 = vrot.lane.b32.xlu1 %v18830_v26, %s12571_s22  ;;  %4584 = vrot.lane.b32.xlu0 %v14748_v63, %s12571_s22 }
 0x452   :  { %v4543_v36 = vpop.permute.xlu1 %4542  ;;  %v4205_v58 = vpop.permute.xlu0 %4204 }
 0x453   :  { %v4276_v17 = vadd.f32 %v4205_v58, %v4140_v55  ;;  %v18833_v58 = vrot.slane %v14797_v27, 1 }
 0x454   :  { %4092 = vrot.lane.b32.xlu1 %v14778_v4, %s12570_s21  ;;  %4592 = vrot.lane.b32.xlu0 %v14795_v30, %s12571_s22  ;;  %v18832_v4 = vrot.slane %v14797_v27, 4 }
 0x456   :  { %v4545_v21 = vpop.permute.xlu0 %4544  ;;  %v4073_v51 = vpop.permute.xlu1 %4072 }
 0x457   :  { %v4639_v20 = vsel %vm4638_vm11, %v4543_v36, %v4545_v21 }
 0x458   :  { %4228 = vrot.lane.b32.xlu1 %v14781_v24, %s12572_s24  ;;  %4369 = vrot.lane.b32.xlu0 %v18831_v45, %s12569_s3  ;;  %v4413_v24 = vadd.f32 %v4342_v12, %v4276_v17 }
 0x45a   :  { %v4346_v63 = vpop.permute.xlu0 %4345  ;;  %v4209_v8 = vpop.permute.xlu1 %4208  ;;  %v4687_v26 = vadd.f32 %v4639_v20, %v4413_v24 }
 0x45c   :  { %4365 = vrot.lane.b32.xlu1 %v14784_v23, %s12569_s3  ;;  %4598 = vrot.lane.b32.xlu0 %v18832_v4, %s12571_s22  ;;  %v4735_v55 = vcombine.high %v4687_v26, %v4687_v26 }
 0x45e   :  { %v4551_v30 = vpop.permute.xlu0 %4550  ;;  %v4071_v47 = vpop.permute.xlu1 %4070 }
 0x45f   :  { %v4141_v35 = vadd.f32 %v4071_v47, %v14522_v3  ;;  %v18834_v3 = vrot.slane %v14797_v27, 2  ;;  %v4751_v47 = vcombine.low %v4687_v26, %v4735_v55  ;;  %v18838_v55 = vrot.slane %v14856_v25, 2 }
 0x460   :  { %4590 = vrot.lane.b32.xlu1 %v14787_v18, %s12571_s22  ;;  %4094 = vrot.lane.b32.xlu0 %v14815_v40, %s12570_s21 }
 0x462   :  { %v4344_v57 = vpop.permute.xlu0 %4343  ;;  %v4207_v23 = vpop.permute.xlu1 %4206 }
 0x463   :  { %v4277_v9 = vadd.f32 %v4207_v23, %v4141_v35 }
 0x464   :  { %4096 = vrot.lane.b32.xlu1 %v18833_v58, %s12570_s21  ;;  %4230 = vrot.lane.b32.xlu0 %v14820_v56, %s12572_s24 }
 0x465   :  { %v4414_v12 = vadd.f32 %v4344_v57, %v4277_v9  ;;  %v4142_v57 = vadd.f32 %v4073_v51, %v14539_v34 }
 0x466   :  { %v4547_v18 = vpop.permute.xlu1 %4546  ;;  %v4549_v45 = vpop.permute.xlu0 %4548 }
 0x467   :  { %v4640_v40 = vsel %vm4638_vm11, %v4547_v18, %v4549_v45  ;;  %v4278_v23 = vadd.f32 %v4209_v8, %v4142_v57  ;;  %v18840_v57 = vld [vmem:[#allocation15_spill] sm:$0xff] }
 0x468   :  { %v4688_v36 = vadd.f32 %v4640_v40, %v4414_v12  ;;  %4232 = vrot.lane.b32.xlu1 %v18834_v3, %s12572_s24  ;;  %4367 = vrot.lane.b32.xlu0 %v14825_v6, %s12569_s3  ;;  %v18835_v6 = vrot.slane %v14799_v62, 4 }
 0x469   :  { %v4415_v62 = vadd.f32 %v4346_v63, %v4278_v23 }
 0x46a   :  { %v4736_v21 = vcombine.high %v4688_v36, %v4688_v36  ;;  %v4553_v17 = vpop.permute.xlu1 %4552  ;;  %v4075_v4 = vpop.permute.xlu0 %4074 }
 0x46b   :  { %v4641_v34 = vsel %vm4638_vm11, %v4551_v30, %v4553_v17 }
 0x46c   :  { %v4752_v24 = vcombine.low %v4688_v36, %v4736_v21  ;;  %4594 = vrot.lane.b32.xlu1 %v14830_v11, %s12571_s22  ;;  %4596 = vrot.lane.b32.xlu0 %v14835_v7, %s12571_s22  ;;  %v4143_v11 = vadd.f32 %v4075_v4, %v14550_v29  ;;  %v4689_v8 = vadd.f32 %v4641_v34, %v4415_v62  ;;  %v18836_v29 = vrot.slane %v14856_v25, 1 }
 0x46d   :  { %v18839_v4 = vrot.slane %v14856_v25, 4 }
 0x46e   :  { %v4791_v56 = vpack.c.bf16 %v4752_v24, %v4751_v47  ;;  %v4211_v20 = vpop.permute.xlu1 %4210  ;;  %v4555_v35 = vpop.permute.xlu0 %4554 }
 0x46f   :  { %v4279_v26 = vadd.f32 %v4211_v20, %v4143_v11 }
 0x470   :  { %4999 = vmatpush1.bf16.msra.mxu0 %v4791_v56  ;;  %4600 = vrot.lane.b32.xlu1 %v18835_v6, %s12571_s22  ;;  %v18841_v6 = vld [vmem:[#allocation17_spill] sm:$0xff] }
 0x471   :  { %4098 = vrot.lane.b32.xlu0 %v14861_v1, %s12570_s21  ;;  %5000 = vmatprep.subr.bf16.mxu0 %v18791_v49 }
 0x472   :  { %v4348_v9 = vpop.permute.xlu1 %4347  ;;  %v4079_v7 = vpop.permute.xlu0 %4078 }
 0x473   :  { %v4416_v51 = vadd.f32 %v4348_v9, %v4279_v26  ;;  %v18842_v26 = vld [vmem:[#allocation6_spill] sm:$0xff] }
 0x474   :  { %4234 = vrot.lane.b32.xlu1 %v14864_v42, %s12572_s24 }
 0x475   :  { %4602 = vrot.lane.b32.xlu0 %v14867_v38, %s12571_s22  ;;  %v18837_v38 = vrot.slane %v14856_v25, 3 }
 0x476   :  { %v4557_v58 = vpop.permute.xlu1 %4556  ;;  %v4352_v1 = vpop.permute.xlu0 %4351 }
 0x477   :  { %v4642_v12 = vsel %vm4638_vm11, %v4555_v35, %v4557_v58  ;;  %v18843_v58 = vld [vmem:[#allocation16_spill] sm:$0xff] }
 0x478   :  { %v4690_v18 = vadd.f32 %v4642_v12, %v4416_v51  ;;  %4371 = vrot.lane.b32.xlu1 %v14870_v10, %s12569_s3  ;;  %v4145_v10 = vadd.f32 %v4079_v7, %v14573_v19 }
 0x479   :  { %4102 = vrot.lane.b32.xlu0 %v18836_v29, %s12570_s21 }
 0x47a   :  { %v4753_v42 = vcombine.low %v4689_v8, %v4690_v18  ;;  %v4215_v30 = vpop.permute.xlu1 %4214  ;;  %v4077_v45 = vpop.permute.xlu0 %4076  ;;  %v4737_v20 = vcombine.high %v4690_v18, %v4690_v18 }
 0x47b   :  { %v4144_v36 = vadd.f32 %v4077_v45, %v14561_v48 }
 0x47c   :  { %4604 = vrot.lane.b32.xlu1 %v14875_v46, %s12571_s22  ;;  %v4281_v46 = vadd.f32 %v4215_v30, %v4145_v10 }
 0x47d   :  { %4375 = vrot.lane.b32.xlu0 %v18837_v38, %s12569_s3 }
 0x47e   :  { %v4563_v63 = vpop.permute.xlu1 %4562  ;;  %v4213_v40 = vpop.permute.xlu0 %4212  ;;  %v4418_v48 = vadd.f32 %v4352_v1, %v4281_v46  ;;  %v18844_v1 = vld [vmem:[#allocation14_spill] sm:$0xff] }
 0x47f   :  { %v4280_v17 = vadd.f32 %v4213_v40, %v4144_v36  ;;  %v18845_v12 = vrot.slane %v18844_v1, 4  ;;  %v18846_v40 = vld [vmem:[#allocation20_spill] sm:$0xff] }
 0x480   :  { %4238 = vrot.lane.b32.xlu1 %v18838_v55, %s12572_s24  ;;  %v18847_v55 = vld [vmem:[#allocation21_spill] sm:$0xff] }
 0x481   :  { %4100 = vrot.lane.b32.xlu0 %v14887_v31, %s12570_s21 }
 0x482   :  { %v4350_v3 = vpop.permute.xlu1 %4349  ;;  %v4559_v21 = vpop.permute.xlu0 %4558 }
 0x483   :  { %v4417_v47 = vadd.f32 %v4350_v3, %v4280_v17 }
 0x484   :  { %4610 = vrot.lane.b32.xlu1 %v18839_v4, %s12571_s22 }
 0x485   :  { %4236 = vrot.lane.b32.xlu0 %v14902_v54, %s12572_s24 }
 0x486   :  { %v4565_v24 = vpop.permute.xlu0 %4564  ;;  %v4561_v56 = vpop.permute.xlu1 %4560 }
 0x487   :  { %v4644_v31 = vsel %vm4638_vm11, %v4563_v63, %v4565_v24  ;;  %v4643_v19 = vsel %vm4638_vm11, %v4559_v21, %v4561_v56  ;;  %v18851_v24 = vrot.slane %v14947_v14, 2 }
 0x488   :  { %v4691_v35 = vadd.f32 %v4643_v19, %v4417_v47  ;;  %4373 = vrot.lane.b32.xlu1 %v18840_v57, %s12569_s3  ;;  %v4692_v23 = vadd.f32 %v4644_v31, %v4418_v48  ;;  %v18850_v47 = vrot.slane %v14947_v14, 3  ;;  %v18852_v19 = vrot.slane %v14947_v14, 4  ;;  %v18854_v57 = vld [vmem:[#allocation26_spill] sm:$0xff] }
 0x489   :  { %4606 = vrot.lane.b32.xlu0 %v18841_v6, %s12571_s22  ;;  %v18855_v6 = vld [vmem:[#allocation5_spill] sm:$0xff] }
 0x48a   :  { %v4738_v11 = vcombine.high %v4691_v35, %v4691_v35  ;;  %v4754_v9 = vcombine.low %v4737_v20, %v4691_v35  ;;  %v4217_v54 = vpop.permute.xlu1 %4216  ;;  %v4081_v7 = vpop.permute.xlu0 %4080  ;;  %v18853_v35 = vld [vmem:[#allocation25_spill] sm:$0xff] }
 0x48b   :  { %v4146_v34 = vadd.f32 %v4081_v7, %v18842_v26  ;;  %v18856_v7 = vld [vmem:[#allocation27_spill] sm:$0xff] }
 0x48c   :  { %v4755_v62 = vcombine.low %v4738_v11, %v4692_v23  ;;  %v4792_v51 = vpack.c.bf16 %v4754_v9, %v4753_v42  ;;  %4608 = vrot.lane.b32.xlu1 %v18843_v58, %s12571_s22  ;;  %v18857_v26 = vld [vmem:[#allocation23_spill] sm:$0xff] }
 0x48d   :  { %4612 = vrot.lane.b32.xlu0 %v18845_v12, %s12571_s22  ;;  %v4282_v18 = vadd.f32 %v4217_v54, %v4146_v34  ;;  %v18858_v34 = vrot.slane %v18857_v26, 4  ;;  %v18859_v58 = vld [vmem:[#allocation7_spill] sm:$0xff]  ;;  %v18860_v12 = vld [vmem:[#allocation8_spill] sm:$0xff] }
 0x48e   :  { %5001 = vmatpush1.bf16.msra.mxu0 %v4792_v51  ;;  %v4567_v8 = vpop.permute.xlu1 %4566  ;;  %v4354_v29 = vpop.permute.xlu0 %4353 }
 0x48f   :  { %5002 = vmatprep.subr.bf16.mxu0 %v18791_v49  ;;  %v4419_v42 = vadd.f32 %v4354_v29, %v4282_v18  ;;  %v18861_v29 = vld [vmem:[#allocation28_spill] sm:$0xff] }
 0x490   :  { %4240 = vrot.lane.b32.xlu1 %v14927_v41, %s12572_s24  ;;  %v18848_v41 = vrot.slane %v14947_v14, 1 }
 0x491   :  { %4104 = vrot.lane.b32.xlu0 %v14930_v59, %s12570_s21  ;;  %v18849_v59 = vld [vmem:[#allocation22_spill] sm:$0xff] }
 0x492   :  { %v4569_v30 = vpop.permute.xlu0 %4568  ;;  %v4085_v45 = vpop.permute.xlu1 %4084 }
 0x493   :  { %v4645_v38 = vsel %vm4638_vm11, %v4567_v8, %v4569_v30  ;;  %v4148_v8 = vadd.f32 %v4085_v45, %v18860_v12 }
 0x494   :  { %v4693_v63 = vadd.f32 %v4645_v38, %v4419_v42  ;;  %4614 = vrot.lane.b32.xlu1 %v18846_v40, %s12571_s22 }
 0x495   :  { %4377 = vrot.lane.b32.xlu0 %v18847_v55, %s12569_s3 }
 0x496   :  { %v4739_v10 = vcombine.high %v4693_v63, %v4693_v63  ;;  %v4221_v36 = vpop.permute.xlu0 %4220  ;;  %v4358_v3 = vpop.permute.xlu1 %4357 }
 0x497   :  { %v4284_v42 = vadd.f32 %v4221_v36, %v4148_v8 }
 0x498   :  { %v4756_v21 = vcombine.low %v4693_v63, %v4739_v10  ;;  %4108 = vrot.lane.b32.xlu1 %v18848_v41, %s12570_s21 }
 0x499   :  { %4616 = vrot.lane.b32.xlu0 %v18849_v59, %s12571_s22  ;;  %v4421_v45 = vadd.f32 %v4358_v3, %v4284_v42 }
 0x49a   :  { %v4793_v46 = vpack.c.bf16 %v4756_v21, %v4755_v62  ;;  %v4575_v17 = vpop.permute.xlu1 %4574  ;;  %v4083_v4 = vpop.permute.xlu0 %4082 }
 0x49b   :  { %v4147_v23 = vadd.f32 %v4083_v4, %v18855_v6 }
 0x49c   :  { %5003 = vmatpush1.bf16.msra.mxu0 %v4793_v46  ;;  %4381 = vrot.lane.b32.xlu1 %v18850_v47, %s12569_s3 }
 0x49d   :  { %4244 = vrot.lane.b32.xlu0 %v18851_v24, %s12572_s24  ;;  %5004 = vmatprep.subr.bf16.mxu0 %v18791_v49 }
 0x49e   :  { %v4219_v56 = vpop.permute.xlu1 %4218  ;;  %v4356_v31 = vpop.permute.xlu0 %4355 }
 0x49f   :  { %v4283_v54 = vadd.f32 %v4219_v56, %v4147_v23  ;;  %v18862_v56 = vld [vmem:[#allocation10_spill] sm:$0xff] }
 0x4a0   :  { %4622 = vrot.lane.b32.xlu1 %v18852_v19, %s12571_s22 }
 0x4a1   :  { %4106 = vrot.lane.b32.xlu0 %v14966_v33, %s12570_s21  ;;  %v4420_v18 = vadd.f32 %v4356_v31, %v4283_v54 }
 0x4a2   :  { %v4571_v20 = vpop.permute.xlu1 %4570  ;;  %v4577_v48 = vpop.permute.xlu0 %4576 }
 0x4a3   :  { %v4647_v55 = vsel %vm4638_vm11, %v4575_v17, %v4577_v48 }
 0x4a4   :  { %4242 = vrot.lane.b32.xlu1 %v18853_v35, %s12572_s24  ;;  %v4695_v36 = vadd.f32 %v4647_v55, %v4421_v45 }
 0x4a5   :  { %4379 = vrot.lane.b32.xlu0 %v18854_v57, %s12569_s3 }
 0x4a6   :  { %v4573_v11 = vpop.permute.xlu0 %4572  ;;  %v4223_v9 = vpop.permute.xlu1 %4222 }
 0x4a7   :  { %v4646_v51 = vsel %vm4638_vm11, %v4571_v20, %v4573_v11 }
 0x4a8   :  { %4618 = vrot.lane.b32.xlu1 %v18856_v7, %s12571_s22  ;;  %v4694_v30 = vadd.f32 %v4646_v51, %v4420_v18 }
 0x4a9   :  { %4624 = vrot.lane.b32.xlu0 %v18858_v34, %s12571_s22 }
 0x4aa   :  { %v4579_v33 = vpop.permute.xlu1 %4578  ;;  %v4087_v62 = vpop.permute.xlu0 %4086  ;;  %v4740_v10 = vcombine.high %v4694_v30, %v4694_v30 }
 0x4ab   :  { %v4149_v1 = vadd.f32 %v4087_v62, %v18859_v58  ;;  %v18863_v58 = vld [vmem:[#allocation9_spill] sm:$0xff] }
 0x4ac   :  { %4246 = vrot.lane.b32.xlu1 %v15012_v16, %s12572_s24 }
 0x4ad   :  { %4620 = vrot.lane.b32.xlu0 %v18861_v29, %s12571_s22  ;;  %v4285_v38 = vadd.f32 %v4223_v9, %v4149_v1  ;;  %v18864_v29 = vld [vmem:[#allocation11_spill] sm:$0xff] }
 0x4ae   :  { %v4360_v63 = vpop.permute.xlu0 %4359  ;;  %v4091_v40 = vpop.permute.xlu1 %4090 }
 0x4af   :  { %v4422_v21 = vadd.f32 %v4360_v63, %v4285_v38  ;;  %v4151_v19 = vadd.f32 %v4091_v40, %v14706_v2  ;;  %v12173_v2 = vld [vmem:[%s18611_s4 + $0x4] ss:$8 sps:$4 sm:$0xff]  }
 0x4b0   :  { %4626 = vrot.lane.b32.xlu1 %v15015_v15, %s12571_s22  ;;  %v4757_v15 = vcombine.low %v4694_v30, %v4740_v10  ;;  %11218 = vmatprep.mubr.msk.bf16.mxu0 %vm4955_vm12, %v12173_v2 }
 0x4b1   :  { %4110 = vrot.lane.b32.xlu0 %v15018_v52, %s12570_s21 }
 0x4b2   :  { %v4581_v16 = vpop.permute.xlu0 %4580  ;;  %v4227_v41 = vpop.permute.xlu1 %4226 }
 0x4b3   :  { %v4648_v59 = vsel %vm4638_vm11, %v4579_v33, %v4581_v16 }
 0x4b4   :  { %v4696_v46 = vadd.f32 %v4648_v59, %v4422_v21  ;;  %4114 = vrot.lane.b32.xlu1 %v4066_v61, %s12570_s21 }
 0x4b5   :  { %4383 = vrot.lane.b32.xlu0 %v15021_v32, %s12569_s3 }
 0x4b6   :  { %v4758_v17 = vcombine.low %v4695_v36, %v4696_v46  ;;  %v4587_v4 = vpop.permute.xlu0 %4586  ;;  %v4364_v52 = vpop.permute.xlu1 %4363 }
 0x4b8   :  { %v4794_v3 = vpack.c.bf16 %v4758_v17, %v4757_v15  ;;  %4250 = vrot.lane.b32.xlu1 %v4202_v53, %s12572_s24 }
 0x4b9   :  { %4628 = vrot.lane.b32.xlu0 %v15026_v5, %s12571_s22  ;;  %v4287_v5 = vadd.f32 %v4227_v41, %v4151_v19 }
 0x4ba   :  { %5005 = vmatpush1.bf16.msra.mxu0 %v4794_v3  ;;  %v4225_v47 = vpop.permute.xlu0 %4224  ;;  %v4089_v24 = vpop.permute.xlu1 %4088 }
 0x4bb   :  { %v4150_v61 = vadd.f32 %v4089_v24, %v18862_v56  ;;  %5006 = vmatprep.subr.bf16.mxu0 %v18791_v49  ;;  %v4424_v6 = vadd.f32 %v4364_v52, %v4287_v5  ;;  %v18865_v24 = vld [vmem:[#allocation12_spill] sm:$0xff] }
 0x4bc   :  { %4387 = vrot.lane.b32.xlu1 %v4339_v28, %s12569_s3 }
 0x4bd   :  { %4248 = vrot.lane.b32.xlu0 %v15038_v39, %s12572_s24  ;;  %v4286_v31 = vadd.f32 %v4225_v47, %v4150_v61  ;;  %v4741_v39 = vcombine.high %v4696_v46, %v4696_v46 }
 0x4be   :  { %v4362_v32 = vpop.permute.xlu0 %4361  ;;  %v4583_v53 = vpop.permute.xlu1 %4582 }
 0x4bf   :  { %v4423_v20 = vadd.f32 %v4362_v32, %v4286_v31 }
 0x4c0   :  { %4112 = vrot.lane.b32.xlu1 %v15043_v22, %s12570_s21 }
 0x4c1   :  { %4385 = vrot.lane.b32.xlu0 %v15053_v37, %s12569_s3 }
 0x4c2   :  { %v4589_v48 = vpop.permute.xlu1 %4588  ;;  %v4585_v35 = vpop.permute.xlu0 %4584 }
 0x4c3   :  { %v4650_v28 = vsel %vm4638_vm11, %v4587_v4, %v4589_v48  ;;  %v4649_v57 = vsel %vm4638_vm11, %v4583_v53, %v4585_v35 }
 0x4c4   :  { %v4697_v23 = vadd.f32 %v4649_v57, %v4423_v20  ;;  %4630 = vrot.lane.b32.xlu1 %v15058_v60, %s12571_s22  ;;  %v4698_v22 = vadd.f32 %v4650_v28, %v4424_v6 }
 0x4c5   :  { %4632 = vrot.lane.b32.xlu0 %v15048_v13, %s12571_s22 }
 0x4c6   :  { %v4742_v37 = vcombine.high %v4697_v23, %v4697_v23  ;;  %v4759_v11 = vcombine.low %v4741_v39, %v4697_v23  ;;  %v4093_v9 = vpop.permute.xlu1 %4092  ;;  %v4593_v54 = vpop.permute.xlu0 %4592 }
 0x4c7   :  { %v4152_v1 = vadd.f32 %v4093_v9, %v18863_v58 }
 0x4c8   :  { %v4760_v7 = vcombine.low %v4742_v37, %v4698_v22  ;;  %4636 = vrot.lane.b32.xlu1 %v4540_v50, %s12571_s22  ;;  %v18866_v37 = vld [vmem:[#allocation13_spill] sm:$0xff] }
 0x4c9   :  { %4634 = vrot.lane.b32.xlu0 %v4538_v43, %s12571_s22 }
 0x4ca   :  { %v4795_v13 = vpack.c.bf16 %v4760_v7, %v4759_v11  ;;  %v4229_v60 = vpop.permute.xlu1 %4228  ;;  %v4370_v26 = vpop.permute.xlu0 %4369 }
 0x4cb   :  { %v4288_v44 = vadd.f32 %v4229_v60, %v4152_v1 }
 0x4cc   :  { %5007 = vmatpush1.bf16.msra.mxu0 %v4795_v13 }
 0x4cd   :  { %5008 = vmatprep.subr.bf16.mxu0 %v18791_v49 }
 0x4ce   :  { %v4366_v34 = vpop.permute.xlu1 %4365  ;;  %v4599_v33 = vpop.permute.xlu0 %4598 }
 0x4cf   :  { %v4425_v18 = vadd.f32 %v4366_v34, %v4288_v44 }
 0x4d2   :  { %v4591_v62 = vpop.permute.xlu1 %4590  ;;  %v4095_v51 = vpop.permute.xlu0 %4094 }
 0x4d3   :  { %v4651_v50 = vsel %vm4638_vm11, %v4591_v62, %v4593_v54  ;;  %v4153_v43 = vadd.f32 %v4095_v51, %v18864_v29 }
 0x4d4   :  { %v4699_v38 = vadd.f32 %v4651_v50, %v4425_v18 }
 0x4d6   :  { %v4097_v12 = vpop.permute.xlu1 %4096  ;;  %v4231_v8 = vpop.permute.xlu0 %4230  ;;  %v4743_v21 = vcombine.high %v4699_v38, %v4699_v38 }
 0x4d7   :  { %v4289_v63 = vadd.f32 %v4231_v8, %v4153_v43  ;;  %v4154_v3 = vadd.f32 %v4097_v12, %v14797_v27  ;;  %v18867_v43 = vld [vmem:[#allocation18_spill] sm:$0xff] }
 0x4d8   :  { %v4761_v46 = vcombine.low %v4699_v38, %v4743_v21 }
 0x4da   :  { %v4233_v42 = vpop.permute.xlu1 %4232  ;;  %v4368_v30 = vpop.permute.xlu0 %4367 }
 0x4db   :  { %v4426_v40 = vadd.f32 %v4368_v30, %v4289_v63  ;;  %v4290_v47 = vadd.f32 %v4233_v42, %v4154_v3 }
 0x4dd   :  { %v4427_v19 = vadd.f32 %v4370_v26, %v4290_v47 }
 0x4de   :  { %v4595_v55 = vpop.permute.xlu1 %4594  ;;  %v4597_v45 = vpop.permute.xlu0 %4596 }
 0x4df   :  { %v4652_v10 = vsel %vm4638_vm11, %v4595_v55, %v4597_v45 }
 0x4e0   :  { %v4700_v16 = vadd.f32 %v4652_v10, %v4426_v40 }
 0x4e2   :  { %v4744_v41 = vcombine.high %v4700_v16, %v4700_v16  ;;  %v4601_v59 = vpop.permute.xlu1 %4600 }
 0x4e3   :  { %v4099_v36 = vpop.permute.xlu0 %4098  ;;  %v4653_v53 = vsel %vm4638_vm11, %v4599_v33, %v4601_v59 }
 0x4e4   :  { %v4762_v15 = vcombine.low %v4700_v16, %v4744_v41  ;;  %v4155_v56 = vadd.f32 %v4099_v36, %v18865_v24  ;;  %v4701_v28 = vadd.f32 %v4653_v53, %v4427_v19 }
 0x4e6   :  { %v4796_v17 = vpack.c.bf16 %v4762_v15, %v4761_v46  ;;  %v4235_v4 = vpop.permute.xlu1 %4234 }
 0x4e7   :  { %v4603_v52 = vpop.permute.xlu0 %4602  ;;  %v4291_v31 = vadd.f32 %v4235_v4, %v4155_v56  ;;  %v18868_v56 = vld [vmem:[#allocation19_spill] sm:$0xff] }
 0x4e8   :  { %5009 = vmatpush1.bf16.msra.mxu0 %v4796_v17 }
 0x4e9   :  { %5010 = vmatprep.subr.bf16.mxu0 %v18791_v49 }
 0x4ea   :  { %v4372_v61 = vpop.permute.xlu1 %4371 }
 0x4eb   :  { %v4103_v32 = vpop.permute.xlu0 %4102  ;;  %v4428_v5 = vadd.f32 %v4372_v61, %v4291_v31 }
 0x4ec   :  { %v4157_v22 = vadd.f32 %v4103_v32, %v14856_v25 }
 0x4ee   :  { %v4605_v20 = vpop.permute.xlu1 %4604 }
 0x4ef   :  { %v4654_v48 = vsel %vm4638_vm11, %v4603_v52, %v4605_v20  ;;  %v4376_v35 = vpop.permute.xlu0 %4375  ;;  %v18869_v20 = vld [vmem:[#allocation24_spill] sm:$0xff] }
 0x4f0   :  { %v4702_v57 = vadd.f32 %v4654_v48, %v4428_v5 }
 0x4f2   :  { %v4763_v27 = vcombine.low %v4701_v28, %v4702_v57  ;;  %v4239_v39 = vpop.permute.xlu1 %4238  ;;  %v4745_v62 = vcombine.high %v4702_v57, %v4702_v57 }
 0x4f3   :  { %v4101_v6 = vpop.permute.xlu0 %4100  ;;  %v4293_v7 = vadd.f32 %v4239_v39, %v4157_v22 }
 0x4f4   :  { %v4156_v11 = vadd.f32 %v4101_v6, %v18866_v37 }
 0x4f5   :  { %v4430_v51 = vadd.f32 %v4376_v35, %v4293_v7 }
 0x4f6   :  { %v4611_v23 = vpop.permute.xlu1 %4610 }
 0x4f7   :  { %v4237_v2 = vpop.permute.xlu0 %4236 }
 0x4f8   :  { %v4292_v13 = vadd.f32 %v4237_v2, %v4156_v11 }
 0x4fa   :  { %v4374_v9 = vpop.permute.xlu1 %4373 }
 0x4fb   :  { %v4607_v54 = vpop.permute.xlu0 %4606  ;;  %v4429_v60 = vadd.f32 %v4374_v9, %v4292_v13 }
 0x4fe   :  { %v4609_v26 = vpop.permute.xlu1 %4608 }
 0x4ff   :  { %v4613_v34 = vpop.permute.xlu0 %4612  ;;  %v4655_v33 = vsel %vm4638_vm11, %v4607_v54, %v4609_v26 }
 0x500   :  { %v4656_v58 = vsel %vm4638_vm11, %v4611_v23, %v4613_v34  ;;  %v4703_v1 = vadd.f32 %v4655_v33, %v4429_v60 }
 0x501   :  { %v4704_v12 = vadd.f32 %v4656_v58, %v4430_v51 }
 0x502   :  { %v4746_v8 = vcombine.high %v4703_v1, %v4703_v1  ;;  %v4764_v44 = vcombine.low %v4745_v62, %v4703_v1  ;;  %v4241_v25 = vpop.permute.xlu1 %4240  ;;  %v18870_v1 = vld [vmem:[#allocation29_spill] sm:$0xff] }
 0x503   :  { %v4105_v50 = vpop.permute.xlu0 %4104 }
 0x504   :  { %v4765_v18 = vcombine.low %v4746_v8, %v4704_v12  ;;  %v4797_v29 = vpack.c.bf16 %v4764_v44, %v4763_v27  ;;  %v4158_v42 = vadd.f32 %v4105_v50, %v18867_v43 }
 0x506   :  { %5011 = vmatpush1.bf16.msra.mxu0 %v4797_v29  ;;  %v4615_v30 = vpop.permute.xlu1 %4614  ;;  %v4294_v38 = vadd.f32 %v4241_v25, %v4158_v42 }
 0x507   :  { %v4378_v63 = vpop.permute.xlu0 %4377  ;;  %5012 = vmatprep.subr.bf16.mxu0 %v18791_v49 }
 0x508   :  { %v4431_v55 = vadd.f32 %v4378_v63, %v4294_v38 }
 0x50a   :  { %v4109_v40 = vpop.permute.xlu1 %4108 }
 0x50b   :  { %v4617_v45 = vpop.permute.xlu0 %4616  ;;  %v4160_v35 = vadd.f32 %v4109_v40, %v14947_v14 }
 0x50c   :  { %v4657_v10 = vsel %vm4638_vm11, %v4615_v30, %v4617_v45 }
 0x50d   :  { %v4705_v21 = vadd.f32 %v4657_v10, %v4431_v55 }
 0x50e   :  { %v4382_v16 = vpop.permute.xlu1 %4381 }
 0x50f   :  { %v4747_v41 = vcombine.high %v4705_v21, %v4705_v21  ;;  %v4245_v59 = vpop.permute.xlu0 %4244 }
 0x510   :  { %v4296_v27 = vadd.f32 %v4245_v59, %v4160_v35  ;;  %v12174_v59 = vld [vmem:[%s18611_s4 + $0x14] ss:$8 sps:$4 sm:$0xff]   ;;  %v12203_v35 = vld [vmem:[%s18611_s4 + $0xa0] ss:$8 sps:$4 sm:$0xff]  }
 0x511   :  { %v4766_v36 = vcombine.low %v4705_v21, %v4747_v41 }
 0x512   :  { %v4623_v46 = vpop.permute.xlu1 %4622  ;;  %v4433_v37 = vadd.f32 %v4382_v16, %v4296_v27  ;;  %v12207_v27 = vld [vmem:[%s18611_s4 + $0xc4] ss:$8 sps:$4 sm:$0xff]  }
 0x513   :  { %v4798_v15 = vpack.c.bf16 %v4766_v36, %v4765_v18  ;;  %v4107_v17 = vpop.permute.xlu0 %4106  ;;  %v12176_v36 = vld [vmem:[%s18611_s4 + $0x10] ss:$8 sps:$4 sm:$0xff]  }
 0x514   :  { %v4159_v61 = vadd.f32 %v4107_v17, %v18868_v56  ;;  %v12180_v17 = vld [vmem:[%s18611_s4 + $0x34] ss:$8 sps:$4 sm:$0xff]   ;;  %v12189_v56 = vld [vmem:[%s18611_s4 + $0x64] ss:$8 sps:$4 sm:$0xff]  }
 0x515   :  { %5013 = vmatpush1.bf16.msra.mxu0 %v4798_v15  ;;  %v12179_v15 = vld [vmem:[%s18611_s4 + $0x20] ss:$8 sps:$4 sm:$0xff]  }
 0x516   :  { %v4243_v4 = vpop.permute.xlu1 %4242  ;;  %5014 = vmatprep.subr.bf16.mxu0 %v18791_v49 }
 0x517   :  { %v4380_v52 = vpop.permute.xlu0 %4379  ;;  %v4295_v31 = vadd.f32 %v4243_v4, %v4159_v61  ;;  %v12182_v4 = vld [vmem:[%s18611_s4 + $0x30] ss:$8 sps:$4 sm:$0xff]   ;;  %v12191_v61 = vld [vmem:[%s18611_s4 + $0x60] ss:$8 sps:$4 sm:$0xff]  }
 0x519   :  { %v4432_v28 = vadd.f32 %v4380_v52, %v4295_v31  ;;  %v12183_v52 = vld [vmem:[%s18611_s4 + $0x44] ss:$8 sps:$4 sm:$0xff]   ;;  %v12194_v31 = vld [vmem:[%s18611_s4 + $0x70] ss:$8 sps:$4 sm:$0xff]  }
 0x51a   :  { %v4619_v3 = vpop.permute.xlu1 %4618 }
 0x51b   :  { %v4625_v47 = vpop.permute.xlu0 %4624 }
 0x51c   :  { %v4659_v2 = vsel %vm4638_vm11, %v4623_v46, %v4625_v47  ;;  %v12177_v46 = vld [vmem:[%s18611_s4 + $0x24] ss:$8 sps:$4 sm:$0xff]   ;;  %v12186_v47 = vld [vmem:[%s18611_s4 + $0x54] ss:$8 sps:$4 sm:$0xff]  }
 0x51d   :  { %v4707_v13 = vadd.f32 %v4659_v2, %v4433_v37 }
 0x51e   :  { %v4247_v24 = vpop.permute.xlu1 %4246 }
 0x51f   :  { %v4621_v32 = vpop.permute.xlu0 %4620 }
 0x520   :  { %v4658_v5 = vsel %vm4638_vm11, %v4619_v3, %v4621_v32  ;;  %v12185_v3 = vld [vmem:[%s18611_s4 + $0x40] ss:$8 sps:$4 sm:$0xff]   ;;  %v12192_v32 = vld [vmem:[%s18611_s4 + $0x74] ss:$8 sps:$4 sm:$0xff]  }
 0x521   :  { %v4706_v39 = vadd.f32 %v4658_v5, %v4432_v28  ;;  %v12198_v5 = vld [vmem:[%s18611_s4 + $0x94] ss:$8 sps:$4 sm:$0xff]  }
 0x522   :  { %v4627_v53 = vpop.permute.xlu1 %4626  ;;  %v12204_v28 = vld [vmem:[%s18611_s4 + $0xb4] ss:$8 sps:$4 sm:$0xff]  }
 0x523   :  { %v4111_v19 = vpop.permute.xlu0 %4110  ;;  %v4748_v11 = vcombine.high %v4706_v39, %v4706_v39 }
 0x524   :  { %v4161_v48 = vadd.f32 %v4111_v19, %v18869_v20  ;;  %v12197_v19 = vld [vmem:[%s18611_s4 + $0x80] ss:$8 sps:$4 sm:$0xff]   ;;  %v12200_v20 = vld [vmem:[%s18611_s4 + $0x90] ss:$8 sps:$4 sm:$0xff]  }
 0x525   :  { %v4767_v34 = vcombine.low %v4706_v39, %v4748_v11  ;;  %v12209_v39 = vld [vmem:[%s18611_s4 + $0xc0] ss:$8 sps:$4 sm:$0xff]  }
 0x526   :  { %v4115_v57 = vpop.permute.xlu1 %4114  ;;  %v4297_v6 = vadd.f32 %v4247_v24, %v4161_v48  ;;  %v12188_v24 = vld [vmem:[%s18611_s4 + $0x50] ss:$8 sps:$4 sm:$0xff]   ;;  %v12201_v48 = vld [vmem:[%s18611_s4 + $0xa4] ss:$8 sps:$4 sm:$0xff]  }
 0x527   :  { %v4384_v23 = vpop.permute.xlu0 %4383  ;;  %v4163_v25 = vadd.f32 %v4115_v57, %v15007_v0  ;;  %v12171_v0 = vld [vmem:[%s18611_s4] ss:$8 sps:$4 sm:$0xff]   ;;  %v12206_v57 = vld [vmem:[%s18611_s4 + $0xb0] ss:$8 sps:$4 sm:$0xff]  }
 0x528   :  { %v4434_v9 = vadd.f32 %v4384_v23, %v4297_v6  ;;  %v12210_v6 = vld [vmem:[%s18611_s4 + $0xd4] ss:$8 sps:$4 sm:$0xff]   ;;  %v12212_v23 = vld [vmem:[%s18611_s4 + $0xd0] ss:$8 sps:$4 sm:$0xff]  }
 0x52a   :  { %v4251_v22 = vpop.permute.xlu1 %4250 }
 0x52b   :  { %v4629_v54 = vpop.permute.xlu0 %4628  ;;  %v4299_v42 = vadd.f32 %v4251_v22, %v4163_v25 }
 0x52c   :  { %v4660_v7 = vsel %vm4638_vm11, %v4627_v53, %v4629_v54  ;;  %v12195_v53 = vld [vmem:[%s18611_s4 + $0x84] ss:$8 sps:$4 sm:$0xff]  }
 0x52d   :  { %v4708_v60 = vadd.f32 %v4660_v7, %v4434_v9 }
 0x52e   :  { %v4388_v26 = vpop.permute.xlu1 %4387 }
 0x52f   :  { %v4768_v14 = vcombine.low %v4707_v13, %v4708_v60  ;;  %v4249_v33 = vpop.permute.xlu0 %4248  ;;  %v4749_v43 = vcombine.high %v4708_v60, %v4708_v60  ;;  %v4436_v63 = vadd.f32 %v4388_v26, %v4299_v42 }
 0x531   :  { %v4799_v62 = vpack.c.bf16 %v4768_v14, %v4767_v34 }
 0x532   :  { %v4113_v51 = vpop.permute.xlu1 %4112 }
 0x533   :  { %5015 = vmatpush1.bf16.msra.mxu0 %v4799_v62  ;;  %v4386_v58 = vpop.permute.xlu0 %4385  ;;  %v4162_v12 = vadd.f32 %v4113_v51, %v18870_v1 }
 0x534   :  { %5016 = vmatprep.subr.bf16.mxu0 %v18791_v49 }
 0x535   :  { %v4298_v8 = vadd.f32 %v4249_v33, %v4162_v12 }
 0x536   :  { %v4631_v44 = vpop.permute.xlu1 %4630 }
 0x537   :  { %v4435_v50 = vadd.f32 %v4386_v58, %v4298_v8  ;;  %v4633_v18 = vpop.permute.xlu0 %4632 }
 0x538   :  { %v4661_v29 = vsel %vm4638_vm11, %v4631_v44, %v4633_v18 }
 0x539   :  { %v4709_v30 = vadd.f32 %v4661_v29, %v4435_v50 }
 0x53a   :  { %v4637_v38 = vpop.permute.xlu1 %4636 }
 0x53b   :  { %v4750_v40 = vcombine.high %v4709_v30, %v4709_v30  ;;  %v4769_v55 = vcombine.low %v4749_v43, %v4709_v30  ;;  %v4635_v45 = vpop.permute.xlu0 %4634 }
 0x53c   :  { %v4662_v10 = vsel %vm4638_vm11, %v4635_v45, %v4637_v38 }
 0x53d   :  { %v4710_v21 = vadd.f32 %v4662_v10, %v4436_v63 }
 0x53f   :  { %v4770_v16 = vcombine.low %v4750_v40, %v4710_v21 }
 0x541   :  { %v4800_v41 = vpack.c.bf16 %v4770_v16, %v4769_v55 }
 0x543   :  { %5017 = vmatpush1.bf16.msra.mxu0 %v4800_v41 }
 0x546   :  { %5031 = vmatmul.mubr.bf16.vlgmr.msra.gmra.mrb[144].mxu0 %v12171_v0 }
 0x547   :  { %11219 = vmatprep.mubr.msk.bf16.mxu0 %vm4955_vm12, %v12174_v59 }
 0x54e   :  { %5039 = vmatmul.mubr.bf16.gmra.mrb[148].mxu0 %v12176_v36 }
 0x54f   :  { %11220 = vmatprep.mubr.msk.bf16.mxu0 %vm4955_vm12, %v12177_v46 }
 0x556   :  { %5047 = vmatmul.mubr.bf16.gmra.mrb[152].mxu0 %v12179_v15 }
 0x557   :  { %11221 = vmatprep.mubr.msk.bf16.mxu0 %vm4955_vm12, %v12180_v17 }
 0x55e   :  { %5055 = vmatmul.mubr.bf16.gmra.mrb[156].mxu0 %v12182_v4 }
 0x55f   :  { %11222 = vmatprep.mubr.msk.bf16.mxu0 %vm4955_vm12, %v12183_v52 }
 0x566   :  { %5063 = vmatmul.mubr.bf16.gmra.mrb[160].mxu0 %v12185_v3 }
 0x567   :  { %11223 = vmatprep.mubr.msk.bf16.mxu0 %vm4955_vm12, %v12186_v47 }
 0x56e   :  { %5071 = vmatmul.mubr.bf16.gmra.mrb[164].mxu0 %v12188_v24 }
 0x56f   :  { %11224 = vmatprep.mubr.msk.bf16.mxu0 %vm4955_vm12, %v12189_v56 }
 0x576   :  { %5079 = vmatmul.mubr.bf16.gmra.mrb[168].mxu0 %v12191_v61 }
 0x577   :  { %11225 = vmatprep.mubr.msk.bf16.mxu0 %vm4955_vm12, %v12192_v32 }
 0x57e   :  { %5087 = vmatmul.mubr.bf16.gmra.mrb[172].mxu0 %v12194_v31 }
 0x57f   :  { %11226 = vmatprep.mubr.msk.bf16.mxu0 %vm4955_vm12, %v12195_v53 }
 0x586   :  { %5095 = vmatmul.mubr.bf16.gmra.mrb[176].mxu0 %v12197_v19 }
 0x587   :  { %11227 = vmatprep.mubr.msk.bf16.mxu0 %vm4955_vm12, %v12198_v5 }
 0x58e   :  { %5103 = vmatmul.mubr.bf16.gmra.mrb[180].mxu0 %v12200_v20 }
 0x58f   :  { %11228 = vmatprep.mubr.msk.bf16.mxu0 %vm4955_vm12, %v12201_v48 }
 0x596   :  { %5111 = vmatmul.mubr.bf16.gmra.mrb[184].mxu0 %v12203_v35 }
 0x597   :  { %11229 = vmatprep.mubr.msk.bf16.mxu0 %vm4955_vm12, %v12204_v28 }
 0x59e   :  { %5119 = vmatmul.mubr.bf16.gmra.mrb[188].mxu0 %v12206_v57 }
 0x59f   :  { %11230 = vmatprep.mubr.msk.bf16.mxu0 %vm4955_vm12, %v12207_v27 }
 0x5a6   :  { %5127 = vmatmul.mubr.bf16.gmra.mrb[192].mxu0 %v12209_v39 }
 0x5a7   :  { %11231 = vmatprep.mubr.msk.bf16.mxu0 %vm4955_vm12, %v12210_v6 }
 0x5ae   :  { %5135 = vmatmul.mubr.bf16.gmra.mrb[196].mxu0 %v12212_v23 }
 0x619   :  { %v15388_v2 = vpop.f32.mrb[144].mxu0 }
 0x61a   :  { %v15392_v22 = vcombine.high %v15388_v2, %v15388_v2  ;;  %v5034_v37 = vpop.f32.mrb[145].mxu0 }
 0x61b   :  { %v15394_v11 = vpop.f32.mrb[146].mxu0 }
 0x61c   :  { %v5227_v9 = vcombine.low %v15388_v2, %v15392_v22  ;;  %v15400_v54 = vcombine.high %v15394_v11, %v15394_v11  ;;  %v5037_v7 = vpop.f32.mrb[147].mxu0 }
 0x61e   :  { %v5228_v13 = vcombine.low %v15394_v11, %v15400_v54  ;;  %v5275_v60 = vsel %vm468_vm6, %v5227_v9, -inf }
 0x61f   :  { %5276 = vmax.xlane.f32.xlu0 %v5275_v60 }
 0x620   :  { %v5278_v26 = vsel %vm468_vm6, %v5228_v13, -inf }
 0x621   :  { %v15406_v34 = vpop.f32.mrb[148].mxu0  ;;  %5279 = vmax.xlane.f32.xlu1 %v5278_v26 }
 0x622   :  { %v15410_v14 = vcombine.high %v15406_v34, %v15406_v34  ;;  %v5042_v33 = vpop.f32.mrb[149].mxu0 }
 0x623   :  { %v15412_v62 = vpop.f32.mrb[150].mxu0 }
 0x624   :  { %v5229_v51 = vcombine.low %v15406_v34, %v15410_v14  ;;  %v5285_v58 = vsel %vm5284_vm13, %v15412_v62, -inf  ;;  %v5045_v1 = vpop.f32.mrb[151].mxu0  ;;  %v15420_v12 = vcombine.high %v15412_v62, %v15412_v62 }
 0x625   :  { %5286 = vmax.xlane.f32.xlu0 %v5285_v58 }
 0x626   :  { %v5281_v8 = vsel %vm468_vm6, %v5229_v51, -inf }
 0x629   :  { %5282 = vmax.xlane.f32.xlu0 %v5281_v8  ;;  %v15423_v44 = vpop.f32.mrb[152].mxu0 }
 0x62a   :  { %v15427_v25 = vcombine.high %v15423_v44, %v15423_v44  ;;  %v5230_v50 = vcombine.low %v15420_v12, %v15423_v44  ;;  %v5050_v18 = vpop.f32.mrb[153].mxu0 }
 0x62b   :  { %v15431_v29 = vpop.f32.mrb[154].mxu0 }
 0x62c   :  { %v5231_v43 = vcombine.low %v15427_v25, %v15431_v29  ;;  %v5288_v42 = vsel %vm468_vm6, %v5230_v50, -inf  ;;  %v5053_v30 = vpop.f32.mrb[155].mxu0  ;;  %v15439_v63 = vcombine.high %v15431_v29, %v15431_v29 }
 0x62d   :  { %5289 = vmax.xlane.f32.xlu1 %v5288_v42 }
 0x62e   :  { %v5291_v38 = vsel %vm468_vm6, %v5231_v43, -inf }
 0x62f   :  { %5292 = vmax.xlane.f32.xlu0 %v5291_v38 }
 0x631   :  { %v15441_v40 = vpop.f32.mrb[156].mxu0 }
 0x632   :  { %v15445_v55 = vcombine.high %v15441_v40, %v15441_v40  ;;  %v5232_v45 = vcombine.low %v15439_v63, %v15441_v40  ;;  %v5058_v10 = vpop.f32.mrb[157].mxu0 }
 0x633   :  { %v15449_v21 = vpop.f32.mrb[158].mxu0 }
 0x634   :  { %v5294_v16 = vsel %vm468_vm6, %v5232_v45, -inf  ;;  %v5297_v41 = vsel %vm5284_vm13, %v15445_v55, -inf  ;;  %v15456_v0 = vcombine.high %v15449_v21, %v15449_v21  ;;  %v5061_v59 = vpop.f32.mrb[159].mxu0 }
 0x635   :  { %5295 = vmax.xlane.f32.xlu1 %v5294_v16  ;;  %5298 = vmax.xlane.f32.xlu0 %v5297_v41 }
 0x636   :  { %v5233_v36 = vcombine.low %v15449_v21, %v15456_v0 }
 0x638   :  { %v5300_v46 = vsel %vm468_vm6, %v5233_v36, -inf }
 0x639   :  { %v15461_v15 = vpop.f32.mrb[160].mxu0  ;;  %5301 = vmax.xlane.f32.xlu1 %v5300_v46 }
 0x63a   :  { %v15465_v17 = vcombine.high %v15461_v15, %v15461_v15  ;;  %v5066_v4 = vpop.f32.mrb[161].mxu0 }
 0x63b   :  { %v15467_v52 = vpop.f32.mrb[162].mxu0 }
 0x63c   :  { %v5234_v3 = vcombine.low %v15461_v15, %v15465_v17  ;;  %v15473_v47 = vcombine.high %v15467_v52, %v15467_v52  ;;  %v5069_v24 = vpop.f32.mrb[163].mxu0 }
 0x63e   :  { %v5235_v56 = vcombine.low %v15467_v52, %v15473_v47  ;;  %v5303_v61 = vsel %vm468_vm6, %v5234_v3, -inf }
 0x63f   :  { %5304 = vmax.xlane.f32.xlu0 %v5303_v61 }
 0x640   :  { %v5306_v32 = vsel %vm468_vm6, %v5235_v56, -inf }
 0x641   :  { %5307 = vmax.xlane.f32.xlu1 %v5306_v32  ;;  %v15479_v31 = vpop.f32.mrb[164].mxu0 }
 0x642   :  { %v15483_v53 = vcombine.high %v15479_v31, %v15479_v31  ;;  %v5309_v19 = vsel %vm5284_vm13, %v15479_v31, -inf  ;;  %v5074_v5 = vpop.f32.mrb[165].mxu0 }
 0x643   :  { %5310 = vmax.xlane.f32.xlu0 %v5309_v19  ;;  %v15487_v20 = vpop.f32.mrb[166].mxu0 }
 0x644   :  { %v5236_v48 = vcombine.low %v15483_v53, %v15487_v20  ;;  %v5077_v35 = vpop.f32.mrb[167].mxu0  ;;  %v15493_v28 = vcombine.high %v15487_v20, %v15487_v20 }
 0x646   :  { %v5312_v57 = vsel %vm468_vm6, %v5236_v48, -inf }
 0x647   :  { %5313 = vmax.xlane.f32.xlu1 %v5312_v57 }
 0x649   :  { %v15496_v27 = vpop.f32.mrb[168].mxu0 }
 0x64a   :  { %v15500_v39 = vcombine.high %v15496_v27, %v15496_v27  ;;  %v5237_v6 = vcombine.low %v15493_v28, %v15496_v27  ;;  %v5082_v23 = vpop.f32.mrb[169].mxu0 }
 0x64b   :  { %v15504_v37 = vpop.f32.mrb[170].mxu0 }
 0x64c   :  { %v15508_v9 = vcombine.high %v15504_v37, %v15504_v37  ;;  %v5238_v7 = vcombine.low %v15500_v39, %v15504_v37  ;;  %v5315_v13 = vsel %vm468_vm6, %v5237_v6, -inf  ;;  %v5085_v60 = vpop.f32.mrb[171].mxu0 }
 0x64d   :  { %5316 = vmax.xlane.f32.xlu0 %v5315_v13 }
 0x64e   :  { %v5318_v26 = vsel %vm468_vm6, %v5238_v7, -inf  ;;  %v5321_v33 = vsel %vm5284_vm13, %v15508_v9, -inf }
 0x64f   :  { %5319 = vmax.xlane.f32.xlu1 %v5318_v26 }
 0x651   :  { %5322 = vmax.xlane.f32.xlu0 %v5321_v33  ;;  %v15516_v51 = vpop.f32.mrb[172].mxu0 }
 0x652   :  { %v15520_v58 = vcombine.high %v15516_v51, %v15516_v51  ;;  %v5090_v1 = vpop.f32.mrb[173].mxu0 }
 0x653   :  { %v15522_v8 = vpop.f32.mrb[174].mxu0 }
 0x654   :  { %v5239_v50 = vcombine.low %v15516_v51, %v15520_v58  ;;  %v15528_v18 = vcombine.high %v15522_v8, %v15522_v8  ;;  %v5093_v43 = vpop.f32.mrb[175].mxu0 }
 0x656   :  { %v5240_v42 = vcombine.low %v15522_v8, %v15528_v18  ;;  %v5324_v30 = vsel %vm468_vm6, %v5239_v50, -inf }
 0x657   :  { %5325 = vmax.xlane.f32.xlu1 %v5324_v30 }
 0x658   :  { %v5327_v38 = vsel %vm468_vm6, %v5240_v42, -inf }
 0x659   :  { %v15534_v45 = vpop.f32.mrb[176].mxu0  ;;  %5328 = vmax.xlane.f32.xlu0 %v5327_v38 }
 0x65a   :  { %v15538_v10 = vcombine.high %v15534_v45, %v15534_v45  ;;  %v5098_v16 = vpop.f32.mrb[177].mxu0 }
 0x65b   :  { %v15540_v41 = vpop.f32.mrb[178].mxu0 }
 0x65c   :  { %v5241_v59 = vcombine.low %v15534_v45, %v15538_v10  ;;  %v5333_v36 = vsel %vm5284_vm13, %v15540_v41, -inf  ;;  %v5101_v46 = vpop.f32.mrb[179].mxu0  ;;  %v15548_v4 = vcombine.high %v15540_v41, %v15540_v41 }
 0x65d   :  { %5334 = vmax.xlane.f32.xlu0 %v5333_v36 }
 0x65e   :  { %v5330_v3 = vsel %vm468_vm6, %v5241_v59, -inf }
 0x65f   :  { %5331 = vmax.xlane.f32.xlu1 %v5330_v3 }
 0x661   :  { %v15551_v24 = vpop.f32.mrb[180].mxu0 }
 0x662   :  { %v15555_v56 = vcombine.high %v15551_v24, %v15551_v24  ;;  %v5242_v61 = vcombine.low %v15548_v4, %v15551_v24  ;;  %v5106_v32 = vpop.f32.mrb[181].mxu0 }
 0x663   :  { %v15559_v19 = vpop.f32.mrb[182].mxu0 }
 0x664   :  { %v5243_v5 = vcombine.low %v15555_v56, %v15559_v19  ;;  %v5109_v48 = vpop.f32.mrb[183].mxu0  ;;  %v5336_v35 = vsel %vm468_vm6, %v5242_v61, -inf  ;;  %v15566_v57 = vcombine.high %v15559_v19, %v15559_v19 }
 0x665   :  { %5337 = vmax.xlane.f32.xlu1 %v5336_v35 }
 0x666   :  { %v5339_v6 = vsel %vm468_vm6, %v5243_v5, -inf }
 0x667   :  { %5340 = vmax.xlane.f32.xlu0 %v5339_v6 }
 0x669   :  { %v15569_v23 = vpop.f32.mrb[184].mxu0 }
 0x66a   :  { %v15573_v7 = vcombine.high %v15569_v23, %v15569_v23  ;;  %v5244_v13 = vcombine.low %v15566_v57, %v15569_v23  ;;  %v5114_v60 = vpop.f32.mrb[185].mxu0 }
 0x66b   :  { %v15577_v26 = vpop.f32.mrb[186].mxu0 }
 0x66c   :  { %18871 = vst [vmem:[#allocation15_spill] sm:$0xff] %v15577_v26  ;;  %v5342_v33 = vsel %vm468_vm6, %v5244_v13, -inf  ;;  %v5345_v1 = vsel %vm5284_vm13, %v15573_v7, -inf  ;;  %v15584_v50 = vcombine.high %v15577_v26, %v15577_v26  ;;  %v5117_v43 = vpop.f32.mrb[187].mxu0 }
 0x66d   :  { %5343 = vmax.xlane.f32.xlu1 %v5342_v33  ;;  %5346 = vmax.xlane.f32.xlu0 %v5345_v1 }
 0x66e   :  { %18872 = vst [vmem:[#allocation17_spill] sm:$0xff] %v15584_v50  ;;  %v5245_v42 = vcombine.low %v15577_v26, %v15584_v50 }
 0x670   :  { %v5348_v30 = vsel %vm468_vm6, %v5245_v42, -inf }
 0x671   :  { %v15589_v38 = vpop.f32.mrb[188].mxu0  ;;  %5349 = vmax.xlane.f32.xlu1 %v5348_v30 }
 0x672   :  { %18873 = vst [vmem:[#allocation6_spill] sm:$0xff] %v15589_v38  ;;  %v15593_v16 = vcombine.high %v15589_v38, %v15589_v38  ;;  %v5122_v59 = vpop.f32.mrb[189].mxu0 }
 0x673   :  { %v15595_v36 = vpop.f32.mrb[190].mxu0 }
 0x674   :  { %18874 = vst [vmem:[#allocation16_spill] sm:$0xff] %v15593_v16  ;;  %18875 = vst [vmem:[#allocation14_spill] sm:$0xff] %v15595_v36  ;;  %v5246_v46 = vcombine.low %v15589_v38, %v15593_v16  ;;  %v15601_v3 = vcombine.high %v15595_v36, %v15595_v36  ;;  %v5125_v61 = vpop.f32.mrb[191].mxu0 }
 0x676   :  { %18876 = vst [vmem:[#allocation20_spill] sm:$0xff] %v15601_v3  ;;  %v5247_v32 = vcombine.low %v15595_v36, %v15601_v3  ;;  %v5351_v5 = vsel %vm468_vm6, %v5246_v46, -inf }
 0x677   :  { %5352 = vmax.xlane.f32.xlu0 %v5351_v5 }
 0x678   :  { %v5354_v48 = vsel %vm468_vm6, %v5247_v32, -inf }
 0x679   :  { %v15607_v35 = vpop.f32.mrb[192].mxu0  ;;  %5355 = vmax.xlane.f32.xlu1 %v5354_v48 }
 0x67a   :  { %v15611_v6 = vcombine.high %v15607_v35, %v15607_v35  ;;  %v5357_v13 = vsel %vm5284_vm13, %v15607_v35, -inf  ;;  %v5130_v60 = vpop.f32.mrb[193].mxu0 }
 0x67b   :  { %5358 = vmax.xlane.f32.xlu0 %v5357_v13  ;;  %v15615_v33 = vpop.f32.mrb[194].mxu0 }
 0x67c   :  { %18877 = vst [vmem:[#allocation21_spill] sm:$0xff] %v15611_v6  ;;  %18878 = vst [vmem:[#allocation22_spill] sm:$0xff] %v15615_v33  ;;  %v5248_v1 = vcombine.low %v15611_v6, %v15615_v33  ;;  %v5133_v43 = vpop.f32.mrb[195].mxu0  ;;  %v15621_v42 = vcombine.high %v15615_v33, %v15615_v33 }
 0x67e   :  { %18879 = vst [vmem:[#allocation25_spill] sm:$0xff] %v15621_v42  ;;  %v5360_v30 = vsel %vm468_vm6, %v5248_v1, -inf }
 0x67f   :  { %5361 = vmax.xlane.f32.xlu1 %v5360_v30 }
 0x681   :  { %v15624_v59 = vpop.f32.mrb[196].mxu0 }
 0x682   :  { %18880 = vst [vmem:[#allocation26_spill] sm:$0xff] %v15624_v59  ;;  %v15628_v46 = vcombine.high %v15624_v59, %v15624_v59  ;;  %v5249_v61 = vcombine.low %v15621_v42, %v15624_v59  ;;  %v5138_v32 = vpop.f32.mrb[197].mxu0 }
 0x683   :  { %v15632_v5 = vpop.f32.mrb[198].mxu0 }
 0x684   :  { %18881 = vst [vmem:[#allocation5_spill] sm:$0xff] %v15628_v46  ;;  %18882 = vst [vmem:[#allocation27_spill] sm:$0xff] %v15632_v5  ;;  %v15636_v48 = vcombine.high %v15632_v5, %v15632_v5  ;;  %v5250_v13 = vcombine.low %v15628_v46, %v15632_v5  ;;  %v5363_v60 = vsel %vm468_vm6, %v5249_v61, -inf  ;;  %v5141_v1 = vpop.f32.mrb[199].mxu0 }
 0x685   :  { %5364 = vmax.xlane.f32.xlu0 %v5363_v60 }
 0x686   :  { %18883 = vst [vmem:[#allocation23_spill] sm:$0xff] %v15636_v48  ;;  %v5366_v43 = vsel %vm468_vm6, %v5250_v13, -inf  ;;  %v5369_v30 = vsel %vm5284_vm13, %v15636_v48, -inf }
 0x687   :  { %5367 = vmax.xlane.f32.xlu1 %v5366_v43 }
 0x689   :  { %5370 = vmax.xlane.f32.xlu0 %v5369_v30 }
 0x6ac   :  { %v5277_v32 = vpop.xlane.xlu0 %5276 }
 0x6ae   :  { %v5280_v49 = vpop.xlane.xlu1 %5279 }
 0x6af   :  { %v5372_v42 = vmax.f32 %v5277_v32, %v5280_v49 }
 0x6b2   :  { %v5287_v59 = vpop.xlane.xlu0 %5286 }
 0x6b3   :  { %v5374_v3 = vsel %vm4461_vm10, %v5287_v59, -inf }
 0x6b6   :  { %v5283_v33 = vpop.xlane.xlu0 %5282 }
 0x6b7   :  { %v5373_v6 = vmax.f32 %v5372_v42, %v5283_v33 }
 0x6b9   :  { %v5375_v5 = vmax.f32 %v5373_v6, %v5374_v3 }
 0x6ba   :  { %v5290_v1 = vpop.xlane.xlu1 %5289 }
 0x6bb   :  { %v5376_v46 = vrot.slane %v5375_v5, 4 }
 0x6bc   :  { %v5293_v60 = vpop.xlane.xlu0 %5292 }
 0x6bd   :  { %v5377_v61 = vmax.f32 %v5375_v5, %v5376_v46  ;;  %v5382_v16 = vmax.f32 %v5290_v1, %v5293_v60 }
 0x6bf   :  { %v5378_v36 = vrot.slane %v5377_v61, 2 }
 0x6c1   :  { %v5379_v13 = vmax.f32 %v5377_v61, %v5378_v36 }
 0x6c2   :  { %v5296_v38 = vpop.xlane.xlu1 %5295  ;;  %v5299_v48 = vpop.xlane.xlu0 %5298 }
 0x6c3   :  { %v5380_v43 = vrot.slane %v5379_v13, 1  ;;  %v5383_v30 = vmax.f32 %v5382_v16, %v5296_v38  ;;  %v5384_v50 = vsel %vm4461_vm10, %v5299_v48, -inf }
 0x6c5   :  { %v5381_v26 = vmax.f32 %v5379_v13, %v5380_v43  ;;  %v5385_v49 = vmax.f32 %v5383_v30, %v5384_v50 }
 0x6c6   :  { %v5302_v50 = vpop.xlane.xlu1 %5301 }
 0x6c7   :  { %v5386_v32 = vrot.slane %v5385_v49, 4  ;;  %v5458_v33 = vsub.f32 %v15412_v62, %v5381_v26  ;;  %v5452_v3 = vsub.f32 %v15388_v2, %v5381_v26  ;;  %v5453_v6 = vsub.f32 %v15392_v22, %v5381_v26 }
 0x6c8   :  { %v5454_v42 = vsub.f32 %v15394_v11, %v5381_v26  ;;  %v5455_v36 = vsub.f32 %v15400_v54, %v5381_v26  ;;  %v5456_v59 = vsub.f32 %v15406_v34, %v5381_v26  ;;  %v5457_v46 = vsub.f32 %v15410_v14, %v5381_v26 }
 0x6c9   :  { %v5387_v38 = vmax.f32 %v5385_v49, %v5386_v32  ;;  %v5520_v16 = vmul.f32 1.442695, %v5458_v33  ;;  %v5508_v5 = vmul.f32 1.442695, %v5452_v3  ;;  %v5510_v48 = vmul.f32 1.442695, %v5453_v6 }
 0x6ca   :  { %v5512_v61 = vmul.f32 1.442695, %v5454_v42  ;;  %v5514_v62 = vmul.f32 1.442695, %v5455_v36  ;;  %v5516_v22 = vmul.f32 1.442695, %v5456_v59 }
 0x6cb   :  { %v5388_v1 = vrot.slane %v5387_v38, 2  ;;  %12400 = vpow2.f32 %v5520_v16  ;;  %v5518_v54 = vmul.f32 1.442695, %v5457_v46 }
 0x6cc   :  { %v5305_v2 = vpop.xlane.xlu0 %5304  ;;  %12402 = vpow2.f32 %v5508_v5 }
 0x6cd   :  { %v5389_v60 = vmax.f32 %v5387_v38, %v5388_v1  ;;  %v5392_v11 = vmax.f32 %v5302_v50, %v5305_v2  ;;  %12404 = vpow2.f32 %v5510_v48 }
 0x6ce   :  { %v5308_v13 = vpop.xlane.xlu1 %5307  ;;  %12406 = vpow2.f32 %v5512_v61 }
 0x6cf   :  { %v5390_v34 = vrot.slane %v5389_v60, 1  ;;  %v5393_v14 = vmax.f32 %v5392_v11, %v5308_v13  ;;  %12408 = vpow2.f32 %v5514_v62 }
 0x6d0   :  { %v5311_v26 = vpop.xlane.xlu0 %5310  ;;  %12410 = vpow2.f32 %v5516_v22 }
 0x6d1   :  { %v5391_v43 = vmax.f32 %v5389_v60, %v5390_v34  ;;  %v5394_v30 = vsel %vm4461_vm10, %v5311_v26, -inf  ;;  %12412 = vpow2.f32 %v5518_v54 }
 0x6d2   :  { %v5395_v49 = vmax.f32 %v5393_v14, %v5394_v30 }
 0x6d3   :  { %v5465_v32 = vsub.f32 %v15445_v55, %v5391_v43  ;;  %v5459_v33 = vsub.f32 %v15420_v12, %v5391_v43  ;;  %v5460_v3 = vsub.f32 %v15423_v44, %v5391_v43  ;;  %v5461_v6 = vsub.f32 %v15427_v25, %v5391_v43 }
 0x6d4   :  { %v5396_v42 = vrot.slane %v5395_v49, 4  ;;  %v5462_v36 = vsub.f32 %v15431_v29, %v5391_v43  ;;  %v5463_v59 = vsub.f32 %v15439_v63, %v5391_v43  ;;  %v5464_v48 = vsub.f32 %v15441_v40, %v5391_v43  ;;  %v5314_v44 = vpop.xlane.xlu1 %5313 }
 0x6d5   :  { %v15660_v46 = vpop.eup %12400  ;;  %v5534_v38 = vmul.f32 1.442695, %v5465_v32  ;;  %v5522_v16 = vmul.f32 1.442695, %v5459_v33  ;;  %v5524_v5 = vmul.f32 1.442695, %v5460_v3 }
 0x6d6   :  { %v15663_v50 = vpop.eup %12402  ;;  %v5397_v55 = vmax.f32 %v5395_v49, %v5396_v42  ;;  %v5725_v12 = vsel %vm5284_vm13, %v15660_v46, 0.0  ;;  %v5526_v25 = vmul.f32 1.442695, %v5461_v6  ;;  %v5528_v29 = vmul.f32 1.442695, %v5462_v36 }
 0x6d7   :  { %v15667_v61 = vpop.eup %12404  ;;  %5726 = vadd.xlane.f32.xlu0 %v5725_v12  ;;  %12414 = vpow2.f32 %v5534_v38  ;;  %v5530_v40 = vmul.f32 1.442695, %v5463_v59  ;;  %v5532_v22 = vmul.f32 1.442695, %v5464_v48 }
 0x6d8   :  { %v15669_v63 = vpop.eup %12406  ;;  %v5398_v1 = vrot.slane %v5397_v55, 2  ;;  %v5668_v62 = vcombine.low %v15663_v50, %v15667_v61  ;;  %12416 = vpow2.f32 %v5522_v16 }
 0x6d9   :  { %v15673_v2 = vpop.eup %12408  ;;  %12418 = vpow2.f32 %v5524_v5 }
 0x6da   :  { %v15675_v60 = vpop.eup %12410  ;;  %v5399_v11 = vmax.f32 %v5397_v55, %v5398_v1  ;;  %v5716_v54 = vsel %vm468_vm6, %v5668_v62, 0.0  ;;  %v5317_v13 = vpop.xlane.xlu0 %5316  ;;  %v5669_v34 = vcombine.low %v15669_v63, %v15673_v2  ;;  %12420 = vpow2.f32 %v5526_v25 }
 0x6db   :  { %v15680_v14 = vpop.eup %12412  ;;  %5717 = vadd.xlane.f32.xlu1 %v5716_v54  ;;  %v5402_v26 = vmax.f32 %v5314_v44, %v5317_v13  ;;  %12422 = vpow2.f32 %v5528_v29 }
 0x6dc   :  { %v5400_v43 = vrot.slane %v5399_v11, 1  ;;  %v5719_v30 = vsel %vm468_vm6, %v5669_v34, 0.0  ;;  %v5320_v49 = vpop.xlane.xlu1 %5319  ;;  %v5670_v32 = vcombine.low %v15675_v60, %v15680_v14  ;;  %12424 = vpow2.f32 %v5530_v40 }
 0x6dd   :  { %5720 = vadd.xlane.f32.xlu0 %v5719_v30  ;;  %v5403_v33 = vmax.f32 %v5402_v26, %v5320_v49  ;;  %12426 = vpow2.f32 %v5532_v22 }
 0x6de   :  { %v5401_v3 = vmax.f32 %v5399_v11, %v5400_v43  ;;  %v5722_v6 = vsel %vm468_vm6, %v5670_v32, 0.0  ;;  %v5323_v42 = vpop.xlane.xlu0 %5322 }
 0x6df   :  { %5723 = vadd.xlane.f32.xlu1 %v5722_v6  ;;  %v5404_v36 = vsel %vm4461_vm10, %v5323_v42, -inf }
 0x6e0   :  { %v5405_v59 = vmax.f32 %v5403_v33, %v5404_v36  ;;  %v5472_v38 = vsub.f32 %v15479_v31, %v5401_v3  ;;  %v5466_v16 = vsub.f32 %v15449_v21, %v5401_v3  ;;  %v5467_v5 = vsub.f32 %v15456_v0, %v5401_v3 }
 0x6e1   :  { %v15690_v48 = vpop.eup %12414  ;;  %v5468_v55 = vsub.f32 %v15461_v15, %v5401_v3  ;;  %v5469_v12 = vsub.f32 %v15465_v17, %v5401_v3  ;;  %v5470_v44 = vsub.f32 %v15467_v52, %v5401_v3  ;;  %v5471_v25 = vsub.f32 %v15473_v47, %v5401_v3 }
 0x6e2   :  { %v15696_v29 = vpop.eup %12416  ;;  %v5406_v1 = vrot.slane %v5405_v59, 4  ;;  %v5737_v31 = vsel %vm5284_vm13, %v15690_v48, 0.0  ;;  %v5548_v62 = vmul.f32 1.442695, %v5472_v38  ;;  %v5536_v21 = vmul.f32 1.442695, %v5466_v16 }
 0x6e3   :  { %v15700_v40 = vpop.eup %12418  ;;  %5738 = vadd.xlane.f32.xlu0 %v5737_v31  ;;  %v5538_v0 = vmul.f32 1.442695, %v5467_v5  ;;  %v5540_v22 = vmul.f32 1.442695, %v5468_v55  ;;  %v5542_v47 = vmul.f32 1.442695, %v5469_v12 }
 0x6e4   :  { %v15702_v15 = vpop.eup %12420  ;;  %v5407_v17 = vmax.f32 %v5405_v59, %v5406_v1  ;;  %v5671_v52 = vcombine.low %v15696_v29, %v15700_v40  ;;  %12428 = vpow2.f32 %v5548_v62  ;;  %v5544_v54 = vmul.f32 1.442695, %v5470_v44  ;;  %v5326_v49 = vpop.xlane.xlu1 %5325 }
 0x6e5   :  { %v15706_v11 = vpop.eup %12422  ;;  %12430 = vpow2.f32 %v5536_v21  ;;  %v5546_v13 = vmul.f32 1.442695, %v5471_v25 }
 0x6e6   :  { %v15708_v34 = vpop.eup %12424  ;;  %v5408_v26 = vrot.slane %v5407_v17, 2  ;;  %v5728_v43 = vsel %vm468_vm6, %v5671_v52, 0.0  ;;  %v5672_v30 = vcombine.low %v15702_v15, %v15706_v11  ;;  %v5329_v32 = vpop.xlane.xlu0 %5328  ;;  %12432 = vpow2.f32 %v5538_v0 }
 0x6e7   :  { %v15713_v33 = vpop.eup %12426  ;;  %5729 = vadd.xlane.f32.xlu1 %v5728_v43  ;;  %12434 = vpow2.f32 %v5540_v22  ;;  %v5412_v36 = vmax.f32 %v5326_v49, %v5329_v32 }
 0x6e8   :  { %v5409_v3 = vmax.f32 %v5407_v17, %v5408_v26  ;;  %v5731_v6 = vsel %vm468_vm6, %v5672_v30, 0.0  ;;  %v5673_v42 = vcombine.low %v15708_v34, %v15713_v33  ;;  %12436 = vpow2.f32 %v5542_v47 }
 0x6e9   :  { %5732 = vadd.xlane.f32.xlu0 %v5731_v6  ;;  %12438 = vpow2.f32 %v5544_v54 }
 0x6ea   :  { %v5410_v59 = vrot.slane %v5409_v3, 1  ;;  %v5734_v38 = vsel %vm468_vm6, %v5673_v42, 0.0  ;;  %v5335_v16 = vpop.xlane.xlu0 %5334  ;;  %12440 = vpow2.f32 %v5546_v13 }
 0x6eb   :  { %5735 = vadd.xlane.f32.xlu1 %v5734_v38  ;;  %v5414_v12 = vsel %vm4461_vm10, %v5335_v16, -inf }
 0x6ec   :  { %v5411_v5 = vmax.f32 %v5409_v3, %v5410_v59  ;;  %v5332_v55 = vpop.xlane.xlu1 %5331 }
 0x6ed   :  { %v5413_v44 = vmax.f32 %v5412_v36, %v5332_v55 }
 0x6ee   :  { %v15720_v25 = vpop.eup %12428  ;;  %v5479_v1 = vsub.f32 %v15508_v9, %v5411_v5  ;;  %v5473_v31 = vsub.f32 %v15483_v53, %v5411_v5  ;;  %v5474_v62 = vsub.f32 %v15487_v20, %v5411_v5  ;;  %v5475_v21 = vsub.f32 %v15493_v28, %v5411_v5 }
 0x6ef   :  { %v15726_v0 = vpop.eup %12430  ;;  %v5415_v22 = vmax.f32 %v5413_v44, %v5414_v12  ;;  %v5749_v17 = vsel %vm5284_vm13, %v15720_v25, 0.0  ;;  %v5476_v52 = vsub.f32 %v15496_v27, %v5411_v5  ;;  %v5477_v53 = vsub.f32 %v15500_v39, %v5411_v5 }
 0x6f0   :  { %v15731_v47 = vpop.eup %12432  ;;  %5750 = vadd.xlane.f32.xlu0 %v5749_v17  ;;  %v5562_v54 = vmul.f32 1.442695, %v5479_v1  ;;  %v5550_v13 = vmul.f32 1.442695, %v5473_v31  ;;  %v5552_v9 = vmul.f32 1.442695, %v5474_v62  ;;  %v5478_v43 = vsub.f32 %v15504_v37, %v5411_v5 }
 0x6f1   :  { %v15734_v26 = vpop.eup %12434  ;;  %v5416_v20 = vrot.slane %v5415_v22, 4  ;;  %v5674_v28 = vcombine.low %v15726_v0, %v15731_v47  ;;  %v5554_v27 = vmul.f32 1.442695, %v5475_v21  ;;  %v5556_v49 = vmul.f32 1.442695, %v5476_v52 }
 0x6f2   :  { %v15739_v30 = vpop.eup %12436  ;;  %12442 = vpow2.f32 %v5562_v54  ;;  %v5338_v36 = vpop.xlane.xlu1 %5337  ;;  %v5558_v37 = vmul.f32 1.442695, %v5477_v53  ;;  %v5560_v5 = vmul.f32 1.442695, %v5478_v43 }
 0x6f3   :  { %v15741_v32 = vpop.eup %12438  ;;  %v5417_v3 = vmax.f32 %v5415_v22, %v5416_v20  ;;  %v5740_v6 = vsel %vm468_vm6, %v5674_v28, 0.0  ;;  %v5675_v39 = vcombine.low %v15734_v26, %v15739_v30  ;;  %12444 = vpow2.f32 %v5550_v13 }
 0x6f4   :  { %v15746_v42 = vpop.eup %12440  ;;  %5741 = vadd.xlane.f32.xlu1 %v5740_v6  ;;  %12446 = vpow2.f32 %v5552_v9  ;;  %v5341_v55 = vpop.xlane.xlu0 %5340 }
 0x6f5   :  { %v5418_v59 = vrot.slane %v5417_v3, 2  ;;  %v5743_v38 = vsel %vm468_vm6, %v5675_v39, 0.0  ;;  %v5676_v16 = vcombine.low %v15741_v32, %v15746_v42  ;;  %12448 = vpow2.f32 %v5554_v27 }
 0x6f6   :  { %5744 = vadd.xlane.f32.xlu0 %v5743_v38  ;;  %12450 = vpow2.f32 %v5556_v49  ;;  %v5422_v31 = vmax.f32 %v5338_v36, %v5341_v55 }
 0x6f7   :  { %v5419_v12 = vmax.f32 %v5417_v3, %v5418_v59  ;;  %v5746_v44 = vsel %vm468_vm6, %v5676_v16, 0.0  ;;  %12452 = vpow2.f32 %v5558_v37 }
 0x6f8   :  { %5747 = vadd.xlane.f32.xlu1 %v5746_v44  ;;  %12454 = vpow2.f32 %v5560_v5 }
 0x6f9   :  { %v5420_v1 = vrot.slane %v5419_v12, 1 }
 0x6fa   :  { %v5344_v62 = vpop.xlane.xlu1 %5343  ;;  %v5347_v21 = vpop.xlane.xlu0 %5346 }
 0x6fb   :  { %v5421_v22 = vmax.f32 %v5419_v12, %v5420_v1  ;;  %v5423_v17 = vmax.f32 %v5422_v31, %v5344_v62  ;;  %v5424_v52 = vsel %vm4461_vm10, %v5347_v21, -inf }
 0x6fc   :  { %v15753_v54 = vpop.eup %12442 }
 0x6fd   :  { %v15755_v13 = vpop.eup %12444  ;;  %v5425_v9 = vmax.f32 %v5423_v17, %v5424_v52  ;;  %v5761_v53 = vsel %vm5284_vm13, %v15753_v54, 0.0  ;;  %v5486_v20 = vsub.f32 %v15540_v41, %v5421_v22  ;;  %v5480_v28 = vsub.f32 %v15516_v51, %v5421_v22 }
 0x6fe   :  { %v15761_v43 = vpop.eup %12446  ;;  %5762 = vadd.xlane.f32.xlu0 %v5761_v53  ;;  %v5481_v27 = vsub.f32 %v15520_v58, %v5421_v22  ;;  %v5482_v49 = vsub.f32 %v15522_v8, %v5421_v22  ;;  %v5483_v3 = vsub.f32 %v15528_v18, %v5421_v22  ;;  %v5484_v6 = vsub.f32 %v15534_v45, %v5421_v22  ;;  %v5350_v51 = vpop.xlane.xlu1 %5349 }
 0x6ff   :  { %v5426_v39 = vrot.slane %v5425_v9, 4  ;;  %v5677_v36 = vcombine.low %v15755_v13, %v15761_v43  ;;  %v5576_v37 = vmul.f32 1.442695, %v5486_v20  ;;  %v5564_v59 = vmul.f32 1.442695, %v5480_v28  ;;  %v15769_v41 = vpop.eup %12448 }
 0x700   :  { %v5566_v38 = vmul.f32 1.442695, %v5481_v27  ;;  %v5568_v16 = vmul.f32 1.442695, %v5482_v49  ;;  %v5485_v5 = vsub.f32 %v15538_v10, %v5421_v22  ;;  %v15772_v58 = vpop.eup %12450  ;;  %v5570_v45 = vmul.f32 1.442695, %v5483_v3 }
 0x701   :  { %v5427_v8 = vmax.f32 %v5425_v9, %v5426_v39  ;;  %v5752_v18 = vsel %vm468_vm6, %v5677_v36, 0.0  ;;  %12456 = vpow2.f32 %v5576_v37  ;;  %v15775_v55 = vpop.eup %12452  ;;  %v5678_v12 = vcombine.low %v15769_v41, %v15772_v58 }
 0x702   :  { %5753 = vadd.xlane.f32.xlu1 %v5752_v18  ;;  %12458 = vpow2.f32 %v5564_v59  ;;  %v5572_v44 = vmul.f32 1.442695, %v5484_v6  ;;  %v15779_v1 = vpop.eup %12454  ;;  %v5574_v10 = vmul.f32 1.442695, %v5485_v5 }
 0x703   :  { %v5428_v31 = vrot.slane %v5427_v8, 2  ;;  %12460 = vpow2.f32 %v5566_v38  ;;  %v5755_v62 = vsel %vm468_vm6, %v5678_v12, 0.0  ;;  %v5679_v22 = vcombine.low %v15775_v55, %v15779_v1 }
 0x704   :  { %v5353_v21 = vpop.xlane.xlu0 %5352  ;;  %12462 = vpow2.f32 %v5568_v16  ;;  %5756 = vadd.xlane.f32.xlu0 %v5755_v62 }
 0x705   :  { %v5429_v17 = vmax.f32 %v5427_v8, %v5428_v31  ;;  %v5432_v52 = vmax.f32 %v5350_v51, %v5353_v21  ;;  %12464 = vpow2.f32 %v5570_v45  ;;  %v5758_v9 = vsel %vm468_vm6, %v5679_v22, 0.0 }
 0x706   :  { %v5356_v53 = vpop.xlane.xlu1 %5355  ;;  %12466 = vpow2.f32 %v5572_v44  ;;  %5759 = vadd.xlane.f32.xlu1 %v5758_v9 }
 0x707   :  { %v5430_v20 = vrot.slane %v5429_v17, 1  ;;  %v5433_v28 = vmax.f32 %v5432_v52, %v5356_v53  ;;  %12468 = vpow2.f32 %v5574_v10 }
 0x708   :  { %v5359_v27 = vpop.xlane.xlu0 %5358 }
 0x709   :  { %v5431_v49 = vmax.f32 %v5429_v17, %v5430_v20  ;;  %v5434_v3 = vsel %vm4461_vm10, %v5359_v27, -inf }
 0x70a   :  { %v5435_v6 = vmax.f32 %v5433_v28, %v5434_v3 }
 0x70b   :  { %v15786_v39 = vpop.eup %12456  ;;  %v5493_v36 = vsub.f32 %v15573_v7, %v5431_v49  ;;  %v5487_v37 = vsub.f32 %v15548_v4, %v5431_v49  ;;  %v5488_v59 = vsub.f32 %v15551_v24, %v5431_v49  ;;  %v5489_v51 = vsub.f32 %v15555_v56, %v5431_v49 }
 0x70c   :  { %v15792_v38 = vpop.eup %12458  ;;  %v5436_v16 = vrot.slane %v5435_v6, 4  ;;  %v5773_v5 = vsel %vm5284_vm13, %v15786_v39, 0.0  ;;  %v5490_v8 = vsub.f32 %v15559_v19, %v5431_v49  ;;  %v5491_v18 = vsub.f32 %v15566_v57, %v5431_v49  ;;  %v5362_v10 = vpop.xlane.xlu1 %5361 }
 0x70d   :  { %v15798_v45 = vpop.eup %12460  ;;  %5774 = vadd.xlane.f32.xlu0 %v5773_v5  ;;  %v5590_v7 = vmul.f32 1.442695, %v5493_v36  ;;  %v5578_v12 = vmul.f32 1.442695, %v5487_v37  ;;  %v5580_v4 = vmul.f32 1.442695, %v5488_v59  ;;  %v5492_v24 = vsub.f32 %v15569_v23, %v5431_v49 }
 0x70e   :  { %v15801_v44 = vpop.eup %12462  ;;  %v5437_v56 = vmax.f32 %v5435_v6, %v5436_v16  ;;  %v5680_v31 = vcombine.low %v15792_v38, %v15798_v45  ;;  %v5582_v62 = vmul.f32 1.442695, %v5489_v51  ;;  %v5584_v19 = vmul.f32 1.442695, %v5490_v8 }
 0x70f   :  { %v15805_v21 = vpop.eup %12464  ;;  %12470 = vpow2.f32 %v5590_v7  ;;  %v5586_v57 = vmul.f32 1.442695, %v5491_v18  ;;  %v5588_v53 = vmul.f32 1.442695, %v5492_v24  ;;  %v18884_v7 = vld [vmem:[#allocation15_spill] sm:$0xff] }
 0x710   :  { %v15807_v22 = vpop.eup %12466  ;;  %v5438_v17 = vrot.slane %v5437_v56, 2  ;;  %v5764_v52 = vsel %vm468_vm6, %v5680_v31, 0.0  ;;  %v5681_v23 = vcombine.low %v15801_v44, %v15805_v21  ;;  %12472 = vpow2.f32 %v5578_v12  ;;  %v18886_v31 = vld [vmem:[#allocation6_spill] sm:$0xff] }
 0x711   :  { %v15812_v9 = vpop.eup %12468  ;;  %5765 = vadd.xlane.f32.xlu1 %v5764_v52  ;;  %12474 = vpow2.f32 %v5580_v4  ;;  %v18885_v4 = vld [vmem:[#allocation17_spill] sm:$0xff]  ;;  %v18889_v52 = vld [vmem:[#allocation20_spill] sm:$0xff] }
 0x712   :  { %v5439_v20 = vmax.f32 %v5437_v56, %v5438_v17  ;;  %v5767_v28 = vsel %vm468_vm6, %v5681_v23, 0.0  ;;  %v5365_v27 = vpop.xlane.xlu0 %5364  ;;  %v5682_v49 = vcombine.low %v15807_v22, %v15812_v9  ;;  %12476 = vpow2.f32 %v5582_v62  ;;  %v18887_v62 = vld [vmem:[#allocation16_spill] sm:$0xff] }
 0x713   :  { %5768 = vadd.xlane.f32.xlu0 %v5767_v28  ;;  %v5442_v3 = vmax.f32 %v5362_v10, %v5365_v27  ;;  %12478 = vpow2.f32 %v5584_v19 }
 0x714   :  { %v5440_v6 = vrot.slane %v5439_v20, 1  ;;  %v5770_v36 = vsel %vm468_vm6, %v5682_v49, 0.0  ;;  %v5368_v37 = vpop.xlane.xlu1 %5367  ;;  %12480 = vpow2.f32 %v5586_v57  ;;  %v18888_v57 = vld [vmem:[#allocation14_spill] sm:$0xff] }
 0x715   :  { %5771 = vadd.xlane.f32.xlu1 %v5770_v36  ;;  %v5443_v59 = vmax.f32 %v5442_v3, %v5368_v37  ;;  %12482 = vpow2.f32 %v5588_v53 }
 0x716   :  { %v5441_v51 = vmax.f32 %v5439_v20, %v5440_v6  ;;  %v5371_v16 = vpop.xlane.xlu0 %5370 }
 0x717   :  { %v5444_v5 = vsel %vm4461_vm10, %v5371_v16, -inf }
 0x718   :  { %v5445_v8 = vmax.f32 %v5443_v59, %v5444_v5  ;;  %v5500_v18 = vsub.f32 %v15607_v35, %v5441_v51  ;;  %v5494_v12 = vsub.f32 %v18884_v7, %v5441_v51  ;;  %v5495_v24 = vsub.f32 %v18885_v4, %v5441_v51 }
 0x719   :  { %v15822_v56 = vpop.eup %12470  ;;  %v5496_v10 = vsub.f32 %v18886_v31, %v5441_v51  ;;  %v5497_v19 = vsub.f32 %v18887_v62, %v5441_v51  ;;  %v5498_v17 = vsub.f32 %v18888_v57, %v5441_v51  ;;  %v5499_v23 = vsub.f32 %v18889_v52, %v5441_v51 }
 0x71a   :  { %v15828_v53 = vpop.eup %12472  ;;  %v5446_v20 = vrot.slane %v5445_v8, 4  ;;  %v5785_v35 = vsel %vm5284_vm13, %v15822_v56, 0.0  ;;  %v5604_v28 = vmul.f32 1.442695, %v5500_v18  ;;  %v5592_v27 = vmul.f32 1.442695, %v5494_v12 }
 0x71b   :  { %v15832_v49 = vpop.eup %12474  ;;  %5786 = vadd.xlane.f32.xlu0 %v5785_v35  ;;  %v5594_v3 = vmul.f32 1.442695, %v5495_v24  ;;  %v5596_v6 = vmul.f32 1.442695, %v5496_v10  ;;  %v5598_v51 = vmul.f32 1.442695, %v5497_v19 }
 0x71c   :  { %v15834_v36 = vpop.eup %12476  ;;  %v5447_v37 = vmax.f32 %v5445_v8, %v5446_v20  ;;  %v5683_v59 = vcombine.low %v15828_v53, %v15832_v49  ;;  %12484 = vpow2.f32 %v5604_v28  ;;  %v5600_v5 = vmul.f32 1.442695, %v5498_v17  ;;  %v18892_v35 = vld [vmem:[#allocation21_spill] sm:$0xff] }
 0x71d   :  { %v15838_v16 = vpop.eup %12478  ;;  %12486 = vpow2.f32 %v5592_v27  ;;  %v5602_v7 = vmul.f32 1.442695, %v5499_v23  ;;  %v18891_v23 = vld [vmem:[#allocation23_spill] sm:$0xff]  ;;  %v18893_v27 = vld [vmem:[#allocation22_spill] sm:$0xff] }
 0x71e   :  { %v15840_v18 = vpop.eup %12480  ;;  %v5448_v12 = vrot.slane %v5447_v37, 2  ;;  %v5776_v4 = vsel %vm468_vm6, %v5683_v59, 0.0  ;;  %v5684_v24 = vcombine.low %v15834_v36, %v15838_v16  ;;  %12488 = vpow2.f32 %v5594_v3 }
 0x71f   :  { %v15845_v8 = vpop.eup %12482  ;;  %5777 = vadd.xlane.f32.xlu1 %v5776_v4  ;;  %12490 = vpow2.f32 %v5596_v6  ;;  %v18894_v6 = vld [vmem:[#allocation25_spill] sm:$0xff] }
 0x720   :  { %v5449_v31 = vmax.f32 %v5447_v37, %v5448_v12  ;;  %v5779_v10 = vsel %vm468_vm6, %v5684_v24, 0.0  ;;  %v5685_v62 = vcombine.low %v15840_v18, %v15845_v8  ;;  %12492 = vpow2.f32 %v5598_v51 }
 0x721   :  { %5780 = vadd.xlane.f32.xlu0 %v5779_v10  ;;  %12494 = vpow2.f32 %v5600_v5  ;;  %v18895_v5 = vld [vmem:[#allocation26_spill] sm:$0xff] }
 0x722   :  { %v5450_v19 = vrot.slane %v5449_v31, 1  ;;  %v5782_v57 = vsel %vm468_vm6, %v5685_v62, 0.0  ;;  %12496 = vpow2.f32 %v5602_v7  ;;  %v18896_v7 = vld [vmem:[#allocation5_spill] sm:$0xff] }
 0x723   :  { %5783 = vadd.xlane.f32.xlu1 %v5782_v57 }
 0x724   :  { %v5451_v17 = vmax.f32 %v5449_v31, %v5450_v19  ;;  %v18898_v19 = vld [vmem:[#allocation27_spill] sm:$0xff] }
 0x726   :  { %v15851_v52 = vpop.eup %12484  ;;  %v5507_v20 = vsub.f32 %v18891_v23, %v5451_v17  ;;  %v5501_v28 = vsub.f32 %v18892_v35, %v5451_v17  ;;  %v5502_v3 = vsub.f32 %v18893_v27, %v5451_v17  ;;  %v5503_v37 = vsub.f32 %v18894_v6, %v5451_v17 }
 0x727   :  { %18890 = vst [vmem:[#allocation7_spill] sm:$0xff] %v15851_v52  ;;  %v15857_v59 = vpop.eup %12486  ;;  %v5797_v51 = vsel %vm5284_vm13, %v15851_v52, 0.0  ;;  %v5504_v12 = vsub.f32 %v18895_v5, %v5451_v17  ;;  %v5505_v4 = vsub.f32 %v18896_v7, %v5451_v17  ;;  %v5506_v57 = vsub.f32 %v18898_v19, %v5451_v17 }
 0x728   :  { %v15863_v24 = vpop.eup %12488  ;;  %5798 = vadd.xlane.f32.xlu0 %v5797_v51  ;;  %v5618_v31 = vmul.f32 1.442695, %v5507_v20  ;;  %v5606_v10 = vmul.f32 1.442695, %v5501_v28  ;;  %v5608_v62 = vmul.f32 1.442695, %v5502_v3 }
 0x729   :  { %18897 = vst [vmem:[#allocation8_spill] sm:$0xff] %v15863_v24  ;;  %v15866_v23 = vpop.eup %12490  ;;  %v5686_v35 = vcombine.low %v15857_v59, %v15863_v24  ;;  %v5610_v27 = vmul.f32 1.442695, %v5503_v37  ;;  %v5612_v5 = vmul.f32 1.442695, %v5504_v12 }
 0x72a   :  { %18899 = vst [vmem:[#allocation28_spill] sm:$0xff] %v15866_v23  ;;  %v15870_v6 = vpop.eup %12492  ;;  %12498 = vpow2.f32 %v5618_v31  ;;  %v5614_v28 = vmul.f32 1.442695, %v5505_v4  ;;  %v5616_v3 = vmul.f32 1.442695, %v5506_v57 }
 0x72b   :  { %18900 = vst [vmem:[#allocation10_spill] sm:$0xff] %v15870_v6  ;;  %v15872_v52 = vpop.eup %12494  ;;  %v5788_v7 = vsel %vm468_vm6, %v5686_v35, 0.0  ;;  %v5687_v20 = vcombine.low %v15866_v23, %v15870_v6  ;;  %12500 = vpow2.f32 %v5606_v10  ;;  %v12225_v23 = vld [vmem:[%s18612_s5 + $0x40] ss:$8 sps:$4 sm:$0xff]  }
 0x72c   :  { %v15877_v17 = vpop.eup %12496  ;;  %5789 = vadd.xlane.f32.xlu1 %v5788_v7  ;;  %12502 = vpow2.f32 %v5608_v62 }
 0x72d   :  { %v5791_v37 = vsel %vm468_vm6, %v5687_v20, 0.0  ;;  %v5688_v51 = vcombine.low %v15872_v52, %v15877_v17  ;;  %12504 = vpow2.f32 %v5610_v27 }
 0x72e   :  { %5792 = vadd.xlane.f32.xlu0 %v5791_v37  ;;  %12506 = vpow2.f32 %v5612_v5 }
 0x72f   :  { %v5794_v12 = vsel %vm468_vm6, %v5688_v51, 0.0  ;;  %12508 = vpow2.f32 %v5614_v28  ;;  %v12213_v51 = vld [vmem:[%s18612_s5] ss:$8 sps:$4 sm:$0xff]  }
 0x730   :  { %5795 = vadd.xlane.f32.xlu1 %v5794_v12  ;;  %12510 = vpow2.f32 %v5616_v3  ;;  %v12215_v12 = vld [vmem:[%s18612_s5 + $0x4] ss:$8 sps:$4 sm:$0xff]  }
 0x731   :  { %6952 = vmatprep.subr.bf16.mxu0 %v12215_v12 }
 0x732   :  { %6953 = vmatpush1.bf16.msra.mxu0 %v12213_v51 }
 0x734   :  { %v15883_v31 = vpop.eup %12498 }
 0x735   :  { %18901 = vst [vmem:[#allocation9_spill] sm:$0xff] %v15883_v31  ;;  %v15885_v4 = vpop.eup %12500  ;;  %v5809_v10 = vsel %vm5284_vm13, %v15883_v31, 0.0 }
 0x736   :  { %18902 = vst [vmem:[#allocation11_spill] sm:$0xff] %v15885_v4  ;;  %v15889_v62 = vpop.eup %12502  ;;  %5810 = vadd.xlane.f32.xlu0 %v5809_v10  ;;  %v12216_v10 = vld [vmem:[%s18612_s5 + $0x10] ss:$8 sps:$4 sm:$0xff]  }
 0x737   :  { %18903 = vst [vmem:[#allocation12_spill] sm:$0xff] %v15889_v62  ;;  %v15891_v19 = vpop.eup %12504  ;;  %v5689_v57 = vcombine.low %v15885_v4, %v15889_v62 }
 0x738   :  { %18904 = vst [vmem:[#allocation13_spill] sm:$0xff] %v15891_v19  ;;  %v15895_v35 = vpop.eup %12506 }
 0x739   :  { %18905 = vst [vmem:[#allocation18_spill] sm:$0xff] %v15895_v35  ;;  %v15897_v27 = vpop.eup %12508  ;;  %v5800_v5 = vsel %vm468_vm6, %v5689_v57, 0.0  ;;  %v5690_v7 = vcombine.low %v15891_v19, %v15895_v35  ;;  %v12218_v57 = vld [vmem:[%s18612_s5 + $0x14] ss:$8 sps:$4 sm:$0xff]  }
 0x73a   :  { %18906 = vst [vmem:[#allocation19_spill] sm:$0xff] %v15897_v27  ;;  %v15902_v20 = vpop.eup %12510  ;;  %5801 = vadd.xlane.f32.xlu1 %v5800_v5  ;;  %6954 = vmatprep.subr.bf16.mxu0 %v12218_v57  ;;  %v12224_v35 = vld [vmem:[%s18612_s5 + $0x34] ss:$8 sps:$4 sm:$0xff]  }
 0x73b   :  { %18907 = vst [vmem:[#allocation24_spill] sm:$0xff] %v15902_v20  ;;  %v5803_v28 = vsel %vm468_vm6, %v5690_v7, 0.0  ;;  %v5691_v3 = vcombine.low %v15897_v27, %v15902_v20  ;;  %6955 = vmatpush1.bf16.msra.mxu0 %v12216_v10  ;;  %v12219_v7 = vld [vmem:[%s18612_s5 + $0x20] ss:$8 sps:$4 sm:$0xff]   ;;  %v12222_v27 = vld [vmem:[%s18612_s5 + $0x30] ss:$8 sps:$4 sm:$0xff]  }
 0x73c   :  { %5804 = vadd.xlane.f32.xlu0 %v5803_v28  ;;  %v12221_v28 = vld [vmem:[%s18612_s5 + $0x24] ss:$8 sps:$4 sm:$0xff]  }
 0x73d   :  { %v5806_v37 = vsel %vm468_vm6, %v5691_v3, 0.0  ;;  %6956 = vmatprep.subr.bf16.mxu0 %v12221_v28 }
 0x73e   :  { %5807 = vadd.xlane.f32.xlu1 %v5806_v37 }
 0x73f   :  { %6957 = vmatpush1.bf16.msra.mxu0 %v12219_v7 }
 0x740   :  { %6958 = vmatprep.subr.bf16.mxu0 %v12224_v35 }
 0x743   :  { %6959 = vmatpush1.bf16.msra.mxu0 %v12222_v27 }
 0x764   :  { %v5727_v5 = vpop.xlane.xlu0 %5726 }
 0x765   :  { %v5814_v20 = vsel %vm4461_vm10, %v5727_v5, 0.0 }
 0x768   :  { %v5718_v3 = vpop.xlane.xlu1 %5717 }
 0x76a   :  { %v5721_v37 = vpop.xlane.xlu0 %5720 }
 0x76b   :  { %v5812_v51 = vadd.f32 %v5721_v37, %v5718_v3 }
 0x76c   :  { %v5724_v12 = vpop.xlane.xlu1 %5723 }
 0x76d   :  { %v5813_v31 = vadd.f32 %v5812_v51, %v5724_v12 }
 0x76f   :  { %v5815_v57 = vadd.f32 %v5814_v20, %v5813_v31 }
 0x770   :  { %v5739_v10 = vpop.xlane.xlu0 %5738 }
 0x771   :  { %v5816_v19 = vrot.slane %v5815_v57, 4  ;;  %v5824_v62 = vsel %vm4461_vm10, %v5739_v10, 0.0 }
 0x773   :  { %v5817_v7 = vadd.f32 %v5816_v19, %v5815_v57  ;;  %v12227_v19 = vld [vmem:[%s18612_s5 + $0x44] ss:$8 sps:$4 sm:$0xff]  }
 0x774   :  { %v5730_v28 = vpop.xlane.xlu1 %5729  ;;  %6960 = vmatprep.subr.bf16.mxu0 %v12227_v19 }
 0x775   :  { %v5818_v3 = vrot.slane %v5817_v7, 2  ;;  %6961 = vmatpush1.bf16.msra.mxu0 %v12225_v23 }
 0x776   :  { %v5733_v37 = vpop.xlane.xlu0 %5732 }
 0x777   :  { %v5819_v51 = vadd.f32 %v5818_v3, %v5817_v7  ;;  %v5822_v12 = vadd.f32 %v5733_v37, %v5730_v28 }
 0x778   :  { %v5736_v5 = vpop.xlane.xlu1 %5735 }
 0x779   :  { %v5820_v31 = vrot.slane %v5819_v51, 1  ;;  %v5823_v20 = vadd.f32 %v5822_v12, %v5736_v5 }
 0x77b   :  { %v5821_v4 = vadd.f32 %v5820_v31, %v5819_v51  ;;  %v5825_v6 = vadd.f32 %v5824_v62, %v5823_v20  ;;  %v12228_v62 = vld [vmem:[%s18612_s5 + $0x50] ss:$8 sps:$4 sm:$0xff]   ;;  %v12230_v51 = vld [vmem:[%s18612_s5 + $0x54] ss:$8 sps:$4 sm:$0xff]  }
 0x77c   :  { %6962 = vmatprep.subr.bf16.mxu0 %v12230_v51 }
 0x77d   :  { %12512 = vrcp.f32 %v5821_v4  ;;  %v5826_v35 = vrot.slane %v5825_v6, 4  ;;  %v5751_v27 = vpop.xlane.xlu0 %5750  ;;  %6963 = vmatpush1.bf16.msra.mxu0 %v12228_v62 }
 0x77e   :  { %v5834_v23 = vsel %vm4461_vm10, %v5751_v27, 0.0 }
 0x77f   :  { %v5827_v57 = vadd.f32 %v5826_v35, %v5825_v6 }
 0x781   :  { %v5828_v7 = vrot.slane %v5827_v57, 2  ;;  %v5742_v28 = vpop.xlane.xlu1 %5741 }
 0x783   :  { %v5829_v3 = vadd.f32 %v5828_v7, %v5827_v57  ;;  %v5745_v10 = vpop.xlane.xlu0 %5744  ;;  %v12231_v7 = vld [vmem:[%s18612_s5 + $0x60] ss:$8 sps:$4 sm:$0xff]  }
 0x784   :  { %v5832_v37 = vadd.f32 %v5745_v10, %v5742_v28  ;;  %v12233_v28 = vld [vmem:[%s18612_s5 + $0x64] ss:$8 sps:$4 sm:$0xff]  }
 0x785   :  { %v5830_v12 = vrot.slane %v5829_v3, 1  ;;  %v5748_v4 = vpop.xlane.xlu1 %5747  ;;  %6964 = vmatprep.subr.bf16.mxu0 %v12233_v28 }
 0x786   :  { %v5833_v5 = vadd.f32 %v5832_v37, %v5748_v4  ;;  %6965 = vmatpush1.bf16.msra.mxu0 %v12231_v7 }
 0x787   :  { %v12513_v31 = vpop.eup %12512  ;;  %v5831_v6 = vadd.f32 %v5830_v12, %v5829_v3 }
 0x788   :  { %v5835_v20 = vadd.f32 %v5834_v23, %v5833_v5  ;;  %v5904_v19 = vmul.f32 %v12513_v31, %v15675_v60  ;;  %v5905_v35 = vmul.f32 %v12513_v31, %v15680_v14  ;;  %v5906_v57 = vmul.f32 %v12513_v31, %v15660_v46  ;;  %v12532_v46 = vld [vmem:[%s18607_s0 + $0x18] sm:$0xf]  ;;  %v12236_v5 = vld [vmem:[%s18612_s5 + $0x74] ss:$8 sps:$4 sm:$0xff]  }
 0x789   :  { %12514 = vrcp.f32 %v5831_v6  ;;  %v5900_v3 = vmul.f32 %v12513_v31, %v15663_v50  ;;  %v5901_v27 = vmul.f32 %v12513_v31, %v15667_v61  ;;  %v5902_v10 = vmul.f32 %v12513_v31, %v15669_v63  ;;  %v12533_v63 = vld [vmem:[%s18607_s0 + $0x10] sm:$0xff]  ;;  %v12534_v6 = vld [vmem:[%s18607_s0] sm:$0xff]  ;;  %6966 = vmatprep.subr.bf16.mxu0 %v12236_v5 }
 0x78a   :  { %v5836_v60 = vrot.slane %v5835_v20, 4  ;;  %v6006_v37 = vcombine.low %v5904_v19, %v5905_v35  ;;  %v6055_v14 = vmul.f32 %v12532_v46, %v5906_v57  ;;  %6119 = vst.msk [vmem:[%s18613_s15 + $0x18] sm:$0xf] %vm5284_vm13, %v5906_v57  ;;  %v5903_v62 = vmul.f32 %v12513_v31, %v15673_v2  ;;  %v12234_v2 = vld [vmem:[%s18612_s5 + $0x70] ss:$8 sps:$4 sm:$0xff]   ;;  %v12535_v57 = vld [vmem:[%s18607_s0 + $0x8] sm:$0xff] }
 0x78b   :  { %v6004_v50 = vcombine.low %v5900_v3, %v5901_v27  ;;  %v5763_v51 = vpop.xlane.xlu0 %5762  ;;  %6967 = vmatpush1.bf16.msra.mxu0 %v12234_v2 }
 0x78c   :  { %v5837_v61 = vadd.f32 %v5836_v60, %v5835_v20  ;;  %v6054_v12 = vmul.f32 %v12533_v63, %v6006_v37  ;;  %v6087_v4 = vmul.f32 784.0, %v6055_v14  ;;  %6118 = vst.msk [vmem:[%s18613_s15 + $0x10] sm:$0xff] %vm468_vm6, %v6006_v37  ;;  %v6005_v31 = vcombine.low %v5902_v10, %v5903_v62  ;;  %v12237_v10 = vld [vmem:[%s18612_s5 + $0x84] ss:$8 sps:$4 sm:$0x3f]  }
 0x78d   :  { %v6052_v23 = vmul.f32 %v12534_v6, %v6004_v50  ;;  %6116 = vst.msk [vmem:[%s18613_s15] sm:$0xff] %vm468_vm6, %v6004_v50  ;;  %v12239_v60 = vld [vmem:[%s18612_s5 + $0x80] ss:$8 sps:$4 sm:$0x3f]   ;;  %11258 = vmatprep.subr.msk.bf16.mxu0 %vm411_vm0, %v12237_v10  ;;  %v5844_v6 = vsel %vm4461_vm10, %v5763_v51, 0.0 }
 0x78e   :  { %v5838_v20 = vrot.slane %v5837_v61, 2  ;;  %v6086_v19 = vmul.f32 784.0, %v6054_v12  ;;  %6151 = vst.msk [vmem:[%s18614_s14 + $0x18] sm:$0xf] %vm5284_vm13, %v6087_v4  ;;  %v6053_v7 = vmul.f32 %v12535_v57, %v6005_v31  ;;  %v6947_v5 = vsel %vm411_vm0, %v12239_v60, 0 }
 0x78f   :  { %v5754_v35 = vpop.xlane.xlu1 %5753  ;;  %v6084_v28 = vmul.f32 784.0, %v6052_v23  ;;  %6117 = vst.msk [vmem:[%s18613_s15 + $0x8] sm:$0xff] %vm468_vm6, %v6005_v31  ;;  %6969 = vmatpush1.bf16.msra.mxu0 %v6947_v5 }
 0x790   :  { %v5839_v3 = vadd.f32 %v5838_v20, %v5837_v61  ;;  %v15998_v27 = vpack.c.bf16 %v6087_v4, %v6086_v19  ;;  %6150 = vst.msk [vmem:[%s18614_s14 + $0x10] sm:$0xff] %vm468_vm6, %v6086_v19  ;;  %v6085_v37 = vmul.f32 784.0, %v6053_v7 }
 0x791   :  { %6148 = vst.msk [vmem:[%s18614_s14] sm:$0xff] %vm468_vm6, %v6084_v28  ;;  %v5757_v14 = vpop.xlane.xlu0 %5756 }
 0x792   :  { %18908 = vst [vmem:[#allocation29_spill] sm:$0xff] %v15998_v27  ;;  %v5840_v46 = vrot.slane %v5839_v3, 1  ;;  %v6365_v62 = vrot.slane %v15998_v27, 1  ;;  %v6509_v50 = vrot.slane %v15998_v27, 2  ;;  %v6204_v61 = vshll.u32 %v15998_v27, 16  ;;  %6149 = vst.msk [vmem:[%s18614_s14 + $0x8] sm:$0xff] %vm468_vm6, %v6085_v37 }
 0x793   :  { %v12515_v63 = vpop.eup %12514  ;;  %v5842_v12 = vadd.f32 %v5757_v14, %v5754_v35  ;;  %v16022_v4 = vpack.c.bf16 %v6085_v37, %v6084_v28  ;;  %v6208_v2 = vshrl.u32 %v15998_v27, 16  ;;  %v5760_v23 = vpop.xlane.xlu1 %5759 }
 0x794   :  { %v5841_v31 = vadd.f32 %v5840_v46, %v5839_v3  ;;  %6390 = vrot.lane.b32.xlu0 %v6365_v62, %s12565_s20  ;;  %v6424_v20 = vrot.slane %v6204_v61, 2  ;;  %v5911_v3 = vmul.f32 %v12515_v63, %v15708_v34  ;;  %v6206_v14 = vrot.slane %v6204_v61, 1 }
 0x795   :  { %18909 = vst [vmem:[#allocation15_spill] sm:$0xff] %v16022_v4  ;;  %v5843_v19 = vadd.f32 %v5842_v12, %v5760_v23  ;;  %v6508_v35 = vrot.slane %v16022_v4, 2  ;;  %v6197_v57 = vshrl.u32 %v16022_v4, 16  ;;  %v6199_v7 = vshll.u32 %v16022_v4, 16 }
 0x796   :  { %12516 = vrcp.f32 %v5841_v31  ;;  %v6364_v28 = vrot.slane %v16022_v4, 1  ;;  %v6423_v10 = vrot.slane %v6208_v2, 1  ;;  %v5912_v31 = vmul.f32 %v12515_v63, %v15713_v33  ;;  %v12536_v33 = vld [vmem:[%s18607_s0 + $0x38] sm:$0xf] }
 0x797   :  { %v5845_v60 = vadd.f32 %v5844_v6, %v5843_v19  ;;  %v6510_v51 = vsel %vm411_vm0, %v6508_v35, %v6509_v50  ;;  %v6201_v37 = vrot.slane %v6199_v7, 1  ;;  %v6420_v46 = vrot.slane %v6197_v57, 1 }
 0x798   :  { %6532 = vrot.lane.b32.xlu1 %v6510_v51, %s12564_s19  ;;  %6534 = vrot.lane.b32.xlu0 %v6509_v50, %s12564_s19  ;;  %v6366_v12 = vsel %vm265_vm1, %v6364_v28, %v6365_v62  ;;  %v6421_v5 = vrot.slane %v6199_v7, 2  ;;  %v5913_v4 = vmul.f32 %v12515_v63, %v15690_v48  ;;  %v5907_v34 = vmul.f32 %v12515_v63, %v15696_v29  ;;  %v12537_v48 = vld [vmem:[%s18607_s0 + $0x30] sm:$0xff] }
 0x799   :  { %v5846_v23 = vrot.slane %v5845_v60, 4  ;;  %v6202_v27 = vor.u32 %v6201_v37, %v6197_v57  ;;  %v6425_v19 = vor.u32 %v6424_v20, %v6423_v10  ;;  %v6009_v35 = vcombine.low %v5911_v3, %v5912_v31  ;;  %v12538_v37 = vld [vmem:[%s18607_s0 + $0x20] sm:$0xff] }
 0x79a   :  { %v5775_v6 = vpop.xlane.xlu0 %5774  ;;  %v5908_v24 = vmul.f32 %v12515_v63, %v15700_v40  ;;  %v5909_v51 = vmul.f32 %v12515_v63, %v15702_v15  ;;  %v6422_v62 = vor.u32 %v6421_v5, %v6420_v46  ;;  %v6059_v57 = vmul.f32 %v12536_v33, %v5913_v4  ;;  %6123 = vst.msk [vmem:[%s18613_s15 + $0x38] sm:$0xf] %vm5284_vm13, %v5913_v4  ;;  %v12539_v46 = vld [vmem:[%s18607_s0 + $0x28] sm:$0xff] }
 0x79b   :  { %v5847_v50 = vadd.f32 %v5846_v23, %v5845_v60  ;;  %v6207_v61 = vsel %vm96_vm3, %v6202_v27, %v6206_v14  ;;  %v6058_v29 = vmul.f32 %v12537_v48, %v6009_v35  ;;  %6122 = vst.msk [vmem:[%s18613_s15 + $0x30] sm:$0xff] %vm468_vm6, %v6009_v35  ;;  %v5910_v40 = vmul.f32 %v12515_v63, %v15706_v11 }
 0x79c   :  { %6316 = vrot.lane.b32.xlu1 %v6207_v61, %s12566_s23  ;;  %6388 = vrot.lane.b32.xlu0 %v6366_v12, %s12565_s20  ;;  %v6091_v27 = vmul.f32 784.0, %v6059_v57  ;;  %v6007_v20 = vcombine.low %v5907_v34, %v5908_v24  ;;  %v6210_v7 = vor.u32 %v6208_v2, %v6206_v14  ;;  %v6426_v60 = vsel %vm322_vm2, %v6422_v62, %v6425_v19 }
 0x79d   :  { %v5848_v15 = vrot.slane %v5847_v50, 2  ;;  %v6090_v28 = vmul.f32 784.0, %v6058_v29  ;;  %v6008_v10 = vcombine.low %v5909_v51, %v5910_v40  ;;  %v5854_v34 = vsel %vm4461_vm10, %v5775_v6, 0.0 }
 0x79e   :  { %v5766_v4 = vpop.xlane.xlu1 %5765  ;;  %6155 = vst.msk [vmem:[%s18614_s14 + $0x38] sm:$0xf] %vm5284_vm13, %v6091_v27  ;;  %v6056_v11 = vmul.f32 %v12538_v37, %v6007_v20 }
 0x79f   :  { %v5849_v3 = vadd.f32 %v5848_v15, %v5847_v50  ;;  %6120 = vst.msk [vmem:[%s18613_s15 + $0x20] sm:$0xff] %vm468_vm6, %v6007_v20  ;;  %v16076_v2 = vpack.c.bf16 %v6091_v27, %v6090_v28  ;;  %6154 = vst.msk [vmem:[%s18614_s14 + $0x30] sm:$0xff] %vm468_vm6, %v6090_v28  ;;  %v6057_v14 = vmul.f32 %v12539_v46, %v6008_v10 }
 0x7a0   :  { %v16072_v24 = vpop.eup %12516  ;;  %6476 = vrot.lane.b32.xlu1 %v6426_v60, %s12567_s26  ;;  %6318 = vrot.lane.b32.xlu0 %v6210_v7, %s12566_s23  ;;  %v5769_v63 = vpop.xlane.xlu0 %5768  ;;  %6121 = vst.msk [vmem:[%s18613_s15 + $0x28] sm:$0xff] %vm468_vm6, %v6008_v10  ;;  %v6088_v31 = vmul.f32 784.0, %v6056_v11  ;;  %v12541_v10 = vld [vmem:[%s18607_s0 + $0x50] sm:$0xff] }
 0x7a1   :  { %v5850_v12 = vrot.slane %v5849_v3, 1  ;;  %v5852_v5 = vadd.f32 %v5769_v63, %v5766_v4  ;;  %v5918_v23 = vmul.f32 %v16072_v24, %v15741_v32  ;;  %v6368_v35 = vrot.slane %v16076_v2, 1  ;;  %v12540_v4 = vld [vmem:[%s18607_s0 + $0x58] sm:$0xf] }
 0x7a2   :  { %v5772_v51 = vpop.xlane.xlu1 %5771  ;;  %v6219_v50 = vshll.u32 %v16076_v2, 16  ;;  %v6223_v61 = vshrl.u32 %v16076_v2, 16  ;;  %v6089_v57 = vmul.f32 784.0, %v6057_v14  ;;  %6152 = vst.msk [vmem:[%s18614_s14 + $0x20] sm:$0xff] %vm468_vm6, %v6088_v31  ;;  %v5919_v32 = vmul.f32 %v16072_v24, %v15746_v42 }
 0x7a3   :  { %v5851_v62 = vadd.f32 %v5850_v12, %v5849_v3  ;;  %v5853_v33 = vadd.f32 %v5852_v5, %v5772_v51  ;;  %v5920_v40 = vmul.f32 %v16072_v24, %v15720_v25  ;;  %v6512_v20 = vrot.slane %v16076_v2, 2 }
 0x7a4   :  { %6394 = vrot.lane.b32.xlu1 %v6368_v35, %s12565_s20  ;;  %6478 = vrot.lane.b32.xlu0 %v6425_v19, %s12567_s26  ;;  %v16103_v6 = vrot.slane %v6219_v50, 1  ;;  %v6430_v48 = vrot.slane %v6223_v61, 1  ;;  %v6431_v29 = vrot.slane %v6219_v50, 2  ;;  %6153 = vst.msk [vmem:[%s18614_s14 + $0x28] sm:$0xff] %vm468_vm6, %v6089_v57  ;;  %v16111_v27 = vpack.c.bf16 %v6089_v57, %v6088_v31 }
 0x7a5   :  { %12518 = vrcp.f32 %v5851_v62  ;;  %v5855_v15 = vadd.f32 %v5854_v34, %v5853_v33  ;;  %v6012_v42 = vcombine.low %v5918_v23, %v5919_v32  ;;  %v6063_v7 = vmul.f32 %v12540_v4, %v5920_v40  ;;  %6127 = vst.msk [vmem:[%s18613_s15 + $0x58] sm:$0xf] %vm5284_vm13, %v5920_v40 }
 0x7a6   :  { %v6225_v19 = vor.u32 %v6223_v61, %v16103_v6  ;;  %v6367_v28 = vrot.slane %v16111_v27, 1  ;;  %v5914_v60 = vmul.f32 %v16072_v24, %v15726_v0  ;;  %v6212_v63 = vshrl.u32 %v16111_v27, 16 }
 0x7a7   :  { %v5856_v25 = vrot.slane %v5855_v15, 4  ;;  %v6062_v3 = vmul.f32 %v12541_v10, %v6012_v42  ;;  %6126 = vst.msk [vmem:[%s18613_s15 + $0x50] sm:$0xff] %vm468_vm6, %v6012_v42  ;;  %v6095_v11 = vmul.f32 784.0, %v6063_v7  ;;  %v6214_v46 = vshll.u32 %v16111_v27, 16  ;;  %v12543_v10 = vld [vmem:[%s18607_s0 + $0x48] sm:$0xff] }
 0x7a8   :  { %6538 = vrot.lane.b32.xlu1 %v6512_v20, %s12564_s19  ;;  %6322 = vrot.lane.b32.xlu0 %v6225_v19, %s12566_s23  ;;  %v5787_v37 = vpop.xlane.xlu0 %5786  ;;  %v5915_v14 = vmul.f32 %v16072_v24, %v15731_v47  ;;  %v6369_v5 = vsel %vm265_vm1, %v6367_v28, %v6368_v35  ;;  %v6432_v31 = vor.u32 %v6431_v29, %v6430_v48  ;;  %v6511_v23 = vrot.slane %v16111_v27, 2 }
 0x7a9   :  { %v5857_v12 = vadd.f32 %v5856_v25, %v5855_v15  ;;  %v6094_v0 = vmul.f32 784.0, %v6062_v3  ;;  %6159 = vst.msk [vmem:[%s18614_s14 + $0x58] sm:$0xf] %vm5284_vm13, %v6095_v11  ;;  %v6216_v34 = vrot.slane %v6214_v46, 1  ;;  %v6427_v51 = vrot.slane %v6212_v63, 1 }
 0x7aa   :  { %v6428_v50 = vrot.slane %v6214_v46, 2  ;;  %v5916_v62 = vmul.f32 %v16072_v24, %v15734_v26  ;;  %v5917_v47 = vmul.f32 %v16072_v24, %v15739_v30  ;;  %v6010_v35 = vcombine.low %v5914_v60, %v5915_v14  ;;  %v12542_v26 = vld [vmem:[%s18607_s0 + $0x40] sm:$0xff] }
 0x7ab   :  { %v5858_v61 = vrot.slane %v5857_v12, 2  ;;  %v16150_v57 = vpack.c.bf16 %v6095_v11, %v6094_v0  ;;  %6158 = vst.msk [vmem:[%s18614_s14 + $0x50] sm:$0xff] %vm468_vm6, %v6094_v0  ;;  %v6513_v24 = vsel %vm411_vm0, %v6511_v23, %v6512_v20  ;;  %v6217_v15 = vor.u32 %v6216_v34, %v6212_v63 }
 0x7ac   :  { %6392 = vrot.lane.b32.xlu1 %v6369_v5, %s12565_s20  ;;  %v5778_v33 = vpop.xlane.xlu1 %5777  ;;  %6482 = vrot.lane.b32.xlu0 %v6432_v31, %s12567_s26  ;;  %v6011_v48 = vcombine.low %v5916_v62, %v5917_v47  ;;  %v6060_v30 = vmul.f32 %v12542_v26, %v6010_v35  ;;  %6124 = vst.msk [vmem:[%s18613_s15 + $0x40] sm:$0xff] %vm468_vm6, %v6010_v35  ;;  %v5864_v14 = vsel %vm4461_vm10, %v5787_v37, 0.0 }
 0x7ad   :  { %v5859_v32 = vadd.f32 %v5858_v61, %v5857_v12  ;;  %v6371_v40 = vrot.slane %v16150_v57, 1  ;;  %v6429_v42 = vor.u32 %v6428_v50, %v6427_v51  ;;  %v6234_v25 = vshll.u32 %v16150_v57, 16 }
 0x7ae   :  { %v5781_v29 = vpop.xlane.xlu0 %5780  ;;  %v6238_v28 = vshrl.u32 %v16150_v57, 16  ;;  %6125 = vst.msk [vmem:[%s18613_s15 + $0x48] sm:$0xff] %vm468_vm6, %v6011_v48  ;;  %v6061_v3 = vmul.f32 %v12543_v10, %v6011_v48  ;;  %v6092_v60 = vmul.f32 784.0, %v6060_v30  ;;  %v6515_v23 = vrot.slane %v16150_v57, 2 }
 0x7af   :  { %v12519_v19 = vpop.eup %12518  ;;  %v5860_v4 = vrot.slane %v5859_v32, 1  ;;  %v5862_v7 = vadd.f32 %v5781_v29, %v5778_v33  ;;  %v16181_v5 = vrot.slane %v6234_v25, 1  ;;  %v6433_v37 = vsel %vm322_vm2, %v6429_v42, %v6432_v31  ;;  %v12545_v33 = vld [vmem:[%s18607_s0 + $0x78] sm:$0xf] }
 0x7b0   :  { %6536 = vrot.lane.b32.xlu1 %v6513_v24, %s12564_s19  ;;  %v5784_v20 = vpop.xlane.xlu1 %5783  ;;  %6398 = vrot.lane.b32.xlu0 %v6371_v40, %s12565_s20  ;;  %v5925_v11 = vmul.f32 %v12519_v19, %v15775_v55  ;;  %v5926_v63 = vmul.f32 %v12519_v19, %v15779_v1  ;;  %v6093_v0 = vmul.f32 784.0, %v6061_v3  ;;  %6156 = vst.msk [vmem:[%s18614_s14 + $0x40] sm:$0xff] %vm468_vm6, %v6092_v60  ;;  %v6437_v50 = vrot.slane %v6238_v28, 1 }
 0x7b1   :  { %v5861_v46 = vadd.f32 %v5860_v4, %v5859_v32  ;;  %v5863_v12 = vadd.f32 %v5862_v7, %v5784_v20  ;;  %v5927_v34 = vmul.f32 %v12519_v19, %v15753_v54  ;;  %v6222_v1 = vsel %vm96_vm3, %v6217_v15, %v16103_v6  ;;  %v12544_v6 = vld [vmem:[%s18607_s0 + $0x70] sm:$0xff] }
 0x7b2   :  { %v6015_v51 = vcombine.low %v5925_v11, %v5926_v63  ;;  %6157 = vst.msk [vmem:[%s18614_s14 + $0x48] sm:$0xff] %vm468_vm6, %v6093_v0  ;;  %v16200_v54 = vpack.c.bf16 %v6093_v0, %v6092_v60  ;;  %v6438_v61 = vrot.slane %v6234_v25, 2  ;;  %v6240_v35 = vor.u32 %v6238_v28, %v16181_v5 }
 0x7b3   :  { %12520 = vrcp.f32 %v5861_v46  ;;  %v5865_v55 = vadd.f32 %v5864_v14, %v5863_v12  ;;  %6131 = vst.msk [vmem:[%s18613_s15 + $0x78] sm:$0xf] %vm5284_vm13, %v5927_v34  ;;  %v6067_v32 = vmul.f32 %v12545_v33, %v5927_v34  ;;  %v5921_v48 = vmul.f32 %v12519_v19, %v15755_v13 }
 0x7b4   :  { %6320 = vrot.lane.b32.xlu1 %v6222_v1, %s12566_s23  ;;  %6542 = vrot.lane.b32.xlu0 %v6515_v23, %s12564_s19  ;;  %v6066_v31 = vmul.f32 %v12544_v6, %v6015_v51  ;;  %6130 = vst.msk [vmem:[%s18613_s15 + $0x70] sm:$0xff] %vm468_vm6, %v6015_v51  ;;  %v6370_v26 = vrot.slane %v16200_v54, 1  ;;  %v6227_v30 = vshrl.u32 %v16200_v54, 16  ;;  %v5922_v24 = vmul.f32 %v12519_v19, %v15761_v43  ;;  %v12546_v1 = vld [vmem:[%s18607_s0 + $0x60] sm:$0xff] }
 0x7b5   :  { %v5866_v62 = vrot.slane %v5865_v55, 4  ;;  %v5799_v47 = vpop.xlane.xlu0 %5798  ;;  %v5923_v29 = vmul.f32 %v12519_v19, %v15769_v41  ;;  %v6229_v42 = vshll.u32 %v16200_v54, 16  ;;  %v6099_v7 = vmul.f32 784.0, %v6067_v32 }
 0x7b6   :  { %v6098_v4 = vmul.f32 784.0, %v6066_v31  ;;  %v6439_v25 = vor.u32 %v6438_v61, %v6437_v50  ;;  %v5924_v13 = vmul.f32 %v12519_v19, %v15772_v58  ;;  %v6514_v10 = vrot.slane %v16200_v54, 2  ;;  %v12547_v31 = vld [vmem:[%s18607_s0 + $0x68] sm:$0xff] }
 0x7b7   :  { %v5867_v15 = vadd.f32 %v5866_v62, %v5865_v55  ;;  %v6231_v3 = vrot.slane %v6229_v42, 1  ;;  %6163 = vst.msk [vmem:[%s18614_s14 + $0x78] sm:$0xf] %vm5284_vm13, %v6099_v7  ;;  %v6434_v41 = vrot.slane %v6227_v30, 1  ;;  %v6435_v60 = vrot.slane %v6229_v42, 2 }
 0x7b8   :  { %6480 = vrot.lane.b32.xlu1 %v6433_v37, %s12567_s26  ;;  %6326 = vrot.lane.b32.xlu0 %v6240_v35, %s12566_s23  ;;  %v16231_v43 = vpack.c.bf16 %v6099_v7, %v6098_v4  ;;  %6162 = vst.msk [vmem:[%s18614_s14 + $0x70] sm:$0xff] %vm468_vm6, %v6098_v4  ;;  %v6013_v58 = vcombine.low %v5921_v48, %v5922_v24 }
 0x7b9   :  { %v5868_v28 = vrot.slane %v5867_v15, 2  ;;  %v5790_v20 = vpop.xlane.xlu1 %5789  ;;  %v6014_v19 = vcombine.low %v5923_v29, %v5924_v13  ;;  %v6372_v63 = vsel %vm265_vm1, %v6370_v26, %v6371_v40  ;;  %v6232_v14 = vor.u32 %v6231_v3, %v6227_v30  ;;  %v12549_v3 = vld [vmem:[%s18607_s0 + $0x90] sm:$0xff] }
 0x7ba   :  { %6128 = vst.msk [vmem:[%s18613_s15 + $0x60] sm:$0xff] %vm468_vm6, %v6013_v58  ;;  %v5874_v40 = vsel %vm4461_vm10, %v5799_v47, 0.0  ;;  %v6249_v55 = vshll.u32 %v16231_v43, 16  ;;  %v6064_v37 = vmul.f32 %v12546_v1, %v6013_v58  ;;  %v6516_v61 = vsel %vm411_vm0, %v6514_v10, %v6515_v23 }
 0x7bb   :  { %v5869_v11 = vadd.f32 %v5868_v28, %v5867_v15  ;;  %v5793_v46 = vpop.xlane.xlu0 %5792  ;;  %6129 = vst.msk [vmem:[%s18613_s15 + $0x68] sm:$0xff] %vm468_vm6, %v6014_v19  ;;  %v6436_v6 = vor.u32 %v6435_v60, %v6434_v41  ;;  %v6065_v62 = vmul.f32 %v12547_v31, %v6014_v19  ;;  %v6237_v35 = vsel %vm96_vm3, %v6232_v14, %v16181_v5  ;;  %v12551_v31 = vld [vmem:[%s18607_s0 + $0x88] sm:$0xff] }
 0x7bc   :  { %6396 = vrot.lane.b32.xlu1 %v6372_v63, %s12565_s20  ;;  %v5872_v12 = vadd.f32 %v5793_v46, %v5790_v20  ;;  %6486 = vrot.lane.b32.xlu0 %v6439_v25, %s12567_s26  ;;  %v6096_v33 = vmul.f32 784.0, %v6064_v37  ;;  %v6374_v23 = vrot.slane %v16231_v43, 1  ;;  %v16268_v24 = vrot.slane %v6249_v55, 1 }
 0x7bd   :  { %v12521_v0 = vpop.eup %12520  ;;  %v5870_v34 = vrot.slane %v5869_v11, 1  ;;  %v5796_v51 = vpop.xlane.xlu1 %5795  ;;  %v6097_v26 = vmul.f32 784.0, %v6065_v62  ;;  %v6253_v29 = vshrl.u32 %v16231_v43, 16  ;;  %v6440_v4 = vsel %vm322_vm2, %v6436_v6, %v6439_v25 }
 0x7be   :  { %v5873_v50 = vadd.f32 %v5872_v12, %v5796_v51  ;;  %v5932_v32 = vmul.f32 %v12521_v0, %v15807_v22  ;;  %v5933_v30 = vmul.f32 %v12521_v0, %v15812_v9  ;;  %6160 = vst.msk [vmem:[%s18614_s14 + $0x60] sm:$0xff] %vm468_vm6, %v6096_v33  ;;  %v5934_v22 = vmul.f32 %v12521_v0, %v15786_v39  ;;  %v12548_v39 = vld [vmem:[%s18607_s0 + $0x98] sm:$0xf]  ;;  %v12550_v51 = vld [vmem:[%s18607_s0 + $0x80] sm:$0xff] }
 0x7bf   :  { %v5871_v47 = vadd.f32 %v5870_v34, %v5869_v11  ;;  %6161 = vst.msk [vmem:[%s18614_s14 + $0x68] sm:$0xff] %vm468_vm6, %v6097_v26  ;;  %v5928_v9 = vmul.f32 %v12521_v0, %v15792_v38  ;;  %v5929_v42 = vmul.f32 %v12521_v0, %v15798_v45  ;;  %v16283_v13 = vpack.c.bf16 %v6097_v26, %v6096_v33 }
 0x7c0   :  { %v5875_v48 = vadd.f32 %v5874_v40, %v5873_v50  ;;  %6540 = vrot.lane.b32.xlu1 %v6516_v61, %s12564_s19  ;;  %6324 = vrot.lane.b32.xlu0 %v6237_v35, %s12566_s23  ;;  %v6018_v15 = vcombine.low %v5932_v32, %v5933_v30  ;;  %v6071_v28 = vmul.f32 %v12548_v39, %v5934_v22  ;;  %v6444_v25 = vrot.slane %v6253_v29, 1 }
 0x7c1   :  { %12522 = vrcp.f32 %v5871_v47  ;;  %6135 = vst.msk [vmem:[%s18613_s15 + $0x98] sm:$0xf] %vm5284_vm13, %v5934_v22  ;;  %v5930_v38 = vmul.f32 %v12521_v0, %v15801_v44  ;;  %v5931_v45 = vmul.f32 %v12521_v0, %v15805_v21  ;;  %v6445_v10 = vrot.slane %v6249_v55, 2 }
 0x7c2   :  { %v5876_v5 = vrot.slane %v5875_v48, 4  ;;  %6134 = vst.msk [vmem:[%s18613_s15 + $0x90] sm:$0xff] %vm468_vm6, %v6018_v15  ;;  %v6070_v41 = vmul.f32 %v12549_v3, %v6018_v15  ;;  %v6103_v60 = vmul.f32 784.0, %v6071_v28  ;;  %v6518_v19 = vrot.slane %v16231_v43, 2 }
 0x7c3   :  { %v5811_v7 = vpop.xlane.xlu0 %5810  ;;  %v6255_v11 = vor.u32 %v6253_v29, %v16268_v24  ;;  %v6016_v63 = vcombine.low %v5928_v9, %v5929_v42  ;;  %v6373_v14 = vrot.slane %v16283_v13, 1  ;;  %v6517_v44 = vrot.slane %v16283_v13, 2 }
 0x7c4   :  { %v5877_v20 = vadd.f32 %v5876_v5, %v5875_v48  ;;  %6402 = vrot.lane.b32.xlu1 %v6374_v23, %s12565_s20  ;;  %6484 = vrot.lane.b32.xlu0 %v6440_v4, %s12567_s26  ;;  %v6102_v21 = vmul.f32 784.0, %v6070_v41  ;;  %6167 = vst.msk [vmem:[%s18614_s14 + $0x98] sm:$0xf] %vm5284_vm13, %v6103_v60  ;;  %v6244_v12 = vshll.u32 %v16283_v13, 16  ;;  %v6242_v34 = vshrl.u32 %v16283_v13, 16 }
 0x7c5   :  { %v6017_v40 = vcombine.low %v5930_v38, %v5931_v45  ;;  %v6068_v55 = vmul.f32 %v12550_v51, %v6016_v63  ;;  %6132 = vst.msk [vmem:[%s18613_s15 + $0x80] sm:$0xff] %vm468_vm6, %v6016_v63  ;;  %v16322_v37 = vor.u32 %v6445_v10, %v6444_v25  ;;  %v5884_v33 = vsel %vm4461_vm10, %v5811_v7, 0.0 }
 0x7c6   :  { %v5878_v58 = vrot.slane %v5877_v20, 2  ;;  %v16324_v50 = vpack.c.bf16 %v6103_v60, %v6102_v21  ;;  %6166 = vst.msk [vmem:[%s18614_s14 + $0x90] sm:$0xff] %vm468_vm6, %v6102_v21  ;;  %v6375_v32 = vsel %vm265_vm1, %v6373_v14, %v6374_v23  ;;  %v6519_v26 = vsel %vm411_vm0, %v6517_v44, %v6518_v19 }
 0x7c7   :  { %v5802_v46 = vpop.xlane.xlu1 %5801  ;;  %v6069_v62 = vmul.f32 %v12551_v31, %v6017_v40  ;;  %v6100_v47 = vmul.f32 784.0, %v6068_v55  ;;  %6133 = vst.msk [vmem:[%s18613_s15 + $0x88] sm:$0xff] %vm468_vm6, %v6017_v40  ;;  %v6246_v30 = vrot.slane %v6244_v12, 1  ;;  %v6441_v5 = vrot.slane %v6242_v34, 1 }
 0x7c8   :  { %v5879_v0 = vadd.f32 %v5878_v58, %v5877_v20  ;;  %6546 = vrot.lane.b32.xlu1 %v6518_v19, %s12564_s19  ;;  %6330 = vrot.lane.b32.xlu0 %v6255_v11, %s12566_s23  ;;  %v6442_v15 = vrot.slane %v6244_v12, 2  ;;  %v6377_v39 = vrot.slane %v16324_v50, 1  ;;  %v6264_v28 = vshll.u32 %v16324_v50, 16  ;;  %v12553_v11 = vld [vmem:[%s18607_s0 + $0xb0] sm:$0xff] }
 0x7c9   :  { %v5805_v1 = vpop.xlane.xlu0 %5804  ;;  %6164 = vst.msk [vmem:[%s18614_s14 + $0x80] sm:$0xff] %vm468_vm6, %v6100_v47  ;;  %v6101_v9 = vmul.f32 784.0, %v6069_v62  ;;  %v6247_v20 = vor.u32 %v6246_v30, %v6242_v34  ;;  %v6268_v25 = vshrl.u32 %v16324_v50, 16  ;;  %v6521_v10 = vrot.slane %v16324_v50, 2 }
 0x7ca   :  { %v5880_v61 = vrot.slane %v5879_v0, 1  ;;  %v5882_v6 = vadd.f32 %v5805_v1, %v5802_v46  ;;  %v6443_v3 = vor.u32 %v6442_v15, %v6441_v5  ;;  %v16375_v19 = vrot.slane %v6264_v28, 1 }
 0x7cb   :  { %v12523_v35 = vpop.eup %12522  ;;  %v5808_v48 = vpop.xlane.xlu1 %5807  ;;  %6165 = vst.msk [vmem:[%s18614_s14 + $0x88] sm:$0xff] %vm468_vm6, %v6101_v9  ;;  %v16356_v38 = vpack.c.bf16 %v6101_v9, %v6100_v47  ;;  %v6252_v14 = vsel %vm96_vm3, %v6247_v20, %v16268_v24 }
 0x7cc   :  { %v5881_v29 = vadd.f32 %v5880_v61, %v5879_v0  ;;  %6400 = vrot.lane.b32.xlu1 %v6375_v32, %s12565_s20  ;;  %v5883_v22 = vadd.f32 %v5882_v6, %v5808_v48  ;;  %6490 = vrot.lane.b32.xlu0 %v16322_v37, %s12567_s26  ;;  %v5939_v23 = vmul.f32 %v12523_v35, %v15840_v18  ;;  %v12552_v18 = vld [vmem:[%s18607_s0 + $0xb8] sm:$0xf]  ;;  %v12555_v48 = vld [vmem:[%s18607_s0 + $0xa8] sm:$0xff] }
 0x7cd   :  { %v5940_v42 = vmul.f32 %v12523_v35, %v15845_v8  ;;  %v5941_v4 = vmul.f32 %v12523_v35, %v15822_v56  ;;  %v5935_v41 = vmul.f32 %v12523_v35, %v15828_v53  ;;  %v5936_v60 = vmul.f32 %v12523_v35, %v15832_v49 }
 0x7ce   :  { %12524 = vrcp.f32 %v5881_v29  ;;  %v5885_v7 = vadd.f32 %v5884_v33, %v5883_v22  ;;  %v6259_v44 = vshll.u32 %v16356_v38, 16  ;;  %v5937_v21 = vmul.f32 %v12523_v35, %v15834_v36 }
 0x7cf   :  { %v6021_v45 = vcombine.low %v5939_v23, %v5940_v42  ;;  %v6075_v56 = vmul.f32 %v12552_v18, %v5941_v4  ;;  %6139 = vst.msk [vmem:[%s18613_s15 + $0xb8] sm:$0xf] %vm5284_vm13, %v5941_v4  ;;  %v6451_v53 = vrot.slane %v6268_v25, 1  ;;  %v6452_v49 = vrot.slane %v6264_v28, 2  ;;  %v18910_v4 = vld [vmem:[#allocation7_spill] sm:$0xff]  ;;  %v18911_v28 = vld [vmem:[#allocation8_spill] sm:$0xff] }
 0x7d0   :  { %v5886_v8 = vrot.slane %v5885_v7, 4  ;;  %6544 = vrot.lane.b32.xlu1 %v6519_v26, %s12564_s19  ;;  %6406 = vrot.lane.b32.xlu0 %v6377_v39, %s12565_s20  ;;  %v6376_v24 = vrot.slane %v16356_v38, 1  ;;  %v5938_v34 = vmul.f32 %v12523_v35, %v15838_v16  ;;  %v6019_v36 = vcombine.low %v5935_v41, %v5936_v60  ;;  %v12554_v16 = vld [vmem:[%s18607_s0 + $0xa0] sm:$0xff] }
 0x7d1   :  { %6138 = vst.msk [vmem:[%s18613_s15 + $0xb0] sm:$0xff] %vm468_vm6, %v6021_v45  ;;  %v6074_v63 = vmul.f32 %v12553_v11, %v6021_v45  ;;  %v6107_v46 = vmul.f32 784.0, %v6075_v56  ;;  %v6447_v51 = vsel %vm322_vm2, %v6443_v3, %v16322_v37  ;;  %v6270_v55 = vor.u32 %v6268_v25, %v16375_v19  ;;  %v12556_v45 = vld [vmem:[%s18607_s0 + $0xd0] sm:$0xff]  ;;  %v12557_v56 = vld [vmem:[%s18607_s0 + $0xd8] sm:$0xf]  ;;  %v18913_v3 = vld [vmem:[#allocation10_spill] sm:$0xff] }
 0x7d2   :  { %v5887_v58 = vadd.f32 %v5886_v8, %v5885_v7  ;;  %v6257_v1 = vshrl.u32 %v16356_v38, 16  ;;  %v6261_v61 = vrot.slane %v6259_v44, 1  ;;  %v6020_v6 = vcombine.low %v5937_v21, %v5938_v34  ;;  %6136 = vst.msk [vmem:[%s18613_s15 + $0xa0] sm:$0xff] %vm468_vm6, %v6019_v36 }
 0x7d3   :  { %v6106_v0 = vmul.f32 784.0, %v6074_v63  ;;  %6171 = vst.msk [vmem:[%s18614_s14 + $0xb8] sm:$0xf] %vm5284_vm13, %v6107_v46  ;;  %v6072_v31 = vmul.f32 %v12554_v16, %v6019_v36  ;;  %v6453_v47 = vor.u32 %v6452_v49, %v6451_v53  ;;  %v6378_v35 = vsel %vm265_vm1, %v6376_v24, %v6377_v39  ;;  %v12559_v49 = vld [vmem:[%s18607_s0 + $0xc8] sm:$0xff] }
 0x7d4   :  { %v5888_v12 = vrot.slane %v5887_v58, 2  ;;  %6328 = vrot.lane.b32.xlu1 %v6252_v14, %s12566_s23  ;;  %6550 = vrot.lane.b32.xlu0 %v6521_v10, %s12564_s19  ;;  %v6520_v33 = vrot.slane %v16356_v38, 2  ;;  %v6073_v26 = vmul.f32 %v12555_v48, %v6020_v6  ;;  %6137 = vst.msk [vmem:[%s18613_s15 + $0xa8] sm:$0xff] %vm468_vm6, %v6020_v6  ;;  %v6262_v15 = vor.u32 %v6261_v61, %v6257_v1 }
 0x7d5   :  { %6170 = vst.msk [vmem:[%s18614_s14 + $0xb0] sm:$0xff] %vm468_vm6, %v6106_v0  ;;  %v16413_v32 = vpack.c.bf16 %v6107_v46, %v6106_v0  ;;  %v6104_v29 = vmul.f32 784.0, %v6072_v31  ;;  %v6448_v9 = vrot.slane %v6257_v1, 1  ;;  %v6449_v23 = vrot.slane %v6259_v44, 2 }
 0x7d6   :  { %v5889_v40 = vadd.f32 %v5888_v12, %v5887_v58  ;;  %v6105_v42 = vmul.f32 784.0, %v6073_v26  ;;  %v6522_v60 = vsel %vm411_vm0, %v6520_v33, %v6521_v10  ;;  %v6267_v58 = vsel %vm96_vm3, %v6262_v15, %v16375_v19  ;;  %v12558_v10 = vld [vmem:[%s18607_s0 + $0xc0] sm:$0xff]  ;;  %v18916_v26 = vld [vmem:[#allocation13_spill] sm:$0xff] }
 0x7d7   :  { %6168 = vst.msk [vmem:[%s18614_s14 + $0xa0] sm:$0xff] %vm468_vm6, %v6104_v29  ;;  %v6450_v11 = vor.u32 %v6449_v23, %v6448_v9  ;;  %v6283_v63 = vshrl.u32 %v16413_v32, 16  ;;  %v6380_v12 = vrot.slane %v16413_v32, 1  ;;  %v6524_v6 = vrot.slane %v16413_v32, 2  ;;  %v18918_v9 = vld [vmem:[#allocation19_spill] sm:$0xff] }
 0x7d8   :  { %v12525_v37 = vpop.eup %12524  ;;  %v5890_v62 = vrot.slane %v5889_v40, 1  ;;  %6488 = vrot.lane.b32.xlu1 %v6447_v51, %s12567_s26  ;;  %6334 = vrot.lane.b32.xlu0 %v6270_v55, %s12566_s23  ;;  %6169 = vst.msk [vmem:[%s18614_s14 + $0xa8] sm:$0xff] %vm468_vm6, %v6105_v42  ;;  %v16488_v34 = vpack.c.bf16 %v6105_v42, %v6104_v29  ;;  %v18917_v29 = vld [vmem:[#allocation18_spill] sm:$0xff]  ;;  %v18919_v42 = vld [vmem:[#allocation24_spill] sm:$0xff] }
 0x7d9   :  { %v5946_v22 = vmul.f32 %v12525_v37, %v15872_v52  ;;  %v5947_v5 = vmul.f32 %v12525_v37, %v15877_v17  ;;  %v5948_v7 = vmul.f32 %v12525_v37, %v18910_v4  ;;  %v5942_v52 = vmul.f32 %v12525_v37, %v15857_v59  ;;  %v18912_v59 = vld [vmem:[#allocation28_spill] sm:$0xff] }
 0x7da   :  { %v5891_v30 = vadd.f32 %v5890_v62, %v5889_v40  ;;  %v6279_v17 = vshll.u32 %v16413_v32, 16  ;;  %v5943_v20 = vmul.f32 %v12525_v37, %v18911_v28  ;;  %v5944_v25 = vmul.f32 %v12525_v37, %v18912_v59  ;;  %v18914_v62 = vld [vmem:[#allocation11_spill] sm:$0xff]  ;;  %v12560_v59 = vld [vmem:[%s18607_s0 + $0xe0] sm:$0xff] }
 0x7db   :  { %v6024_v39 = vcombine.low %v5946_v22, %v5947_v5  ;;  %v6079_v8 = vmul.f32 %v12557_v56, %v5948_v7  ;;  %6143 = vst.msk [vmem:[%s18613_s15 + $0xd8] sm:$0xf] %vm5284_vm13, %v5948_v7  ;;  %v5945_v41 = vmul.f32 %v12525_v37, %v18913_v3  ;;  %v6454_v24 = vsel %vm322_vm2, %v6450_v11, %v6453_v47  ;;  %v18920_v7 = vld [vmem:[#allocation9_spill] sm:$0xff] }
 0x7dc   :  { %12526 = vrcp.f32 %v5891_v30  ;;  %6404 = vrot.lane.b32.xlu1 %v6378_v35, %s12565_s20  ;;  %6494 = vrot.lane.b32.xlu0 %v6453_v47, %s12567_s26  ;;  %v6022_v44 = vcombine.low %v5942_v52, %v5943_v20  ;;  %v16463_v53 = vrot.slane %v6279_v17, 1  ;;  %v6458_v36 = vrot.slane %v6283_v63, 1  ;;  %v18915_v35 = vld [vmem:[#allocation12_spill] sm:$0xff] }
 0x7dd   :  { %v6078_v18 = vmul.f32 %v12556_v45, %v6024_v39  ;;  %6142 = vst.msk [vmem:[%s18613_s15 + $0xd0] sm:$0xff] %vm468_vm6, %v6024_v39  ;;  %v6111_v14 = vmul.f32 784.0, %v6079_v8  ;;  %v6023_v21 = vcombine.low %v5944_v25, %v5945_v41  ;;  %v6459_v40 = vrot.slane %v6279_v17, 2 }
 0x7de   :  { %v6076_v19 = vmul.f32 %v12558_v10, %v6022_v44  ;;  %6140 = vst.msk [vmem:[%s18613_s15 + $0xc0] sm:$0xff] %vm468_vm6, %v6022_v44  ;;  %v6285_v16 = vor.u32 %v6283_v63, %v16463_v53  ;;  %v6379_v31 = vrot.slane %v16488_v34, 1  ;;  %v6274_v37 = vshll.u32 %v16488_v34, 16  ;;  %v12563_v44 = vld [vmem:[%s18607_s0 + $0xf0] sm:$0xff] }
 0x7df   :  { %v6110_v46 = vmul.f32 784.0, %v6078_v18  ;;  %6175 = vst.msk [vmem:[%s18614_s14 + $0xd8] sm:$0xf] %vm5284_vm13, %v6111_v14  ;;  %v6077_v0 = vmul.f32 %v12559_v49, %v6023_v21  ;;  %v6272_v48 = vshrl.u32 %v16488_v34, 16  ;;  %v6460_v5 = vor.u32 %v6459_v40, %v6458_v36 }
 0x7e0   :  { %6548 = vrot.lane.b32.xlu1 %v6522_v60, %s12564_s19  ;;  %6332 = vrot.lane.b32.xlu0 %v6267_v58, %s12566_s23  ;;  %6141 = vst.msk [vmem:[%s18613_s15 + $0xc8] sm:$0xff] %vm468_vm6, %v6023_v21  ;;  %v6108_v55 = vmul.f32 784.0, %v6076_v19  ;;  %v6381_v17 = vsel %vm265_vm1, %v6379_v31, %v6380_v12  ;;  %v6523_v28 = vrot.slane %v16488_v34, 2  ;;  %v6276_v20 = vrot.slane %v6274_v37, 1  ;;  %v12561_v58 = vld [vmem:[%s18607_s0 + $0xf8] sm:$0xf] }
 0x7e1   :  { %6174 = vst.msk [vmem:[%s18614_s14 + $0xd0] sm:$0xff] %vm468_vm6, %v6110_v46  ;;  %v16492_v51 = vpack.c.bf16 %v6111_v14, %v6110_v46  ;;  %v6109_v1 = vmul.f32 784.0, %v6077_v0  ;;  %v6455_v18 = vrot.slane %v6272_v48, 1  ;;  %v6456_v60 = vrot.slane %v6274_v37, 2  ;;  %v12562_v46 = vld [vmem:[%s18607_s0 + $0xe8] sm:$0xff] }
 0x7e2   :  { %6172 = vst.msk [vmem:[%s18614_s14 + $0xc0] sm:$0xff] %vm468_vm6, %v6108_v55  ;;  %v6525_v10 = vsel %vm411_vm0, %v6523_v28, %v6524_v6  ;;  %v6277_v19 = vor.u32 %v6276_v20, %v6272_v48 }
 0x7e3   :  { %6173 = vst.msk [vmem:[%s18614_s14 + $0xc8] sm:$0xff] %vm468_vm6, %v6109_v1  ;;  %v6294_v15 = vshll.u32 %v16492_v51, 16  ;;  %v16519_v45 = vpack.c.bf16 %v6109_v1, %v6108_v55  ;;  %v6383_v3 = vrot.slane %v16492_v51, 1  ;;  %v6298_v41 = vshrl.u32 %v16492_v51, 16 }
 0x7e4   :  { %6410 = vrot.lane.b32.xlu1 %v6380_v12, %s12565_s20  ;;  %6492 = vrot.lane.b32.xlu0 %v6454_v24, %s12567_s26  ;;  %v6457_v55 = vor.u32 %v6456_v60, %v6455_v18 }
 0x7e5   :  { %v6296_v63 = vrot.slane %v6294_v15, 1  ;;  %v6289_v49 = vshll.u32 %v16519_v45, 16  ;;  %v6465_v1 = vrot.slane %v6298_v41, 1 }
 0x7e6   :  { %v12527_v61 = vpop.eup %12526  ;;  %v6461_v37 = vsel %vm322_vm2, %v6457_v55, %v6460_v5 }
 0x7e7   :  { %v5949_v47 = vmul.f32 %v12527_v61, %v18914_v62  ;;  %v5950_v33 = vmul.f32 %v12527_v61, %v18915_v35  ;;  %v5951_v30 = vmul.f32 %v12527_v61, %v18916_v26  ;;  %v5952_v22 = vmul.f32 %v12527_v61, %v18917_v29 }
 0x7e8   :  { %6554 = vrot.lane.b32.xlu1 %v6524_v6, %s12564_s19  ;;  %6338 = vrot.lane.b32.xlu0 %v6285_v16, %s12566_s23  ;;  %v5953_v23 = vmul.f32 %v12527_v61, %v18918_v9  ;;  %v5954_v4 = vmul.f32 %v12527_v61, %v18919_v42  ;;  %v5955_v39 = vmul.f32 %v12527_v61, %v18920_v7  ;;  %v6466_v61 = vrot.slane %v6294_v15, 2 }
 0x7e9   :  { %v6025_v52 = vcombine.low %v5949_v47, %v5950_v33  ;;  %v6026_v56 = vcombine.low %v5951_v30, %v5952_v22  ;;  %v6300_v40 = vor.u32 %v6298_v41, %v6296_v63  ;;  %v6282_v6 = vsel %vm96_vm3, %v6277_v19, %v16463_v53 }
 0x7ea   :  { %v6027_v8 = vcombine.low %v5953_v23, %v5954_v4  ;;  %6147 = vst.msk [vmem:[%s18613_s15 + $0xf8] sm:$0xf] %vm5284_vm13, %v5955_v39  ;;  %v6083_v11 = vmul.f32 %v12561_v58, %v5955_v39  ;;  %v6287_v16 = vshrl.u32 %v16519_v45, 16  ;;  %v6291_v31 = vrot.slane %v6289_v49, 1 }
 0x7eb   :  { %v6080_v25 = vmul.f32 %v12560_v59, %v6025_v52  ;;  %6144 = vst.msk [vmem:[%s18613_s15 + $0xe0] sm:$0xff] %vm468_vm6, %v6025_v52  ;;  %v6081_v14 = vmul.f32 %v12562_v46, %v6026_v56  ;;  %6145 = vst.msk [vmem:[%s18613_s15 + $0xe8] sm:$0xff] %vm468_vm6, %v6026_v56  ;;  %v6467_v62 = vor.u32 %v6466_v61, %v6465_v1  ;;  %v6382_v47 = vrot.slane %v16519_v45, 1 }
 0x7ec   :  { %6408 = vrot.lane.b32.xlu1 %v6381_v17, %s12565_s20  ;;  %6498 = vrot.lane.b32.xlu0 %v6460_v5, %s12567_s26  ;;  %v6082_v21 = vmul.f32 %v12563_v44, %v6027_v8  ;;  %6146 = vst.msk [vmem:[%s18613_s15 + $0xf0] sm:$0xff] %vm468_vm6, %v6027_v8  ;;  %v6115_v0 = vmul.f32 784.0, %v6083_v11  ;;  %v6292_v35 = vor.u32 %v6291_v31, %v6287_v16  ;;  %v6462_v33 = vrot.slane %v6287_v16, 1 }
 0x7ed   :  { %v6112_v12 = vmul.f32 784.0, %v6080_v25  ;;  %v6113_v24 = vmul.f32 784.0, %v6081_v14  ;;  %v6463_v48 = vrot.slane %v6289_v49, 2  ;;  %v6526_v53 = vrot.slane %v16519_v45, 2  ;;  %v18921_v49 = vld [vmem:[#allocation15_spill] sm:$0xff] }
 0x7ee   :  { %v6114_v36 = vmul.f32 784.0, %v6082_v21  ;;  %6179 = vst.msk [vmem:[%s18614_s14 + $0xf8] sm:$0xf] %vm5284_vm13, %v6115_v0  ;;  %v6527_v26 = vrot.slane %v16492_v51, 2  ;;  %v6384_v29 = vsel %vm265_vm1, %v6382_v47, %v6383_v3  ;;  %v6297_v22 = vsel %vm96_vm3, %v6292_v35, %v6296_v63 }
 0x7ef   :  { %6176 = vst.msk [vmem:[%s18614_s14 + $0xe0] sm:$0xff] %vm468_vm6, %v6112_v12  ;;  %6177 = vst.msk [vmem:[%s18614_s14 + $0xe8] sm:$0xff] %vm468_vm6, %v6113_v24  ;;  %v6464_v5 = vor.u32 %v6463_v48, %v6462_v33  ;;  %v16588_v15 = vpack.c.bf16 %v6113_v24, %v6112_v12 }
 0x7f0   :  { %6552 = vrot.lane.b32.xlu1 %v6525_v10, %s12564_s19  ;;  %6414 = vrot.lane.b32.xlu0 %v6383_v3, %s12565_s20  ;;  %6178 = vst.msk [vmem:[%s18614_s14 + $0xf0] sm:$0xff] %vm468_vm6, %v6114_v36  ;;  %v16584_v30 = vpack.c.bf16 %v6115_v0, %v6114_v36  ;;  %v6528_v9 = vsel %vm411_vm0, %v6526_v53, %v6527_v26  ;;  %v18922_v53 = vld [vmem:[#allocation29_spill] sm:$0xff] }
 0x7f1   :  { %v6468_v42 = vsel %vm322_vm2, %v6464_v5, %v6467_v62  ;;  %v6385_v4 = vrot.slane %v16588_v15, 1  ;;  %v6304_v39 = vshll.u32 %v16588_v15, 16  ;;  %v6529_v52 = vrot.slane %v16588_v15, 2 }
 0x7f2   :  { %v6309_v23 = vshll.u32 %v16584_v30, 16  ;;  %v6386_v7 = vrot.slane %v16584_v30, 1  ;;  %v6313_v28 = vshrl.u32 %v16584_v30, 16  ;;  %v6530_v18 = vrot.slane %v16584_v30, 2 }
 0x7f3   :  { %v6302_v56 = vshrl.u32 %v16588_v15, 16  ;;  %v6306_v8 = vrot.slane %v6304_v39, 1  ;;  %v6470_v63 = vrot.slane %v6304_v39, 2 }
 0x7f4   :  { %6336 = vrot.lane.b32.xlu1 %v6282_v6, %s12566_s23  ;;  %6342 = vrot.lane.b32.xlu0 %v6300_v40, %s12566_s23  ;;  %v6311_v17 = vrot.slane %v6309_v23, 1  ;;  %v6387_v20 = vsel %vm265_vm1, %v6385_v4, %v6386_v7  ;;  %v6472_v3 = vrot.slane %v6313_v28, 1  ;;  %v6473_v41 = vrot.slane %v6309_v23, 2 }
 0x7f5   :  { %v6531_v60 = vsel %vm411_vm0, %v6529_v52, %v6530_v18  ;;  %v6307_v58 = vor.u32 %v6306_v8, %v6302_v56  ;;  %v6469_v11 = vrot.slane %v6302_v56, 1  ;;  %vm8652_vm0 = vcmask 1042434  }
 0x7f6   :  { %v6315_v25 = vor.u32 %v6313_v28, %v6311_v17  ;;  %v6474_v44 = vor.u32 %v6473_v41, %v6472_v3  ;;  %vm8654_vm1 = vcmask 1043459  }
 0x7f7   :  { %v6312_v21 = vsel %vm96_vm3, %v6307_v58, %v6311_v17  ;;  %v6471_v12 = vor.u32 %v6470_v63, %v6469_v11  ;;  %vm8658_vm3 = vcmask 1045509  }
 0x7f8   :  { %6496 = vrot.lane.b32.xlu1 %v6461_v37, %s12567_s26  ;;  %6502 = vrot.lane.b32.xlu0 %v6467_v62, %s12567_s26 }
 0x7f9   :  { %v6475_v24 = vsel %vm322_vm2, %v6471_v12, %v6474_v44  ;;  %vm8656_vm2 = vcmask 1044484  }
 0x7fc   :  { %6412 = vrot.lane.b32.xlu1 %v6384_v29, %s12565_s20  ;;  %6340 = vrot.lane.b32.xlu0 %v6297_v22, %s12566_s23 }
 0x800   :  { %6556 = vrot.lane.b32.xlu1 %v6528_v9, %s12564_s19  ;;  %6500 = vrot.lane.b32.xlu0 %v6468_v42, %s12567_s26 }
 0x804   :  { %6416 = vrot.lane.b32.xlu1 %v6387_v20, %s12565_s20  ;;  %6558 = vrot.lane.b32.xlu0 %v6527_v26, %s12564_s19 }
 0x806   :  { %v6391_v59 = vpop.permute.xlu0 %6390 }
 0x808   :  { %6560 = vrot.lane.b32.xlu1 %v6531_v60, %s12564_s19  ;;  %6346 = vrot.lane.b32.xlu0 %v6315_v25, %s12566_s23 }
 0x80a   :  { %v6533_v46 = vpop.permute.xlu1 %6532  ;;  %v6535_v14 = vpop.permute.xlu0 %6534 }
 0x80b   :  { %11259 = vmatprep.mubr.msk.bf16.mxu0 %vm1244_vm4, %v6533_v46 }
 0x80c   :  { %6344 = vrot.lane.b32.xlu1 %v6312_v21, %s12566_s23  ;;  %6506 = vrot.lane.b32.xlu0 %v6474_v44, %s12567_s26 }
 0x80e   :  { %v6317_v10 = vpop.permute.xlu1 %6316  ;;  %v6389_v19 = vpop.permute.xlu0 %6388 }
 0x80f   :  { %v6565_v0 = vsel %vm468_vm6, %v18921_v49, %v6317_v10 }
 0x810   :  { %6504 = vrot.lane.b32.xlu1 %v6475_v24, %s12567_s26  ;;  %v6597_v36 = vsel %vm501_vm5, %v6565_v0, %v6389_v19 }
 0x812   :  { %v6477_v40 = vpop.permute.xlu1 %6476  ;;  %v6319_v55 = vpop.permute.xlu0 %6318 }
 0x813   :  { %v6629_v1 = vsel %vm534_vm7, %v6597_v36, %v6477_v40  ;;  %v6567_v26 = vsel %vm468_vm6, %v18922_v53, %v6319_v55 }
 0x814   :  { %v6661_v61 = vsel %vm567_vm8, %v6629_v1, %v6533_v46  ;;  %6418 = vrot.lane.b32.xlu1 %v6386_v7, %s12565_s20  ;;  %v6599_v9 = vsel %vm501_vm5, %v6567_v26, %v6391_v59 }
 0x815   :  { %6985 = vmatmul.mubr.bf16.vlgmr.msra.gmra.mrb[200].mxu0 %v6661_v61 }
 0x816   :  { %v6395_v6 = vpop.permute.xlu1 %6394  ;;  %v6479_v16 = vpop.permute.xlu0 %6478 }
 0x817   :  { %v6631_v23 = vsel %vm534_vm7, %v6599_v9, %v6479_v16 }
 0x818   :  { %6562 = vrot.lane.b32.xlu1 %v6530_v18, %s12564_s19  ;;  %v6663_v28 = vsel %vm567_vm8, %v6631_v23, %v6535_v14 }
 0x81a   :  { %v6539_v31 = vpop.permute.xlu1 %6538  ;;  %v6323_v37 = vpop.permute.xlu0 %6322 }
 0x81b   :  { %v6571_v42 = vsel %vm468_vm6, %v16076_v2, %v6323_v37  ;;  %v6719_v20 = vunpack.c.l.b16 %v6539_v31 }
 0x81c   :  { %v6603_v18 = vsel %vm501_vm5, %v6571_v42, %v6395_v6 }
 0x81e   :  { %v6393_v62 = vpop.permute.xlu1 %6392  ;;  %v6483_v47 = vpop.permute.xlu0 %6482 }
 0x81f   :  { %v6635_v56 = vsel %vm534_vm7, %v6603_v18, %v6483_v47 }
 0x820   :  { %v6667_v3 = vsel %vm567_vm8, %v6635_v56, %v6539_v31 }
 0x821   :  { %v6718_v11 = vunpack.c.l.b16 %v6667_v3 }
 0x822   :  { %v6537_v35 = vpop.permute.xlu1 %6536  ;;  %v6399_v33 = vpop.permute.xlu0 %6398 }
 0x823   :  { %v11233_v48 = vcombine.low %v6535_v14, %v6537_v35  ;;  %v6717_v4 = vunpack.c.h.b16 %v6537_v35 }
 0x825   :  { %11260 = vmatprep.mubr.msk.bf16.mxu0 %vm1244_vm4, %v11233_v48  ;;  %v6791_v59 = vpack.c.b16 %v6719_v20, %v6717_v4 }
 0x826   :  { %v6321_v29 = vpop.permute.xlu1 %6320  ;;  %v6543_v22 = vpop.permute.xlu0 %6542 }
 0x827   :  { %v6569_v5 = vsel %vm468_vm6, %v16111_v27, %v6321_v29 }
 0x828   :  { %v6601_v7 = vsel %vm501_vm5, %v6569_v5, %v6393_v62 }
 0x82a   :  { %v6481_v39 = vpop.permute.xlu1 %6480  ;;  %v6327_v52 = vpop.permute.xlu0 %6326 }
 0x82b   :  { %v6633_v17 = vsel %vm534_vm7, %v6601_v7, %v6481_v39 }
 0x82c   :  { %v6665_v27 = vsel %vm567_vm8, %v6633_v17, %v6537_v35 }
 0x82d   :  { %v11232_v8 = vcombine.low %v6663_v28, %v6665_v27  ;;  %v6716_v41 = vunpack.c.h.b16 %v6665_v27 }
 0x82e   :  { %v6397_v25 = vpop.permute.xlu1 %6396  ;;  %v6487_v2 = vpop.permute.xlu0 %6486 }
 0x82f   :  { %6995 = vmatmul.mubr.bf16.gmra.mrb[204].mxu0 %v11232_v8  ;;  %v6790_v63 = vpack.c.b16 %v6718_v11, %v6716_v41 }
 0x830   :  { %11261 = vmatprep.mubr.msk.bf16.mxu0 %vm1244_vm4, %v6791_v59 }
 0x832   :  { %v6541_v60 = vpop.permute.xlu1 %6540  ;;  %v6325_v58 = vpop.permute.xlu0 %6324 }
 0x833   :  { %v6573_v44 = vsel %vm468_vm6, %v16200_v54, %v6325_v58  ;;  %v6575_v54 = vsel %vm468_vm6, %v16150_v57, %v6327_v52 }
 0x834   :  { %v6605_v21 = vsel %vm501_vm5, %v6573_v44, %v6397_v25  ;;  %v6607_v16 = vsel %vm501_vm5, %v6575_v54, %v6399_v33 }
 0x835   :  { %v6639_v31 = vsel %vm534_vm7, %v6607_v16, %v6487_v2 }
 0x836   :  { %v6403_v46 = vpop.permute.xlu1 %6402  ;;  %v6485_v14 = vpop.permute.xlu0 %6484  ;;  %v6671_v53 = vsel %vm567_vm8, %v6639_v31, %v6543_v22 }
 0x837   :  { %7005 = vmatmul.mubr.bf16.gmra.mrb[208].mxu0 %v6790_v63  ;;  %v6637_v19 = vsel %vm534_vm7, %v6605_v21, %v6485_v14 }
 0x838   :  { %11262 = vmatprep.mubr.msk.bf16.mxu0 %vm1244_vm4, %v6541_v60  ;;  %v6669_v0 = vsel %vm567_vm8, %v6637_v19, %v6541_v60 }
 0x83a   :  { %v6547_v12 = vpop.permute.xlu1 %6546  ;;  %v6331_v10 = vpop.permute.xlu0 %6330 }
 0x83b   :  { %v6579_v37 = vsel %vm468_vm6, %v16231_v43, %v6331_v10  ;;  %v6731_v26 = vunpack.c.l.b16 %v6547_v12 }
 0x83c   :  { %v6611_v29 = vsel %vm501_vm5, %v6579_v37, %v6403_v46 }
 0x83e   :  { %v6401_v49 = vpop.permute.xlu1 %6400  ;;  %v6491_v24 = vpop.permute.xlu0 %6490 }
 0x83f   :  { %7015 = vmatmul.mubr.bf16.gmra.mrb[212].mxu0 %v6669_v0  ;;  %v6643_v33 = vsel %vm534_vm7, %v6611_v29, %v6491_v24  ;;  %v12243_v29 = vld [vmem:[%s18615_s7 + $0x10] ss:$8 sps:$4 sm:$0xff]  }
 0x840   :  { %v6675_v42 = vsel %vm567_vm8, %v6643_v33, %v6547_v12 }
 0x842   :  { %v6545_v36 = vpop.permute.xlu1 %6544  ;;  %v6407_v40 = vpop.permute.xlu0 %6406 }
 0x843   :  { %v11235_v55 = vcombine.low %v6543_v22, %v6545_v36  ;;  %v6729_v62 = vunpack.c.h.b16 %v6545_v36  ;;  %v6730_v22 = vunpack.c.l.b16 %v6675_v42 }
 0x845   :  { %11263 = vmatprep.mubr.msk.bf16.mxu0 %vm1244_vm4, %v11235_v55  ;;  %v6797_v9 = vpack.c.b16 %v6731_v26, %v6729_v62  ;;  %v12242_v62 = vld [vmem:[%s18615_s7 + $0x4] ss:$8 sps:$4 sm:$0xff]  }
 0x846   :  { %v6329_v1 = vpop.permute.xlu1 %6328  ;;  %v6551_v61 = vpop.permute.xlu0 %6550  ;;  %9533 = vmatprep.subr.bf16.mxu0 %v12242_v62  ;;  %v12285_v62 = vld [vmem:[%s18615_s7 + $0xf0] ss:$8 sps:$4 sm:$0xff]  }
 0x847   :  { %v6577_v6 = vsel %vm468_vm6, %v16283_v13, %v6329_v1 }
 0x848   :  { %v6609_v47 = vsel %vm501_vm5, %v6577_v6, %v6401_v49 }
 0x84a   :  { %v6489_v35 = vpop.permute.xlu1 %6488  ;;  %v6335_v48 = vpop.permute.xlu0 %6334 }
 0x84b   :  { %v6641_v57 = vsel %vm534_vm7, %v6609_v47, %v6489_v35  ;;  %v12240_v35 = vld [vmem:[%s18615_s7] ss:$8 sps:$4 sm:$0xff]  }
 0x84c   :  { %v6673_v13 = vsel %vm567_vm8, %v6641_v57, %v6545_v36  ;;  %9534 = vmatpush1.bf16.msra.mxu0 %v12240_v35  ;;  %v12245_v57 = vld [vmem:[%s18615_s7 + $0x14] ss:$8 sps:$4 sm:$0xff]   ;;  %v12573_v35 = vmov 1983009808  }
 0x84d   :  { %v11234_v5 = vcombine.low %v6671_v53, %v6673_v13  ;;  %v6728_v4 = vunpack.c.h.b16 %v6673_v13  ;;  %9535 = vmatprep.subr.bf16.mxu0 %v12245_v57  ;;  %v18923_v57 = vld [vmem:[#allocation3_spill] sm:$0xff] }
 0x84e   :  { %v6405_v23 = vpop.permute.xlu1 %6404  ;;  %v6495_v43 = vpop.permute.xlu0 %6494 }
 0x84f   :  { %7025 = vmatmul.mubr.bf16.gmra.mrb[216].mxu0 %v11234_v5  ;;  %v6796_v52 = vpack.c.b16 %v6730_v22, %v6728_v4 }
 0x850   :  { %11264 = vmatprep.mubr.msk.bf16.mxu0 %vm1244_vm4, %v6797_v9  ;;  %9536 = vmatpush1.bf16.msra.mxu0 %v12243_v29 }
 0x852   :  { %v6549_v7 = vpop.permute.xlu1 %6548  ;;  %v6333_v39 = vpop.permute.xlu0 %6332 }
 0x853   :  { %v6581_v20 = vsel %vm468_vm6, %v16356_v38, %v6333_v39  ;;  %v6583_v38 = vsel %vm468_vm6, %v16324_v50, %v6335_v48 }
 0x854   :  { %v6613_v18 = vsel %vm501_vm5, %v6581_v20, %v6405_v23  ;;  %v6615_v46 = vsel %vm501_vm5, %v6583_v38, %v6407_v40 }
 0x855   :  { %v6647_v14 = vsel %vm534_vm7, %v6615_v46, %v6495_v43  ;;  %v12246_v43 = vld [vmem:[%s18615_s7 + $0x20] ss:$8 sps:$4 sm:$0xff]  }
 0x856   :  { %v6411_v17 = vpop.permute.xlu1 %6410  ;;  %v6493_v28 = vpop.permute.xlu0 %6492  ;;  %v6679_v49 = vsel %vm567_vm8, %v6647_v14, %v6551_v61 }
 0x857   :  { %7035 = vmatmul.mubr.bf16.gmra.mrb[220].mxu0 %v6796_v52  ;;  %v6645_v8 = vsel %vm534_vm7, %v6613_v18, %v6493_v28 }
 0x858   :  { %11265 = vmatprep.mubr.msk.bf16.mxu0 %vm1244_vm4, %v6549_v7  ;;  %v6677_v25 = vsel %vm567_vm8, %v6645_v8, %v6549_v7  ;;  %v12251_v7 = vld [vmem:[%s18615_s7 + $0x34] ss:$8 sps:$4 sm:$0xff]  }
 0x85a   :  { %v6555_v27 = vpop.permute.xlu1 %6554  ;;  %v6339_v56 = vpop.permute.xlu0 %6338 }
 0x85b   :  { %v6587_v44 = vsel %vm468_vm6, %v16413_v32, %v6339_v56  ;;  %v6743_v0 = vunpack.c.l.b16 %v6555_v27  ;;  %v12254_v56 = vld [vmem:[%s18615_s7 + $0x44] ss:$8 sps:$4 sm:$0xff]  }
 0x85c   :  { %v6619_v24 = vsel %vm501_vm5, %v6587_v44, %v6411_v17 }
 0x85e   :  { %v6409_v59 = vpop.permute.xlu1 %6408  ;;  %v6499_v2 = vpop.permute.xlu0 %6498 }
 0x85f   :  { %7045 = vmatmul.mubr.bf16.gmra.mrb[224].mxu0 %v6677_v25  ;;  %v6651_v36 = vsel %vm534_vm7, %v6619_v24, %v6499_v2  ;;  %v12252_v25 = vld [vmem:[%s18615_s7 + $0x40] ss:$8 sps:$4 sm:$0xff]   ;;  %v12269_v24 = vld [vmem:[%s18615_s7 + $0x94] ss:$8 sps:$4 sm:$0xff]  }
 0x860   :  { %v6683_v1 = vsel %vm567_vm8, %v6651_v36, %v6555_v27  ;;  %v12272_v36 = vld [vmem:[%s18615_s7 + $0xa4] ss:$8 sps:$4 sm:$0xff]  }
 0x861   :  { %v6742_v31 = vunpack.c.l.b16 %v6683_v1  ;;  %v12276_v1 = vld [vmem:[%s18615_s7 + $0xc0] ss:$8 sps:$4 sm:$0xff]  }
 0x862   :  { %v6553_v3 = vpop.permute.xlu1 %6552  ;;  %v6415_v41 = vpop.permute.xlu0 %6414 }
 0x863   :  { %v11237_v60 = vcombine.low %v6551_v61, %v6553_v3  ;;  %v6741_v21 = vunpack.c.h.b16 %v6553_v3 }
 0x865   :  { %11266 = vmatprep.mubr.msk.bf16.mxu0 %vm1244_vm4, %v11237_v60  ;;  %v6803_v55 = vpack.c.b16 %v6743_v0, %v6741_v21  ;;  %v12260_v21 = vld [vmem:[%s18615_s7 + $0x64] ss:$8 sps:$4 sm:$0xff]   ;;  %v12264_v0 = vld [vmem:[%s18615_s7 + $0x80] ss:$8 sps:$4 sm:$0xff]  }
 0x866   :  { %v6337_v58 = vpop.permute.xlu1 %6336  ;;  %v6343_v11 = vpop.permute.xlu0 %6342 }
 0x867   :  { %v6585_v63 = vsel %vm468_vm6, %v16488_v34, %v6337_v58  ;;  %v6591_v42 = vsel %vm468_vm6, %v16492_v51, %v6343_v11  ;;  %v12249_v51 = vld [vmem:[%s18615_s7 + $0x30] ss:$8 sps:$4 sm:$0xff]  }
 0x868   :  { %v6617_v12 = vsel %vm501_vm5, %v6585_v63, %v6409_v59  ;;  %v6623_v39 = vsel %vm501_vm5, %v6591_v42, %v6415_v41  ;;  %v12257_v41 = vld [vmem:[%s18615_s7 + $0x54] ss:$8 sps:$4 sm:$0xff]  }
 0x86a   :  { %v6497_v10 = vpop.permute.xlu1 %6496  ;;  %v6503_v19 = vpop.permute.xlu0 %6502 }
 0x86b   :  { %v6649_v50 = vsel %vm534_vm7, %v6617_v12, %v6497_v10  ;;  %v12258_v10 = vld [vmem:[%s18615_s7 + $0x60] ss:$8 sps:$4 sm:$0xff]  }
 0x86c   :  { %v6681_v34 = vsel %vm567_vm8, %v6649_v50, %v6553_v3  ;;  %v12255_v3 = vld [vmem:[%s18615_s7 + $0x50] ss:$8 sps:$4 sm:$0xff]  }
 0x86d   :  { %v11236_v40 = vcombine.low %v6679_v49, %v6681_v34  ;;  %v6740_v6 = vunpack.c.h.b16 %v6681_v34  ;;  %v12261_v50 = vld [vmem:[%s18615_s7 + $0x70] ss:$8 sps:$4 sm:$0xff]   ;;  %v12266_v49 = vld [vmem:[%s18615_s7 + $0x84] ss:$8 sps:$4 sm:$0xff]  }
 0x86e   :  { %v6413_v54 = vpop.permute.xlu1 %6412  ;;  %v6341_v32 = vpop.permute.xlu0 %6340  ;;  %v12267_v34 = vld [vmem:[%s18615_s7 + $0x90] ss:$8 sps:$4 sm:$0xff]  }
 0x86f   :  { %7055 = vmatmul.mubr.bf16.gmra.mrb[228].mxu0 %v11236_v40  ;;  %v6802_v37 = vpack.c.b16 %v6742_v31, %v6740_v6  ;;  %v6589_v48 = vsel %vm468_vm6, %v16519_v45, %v6341_v32  ;;  %v12248_v45 = vld [vmem:[%s18615_s7 + $0x24] ss:$8 sps:$4 sm:$0xff]   ;;  %v12270_v40 = vld [vmem:[%s18615_s7 + $0xa0] ss:$8 sps:$4 sm:$0xff]   ;;  %v12281_v6 = vld [vmem:[%s18615_s7 + $0xd4] ss:$8 sps:$4 sm:$0xff]  }
 0x870   :  { %11267 = vmatprep.mubr.msk.bf16.mxu0 %vm1244_vm4, %v6803_v55  ;;  %v6621_v53 = vsel %vm501_vm5, %v6589_v48, %v6413_v54  ;;  %9537 = vmatprep.subr.bf16.mxu0 %v12248_v45  ;;  %v12275_v55 = vld [vmem:[%s18615_s7 + $0xb4] ss:$8 sps:$4 sm:$0xff]   ;;  %v12273_v54 = vld [vmem:[%s18615_s7 + $0xb0] ss:$8 sps:$4 sm:$0xff]   ;;  %v12278_v32 = vld [vmem:[%s18615_s7 + $0xc4] ss:$8 sps:$4 sm:$0xff]   ;;  %v7155_v48 = vunpack.c.l.s4 %v12573_v35 }
 0x871   :  { %9538 = vmatpush1.bf16.msra.mxu0 %v12246_v43  ;;  %v12284_v31 = vld [vmem:[%s18615_s7 + $0xe4] ss:$8 sps:$4 sm:$0xff]  }
 0x872   :  { %v6557_v16 = vpop.permute.xlu1 %6556  ;;  %v6501_v61 = vpop.permute.xlu0 %6500  ;;  %9539 = vmatprep.subr.bf16.mxu0 %v12251_v7 }
 0x873   :  { %v6653_v13 = vsel %vm534_vm7, %v6621_v53, %v6501_v61  ;;  %v12282_v61 = vld [vmem:[%s18615_s7 + $0xe0] ss:$8 sps:$4 sm:$0xff]  }
 0x874   :  { %v6685_v23 = vsel %vm567_vm8, %v6653_v13, %v6557_v16  ;;  %v7156_v13 = vunpack.c.0.s8 %v7155_v48 }
 0x875   :  { %9540 = vmatpush1.bf16.msra.mxu0 %v12249_v51 }
 0x876   :  { %v6417_v47 = vpop.permute.xlu1 %6416  ;;  %v6559_v33 = vpop.permute.xlu0 %6558  ;;  %9541 = vmatprep.subr.bf16.mxu0 %v12254_v56 }
 0x877   :  { %7065 = vmatmul.mubr.bf16.gmra.mrb[232].mxu0 %v6802_v37  ;;  %v12287_v37 = vld [vmem:[%s18615_s7 + $0xf4] ss:$8 sps:$4 sm:$0xff]  }
 0x878   :  { %11268 = vmatprep.mubr.msk.bf16.mxu0 %vm1244_vm4, %v6557_v16  ;;  %v12279_v16 = vld [vmem:[%s18615_s7 + $0xd0] ss:$8 sps:$4 sm:$0xff]  }
 0x879   :  { %9542 = vmatpush1.bf16.msra.mxu0 %v12252_v25 }
 0x87a   :  { %v6561_v26 = vpop.permute.xlu1 %6560  ;;  %v6347_v17 = vpop.permute.xlu0 %6346  ;;  %9543 = vmatprep.subr.bf16.mxu0 %v12257_v41 }
 0x87b   :  { %v11239_v5 = vcombine.low %v6559_v33, %v6561_v26  ;;  %v6595_v8 = vsel %vm468_vm6, %v16584_v30, %v6347_v17  ;;  %v6753_v58 = vunpack.c.h.b16 %v6561_v26 }
 0x87d   :  { %9544 = vmatpush1.bf16.msra.mxu0 %v12255_v3 }
 0x87e   :  { %v6345_v9 = vpop.permute.xlu1 %6344  ;;  %v6507_v60 = vpop.permute.xlu0 %6506  ;;  %9545 = vmatprep.subr.bf16.mxu0 %v12260_v21 }
 0x87f   :  { %v6593_v4 = vsel %vm468_vm6, %v16588_v15, %v6345_v9  ;;  %7075 = vmatmul.mubr.bf16.gmra.mrb[236].mxu0 %v6685_v23  ;;  %v6655_v15 = vsel %vm534_vm7, %v6623_v39, %v6503_v19  ;;  %v12263_v19 = vld [vmem:[%s18615_s7 + $0x74] ss:$8 sps:$4 sm:$0xff]   ;;  %v18925_v23 = vld [vmem:[#allocation2_spill] sm:$0xff]  ;;  %vm12575_vm6 = vmmov 0  }
 0x880   :  { %11269 = vmatprep.mubr.msk.bf16.mxu0 %vm1244_vm4, %v11239_v5  ;;  %v6625_v22 = vsel %vm501_vm5, %v6593_v4, %v6417_v47  ;;  %v6687_v20 = vsel %vm567_vm8, %v6655_v15, %v6559_v33  ;;  %v6774_v47 = vld [vmem:[%s18616_s6] sm:$0x3]  ;;  %v16817_v43 = vsub.s32 %v7156_v13, %v18925_v23 }
 0x881   :  { %9546 = vmatpush1.bf16.msra.mxu0 %v12258_v10  ;;  %v16809_v53 = vrot.slane %v6774_v47, %v18923_v57 }
 0x882   :  { %v6505_v52 = vpop.permute.xlu1 %6504  ;;  %9547 = vmatprep.subr.bf16.mxu0 %v12263_v19  ;;  %18926 = vst [vmem:[#allocation17_spill] sm:$0xff] %v16817_v43 }
 0x883   :  { %v6657_v28 = vsel %vm534_vm7, %v6625_v22, %v6505_v52 }
 0x884   :  { %v6689_v18 = vsel %vm567_vm8, %v6657_v28, %v6561_v26  ;;  %v18924_v26 = vld [vmem:[#allocation4_spill] sm:$0xff] }
 0x885   :  { %v11238_v27 = vcombine.low %v6687_v20, %v6689_v18  ;;  %v6752_v46 = vunpack.c.h.b16 %v6689_v18  ;;  %9548 = vmatpush1.bf16.msra.mxu0 %v12261_v50  ;;  %v16812_v29 = vrot.slane %v6774_v47, %v18924_v26 }
 0x886   :  { %v6419_v59 = vpop.permute.xlu1 %6418  ;;  %9549 = vmatprep.subr.bf16.mxu0 %v12266_v49 }
 0x887   :  { %v6627_v2 = vsel %vm501_vm5, %v6595_v8, %v6419_v59  ;;  %7085 = vmatmul.mubr.bf16.gmra.mrb[240].mxu0 %v11238_v27  ;;  %vm8662_vm5 = vcmask 1047559  }
 0x888   :  { %v6659_v38 = vsel %vm534_vm7, %v6627_v2, %v6507_v60  ;;  %vm10866_vm7 = vcmask 80896  }
 0x889   :  { %9550 = vmatpush1.bf16.msra.mxu0 %v12264_v0 }
 0x88a   :  { %v6563_v30 = vpop.permute.xlu1 %6562  ;;  %9551 = vmatprep.subr.bf16.mxu0 %v12269_v24 }
 0x88b   :  { %v6691_v11 = vsel %vm567_vm8, %v6659_v38, %v6563_v30  ;;  %v6755_v63 = vunpack.c.l.b16 %v6563_v30 }
 0x88c   :  { %v6754_v14 = vunpack.c.l.b16 %v6691_v11 }
 0x88d   :  { %v6809_v44 = vpack.c.b16 %v6755_v63, %v6753_v58  ;;  %9552 = vmatpush1.bf16.msra.mxu0 %v12267_v34 }
 0x88e   :  { %v6808_v12 = vpack.c.b16 %v6754_v14, %v6752_v46  ;;  %9553 = vmatprep.subr.bf16.mxu0 %v12272_v36 }
 0x88f   :  { %11270 = vmatprep.mubr.msk.bf16.mxu0 %vm1244_vm4, %v6809_v44  ;;  %vm8660_vm4 = vcmask 1046534  }
 0x890   :  { %7095 = vmatmul.mubr.bf16.gmra.mrb[244].mxu0 %v6808_v12 }
 0x891   :  { %9554 = vmatpush1.bf16.msra.mxu0 %v12270_v40 }
 0x892   :  { %9555 = vmatprep.subr.bf16.mxu0 %v12275_v55 }
 0x895   :  { %9556 = vmatpush1.bf16.msra.mxu0 %v12273_v54 }
 0x896   :  { %9557 = vmatprep.subr.bf16.mxu0 %v12278_v32 }
 0x899   :  { %9558 = vmatpush1.bf16.msra.mxu0 %v12276_v1 }
 0x89a   :  { %9559 = vmatprep.subr.bf16.mxu0 %v12281_v6 }
 0x89d   :  { %9560 = vmatpush1.bf16.msra.mxu0 %v12279_v16 }
 0x89e   :  { %9561 = vmatprep.subr.bf16.mxu0 %v12284_v31 }
 0x8a1   :  { %9562 = vmatpush1.bf16.msra.mxu0 %v12282_v61 }
 0x8a2   :  { %9563 = vmatprep.subr.bf16.mxu0 %v12287_v37 }
 0x8a5   :  { %9564 = vmatpush1.bf16.msra.mxu0 %v12285_v62 }
 0x8e8   :  { %v6986_v33 = vpop.f32.mrb[200].mxu0 }
 0x8e9   :  { %v6987_v45 = vadd.f32 %v6986_v33, %v16809_v53  ;;  %v6988_v5 = vpop.f32.mrb[201].mxu0 }
 0x8ea   :  { %v6989_v9 = vadd.f32 %v6988_v5, %v16812_v29  ;;  %v6990_v42 = vpop.f32.mrb[202].mxu0 }
 0x8eb   :  { %v6991_v4 = vadd.f32 %v6990_v42, %v16809_v53  ;;  %v6992_v7 = vpop.f32.mrb[203].mxu0 }
 0x8ec   :  { %v7105_v39 = vmax.f32 %v6987_v45, %v6989_v9  ;;  %v6993_v22 = vadd.f32 %v6992_v7, %v16812_v29 }
 0x8ee   :  { %v7153_v52 = vcombine.high %v7105_v39, %v7105_v39  ;;  %v7160_v51 = vrot.slane %v7105_v39, %v16817_v43  ;;  %v7106_v15 = vmax.f32 %v6991_v4, %v6993_v22 }
 0x8f0   :  { %v7167_v17 = vrot.slane %v7153_v52, %v16817_v43  ;;  %v7168_v28 = vcombine.high %v7160_v51, %v7160_v51  ;;  %v7658_v20 = vsel %vm7657_vm14, %v7160_v51, -inf  ;;  %v7170_v18 = vcombine.high %v7106_v15, %v7106_v15 }
 0x8f1   :  { %v7659_v27 = vrot.slane %v7658_v20, 4  ;;  %v7177_v56 = vrot.slane %v7106_v15, %v16817_v43 }
 0x8f2   :  { %v7169_v8 = vcombine.high %v7167_v17, %v7167_v17  ;;  %v7665_v59 = vsel %vm7657_vm14, %v7168_v28, -inf  ;;  %v7672_v25 = vsel %vm7657_vm14, %v7167_v17, -inf  ;;  %v7184_v2 = vrot.slane %v7170_v18, %v16817_v43 }
 0x8f3   :  { %v7660_v3 = vmax.f32 %v7658_v20, %v7659_v27  ;;  %v7666_v41 = vrot.slane %v7665_v59, 4  ;;  %v7673_v60 = vrot.slane %v7672_v25, 4  ;;  %v7185_v30 = vcombine.high %v7177_v56, %v7177_v56 }
 0x8f4   :  { %v7679_v38 = vsel %vm7657_vm14, %v7169_v8, -inf  ;;  %v7186_v58 = vcombine.high %v7184_v2, %v7184_v2  ;;  %v7686_v11 = vsel %vm7657_vm14, %v7177_v56, -inf  ;;  %v7700_v63 = vsel %vm7657_vm14, %v7184_v2, -inf }
 0x8f5   :  { %v7661_v46 = vrot.slane %v7660_v3, 2  ;;  %v7667_v14 = vmax.f32 %v7665_v59, %v7666_v41  ;;  %v7674_v44 = vmax.f32 %v7672_v25, %v7673_v60  ;;  %v7680_v21 = vrot.slane %v7679_v38, 4 }
 0x8f6   :  { %v7687_v12 = vrot.slane %v7686_v11, 4  ;;  %v7693_v10 = vsel %vm7657_vm14, %v7185_v30, -inf  ;;  %v7701_v19 = vrot.slane %v7700_v63, 4  ;;  %v7707_v50 = vsel %vm7657_vm14, %v7186_v58, -inf }
 0x8f7   :  { %v7662_v49 = vmax.f32 %v7660_v3, %v7661_v46  ;;  %v7668_v0 = vrot.slane %v7667_v14, 2  ;;  %v7675_v24 = vrot.slane %v7674_v44, 2  ;;  %v7681_v34 = vmax.f32 %v7679_v38, %v7680_v21 }
 0x8f8   :  { %v7688_v36 = vmax.f32 %v7686_v11, %v7687_v12  ;;  %v7694_v40 = vrot.slane %v7693_v10, 4  ;;  %v7702_v55 = vmax.f32 %v7700_v63, %v7701_v19  ;;  %v7708_v54 = vrot.slane %v7707_v50, 4 }
 0x8f9   :  { %v7663_v32 = vrot.slane %v7662_v49, 1  ;;  %v7669_v1 = vmax.f32 %v7667_v14, %v7668_v0  ;;  %v7676_v6 = vmax.f32 %v7674_v44, %v7675_v24  ;;  %v7682_v16 = vrot.slane %v7681_v34, 2 }
 0x8fa   :  { %v7689_v31 = vrot.slane %v7688_v36, 2  ;;  %v7695_v61 = vmax.f32 %v7693_v10, %v7694_v40  ;;  %v7703_v37 = vrot.slane %v7702_v55, 2  ;;  %v7709_v62 = vmax.f32 %v7707_v50, %v7708_v54 }
 0x8fb   :  { %v7664_v47 = vmax.f32 %v7662_v49, %v7663_v32  ;;  %v7670_v35 = vrot.slane %v7669_v1, 1  ;;  %v7677_v48 = vrot.slane %v7676_v6, 1  ;;  %v7683_v13 = vmax.f32 %v7681_v34, %v7682_v16 }
 0x8fc   :  { %v7690_v33 = vmax.f32 %v7688_v36, %v7689_v31  ;;  %v7696_v45 = vrot.slane %v7695_v61, 2  ;;  %v7704_v5 = vmax.f32 %v7702_v55, %v7703_v37  ;;  %v7710_v9 = vrot.slane %v7709_v62, 2 }
 0x8fd   :  { %v7671_v23 = vmax.f32 %v7669_v1, %v7670_v35  ;;  %v7678_v42 = vmax.f32 %v7676_v6, %v7677_v48  ;;  %v7684_v4 = vrot.slane %v7683_v13, 1  ;;  %v8330_v7 = vmax.f32 %v7664_v47, 0.0 }
 0x8fe   :  { %v7691_v39 = vrot.slane %v7690_v33, 1  ;;  %v7697_v22 = vmax.f32 %v7695_v61, %v7696_v45  ;;  %v7705_v52 = vrot.slane %v7704_v5, 1  ;;  %v7711_v51 = vmax.f32 %v7709_v62, %v7710_v9 }
 0x8ff   :  { %v7685_v15 = vmax.f32 %v7683_v13, %v7684_v4  ;;  %v8331_v17 = vmax.f32 %v7671_v23, 0.0  ;;  %v8332_v28 = vmax.f32 %v7678_v42, 0.0  ;;  %v8426_v20 = vpack.c.bf16 %v8330_v7, %v8330_v7 }
 0x900   :  { %v7692_v18 = vmax.f32 %v7690_v33, %v7691_v39  ;;  %v7698_v27 = vrot.slane %v7697_v22, 1  ;;  %v7706_v56 = vmax.f32 %v7704_v5, %v7705_v52  ;;  %v7712_v8 = vrot.slane %v7711_v51, 1 }
 0x901   :  { %v8333_v59 = vmax.f32 %v7685_v15, 0.0  ;;  %v8427_v25 = vpack.c.bf16 %v8331_v17, %v8331_v17  ;;  %v8428_v2 = vpack.c.bf16 %v8332_v28, %v8332_v28  ;;  %v8586_v3 = vunpack.c.l.b16 %v8426_v20 }
 0x902   :  { %v7699_v41 = vmax.f32 %v7697_v22, %v7698_v27  ;;  %v7713_v60 = vmax.f32 %v7711_v51, %v7712_v8  ;;  %v8334_v30 = vmax.f32 %v7692_v18, 0.0  ;;  %v8336_v38 = vmax.f32 %v7706_v56, 0.0  ;;  %v6996_v58 = vpop.f32.mrb[204].mxu0 }
 0x903   :  { %v8429_v11 = vpack.c.bf16 %v8333_v59, %v8333_v59  ;;  %v8587_v63 = vunpack.c.l.b16 %v8427_v25  ;;  %v8588_v46 = vunpack.c.l.b16 %v8428_v2  ;;  %v6997_v14 = vadd.f32 %v6996_v58, %v16809_v53  ;;  %v6998_v44 = vpop.f32.mrb[205].mxu0 }
 0x904   :  { %v8335_v21 = vmax.f32 %v7699_v41, 0.0  ;;  %v8337_v12 = vmax.f32 %v7713_v60, 0.0  ;;  %v8430_v10 = vpack.c.bf16 %v8334_v30, %v8334_v30  ;;  %v8432_v19 = vpack.c.bf16 %v8336_v38, %v8336_v38  ;;  %v7000_v50 = vpop.f32.mrb[206].mxu0 }
 0x905   :  { %v16834_v49 = vunpack.c.l.b16 %v8429_v11  ;;  %v8651_v0 = vsel %vm8650_vm15, %v8587_v63, %v8586_v3  ;;  %v6999_v24 = vadd.f32 %v6998_v44, %v16812_v29  ;;  %v7002_v34 = vpop.f32.mrb[207].mxu0  ;;  %v7001_v54 = vadd.f32 %v7000_v50, %v16809_v53 }
 0x906   :  { %v8653_v36 = vsel %vm8652_vm0, %v8588_v46, %v8651_v0  ;;  %v8431_v40 = vpack.c.bf16 %v8335_v21, %v8335_v21  ;;  %v8433_v55 = vpack.c.bf16 %v8337_v12, %v8337_v12  ;;  %v16846_v6 = vunpack.c.l.b16 %v8430_v10 }
 0x907   :  { %18927 = vst [vmem:[#allocation6_spill] sm:$0xff] %v16834_v49  ;;  %v8655_v32 = vsel %vm8654_vm1, %v16834_v49, %v8653_v36  ;;  %v16844_v1 = vsel %vm8650_vm15, %v16834_v49, %v8588_v46  ;;  %v7107_v16 = vmax.f32 %v6997_v14, %v6999_v24  ;;  %v16850_v61 = vunpack.c.l.b16 %v8432_v19 }
 0x908   :  { %18928 = vst [vmem:[#allocation16_spill] sm:$0xff] %v16844_v1  ;;  %18929 = vst [vmem:[#allocation14_spill] sm:$0xff] %v16846_v6  ;;  %v16848_v31 = vunpack.c.l.b16 %v8431_v40  ;;  %v7003_v37 = vadd.f32 %v7002_v34, %v16812_v29  ;;  %v8729_v62 = vsel %vm8650_vm15, %v8588_v46, %v8587_v63  ;;  %v8657_v13 = vsel %vm8656_vm2, %v16846_v6, %v8655_v32 }
 0x909   :  { %18931 = vst [vmem:[#allocation23_spill] sm:$0xff] %v16850_v61  ;;  %v7187_v47 = vcombine.high %v7107_v16, %v7107_v16  ;;  %v7194_v35 = vrot.slane %v7107_v16, %v16817_v43  ;;  %v8730_v48 = vsel %vm8652_vm0, %v16834_v49, %v8729_v62  ;;  %v16859_v33 = vunpack.c.l.b16 %v8433_v55 }
 0x90a   :  { %18930 = vst [vmem:[#allocation20_spill] sm:$0xff] %v16848_v31  ;;  %v7108_v45 = vmax.f32 %v7001_v54, %v7003_v37  ;;  %v7006_v5 = vpop.f32.mrb[208].mxu0  ;;  %v16863_v9 = vsel %vm8654_vm1, %v16846_v6, %v8730_v48  ;;  %v16867_v23 = vsel %vm8658_vm3, %v16848_v31, %v8657_v13 }
 0x90b   :  { %18932 = vst [vmem:[#allocation21_spill] sm:$0xff] %v16859_v33  ;;  %v7201_v42 = vrot.slane %v7187_v47, %v16817_v43  ;;  %v7202_v4 = vcombine.high %v7194_v35, %v7194_v35  ;;  %v7714_v7 = vsel %vm7657_vm14, %v7194_v35, -inf  ;;  %v7007_v39 = vadd.f32 %v7006_v5, %v16809_v53  ;;  %v7008_v22 = vpop.f32.mrb[209].mxu0 }
 0x90c   :  { %v7715_v52 = vrot.slane %v7714_v7, 4  ;;  %v7204_v51 = vcombine.high %v7108_v45, %v7108_v45  ;;  %v7211_v15 = vrot.slane %v7108_v45, %v16817_v43  ;;  %v7009_v17 = vadd.f32 %v7008_v22, %v16812_v29  ;;  %v7010_v28 = vpop.f32.mrb[210].mxu0 }
 0x90d   :  { %v7203_v20 = vcombine.high %v7201_v42, %v7201_v42  ;;  %v7721_v18 = vsel %vm7657_vm14, %v7202_v4, -inf  ;;  %v7728_v27 = vsel %vm7657_vm14, %v7201_v42, -inf  ;;  %v16877_v56 = vadd.f32 %v7010_v28, %v16809_v53  ;;  %v16879_v8 = vpop.f32.mrb[211].mxu0 }
 0x90e   :  { %v7716_v59 = vmax.f32 %v7714_v7, %v7715_v52  ;;  %v7722_v25 = vrot.slane %v7721_v18, 4  ;;  %v7729_v2 = vrot.slane %v7728_v27, 4  ;;  %v7218_v3 = vrot.slane %v7204_v51, %v16817_v43 }
 0x90f   :  { %v7735_v41 = vsel %vm7657_vm14, %v7203_v20, -inf  ;;  %v7219_v60 = vcombine.high %v7211_v15, %v7211_v15  ;;  %v7742_v30 = vsel %vm7657_vm14, %v7211_v15, -inf  ;;  %v7109_v38 = vmax.f32 %v7007_v39, %v7009_v17 }
 0x910   :  { %v7717_v58 = vrot.slane %v7716_v59, 2  ;;  %v7723_v11 = vmax.f32 %v7721_v18, %v7722_v25  ;;  %v7730_v63 = vmax.f32 %v7728_v27, %v7729_v2  ;;  %v7736_v46 = vrot.slane %v7735_v41, 4 }
 0x911   :  { %v7220_v14 = vcombine.high %v7218_v3, %v7218_v3  ;;  %v7743_v44 = vrot.slane %v7742_v30, 4  ;;  %v7749_v21 = vsel %vm7657_vm14, %v7219_v60, -inf  ;;  %v7756_v12 = vsel %vm7657_vm14, %v7218_v3, -inf }
 0x912   :  { %v7718_v10 = vmax.f32 %v7716_v59, %v7717_v58  ;;  %v7724_v19 = vrot.slane %v7723_v11, 2  ;;  %v7731_v50 = vrot.slane %v7730_v63, 2  ;;  %v7737_v0 = vmax.f32 %v7735_v41, %v7736_v46  ;;  %v16886_v24 = vpop.f32.mrb[212].mxu0 }
 0x913   :  { %v7744_v34 = vmax.f32 %v7742_v30, %v7743_v44  ;;  %v7750_v36 = vrot.slane %v7749_v21, 4  ;;  %v7757_v40 = vrot.slane %v7756_v12, 4  ;;  %v7763_v55 = vsel %vm7657_vm14, %v7220_v14, -inf  ;;  %v16889_v54 = vpop.f32.mrb[213].mxu0 }
 0x914   :  { %v7719_v32 = vrot.slane %v7718_v10, 1  ;;  %v16891_v16 = vmax.f32 %v7723_v11, %v7724_v19  ;;  %v16893_v37 = vmax.f32 %v7730_v63, %v7731_v50  ;;  %v7738_v62 = vrot.slane %v7737_v0, 2  ;;  %v16895_v47 = vpop.f32.mrb[214].mxu0 }
 0x915   :  { %v7745_v35 = vrot.slane %v7744_v34, 2  ;;  %v7751_v48 = vmax.f32 %v7749_v21, %v7750_v36  ;;  %v7758_v13 = vmax.f32 %v7756_v12, %v7757_v40  ;;  %v7764_v45 = vrot.slane %v7763_v55, 4  ;;  %v16897_v5 = vpop.f32.mrb[215].mxu0 }
 0x916   :  { %18933 = vst [vmem:[#allocation22_spill] sm:$0xff] %v16891_v16  ;;  %18934 = vst [vmem:[#allocation25_spill] sm:$0xff] %v16893_v37  ;;  %v7720_v42 = vmax.f32 %v7718_v10, %v7719_v32  ;;  %v7739_v7 = vmax.f32 %v7737_v0, %v7738_v62  ;;  %v7221_v39 = vcombine.high %v7109_v38, %v7109_v38 }
 0x917   :  { %v7746_v22 = vmax.f32 %v7744_v34, %v7745_v35  ;;  %v7752_v52 = vrot.slane %v7751_v48, 2  ;;  %v7759_v51 = vrot.slane %v7758_v13, 2  ;;  %v7765_v15 = vmax.f32 %v7763_v55, %v7764_v45 }
 0x918   :  { %v7740_v17 = vrot.slane %v7739_v7, 1  ;;  %v8338_v28 = vmax.f32 %v7720_v42, 0.0  ;;  %v7228_v20 = vrot.slane %v7109_v38, %v16817_v43  ;;  %v7235_v18 = vrot.slane %v7221_v39, %v16817_v43 }
 0x919   :  { %v7747_v27 = vrot.slane %v7746_v22, 1  ;;  %v7753_v59 = vmax.f32 %v7751_v48, %v7752_v52  ;;  %v7760_v25 = vmax.f32 %v7758_v13, %v7759_v51  ;;  %v7766_v2 = vrot.slane %v7765_v15, 2 }
 0x91a   :  { %v7741_v3 = vmax.f32 %v7739_v7, %v7740_v17  ;;  %v16902_v41 = vpack.c.bf16 %v8338_v28, %v8338_v28  ;;  %v7236_v60 = vcombine.high %v7228_v20, %v7228_v20  ;;  %v7237_v30 = vcombine.high %v7235_v18, %v7235_v18 }
 0x91b   :  { %v7748_v58 = vmax.f32 %v7746_v22, %v7747_v27  ;;  %v7754_v11 = vrot.slane %v7753_v59, 1  ;;  %v7761_v63 = vrot.slane %v7760_v25, 1  ;;  %v7767_v46 = vmax.f32 %v7765_v15, %v7766_v2 }
 0x91c   :  { %v8341_v14 = vmax.f32 %v7741_v3, 0.0  ;;  %v7770_v44 = vsel %vm7657_vm14, %v7228_v20, -inf  ;;  %v7777_v38 = vsel %vm7657_vm14, %v7236_v60, -inf  ;;  %v7784_v21 = vsel %vm7657_vm14, %v7235_v18, -inf }
 0x91d   :  { %v7755_v12 = vmax.f32 %v7753_v59, %v7754_v11  ;;  %v7762_v10 = vmax.f32 %v7760_v25, %v7761_v63  ;;  %v7768_v19 = vrot.slane %v7767_v46, 1  ;;  %v8342_v50 = vmax.f32 %v7748_v58, 0.0 }
 0x91e   :  { %v16907_v0 = vpack.c.bf16 %v8341_v14, %v8341_v14  ;;  %v7771_v34 = vrot.slane %v7770_v44, 4  ;;  %v7778_v36 = vrot.slane %v7777_v38, 4  ;;  %v7785_v40 = vrot.slane %v7784_v21, 4 }
 0x91f   :  { %v7769_v55 = vmax.f32 %v7767_v46, %v7768_v19  ;;  %v8343_v32 = vmax.f32 %v7755_v12, 0.0  ;;  %v8344_v62 = vmax.f32 %v7762_v10, 0.0  ;;  %v8438_v35 = vpack.c.bf16 %v8342_v50, %v8342_v50 }
 0x920   :  { %18935 = vst [vmem:[#allocation26_spill] sm:$0xff] %v16907_v0  ;;  %v7772_v13 = vmax.f32 %v7770_v44, %v7771_v34  ;;  %v7779_v45 = vmax.f32 %v7777_v38, %v7778_v36  ;;  %v7786_v42 = vmax.f32 %v7784_v21, %v7785_v40  ;;  %v7791_v28 = vsel %vm7657_vm14, %v7237_v30, -inf }
 0x921   :  { %v8345_v7 = vmax.f32 %v7769_v55, 0.0  ;;  %v16910_v39 = vpack.c.bf16 %v8343_v32, %v8343_v32  ;;  %v8440_v22 = vpack.c.bf16 %v8344_v62, %v8344_v62  ;;  %v8594_v52 = vunpack.c.l.b16 %v8438_v35 }
 0x922   :  { %v7773_v51 = vrot.slane %v7772_v13, 2  ;;  %v7780_v15 = vrot.slane %v7779_v45, 2  ;;  %v7787_v17 = vrot.slane %v7786_v42, 2  ;;  %v16913_v20 = vpop.f32.mrb[216].mxu0  ;;  %v7792_v25 = vrot.slane %v7791_v28, 4 }
 0x923   :  { %v8441_v18 = vpack.c.bf16 %v8345_v7, %v8345_v7  ;;  %v18693_v27 = vunpack.c.l.b16 %v16910_v39  ;;  %v16916_v59 = vunpack.c.l.b16 %v8440_v22  ;;  %v16918_v2 = vpop.f32.mrb[217].mxu0  ;;  %v7013_v11 = vadd.f32 %v16879_v8, %v16812_v29 }
 0x924   :  { %v7774_v3 = vmax.f32 %v7772_v13, %v7773_v51  ;;  %v7781_v60 = vmax.f32 %v7779_v45, %v7780_v15  ;;  %v7788_v58 = vmax.f32 %v7786_v42, %v7787_v17  ;;  %v16922_v63 = vpop.f32.mrb[218].mxu0  ;;  %v7793_v14 = vmax.f32 %v7791_v28, %v7792_v25 }
 0x925   :  { %v16924_v46 = vunpack.c.l.b16 %v8441_v18  ;;  %v8664_v30 = vsel %vm8650_vm15, %v18693_v27, %v8594_v52  ;;  %v7017_v44 = vadd.f32 %v16886_v24, %v16809_v53  ;;  %v16931_v38 = vpop.f32.mrb[219].mxu0  ;;  %v7110_v24 = vmax.f32 %v16877_v56, %v7013_v11 }
 0x926   :  { %v8665_v21 = vsel %vm8652_vm0, %v16916_v59, %v8664_v30  ;;  %v7775_v12 = vrot.slane %v7774_v3, 1  ;;  %v7782_v10 = vrot.slane %v7781_v60, 1  ;;  %v7789_v8 = vrot.slane %v7788_v58, 1 }
 0x927   :  { %18936 = vst [vmem:[#allocation5_spill] sm:$0xff] %v16924_v46  ;;  %v16937_v19 = vsel %vm8654_vm1, %v16924_v46, %v8665_v21  ;;  %v16942_v50 = vsel %vm8650_vm15, %v16924_v46, %v16916_v59  ;;  %v7794_v34 = vrot.slane %v7793_v14, 2  ;;  %v7019_v32 = vadd.f32 %v16889_v54, %v16812_v29 }
 0x928   :  { %18937 = vst [vmem:[#allocation27_spill] sm:$0xff] %v16942_v50  ;;  %v7776_v36 = vmax.f32 %v7774_v3, %v7775_v12  ;;  %v7783_v40 = vmax.f32 %v7781_v60, %v7782_v10  ;;  %v7790_v55 = vmax.f32 %v7788_v58, %v7789_v8  ;;  %v7238_v35 = vcombine.high %v7110_v24, %v7110_v24 }
 0x929   :  { %v7795_v62 = vmax.f32 %v7793_v14, %v7794_v34  ;;  %v7245_v13 = vrot.slane %v7110_v24, %v16817_v43  ;;  %v16950_v45 = vadd.f32 %v16895_v47, %v16809_v53  ;;  %v7111_v52 = vmax.f32 %v7017_v44, %v7019_v32 }
 0x92a   :  { %v8346_v42 = vmax.f32 %v7776_v36, 0.0  ;;  %v8347_v7 = vmax.f32 %v7783_v40, 0.0  ;;  %v8348_v22 = vmax.f32 %v7790_v55, 0.0  ;;  %v16952_v51 = vpop.f32.mrb[220].mxu0  ;;  %v7252_v15 = vrot.slane %v7238_v35, %v16817_v43 }
 0x92b   :  { %v7796_v56 = vrot.slane %v7795_v62, 1  ;;  %v7253_v17 = vcombine.high %v7245_v13, %v7245_v13  ;;  %v7798_v54 = vsel %vm7657_vm14, %v7245_v13, -inf  ;;  %v16956_v28 = vpop.f32.mrb[221].mxu0  ;;  %v7262_v35 = vrot.slane %v7111_v52, %v16817_v43 }
 0x92c   :  { %v8442_v18 = vpack.c.bf16 %v8346_v42, %v8346_v42  ;;  %v8443_v25 = vpack.c.bf16 %v8347_v7, %v8347_v7  ;;  %v8444_v3 = vpack.c.bf16 %v8348_v22, %v8348_v22  ;;  %v7799_v60 = vrot.slane %v7798_v54, 4  ;;  %v16958_v47 = vpop.f32.mrb[222].mxu0 }
 0x92d   :  { %v7797_v58 = vmax.f32 %v7795_v62, %v7796_v56  ;;  %v7254_v11 = vcombine.high %v7252_v15, %v7252_v15  ;;  %v7805_v30 = vsel %vm7657_vm14, %v7253_v17, -inf  ;;  %v7812_v14 = vsel %vm7657_vm14, %v7252_v15, -inf  ;;  %v16962_v44 = vpop.f32.mrb[223].mxu0 }
 0x92e   :  { %v16964_v21 = vunpack.c.l.b16 %v8442_v18  ;;  %v16966_v12 = vunpack.c.l.b16 %v8443_v25  ;;  %v16968_v10 = vunpack.c.l.b16 %v8444_v3  ;;  %v7800_v8 = vmax.f32 %v7798_v54, %v7799_v60 }
 0x92f   :  { %v8349_v34 = vmax.f32 %v7797_v58, 0.0  ;;  %v7806_v24 = vrot.slane %v7805_v30, 4  ;;  %v7813_v36 = vrot.slane %v7812_v14, 4  ;;  %v7819_v40 = vsel %vm7657_vm14, %v7254_v11, -inf }
 0x930   :  { %18938 = vst [vmem:[#allocation7_spill] sm:$0xff] %v16964_v21  ;;  %18939 = vst [vmem:[#allocation8_spill] sm:$0xff] %v16966_v12  ;;  %v7801_v55 = vrot.slane %v7800_v8, 2  ;;  %v7820_v32 = vrot.slane %v7819_v40, 4  ;;  %v7255_v62 = vcombine.high %v7111_v52, %v7111_v52  ;;  %v7023_v22 = vadd.f32 %v16897_v5, %v16812_v29 }
 0x931   :  { %18940 = vst [vmem:[#allocation28_spill] sm:$0xff] %v16968_v10  ;;  %v8445_v13 = vpack.c.bf16 %v8349_v34, %v8349_v34  ;;  %v7807_v42 = vmax.f32 %v7805_v30, %v7806_v24  ;;  %v7814_v7 = vmax.f32 %v7812_v14, %v7813_v36  ;;  %v7270_v54 = vcombine.high %v7262_v35, %v7262_v35 }
 0x932   :  { %v7802_v56 = vmax.f32 %v7800_v8, %v7801_v55  ;;  %v7821_v15 = vmax.f32 %v7819_v40, %v7820_v32  ;;  %v7269_v17 = vrot.slane %v7255_v62, %v16817_v43  ;;  %v16975_v18 = vpop.f32.mrb[224].mxu0  ;;  %v7826_v58 = vsel %vm7657_vm14, %v7262_v35, -inf }
 0x933   :  { %v16977_v25 = vunpack.c.l.b16 %v8445_v13  ;;  %v7808_v3 = vrot.slane %v7807_v42, 2  ;;  %v7815_v60 = vrot.slane %v7814_v7, 2  ;;  %v16980_v52 = vpop.f32.mrb[225].mxu0  ;;  %v7827_v34 = vrot.slane %v7826_v58, 4 }
 0x934   :  { %v7803_v11 = vrot.slane %v7802_v56, 1  ;;  %v7822_v30 = vrot.slane %v7821_v15, 2  ;;  %v7271_v14 = vcombine.high %v7269_v17, %v7269_v17  ;;  %v16982_v5 = vpop.f32.mrb[226].mxu0  ;;  %v7833_v36 = vsel %vm7657_vm14, %v7270_v54, -inf }
 0x935   :  { %18941 = vst [vmem:[#allocation10_spill] sm:$0xff] %v16977_v25  ;;  %v16984_v8 = vmax.f32 %v7807_v42, %v7808_v3  ;;  %v16986_v24 = vmax.f32 %v7814_v7, %v7815_v60  ;;  %v7840_v40 = vsel %vm7657_vm14, %v7269_v17, -inf  ;;  %v16990_v55 = vpop.f32.mrb[227].mxu0  ;;  %v7828_v35 = vmax.f32 %v7826_v58, %v7827_v34 }
 0x936   :  { %v7804_v32 = vmax.f32 %v7802_v56, %v7803_v11  ;;  %v7823_v62 = vmax.f32 %v7821_v15, %v7822_v30  ;;  %v7834_v13 = vrot.slane %v7833_v36, 4  ;;  %v7841_v4 = vrot.slane %v7840_v40, 4 }
 0x937   :  { %18942 = vst [vmem:[#allocation11_spill] sm:$0xff] %v16984_v8  ;;  %18943 = vst [vmem:[#allocation12_spill] sm:$0xff] %v16986_v24  ;;  %v7847_v27 = vsel %vm7657_vm14, %v7271_v14, -inf  ;;  %v7112_v42 = vmax.f32 %v16950_v45, %v7023_v22  ;;  %v7829_v60 = vrot.slane %v7828_v35, 2 }
 0x938   :  { %v7824_v3 = vrot.slane %v7823_v62, 1  ;;  %v8350_v7 = vmax.f32 %v7804_v32, 0.0  ;;  %v7835_v26 = vmax.f32 %v7833_v36, %v7834_v13  ;;  %v7842_v54 = vmax.f32 %v7840_v40, %v7841_v4 }
 0x939   :  { %v7848_v57 = vrot.slane %v7847_v27, 4  ;;  %v7272_v17 = vcombine.high %v7112_v42, %v7112_v42  ;;  %v7279_v0 = vrot.slane %v7112_v42, %v16817_v43  ;;  %v7830_v58 = vmax.f32 %v7828_v35, %v7829_v60 }
 0x93a   :  { %v7825_v56 = vmax.f32 %v7823_v62, %v7824_v3  ;;  %v16996_v15 = vpack.c.bf16 %v8350_v7, %v8350_v7  ;;  %v7836_v11 = vrot.slane %v7835_v26, 2  ;;  %v7843_v30 = vrot.slane %v7842_v54, 2 }
 0x93b   :  { %v7849_v34 = vmax.f32 %v7847_v27, %v7848_v57  ;;  %v7286_v14 = vrot.slane %v7272_v17, %v16817_v43  ;;  %v7287_v48 = vcombine.high %v7279_v0, %v7279_v0  ;;  %v7831_v22 = vrot.slane %v7830_v58, 1 }
 0x93c   :  { %v8353_v45 = vmax.f32 %v7825_v56, 0.0  ;;  %v7837_v32 = vmax.f32 %v7835_v26, %v7836_v11  ;;  %v7854_v36 = vsel %vm7657_vm14, %v7279_v0, -inf  ;;  %v7844_v4 = vmax.f32 %v7842_v54, %v7843_v30 }
 0x93d   :  { %v7850_v40 = vrot.slane %v7849_v34, 2  ;;  %v7288_v13 = vcombine.high %v7286_v14, %v7286_v14  ;;  %v7855_v50 = vrot.slane %v7854_v36, 4  ;;  %v7832_v62 = vmax.f32 %v7830_v58, %v7831_v22 }
 0x93e   :  { %v17000_v42 = vpack.c.bf16 %v8353_v45, %v8353_v45  ;;  %v7838_v3 = vrot.slane %v7837_v32, 1  ;;  %v7861_v35 = vsel %vm7657_vm14, %v7287_v48, -inf  ;;  %v7845_v7 = vrot.slane %v7844_v4, 1 }
 0x93f   :  { %v7851_v57 = vmax.f32 %v7849_v34, %v7850_v40  ;;  %v7856_v27 = vmax.f32 %v7854_v36, %v7855_v50  ;;  %v7862_v60 = vrot.slane %v7861_v35, 4  ;;  %v8354_v26 = vmax.f32 %v7832_v62, 0.0 }
 0x940   :  { %18944 = vst [vmem:[#allocation13_spill] sm:$0xff] %v17000_v42  ;;  %v7839_v56 = vmax.f32 %v7837_v32, %v7838_v3  ;;  %v7868_v0 = vsel %vm7657_vm14, %v7286_v14, -inf  ;;  %v7846_v54 = vmax.f32 %v7844_v4, %v7845_v7  ;;  %v7875_v22 = vsel %vm7657_vm14, %v7288_v13, -inf }
 0x941   :  { %v7852_v11 = vrot.slane %v7851_v57, 1  ;;  %v7857_v30 = vrot.slane %v7856_v27, 2  ;;  %v7863_v1 = vmax.f32 %v7861_v35, %v7862_v60  ;;  %v8450_v6 = vpack.c.bf16 %v8354_v26, %v8354_v26 }
 0x942   :  { %v8355_v45 = vmax.f32 %v7839_v56, 0.0  ;;  %v7869_v58 = vrot.slane %v7868_v0, 4  ;;  %v17006_v48 = vpop.f32.mrb[228].mxu0  ;;  %v8356_v50 = vmax.f32 %v7846_v54, 0.0  ;;  %v7876_v62 = vrot.slane %v7875_v22, 4 }
 0x943   :  { %v7853_v34 = vmax.f32 %v7851_v57, %v7852_v11  ;;  %v7858_v36 = vmax.f32 %v7856_v27, %v7857_v30  ;;  %v7864_v40 = vrot.slane %v7863_v1, 2  ;;  %v17008_v17 = vpop.f32.mrb[229].mxu0  ;;  %v8602_v14 = vunpack.c.l.b16 %v8450_v6 }
 0x944   :  { %v17010_v32 = vpack.c.bf16 %v8355_v45, %v8355_v45  ;;  %v7870_v4 = vmax.f32 %v7868_v0, %v7869_v58  ;;  %v17012_v3 = vpop.f32.mrb[230].mxu0  ;;  %v8452_v7 = vpack.c.bf16 %v8356_v50, %v8356_v50  ;;  %v7877_v27 = vmax.f32 %v7875_v22, %v7876_v62 }
 0x945   :  { %v8357_v35 = vmax.f32 %v7853_v34, 0.0  ;;  %v7859_v60 = vrot.slane %v7858_v36, 1  ;;  %v7865_v56 = vmax.f32 %v7863_v1, %v7864_v40  ;;  %v17014_v13 = vpop.f32.mrb[231].mxu0  ;;  %v7027_v54 = vadd.f32 %v16913_v20, %v16809_v53 }
 0x946   :  { %v18697_v57 = vunpack.c.l.b16 %v17010_v32  ;;  %v7871_v26 = vrot.slane %v7870_v4, 2  ;;  %v17019_v30 = vunpack.c.l.b16 %v8452_v7  ;;  %v7878_v58 = vrot.slane %v7877_v27, 2 }
 0x947   :  { %v8453_v11 = vpack.c.bf16 %v8357_v35, %v8357_v35  ;;  %v7860_v6 = vmax.f32 %v7858_v36, %v7859_v60  ;;  %v7866_v0 = vrot.slane %v7865_v56, 1  ;;  %v7029_v34 = vadd.f32 %v16918_v2, %v16812_v29 }
 0x948   :  { %18945 = vst [vmem:[#allocation18_spill] sm:$0xff] %v17019_v30  ;;  %v17024_v45 = vsel %vm8650_vm15, %v18697_v57, %v8602_v14  ;;  %v7872_v1 = vmax.f32 %v7870_v4, %v7871_v26  ;;  %v7031_v20 = vadd.f32 %v16922_v63, %v16809_v53  ;;  %v7879_v36 = vmax.f32 %v7877_v27, %v7878_v58 }
 0x949   :  { %18946 = vst [vmem:[#allocation19_spill] sm:$0xff] %v17024_v45  ;;  %v17028_v50 = vunpack.c.l.b16 %v8453_v11  ;;  %v7867_v22 = vmax.f32 %v7865_v56, %v7866_v0  ;;  %v8358_v40 = vmax.f32 %v7860_v6, 0.0  ;;  %v7113_v35 = vmax.f32 %v7027_v54, %v7029_v34 }
 0x94a   :  { %v7873_v62 = vrot.slane %v7872_v1, 1  ;;  %v7033_v7 = vadd.f32 %v16931_v38, %v16812_v29  ;;  %v17034_v14 = vpop.f32.mrb[232].mxu0  ;;  %v7037_v2 = vadd.f32 %v16952_v51, %v16809_v53  ;;  %v7039_v56 = vadd.f32 %v16956_v28, %v16812_v29  ;;  %v12290_v38 = vld [vmem:[%s18615_s7 + $0x104] ss:$8 sps:$4 sm:$0xff]  }
 0x94b   :  { %v8359_v4 = vmax.f32 %v7867_v22, 0.0  ;;  %v8454_v60 = vpack.c.bf16 %v8358_v40, %v8358_v40  ;;  %v17040_v26 = vpop.f32.mrb[233].mxu0  ;;  %v7880_v63 = vrot.slane %v7879_v36, 1  ;;  %v7289_v6 = vcombine.high %v7113_v35, %v7113_v35  ;;  %9606 = vmatprep.subr.bf16.mxu0 %v12290_v38 }
 0x94c   :  { %v7874_v11 = vmax.f32 %v7872_v1, %v7873_v62  ;;  %v7296_v27 = vrot.slane %v7113_v35, %v16817_v43  ;;  %v17043_v54 = vpop.f32.mrb[234].mxu0  ;;  %v7114_v51 = vmax.f32 %v7031_v20, %v7033_v7  ;;  %v17050_v34 = vmax.f32 %v7037_v2, %v7039_v56 }
 0x94d   :  { %v8455_v0 = vpack.c.bf16 %v8359_v4, %v8359_v4  ;;  %v17048_v58 = vunpack.c.l.b16 %v8454_v60  ;;  %v17052_v28 = vpop.f32.mrb[235].mxu0  ;;  %v7881_v22 = vmax.f32 %v7879_v36, %v7880_v63  ;;  %v7303_v40 = vrot.slane %v7289_v6, %v16817_v43 }
 0x94e   :  { %v8360_v1 = vmax.f32 %v7874_v11, 0.0  ;;  %v7304_v62 = vcombine.high %v7296_v27, %v7296_v27  ;;  %v7882_v57 = vsel %vm7657_vm14, %v7296_v27, -inf  ;;  %v7306_v42 = vcombine.high %v7114_v51, %v7114_v51 }
 0x94f   :  { %18947 = vst [vmem:[#allocation24_spill] sm:$0xff] %v17048_v58  ;;  %v17055_v35 = vunpack.c.l.b16 %v8455_v0  ;;  %v7313_v4 = vrot.slane %v7114_v51, %v16817_v43  ;;  %v8361_v60 = vmax.f32 %v7881_v22, 0.0  ;;  %v7305_v20 = vcombine.high %v7303_v40, %v7303_v40 }
 0x950   :  { %v8456_v49 = vpack.c.bf16 %v8360_v1, %v8360_v1  ;;  %v7883_v7 = vrot.slane %v7882_v57, 4  ;;  %v7889_v2 = vsel %vm7657_vm14, %v7304_v62, -inf  ;;  %v7896_v36 = vsel %vm7657_vm14, %v7303_v40, -inf }
 0x951   :  { %18948 = vst [vmem:[#allocation9_spill] sm:$0xff] %v17055_v35  ;;  %v7320_v56 = vrot.slane %v7306_v42, %v16817_v43  ;;  %v7321_v11 = vcombine.high %v7313_v4, %v7313_v4  ;;  %v8457_v63 = vpack.c.bf16 %v8361_v60, %v8361_v60  ;;  %v7890_v0 = vrot.slane %v7889_v2, 4 }
 0x952   :  { %v17062_v6 = vunpack.c.l.b16 %v8456_v49  ;;  %v7884_v38 = vmax.f32 %v7882_v57, %v7883_v7  ;;  %v17064_v27 = vpop.f32.mrb[236].mxu0  ;;  %v7897_v24 = vrot.slane %v7896_v36, 4  ;;  %v7903_v51 = vsel %vm7657_vm14, %v7305_v20, -inf }
 0x953   :  { %18950 = vst [vmem:[#allocation29_spill] sm:$0xff] %v17064_v27  ;;  %v7322_v22 = vcombine.high %v7320_v56, %v7320_v56  ;;  %v7910_v1 = vsel %vm7657_vm14, %v7313_v4, -inf  ;;  %v17068_v8 = vpop.f32.mrb[237].mxu0  ;;  %v17070_v62 = vunpack.c.l.b16 %v8457_v63  ;;  %v7891_v42 = vmax.f32 %v7889_v2, %v7890_v0 }
 0x954   :  { %18949 = vst [vmem:[#allocation15_spill] sm:$0xff] %v17062_v6  ;;  %18951 = vst [vmem:[#allocation2_spill] sm:$0xff] %v17068_v8  ;;  %v7885_v40 = vrot.slane %v7884_v38, 2  ;;  %v7904_v37 = vrot.slane %v7903_v51, 4  ;;  %v7898_v60 = vmax.f32 %v7896_v36, %v7897_v24  ;;  %v7911_v49 = vrot.slane %v7910_v1, 4 }
 0x955   :  { %18952 = vst [vmem:[#allocation30_spill] sm:$0xff] %v17070_v62  ;;  %v7917_v57 = vsel %vm7657_vm14, %v7321_v11, -inf  ;;  %v7924_v7 = vsel %vm7657_vm14, %v7320_v56, -inf  ;;  %v7892_v27 = vrot.slane %v7891_v42, 2  ;;  %v7931_v63 = vsel %vm7657_vm14, %v7322_v22, -inf }
 0x956   :  { %v7886_v16 = vmax.f32 %v7884_v38, %v7885_v40  ;;  %v17074_v45 = vmax.f32 %v7903_v51, %v7904_v37  ;;  %v7918_v20 = vrot.slane %v7917_v57, 4  ;;  %v7899_v6 = vrot.slane %v7898_v60, 2 }
 0x957   :  { %v7912_v4 = vmax.f32 %v7910_v1, %v7911_v49  ;;  %v7925_v35 = vrot.slane %v7924_v7, 4  ;;  %v17077_v62 = vmax.f32 %v7891_v42, %v7892_v27  ;;  %v7932_v38 = vrot.slane %v7931_v63, 4 }
 0x958   :  { %18953 = vst [vmem:[#allocation31_spill] sm:$0xff] %v17074_v45  ;;  %v7887_v8 = vrot.slane %v7886_v16, 1  ;;  %v7919_v2 = vmax.f32 %v7917_v57, %v7918_v20  ;;  %v17080_v36 = vmax.f32 %v7898_v60, %v7899_v6  ;;  %v7323_v1 = vcombine.high %v17050_v34, %v17050_v34 }
 0x959   :  { %18954 = vst [vmem:[#allocation32_spill] sm:$0xff] %v17077_v62  ;;  %v7913_v11 = vrot.slane %v7912_v4, 2  ;;  %v7926_v56 = vmax.f32 %v7924_v7, %v7925_v35  ;;  %v7933_v49 = vmax.f32 %v7931_v63, %v7932_v38  ;;  %v7330_v27 = vrot.slane %v17050_v34, %v16817_v43 }
 0x95a   :  { %18955 = vst [vmem:[#allocation33_spill] sm:$0xff] %v17080_v36  ;;  %v7888_v0 = vmax.f32 %v7886_v16, %v7887_v8  ;;  %v7920_v51 = vrot.slane %v7919_v2, 2  ;;  %v7337_v6 = vrot.slane %v7323_v1, %v16817_v43  ;;  %v7041_v35 = vadd.f32 %v16958_v47, %v16809_v53 }
 0x95b   :  { %v7914_v40 = vmax.f32 %v7912_v4, %v7913_v11  ;;  %v7927_v22 = vrot.slane %v7926_v56, 2  ;;  %v7934_v60 = vrot.slane %v7933_v49, 2  ;;  %v7338_v7 = vcombine.high %v7330_v27, %v7330_v27 }
 0x95c   :  { %v8362_v42 = vmax.f32 %v7888_v0, 0.0  ;;  %v7921_v57 = vmax.f32 %v7919_v2, %v7920_v51  ;;  %v7339_v4 = vcombine.high %v7337_v6, %v7337_v6  ;;  %v7938_v63 = vsel %vm7657_vm14, %v7330_v27, -inf }
 0x95d   :  { %v7915_v16 = vrot.slane %v7914_v40, 1  ;;  %v7928_v8 = vmax.f32 %v7926_v56, %v7927_v22  ;;  %v7935_v34 = vmax.f32 %v7933_v49, %v7934_v60  ;;  %v7939_v0 = vrot.slane %v7938_v63, 4 }
 0x95e   :  { %v17090_v20 = vpack.c.bf16 %v8362_v42, %v8362_v42  ;;  %v7922_v24 = vrot.slane %v7921_v57, 1  ;;  %v7945_v51 = vsel %vm7657_vm14, %v7338_v7, -inf  ;;  %v7952_v1 = vsel %vm7657_vm14, %v7337_v6, -inf  ;;  %v17098_v6 = vpop.f32.mrb[238].mxu0 }
 0x95f   :  { %v7916_v11 = vmax.f32 %v7914_v40, %v7915_v16  ;;  %v7929_v38 = vrot.slane %v7928_v8, 1  ;;  %v7959_v47 = vsel %vm7657_vm14, %v7339_v4, -inf  ;;  %v7936_v22 = vrot.slane %v7935_v34, 1 }
 0x960   :  { %v7923_v2 = vmax.f32 %v7921_v57, %v7922_v24  ;;  %v7940_v42 = vmax.f32 %v7938_v63, %v7939_v0  ;;  %v7946_v36 = vrot.slane %v7945_v51, 4  ;;  %v7953_v62 = vrot.slane %v7952_v1, 4  ;;  %v17100_v63 = vpop.f32.mrb[239].mxu0 }
 0x961   :  { %v7930_v56 = vmax.f32 %v7928_v8, %v7929_v38  ;;  %v8366_v37 = vmax.f32 %v7916_v11, 0.0  ;;  %v7960_v58 = vrot.slane %v7959_v47, 4  ;;  %v7937_v27 = vmax.f32 %v7935_v34, %v7936_v22 }
 0x962   :  { %v8367_v45 = vmax.f32 %v7923_v2, 0.0  ;;  %v7941_v49 = vrot.slane %v7940_v42, 2  ;;  %v7947_v24 = vmax.f32 %v7945_v51, %v7946_v36  ;;  %v7954_v57 = vmax.f32 %v7952_v1, %v7953_v62 }
 0x963   :  { %v8368_v40 = vmax.f32 %v7930_v56, 0.0  ;;  %v8462_v16 = vpack.c.bf16 %v8366_v37, %v8366_v37  ;;  %v7961_v7 = vmax.f32 %v7959_v47, %v7960_v58  ;;  %v8369_v4 = vmax.f32 %v7937_v27, 0.0  ;;  %v17103_v37 = vpop.f32.mrb[240].mxu0 }
 0x964   :  { %v17096_v60 = vpack.c.bf16 %v8367_v45, %v8367_v45  ;;  %v7942_v11 = vmax.f32 %v7940_v42, %v7941_v49  ;;  %v7948_v2 = vrot.slane %v7947_v24, 2  ;;  %v7955_v34 = vrot.slane %v7954_v57, 2  ;;  %18956 = vst [vmem:[#allocation34_spill] sm:$0xff] %v17103_v37  ;;  %v17109_v51 = vpop.f32.mrb[241].mxu0 }
 0x965   :  { %v8464_v8 = vpack.c.bf16 %v8368_v40, %v8368_v40  ;;  %v8610_v38 = vunpack.c.l.b16 %v8462_v16  ;;  %v7962_v56 = vrot.slane %v7961_v7, 2  ;;  %v8465_v45 = vpack.c.bf16 %v8369_v4, %v8369_v4  ;;  %18958 = vst [vmem:[#allocation36_spill] sm:$0xff] %v17109_v51 }
 0x966   :  { %v18715_v0 = vunpack.c.l.b16 %v17096_v60  ;;  %v7943_v58 = vrot.slane %v7942_v11, 1  ;;  %v7043_v62 = vadd.f32 %v16962_v44, %v16812_v29  ;;  %v7949_v47 = vmax.f32 %v7947_v24, %v7948_v2 }
 0x967   :  { %v17105_v36 = vunpack.c.l.b16 %v8464_v8  ;;  %v7956_v22 = vmax.f32 %v7954_v57, %v7955_v34  ;;  %v7963_v42 = vmax.f32 %v7961_v7, %v7962_v56  ;;  %v17116_v27 = vunpack.c.l.b16 %v8465_v45 }
 0x968   :  { %v17114_v1 = vsel %vm8650_vm15, %v18715_v0, %v8610_v38  ;;  %v7944_v40 = vmax.f32 %v7942_v11, %v7943_v58  ;;  %v7116_v16 = vmax.f32 %v7041_v35, %v7043_v62  ;;  %v17119_v49 = vunpack.c.l.b16 %v16902_v41 }
 0x969   :  { %18957 = vst [vmem:[#allocation35_spill] sm:$0xff] %v17105_v36  ;;  %18959 = vst [vmem:[#allocation37_spill] sm:$0xff] %v17116_v27  ;;  %v7950_v4 = vrot.slane %v7949_v47, 1  ;;  %v7957_v8 = vrot.slane %v7956_v22, 1  ;;  %v7964_v44 = vrot.slane %v7963_v42, 1  ;;  %v17122_v51 = vunpack.c.l.b16 %v16996_v15 }
 0x96a   :  { %18960 = vst [vmem:[#allocation38_spill] sm:$0xff] %v17119_v49  ;;  %v8370_v37 = vmax.f32 %v7944_v40, 0.0  ;;  %v7340_v38 = vcombine.high %v7116_v16, %v7116_v16  ;;  %v7347_v24 = vrot.slane %v7116_v16, %v16817_v43  ;;  %v8732_v57 = vsel %vm8656_vm2, %v16848_v31, %v16863_v9  ;;  %v17132_v16 = vpop.f32.mrb[242].mxu0 }
 0x96b   :  { %18961 = vst [vmem:[#allocation39_spill] sm:$0xff] %v17122_v51  ;;  %v7951_v7 = vmax.f32 %v7949_v47, %v7950_v4  ;;  %v7958_v35 = vmax.f32 %v7956_v22, %v7957_v8  ;;  %v7965_v11 = vmax.f32 %v7963_v42, %v7964_v44  ;;  %v8733_v41 = vsel %vm8658_vm3, %v16850_v61, %v8732_v57  ;;  %v17138_v42 = vpop.f32.mrb[243].mxu0 }
 0x96c   :  { %v8466_v2 = vpack.c.bf16 %v8370_v37, %v8370_v37  ;;  %v7354_v34 = vrot.slane %v7340_v38, %v16817_v43  ;;  %v7355_v56 = vcombine.high %v7347_v24, %v7347_v24  ;;  %v7966_v15 = vsel %vm7657_vm14, %v7347_v24, -inf }
 0x96d   :  { %v8371_v45 = vmax.f32 %v7951_v7, 0.0  ;;  %v8372_v58 = vmax.f32 %v7958_v35, 0.0  ;;  %v8373_v62 = vmax.f32 %v7965_v11, 0.0  ;;  %v7967_v40 = vrot.slane %v7966_v15, 4 }
 0x96e   :  { %v17134_v0 = vunpack.c.l.b16 %v8466_v2  ;;  %v7356_v9 = vcombine.high %v7354_v34, %v7354_v34  ;;  %v7973_v47 = vsel %vm7657_vm14, %v7355_v56, -inf  ;;  %v7980_v22 = vsel %vm7657_vm14, %v7354_v34, -inf }
 0x96f   :  { %v8467_v37 = vpack.c.bf16 %v8371_v45, %v8371_v45  ;;  %v8468_v4 = vpack.c.bf16 %v8372_v58, %v8372_v58  ;;  %v8469_v8 = vpack.c.bf16 %v8373_v62, %v8373_v62  ;;  %v7968_v44 = vmax.f32 %v7966_v15, %v7967_v40 }
 0x970   :  { %18962 = vst [vmem:[#allocation40_spill] sm:$0xff] %v17134_v0  ;;  %v7974_v38 = vrot.slane %v7973_v47, 4  ;;  %v7981_v24 = vrot.slane %v7980_v22, 4  ;;  %v7987_v57 = vsel %vm7657_vm14, %v7356_v9, -inf  ;;  %v8734_v7 = vsel %vm8660_vm4, %v16859_v33, %v8733_v41 }
 0x971   :  { %v17143_v35 = vunpack.c.l.b16 %v8467_v37  ;;  %v17145_v11 = vunpack.c.l.b16 %v8468_v4  ;;  %v17147_v2 = vunpack.c.l.b16 %v8469_v8  ;;  %v7969_v34 = vrot.slane %v7968_v44, 2  ;;  %v17165_v8 = vpop.f32.mrb[244].mxu0 }
 0x972   :  { %v7975_v56 = vmax.f32 %v7973_v47, %v7974_v38  ;;  %v7982_v31 = vmax.f32 %v7980_v22, %v7981_v24  ;;  %v7988_v45 = vrot.slane %v7987_v57, 4  ;;  %v8735_v15 = vsel %vm8662_vm5, %v17119_v49, %v8734_v7 }
 0x973   :  { %18963 = vst [vmem:[#allocation41_spill] sm:$0xff] %v17143_v35  ;;  %18964 = vst [vmem:[#allocation42_spill] sm:$0xff] %v17145_v11  ;;  %v7970_v58 = vmax.f32 %v7968_v44, %v7969_v34  ;;  %v18966_v62 = vunpack.c.l.b16 %v16910_v39  ;;  %v8661_v41 = vsel %vm8660_vm4, %v16850_v61, %v16867_v23  ;;  %v8667_v9 = vsel %vm8656_vm2, %v16964_v21, %v16937_v19  ;;  %v17173_v19 = vpop.f32.mrb[245].mxu0 }
 0x974   :  { %18965 = vst [vmem:[#allocation43_spill] sm:$0xff] %v17147_v2  ;;  %v7976_v47 = vrot.slane %v7975_v56, 2  ;;  %v7983_v22 = vrot.slane %v7982_v31, 2  ;;  %v17161_v37 = vmax.f32 %v7987_v57, %v7988_v45  ;;  %v8663_v23 = vsel %vm8662_vm5, %v16859_v33, %v8661_v41  ;;  %v17182_v34 = vpop.f32.mrb[246].mxu0 }
 0x975   :  { %v8736_v40 = vsel %vm8650_vm15, %v16916_v59, %v18966_v62  ;;  %v7971_v39 = vrot.slane %v7970_v58, 1  ;;  %v8668_v44 = vsel %vm8658_vm3, %v16966_v12, %v8667_v9  ;;  %v17190_v41 = vpop.f32.mrb[247].mxu0 }
 0x976   :  { %18967 = vst [vmem:[#allocation44_spill] sm:$0xff] %v17161_v37  ;;  %v8737_v4 = vsel %vm8652_vm0, %v16924_v46, %v8736_v40  ;;  %v17175_v38 = vmax.f32 %v7975_v56, %v7976_v47  ;;  %v17177_v24 = vmax.f32 %v7982_v31, %v7983_v22  ;;  %v8669_v40 = vsel %vm8660_vm4, %v16968_v10, %v8668_v44 }
 0x977   :  { %v8738_v59 = vsel %vm8654_vm1, %v16964_v21, %v8737_v4  ;;  %v7972_v45 = vmax.f32 %v7970_v58, %v7971_v39  ;;  %v7047_v56 = vadd.f32 %v16975_v18, %v16809_v53  ;;  %v8670_v47 = vsel %vm8662_vm5, %v16977_v25, %v8669_v40 }
 0x978   :  { %18968 = vst [vmem:[#allocation45_spill] sm:$0xff] %v17175_v38  ;;  %18969 = vst [vmem:[#allocation46_spill] sm:$0xff] %v17177_v24  ;;  %v8739_v7 = vsel %vm8656_vm2, %v16966_v12, %v8738_v59  ;;  %v7049_v58 = vadd.f32 %v16980_v52, %v16812_v29  ;;  %v9093_v39 = vpack.c.b16 %v8670_v47, %v8663_v23  ;;  %v12288_v52 = vld [vmem:[%s18615_s7 + $0x100] ss:$8 sps:$4 sm:$0xff]  }
 0x979   :  { %v8740_v62 = vsel %vm8658_vm3, %v16968_v10, %v8739_v7  ;;  %v8374_v22 = vmax.f32 %v7972_v45, 0.0  ;;  %v7051_v18 = vadd.f32 %v16982_v5, %v16809_v53  ;;  %v7053_v7 = vadd.f32 %v16990_v55, %v16812_v29  ;;  %v12293_v55 = vld [vmem:[%s18615_s7 + $0x114] ss:$8 sps:$4 sm:$0xff]  }
 0x97a   :  { %v8741_v9 = vsel %vm8660_vm4, %v16977_v25, %v8740_v62  ;;  %v7117_v44 = vmax.f32 %v7047_v56, %v7049_v58  ;;  %v7057_v62 = vadd.f32 %v17006_v48, %v16809_v53  ;;  %v7059_v23 = vadd.f32 %v17008_v17, %v16812_v29 }
 0x97b   :  { %v8742_v4 = vsel %vm8662_vm5, %v17122_v51, %v8741_v9  ;;  %v17210_v45 = vpack.c.bf16 %v8374_v22, %v8374_v22  ;;  %v7061_v5 = vadd.f32 %v17012_v3, %v16809_v53  ;;  %v7118_v56 = vmax.f32 %v7051_v18, %v7053_v7 }
 0x97c   :  { %v9094_v59 = vpack.c.b16 %v8742_v4, %v8735_v15  ;;  %v7063_v15 = vadd.f32 %v17014_v13, %v16812_v29  ;;  %v7357_v48 = vcombine.high %v7117_v44, %v7117_v44  ;;  %v7364_v40 = vrot.slane %v7117_v44, %v16817_v43  ;;  %v12296_v44 = vld [vmem:[%s18615_s7 + $0x124] ss:$8 sps:$4 sm:$0xff]  }
 0x97d   :  { %v17224_v9 = vadd.f32 %v17034_v14, %v16809_v53  ;;  %v17226_v17 = vmax.f32 %v7057_v62, %v7059_v23  ;;  %v17232_v13 = vadd.f32 %v17040_v26, %v16812_v29  ;;  %v17236_v47 = vadd.f32 %v17043_v54, %v16809_v53 }
 0x97e   :  { %9565 = vmatprep.mubr.bf16.mxu0 %v9094_v59  ;;  %v17228_v3 = vmax.f32 %v7061_v5, %v7063_v15  ;;  %v7371_v58 = vrot.slane %v7357_v48, %v16817_v43  ;;  %v7372_v22 = vcombine.high %v7364_v40, %v7364_v40  ;;  %v7994_v4 = vsel %vm7657_vm14, %v7364_v40, -inf }
 0x97f   :  { %9566 = vmatmul.mubr.bf16.vlgmr.msra.gmra.mrb[248].mxu0 %v9093_v39  ;;  %v7374_v14 = vcombine.high %v7118_v56, %v7118_v56  ;;  %v12291_v39 = vld [vmem:[%s18615_s7 + $0x110] ss:$8 sps:$4 sm:$0xff]   ;;  %v7995_v18 = vrot.slane %v7994_v4, 4  ;;  %v7381_v59 = vrot.slane %v7118_v56, %v16817_v43  ;;  %v17248_v54 = vrot.slane %v17226_v17, %v16817_v43 }
 0x980   :  { %9607 = vmatpush1.bf16.msra.mxu0 %v12288_v52  ;;  %v7373_v7 = vcombine.high %v7371_v58, %v7371_v58  ;;  %v8001_v62 = vsel %vm7657_vm14, %v7372_v22, -inf  ;;  %v8008_v52 = vsel %vm7657_vm14, %v7371_v58, -inf  ;;  %v12294_v22 = vld [vmem:[%s18615_s7 + $0x120] ss:$8 sps:$4 sm:$0xff]  }
 0x981   :  { %9608 = vmatprep.subr.bf16.mxu0 %v12293_v55  ;;  %v7388_v23 = vrot.slane %v7374_v14, %v16817_v43  ;;  %v7996_v5 = vmax.f32 %v7994_v4, %v7995_v18  ;;  %v8002_v15 = vrot.slane %v8001_v62, 4  ;;  %v8009_v48 = vrot.slane %v8008_v52, 4  ;;  %v12299_v4 = vld [vmem:[%s18615_s7 + $0x134] ss:$8 sps:$4 sm:$0xff]  }
 0x982   :  { %v7389_v40 = vcombine.high %v7381_v59, %v7381_v59  ;;  %v8015_v56 = vsel %vm7657_vm14, %v7373_v7, -inf  ;;  %v8022_v55 = vsel %vm7657_vm14, %v7381_v59, -inf }
 0x983   :  { %v7390_v57 = vcombine.high %v7388_v23, %v7388_v23  ;;  %v8036_v31 = vsel %vm7657_vm14, %v7388_v23, -inf  ;;  %v7997_v26 = vrot.slane %v7996_v5, 2  ;;  %v8003_v58 = vmax.f32 %v8001_v62, %v8002_v15 }
 0x984   :  { %9609 = vmatpush1.bf16.msra.mxu0 %v12291_v39  ;;  %v8010_v37 = vmax.f32 %v8008_v52, %v8009_v48  ;;  %v8016_v14 = vrot.slane %v8015_v56, 4  ;;  %v8023_v18 = vrot.slane %v8022_v55, 4  ;;  %v8029_v7 = vsel %vm7657_vm14, %v7389_v40, -inf }
 0x985   :  { %9610 = vmatprep.subr.bf16.mxu0 %v12296_v44  ;;  %v8037_v59 = vrot.slane %v8036_v31, 4  ;;  %v8043_v23 = vsel %vm7657_vm14, %v7390_v57, -inf  ;;  %v7998_v39 = vmax.f32 %v7996_v5, %v7997_v26  ;;  %v8004_v24 = vrot.slane %v8003_v58, 2  ;;  %v12297_v44 = vld [vmem:[%s18615_s7 + $0x130] ss:$8 sps:$4 sm:$0xff]  }
 0x986   :  { %v8011_v38 = vrot.slane %v8010_v37, 2  ;;  %v8017_v51 = vmax.f32 %v8015_v56, %v8016_v14  ;;  %v8024_v49 = vmax.f32 %v8022_v55, %v8023_v18  ;;  %v8030_v25 = vrot.slane %v8029_v7, 4  ;;  %v12302_v57 = vld [vmem:[%s18615_s7 + $0x144] ss:$8 sps:$4 sm:$0xff]  }
 0x987   :  { %v8038_v62 = vmax.f32 %v8036_v31, %v8037_v59  ;;  %v8044_v52 = vrot.slane %v8043_v23, 4  ;;  %v7999_v15 = vrot.slane %v7998_v39, 1  ;;  %v8005_v48 = vmax.f32 %v8003_v58, %v8004_v24 }
 0x988   :  { %9611 = vmatpush1.bf16.msra.mxu0 %v12294_v22  ;;  %v8012_v33 = vmax.f32 %v8010_v37, %v8011_v38  ;;  %v8018_v40 = vrot.slane %v8017_v51, 2  ;;  %v8025_v26 = vrot.slane %v8024_v49, 2  ;;  %v8031_v5 = vmax.f32 %v8029_v7, %v8030_v25  ;;  %v12300_v37 = vld [vmem:[%s18615_s7 + $0x140] ss:$8 sps:$4 sm:$0xff]   ;;  %v12305_v25 = vld [vmem:[%s18615_s7 + $0x154] ss:$8 sps:$4 sm:$0xff]  }
 0x989   :  { %9612 = vmatprep.subr.bf16.mxu0 %v12299_v4  ;;  %v8039_v56 = vrot.slane %v8038_v62, 2  ;;  %v8045_v55 = vmax.f32 %v8043_v23, %v8044_v52  ;;  %v8000_v31 = vmax.f32 %v7998_v39, %v7999_v15  ;;  %v8006_v14 = vrot.slane %v8005_v48, 1 }
 0x98a   :  { %v8013_v22 = vrot.slane %v8012_v33, 1  ;;  %v8019_v18 = vmax.f32 %v8017_v51, %v8018_v40  ;;  %v8026_v59 = vmax.f32 %v8024_v49, %v8025_v26  ;;  %v8032_v10 = vrot.slane %v8031_v5, 2 }
 0x98b   :  { %v8040_v61 = vmax.f32 %v8038_v62, %v8039_v56  ;;  %v8046_v12 = vrot.slane %v8045_v55, 2  ;;  %v8007_v38 = vmax.f32 %v8005_v48, %v8006_v14  ;;  %v8378_v4 = vmax.f32 %v8000_v31, 0.0 }
 0x98c   :  { %9613 = vmatpush1.bf16.msra.mxu0 %v12297_v44  ;;  %v8014_v24 = vmax.f32 %v8012_v33, %v8013_v22  ;;  %v8020_v58 = vrot.slane %v8019_v18, 1  ;;  %v8027_v7 = vrot.slane %v8026_v59, 1  ;;  %v8033_v51 = vmax.f32 %v8031_v5, %v8032_v10  ;;  %v12303_v33 = vld [vmem:[%s18615_s7 + $0x150] ss:$8 sps:$4 sm:$0xff]  }
 0x98d   :  { %9614 = vmatprep.subr.bf16.mxu0 %v12302_v57  ;;  %v8041_v49 = vrot.slane %v8040_v61, 1  ;;  %v8047_v23 = vmax.f32 %v8045_v55, %v8046_v12  ;;  %v8379_v62 = vmax.f32 %v8007_v38, 0.0  ;;  %v8474_v44 = vpack.c.bf16 %v8378_v4, %v8378_v4  ;;  %v12308_v12 = vld [vmem:[%s18615_s7 + $0x164] ss:$8 sps:$4 sm:$0xff]  }
 0x98e   :  { %v8021_v39 = vmax.f32 %v8019_v18, %v8020_v58  ;;  %v8380_v52 = vmax.f32 %v8014_v24, 0.0  ;;  %v8028_v15 = vmax.f32 %v8026_v59, %v8027_v7  ;;  %v8034_v40 = vrot.slane %v8033_v51, 1  ;;  %v12306_v7 = vld [vmem:[%s18615_s7 + $0x160] ss:$8 sps:$4 sm:$0xff]  }
 0x98f   :  { %v8042_v26 = vmax.f32 %v8040_v61, %v8041_v49  ;;  %v8048_v48 = vrot.slane %v8047_v23, 1  ;;  %v17282_v56 = vpack.c.bf16 %v8379_v62, %v8379_v62  ;;  %v8618_v10 = vunpack.c.l.b16 %v8474_v44 }
 0x990   :  { %9615 = vmatpush1.bf16.msra.mxu0 %v12300_v37  ;;  %v8381_v57 = vmax.f32 %v8021_v39, 0.0  ;;  %v8476_v31 = vpack.c.bf16 %v8380_v52, %v8380_v52  ;;  %v8035_v5 = vmax.f32 %v8033_v51, %v8034_v40  ;;  %v8382_v14 = vmax.f32 %v8028_v15, 0.0  ;;  %v12311_v39 = vld [vmem:[%s18615_s7 + $0x174] ss:$8 sps:$4 sm:$0xff]  }
 0x991   :  { %9616 = vmatprep.subr.bf16.mxu0 %v12305_v25  ;;  %v8049_v55 = vmax.f32 %v8047_v23, %v8048_v48  ;;  %v8384_v61 = vmax.f32 %v8042_v26, 0.0  ;;  %v18737_v18 = vunpack.c.l.b16 %v17282_v56  ;;  %v18970_v37 = vcombine.high %v17226_v17, %v17226_v17 }
 0x992   :  { %v8477_v22 = vpack.c.bf16 %v8381_v57, %v8381_v57  ;;  %v17288_v59 = vunpack.c.l.b16 %v8476_v31  ;;  %v8383_v24 = vmax.f32 %v8035_v5, 0.0  ;;  %v8478_v4 = vpack.c.bf16 %v8382_v14, %v8382_v14  ;;  %v12309_v5 = vld [vmem:[%s18615_s7 + $0x170] ss:$8 sps:$4 sm:$0xff]  }
 0x993   :  { %v7405_v38 = vrot.slane %v18970_v37, %v16817_v43  ;;  %v8385_v58 = vmax.f32 %v8049_v55, 0.0  ;;  %v8480_v25 = vpack.c.bf16 %v8384_v61, %v8384_v61  ;;  %v8685_v49 = vsel %vm8650_vm15, %v18737_v18, %v8618_v10 }
 0x994   :  { %9617 = vmatpush1.bf16.msra.mxu0 %v12303_v33  ;;  %v17297_v51 = vunpack.c.l.b16 %v8477_v22  ;;  %v7406_v23 = vcombine.high %v17248_v54, %v17248_v54  ;;  %v8686_v62 = vsel %vm8652_vm0, %v17288_v59, %v8685_v49  ;;  %v8479_v52 = vpack.c.bf16 %v8383_v24, %v8383_v24  ;;  %v12314_v49 = vld [vmem:[%s18615_s7 + $0x184] ss:$8 sps:$4 sm:$0xff]  }
 0x995   :  { %v7407_v17 = vcombine.high %v7405_v38, %v7405_v38  ;;  %9618 = vmatprep.subr.bf16.mxu0 %v12308_v12  ;;  %v8481_v44 = vpack.c.bf16 %v8385_v58, %v8385_v58  ;;  %v17309_v15 = vunpack.c.l.b16 %v8478_v4  ;;  %v17316_v48 = vunpack.c.l.b16 %v8480_v25 }
 0x996   :  { %v8687_v40 = vsel %vm8654_vm1, %v17297_v51, %v8686_v62  ;;  %v8829_v26 = vsel %vm8650_vm15, %v17297_v51, %v17288_v59  ;;  %v8050_v33 = vsel %vm7657_vm14, %v17248_v54, -inf  ;;  %v17320_v57 = vunpack.c.l.b16 %v8479_v52  ;;  %v12312_v52 = vld [vmem:[%s18615_s7 + $0x180] ss:$8 sps:$4 sm:$0xff]  }
 0x997   :  { %v17322_v31 = vunpack.c.l.b16 %v8481_v44  ;;  %v8688_v10 = vsel %vm8656_vm2, %v17309_v15, %v8687_v40  ;;  %v17328_v12 = vsel %vm8652_vm0, %v17309_v15, %v8829_v26  ;;  %v8051_v55 = vrot.slane %v8050_v33, 4  ;;  %v12317_v40 = vld [vmem:[%s18615_s7 + $0x194] ss:$8 sps:$4 sm:$0xff]  }
 0x998   :  { %18971 = vst [vmem:[#allocation47_spill] sm:$0xff] %v17328_v12  ;;  %9619 = vmatpush1.bf16.msra.mxu0 %v12306_v7  ;;  %v8057_v14 = vsel %vm7657_vm14, %v7406_v23, -inf  ;;  %v8064_v54 = vsel %vm7657_vm14, %v7405_v38, -inf  ;;  %v8071_v61 = vsel %vm7657_vm14, %v7407_v17, -inf  ;;  %v17338_v22 = vsel %vm8658_vm3, %v17320_v57, %v8688_v10 }
 0x999   :  { %9620 = vmatprep.subr.bf16.mxu0 %v12311_v39  ;;  %v8058_v37 = vrot.slane %v8057_v14, 4  ;;  %v8065_v24 = vrot.slane %v8064_v54, 4  ;;  %v8072_v58 = vrot.slane %v8071_v61, 4  ;;  %v8052_v4 = vmax.f32 %v8050_v33, %v8051_v55 }
 0x99a   :  { %v7408_v25 = vcombine.high %v17228_v3, %v17228_v3  ;;  %v7415_v7 = vrot.slane %v17228_v3, %v16817_v43  ;;  %v7121_v38 = vmax.f32 %v17224_v9, %v17232_v13  ;;  %v17351_v62 = vadd.f32 %v17052_v28, %v16812_v29 }
 0x99b   :  { %v8059_v23 = vmax.f32 %v8057_v14, %v8058_v37  ;;  %v8066_v17 = vmax.f32 %v8064_v54, %v8065_v24  ;;  %v8073_v39 = vmax.f32 %v8071_v61, %v8072_v58  ;;  %v8053_v3 = vrot.slane %v8052_v4, 2 }
 0x99c   :  { %9621 = vmatpush1.bf16.msra.mxu0 %v12309_v5  ;;  %v7422_v44 = vrot.slane %v7408_v25, %v16817_v43  ;;  %v7423_v9 = vcombine.high %v7415_v7, %v7415_v7  ;;  %v8078_v13 = vsel %vm7657_vm14, %v7415_v7, -inf  ;;  %v12315_v25 = vld [vmem:[%s18615_s7 + $0x190] ss:$8 sps:$4 sm:$0xff]   ;;  %v7432_v12 = vrot.slane %v7121_v38, %v16817_v43 }
 0x99d   :  { %9622 = vmatprep.subr.bf16.mxu0 %v12314_v49  ;;  %v8060_v26 = vrot.slane %v8059_v23, 2  ;;  %v8067_v33 = vrot.slane %v8066_v17, 2  ;;  %v8074_v28 = vrot.slane %v8073_v39, 2  ;;  %v8079_v10 = vrot.slane %v8078_v13, 4 }
 0x99e   :  { %v8054_v5 = vmax.f32 %v8052_v4, %v8053_v3  ;;  %v7424_v55 = vcombine.high %v7422_v44, %v7422_v44  ;;  %v8085_v14 = vsel %vm7657_vm14, %v7423_v9, -inf  ;;  %v8092_v54 = vsel %vm7657_vm14, %v7422_v44, -inf }
 0x99f   :  { %v17363_v61 = vmax.f32 %v8059_v23, %v8060_v26  ;;  %v17365_v37 = vmax.f32 %v8066_v17, %v8067_v33  ;;  %v8075_v24 = vmax.f32 %v8073_v39, %v8074_v28  ;;  %v8080_v58 = vmax.f32 %v8078_v13, %v8079_v10  ;;  %v12320_v23 = vld [vmem:[%s18615_s7 + $0x1a4] ss:$8 sps:$4 sm:$0xff]  }
 0x9a0   :  { %9623 = vmatpush1.bf16.msra.mxu0 %v12312_v52  ;;  %v8055_v7 = vrot.slane %v8054_v5, 1  ;;  %v8086_v49 = vrot.slane %v8085_v14, 4  ;;  %v8093_v18 = vrot.slane %v8092_v54, 4  ;;  %v8099_v4 = vsel %vm7657_vm14, %v7424_v55, -inf }
 0x9a1   :  { %18972 = vst [vmem:[#allocation48_spill] sm:$0xff] %v17363_v61  ;;  %18973 = vst [vmem:[#allocation49_spill] sm:$0xff] %v17365_v37  ;;  %9624 = vmatprep.subr.bf16.mxu0 %v12317_v40  ;;  %v8076_v3 = vrot.slane %v8075_v24, 1  ;;  %v8081_v39 = vrot.slane %v8080_v58, 2  ;;  %v8100_v44 = vrot.slane %v8099_v4, 4  ;;  %v7425_v26 = vcombine.high %v7121_v38, %v7121_v38 }
 0x9a2   :  { %v8056_v52 = vmax.f32 %v8054_v5, %v8055_v7  ;;  %v8087_v9 = vmax.f32 %v8085_v14, %v8086_v49  ;;  %v8094_v13 = vmax.f32 %v8092_v54, %v8093_v18  ;;  %v12318_v40 = vld [vmem:[%s18615_s7 + $0x1a0] ss:$8 sps:$4 sm:$0xff]   ;;  %v12323_v18 = vld [vmem:[%s18615_s7 + $0x1b4] ss:$8 sps:$4 sm:$0xff]  }
 0x9a3   :  { %v8077_v33 = vmax.f32 %v8075_v24, %v8076_v3  ;;  %v8082_v28 = vmax.f32 %v8080_v58, %v8081_v39  ;;  %v8101_v10 = vmax.f32 %v8099_v4, %v8100_v44  ;;  %v7439_v61 = vrot.slane %v7425_v26, %v16817_v43 }
 0x9a4   :  { %9625 = vmatpush1.bf16.msra.mxu0 %v12315_v25  ;;  %v8386_v55 = vmax.f32 %v8056_v52, 0.0  ;;  %v8088_v37 = vrot.slane %v8087_v9, 2  ;;  %v8095_v17 = vrot.slane %v8094_v13, 2  ;;  %v7440_v24 = vcombine.high %v7432_v12, %v7432_v12 }
 0x9a5   :  { %9626 = vmatprep.subr.bf16.mxu0 %v12320_v23  ;;  %v8389_v5 = vmax.f32 %v8077_v33, 0.0  ;;  %v8083_v14 = vrot.slane %v8082_v28, 1  ;;  %v8102_v54 = vrot.slane %v8101_v10, 2  ;;  %v7441_v7 = vcombine.high %v7439_v61, %v7439_v61  ;;  %v12321_v23 = vld [vmem:[%s18615_s7 + $0x1b0] ss:$8 sps:$4 sm:$0xff]  }
 0x9a6   :  { %v17383_v38 = vpack.c.bf16 %v8386_v55, %v8386_v55  ;;  %v8089_v58 = vmax.f32 %v8087_v9, %v8088_v37  ;;  %v8096_v25 = vmax.f32 %v8094_v13, %v8095_v17  ;;  %v8106_v39 = vsel %vm7657_vm14, %v7432_v12, -inf  ;;  %v12326_v37 = vld [vmem:[%s18615_s7 + $0x1c4] ss:$8 sps:$4 sm:$0xff]  }
 0x9a7   :  { %v17385_v49 = vpack.c.bf16 %v8389_v5, %v8389_v5  ;;  %v8084_v4 = vmax.f32 %v8082_v28, %v8083_v14  ;;  %v8103_v3 = vmax.f32 %v8101_v10, %v8102_v54  ;;  %v8107_v26 = vrot.slane %v8106_v39, 4 }
 0x9a8   :  { %9627 = vmatpush1.bf16.msra.mxu0 %v12318_v40  ;;  %v8090_v44 = vrot.slane %v8089_v58, 1  ;;  %v8097_v52 = vrot.slane %v8096_v25, 1  ;;  %v8113_v33 = vsel %vm7657_vm14, %v7440_v24, -inf  ;;  %v8120_v55 = vsel %vm7657_vm14, %v7439_v61, -inf }
 0x9a9   :  { %18974 = vst [vmem:[#allocation50_spill] sm:$0xff] %v17385_v49  ;;  %9628 = vmatprep.subr.bf16.mxu0 %v12323_v18  ;;  %v8104_v9 = vrot.slane %v8103_v3, 1  ;;  %v8390_v13 = vmax.f32 %v8084_v4, 0.0  ;;  %v8114_v12 = vrot.slane %v8113_v33, 4  ;;  %v8108_v40 = vmax.f32 %v8106_v39, %v8107_v26  ;;  %v12324_v18 = vld [vmem:[%s18615_s7 + $0x1c0] ss:$8 sps:$4 sm:$0xff]  }
 0x9aa   :  { %v8091_v28 = vmax.f32 %v8089_v58, %v8090_v44  ;;  %v8098_v10 = vmax.f32 %v8096_v25, %v8097_v52  ;;  %v8121_v21 = vrot.slane %v8120_v55, 4  ;;  %v8127_v4 = vsel %vm7657_vm14, %v7441_v7, -inf  ;;  %v12329_v58 = vld [vmem:[%s18615_s7 + $0x1d4] ss:$8 sps:$4 sm:$0xff]  }
 0x9ab   :  { %v8105_v5 = vmax.f32 %v8103_v3, %v8104_v9  ;;  %v8486_v14 = vpack.c.bf16 %v8390_v13, %v8390_v13  ;;  %v8115_v54 = vmax.f32 %v8113_v33, %v8114_v12  ;;  %v8109_v17 = vrot.slane %v8108_v40, 2 }
 0x9ac   :  { %9629 = vmatpush1.bf16.msra.mxu0 %v12321_v23  ;;  %v8391_v24 = vmax.f32 %v8091_v28, 0.0  ;;  %v8392_v46 = vmax.f32 %v8098_v10, 0.0  ;;  %v8122_v39 = vmax.f32 %v8120_v55, %v8121_v21  ;;  %v8128_v26 = vrot.slane %v8127_v4, 4 }
 0x9ad   :  { %9630 = vmatprep.subr.bf16.mxu0 %v12326_v37  ;;  %v8393_v61 = vmax.f32 %v8105_v5, 0.0  ;;  %v8626_v25 = vunpack.c.l.b16 %v8486_v14  ;;  %v8116_v3 = vrot.slane %v8115_v54, 2  ;;  %v8110_v52 = vmax.f32 %v8108_v40, %v8109_v17  ;;  %v12327_v37 = vld [vmem:[%s18615_s7 + $0x1d0] ss:$8 sps:$4 sm:$0xff]  }
 0x9ae   :  { %v17404_v44 = vpack.c.bf16 %v8391_v24, %v8391_v24  ;;  %v8488_v23 = vpack.c.bf16 %v8392_v46, %v8392_v46  ;;  %v8123_v13 = vrot.slane %v8122_v39, 2  ;;  %v7122_v7 = vmax.f32 %v17236_v47, %v17351_v62  ;;  %v12332_v46 = vld [vmem:[%s18615_s7 + $0x1e4] ss:$8 sps:$4 sm:$0xff]  }
 0x9af   :  { %v8489_v33 = vpack.c.bf16 %v8393_v61, %v8393_v61  ;;  %v8117_v9 = vmax.f32 %v8115_v54, %v8116_v3  ;;  %v8111_v21 = vrot.slane %v8110_v52, 1  ;;  %v8129_v10 = vmax.f32 %v8127_v4, %v8128_v26  ;;  %v12330_v61 = vld [vmem:[%s18615_s7 + $0x1e0] ss:$8 sps:$4 sm:$0xff]  }
 0x9b0   :  { %9631 = vmatpush1.bf16.msra.mxu0 %v12324_v18  ;;  %v18744_v12 = vunpack.c.l.b16 %v17404_v44  ;;  %v17412_v28 = vunpack.c.l.b16 %v8488_v23  ;;  %v8124_v47 = vmax.f32 %v8122_v39, %v8123_v13  ;;  %v7442_v62 = vcombine.high %v7122_v7, %v7122_v7 }
 0x9b1   :  { %9632 = vmatprep.subr.bf16.mxu0 %v12329_v58  ;;  %v17417_v17 = vunpack.c.l.b16 %v8489_v33  ;;  %v8118_v40 = vrot.slane %v8117_v9, 1  ;;  %v8112_v5 = vmax.f32 %v8110_v52, %v8111_v21  ;;  %v8130_v14 = vrot.slane %v8129_v10, 2  ;;  %v12335_v52 = vld [vmem:[%s18615_s7 + $0x1f4] ss:$8 sps:$4 sm:$0xff]  }
 0x9b2   :  { %v8692_v55 = vsel %vm8650_vm15, %v18744_v12, %v8626_v25  ;;  %v7449_v54 = vrot.slane %v7122_v7, %v16817_v43  ;;  %v8125_v58 = vrot.slane %v8124_v47, 1  ;;  %v7456_v23 = vrot.slane %v7442_v62, %v16817_v43 }
 0x9b3   :  { %v8693_v18 = vsel %vm8652_vm0, %v17412_v28, %v8692_v55  ;;  %v8836_v24 = vsel %vm8650_vm15, %v17417_v17, %v17412_v28  ;;  %v8119_v4 = vmax.f32 %v8117_v9, %v8118_v40  ;;  %v8131_v3 = vmax.f32 %v8129_v10, %v8130_v14 }
 0x9b4   :  { %9633 = vmatpush1.bf16.msra.mxu0 %v12327_v37  ;;  %v8694_v25 = vsel %vm8654_vm1, %v17417_v17, %v8693_v18  ;;  %v8394_v39 = vmax.f32 %v8112_v5, 0.0  ;;  %v8126_v26 = vmax.f32 %v8124_v47, %v8125_v58  ;;  %v7457_v9 = vcombine.high %v7449_v54, %v7449_v54 }
 0x9b5   :  { %9634 = vmatprep.subr.bf16.mxu0 %v12332_v46  ;;  %v8395_v33 = vmax.f32 %v8119_v4, 0.0  ;;  %v8134_v13 = vsel %vm7657_vm14, %v7449_v54, -inf  ;;  %v8132_v7 = vrot.slane %v8131_v3, 1  ;;  %v7458_v21 = vcombine.high %v7456_v23, %v7456_v23  ;;  %v12333_v46 = vld [vmem:[%s18615_s7 + $0x1f0] ss:$8 sps:$4 sm:$0xff]  }
 0x9b6   :  { %v8490_v37 = vpack.c.bf16 %v8394_v39, %v8394_v39  ;;  %v8135_v40 = vrot.slane %v8134_v13, 4  ;;  %v8396_v55 = vmax.f32 %v8126_v26, 0.0  ;;  %v8141_v10 = vsel %vm7657_vm14, %v7457_v9, -inf  ;;  %v12338_v4 = vld [vmem:[%s18615_s7 + $0x204] ss:$8 sps:$4 sm:$0xff]  }
 0x9b7   :  { %v8491_v18 = vpack.c.bf16 %v8395_v33, %v8395_v33  ;;  %v8148_v62 = vsel %vm7657_vm14, %v7456_v23, -inf  ;;  %v8133_v47 = vmax.f32 %v8131_v3, %v8132_v7  ;;  %v8142_v54 = vrot.slane %v8141_v10, 4 }
 0x9b8   :  { %9635 = vmatpush1.bf16.msra.mxu0 %v12330_v61  ;;  %v17443_v5 = vunpack.c.l.b16 %v8490_v37  ;;  %v8136_v14 = vmax.f32 %v8134_v13, %v8135_v40  ;;  %v8492_v58 = vpack.c.bf16 %v8396_v55, %v8396_v55  ;;  %v8149_v26 = vrot.slane %v8148_v62, 4 }
 0x9b9   :  { %9636 = vmatprep.subr.bf16.mxu0 %v12335_v52  ;;  %v17448_v39 = vunpack.c.l.b16 %v8491_v18  ;;  %v8155_v61 = vsel %vm7657_vm14, %v7458_v21, -inf  ;;  %v8397_v23 = vmax.f32 %v8133_v47, 0.0  ;;  %v8143_v7 = vmax.f32 %v8141_v10, %v8142_v54 }
 0x9ba   :  { %v8695_v33 = vsel %vm8656_vm2, %v17443_v5, %v8694_v25  ;;  %v17455_v3 = vsel %vm8652_vm0, %v17443_v5, %v8836_v24  ;;  %v8137_v9 = vrot.slane %v8136_v14, 2  ;;  %v17457_v52 = vunpack.c.l.b16 %v8492_v58 }
 0x9bb   :  { %18975 = vst [vmem:[#allocation51_spill] sm:$0xff] %v17455_v3  ;;  %v17461_v13 = vsel %vm8658_vm3, %v17448_v39, %v8695_v33  ;;  %v8150_v37 = vmax.f32 %v8148_v62, %v8149_v26  ;;  %v8493_v40 = vpack.c.bf16 %v8397_v23, %v8397_v23  ;;  %v8156_v55 = vrot.slane %v8155_v61, 4 }
 0x9bc   :  { %9637 = vmatpush1.bf16.msra.mxu0 %v12333_v46  ;;  %v8138_v21 = vmax.f32 %v8136_v14, %v8137_v9  ;;  %v17464_v18 = vunpack.c.l.b16 %v17090_v20  ;;  %v8144_v25 = vrot.slane %v8143_v7, 2  ;;  %v17467_v47 = vunpack.c.l.b16 %v17210_v45 }
 0x9bd   :  { %9679 = vmatprep.subr.bf16.mxu0 %v12338_v4  ;;  %v8151_v24 = vrot.slane %v8150_v37, 2  ;;  %v18978_v58 = vunpack.c.l.b16 %v17010_v32  ;;  %v17473_v10 = vunpack.c.l.b16 %v8493_v40  ;;  %v8157_v46 = vmax.f32 %v8155_v61, %v8156_v55  ;;  %v18981_v4 = vld [vmem:[#allocation24_spill] sm:$0xff]  ;;  %v18983_v40 = vld [vmem:[#allocation9_spill] sm:$0xff] }
 0x9be   :  { %18976 = vst [vmem:[#allocation52_spill] sm:$0xff] %v17464_v18  ;;  %18977 = vst [vmem:[#allocation53_spill] sm:$0xff] %v17467_v47  ;;  %v8139_v62 = vrot.slane %v8138_v21, 1  ;;  %v17477_v20 = vmax.f32 %v8143_v7, %v8144_v25  ;;  %v18982_v26 = vunpack.c.l.b16 %v17096_v60  ;;  %v18985_v60 = vld [vmem:[#allocation19_spill] sm:$0xff]  ;;  %v18988_v7 = vld [vmem:[#allocation2_spill] sm:$0xff] }
 0x9bf   :  { %v8743_v33 = vsel %vm8650_vm15, %v17019_v30, %v18978_v58  ;;  %v17479_v54 = vmax.f32 %v8150_v37, %v8151_v24  ;;  %v8158_v9 = vrot.slane %v8157_v46, 2  ;;  %v18984_v37 = vld [vmem:[#allocation15_spill] sm:$0xff]  ;;  %v8672_v58 = vsel %vm8652_vm0, %v17019_v30, %v18985_v60 }
 0x9c0   :  { %v8744_v14 = vsel %vm8652_vm0, %v17028_v50, %v8743_v33  ;;  %18979 = vst [vmem:[#allocation54_spill] sm:$0xff] %v17477_v20  ;;  %v8750_v32 = vsel %vm8650_vm15, %v17105_v36, %v18982_v26  ;;  %v8140_v23 = vmax.f32 %v8138_v21, %v8139_v62  ;;  %v18986_v62 = vld [vmem:[#allocation30_spill] sm:$0xff] }
 0x9c1   :  { %18980 = vst [vmem:[#allocation55_spill] sm:$0xff] %v17479_v54  ;;  %v8745_v45 = vsel %vm8654_vm1, %v18981_v4, %v8744_v14  ;;  %v8751_v55 = vsel %vm8652_vm0, %v17116_v27, %v8750_v32  ;;  %v8159_v21 = vmax.f32 %v8157_v46, %v8158_v9  ;;  %v8679_v46 = vsel %vm8652_vm0, %v17105_v36, %v17114_v1  ;;  %v18987_v1 = vld [vmem:[#allocation29_spill] sm:$0xff] }
 0x9c2   :  { %v8746_v61 = vsel %vm8656_vm2, %v18983_v40, %v8745_v45  ;;  %v8752_v24 = vsel %vm8654_vm1, %v17134_v0, %v8751_v55  ;;  %v8398_v33 = vmax.f32 %v8140_v23, 0.0 }
 0x9c3   :  { %v8747_v25 = vsel %vm8658_vm3, %v18984_v37, %v8746_v61  ;;  %v8753_v45 = vsel %vm8656_vm2, %v17143_v35, %v8752_v24  ;;  %v8673_v61 = vsel %vm8654_vm1, %v17028_v50, %v8672_v58  ;;  %v8160_v23 = vrot.slane %v8159_v21, 1 }
 0x9c4   :  { %v8748_v14 = vsel %vm8660_vm4, %v18986_v62, %v8747_v25  ;;  %v8754_v32 = vsel %vm8658_vm3, %v17145_v11, %v8753_v45  ;;  %v17512_v9 = vpack.c.bf16 %v8398_v33, %v8398_v33  ;;  %v8674_v25 = vsel %vm8656_vm2, %v18981_v4, %v8673_v61 }
 0x9c5   :  { %v8749_v26 = vsel %vm8662_vm5, %v17464_v18, %v8748_v14  ;;  %v8755_v55 = vsel %vm8660_vm4, %v17147_v2, %v8754_v32  ;;  %v8675_v60 = vsel %vm8658_vm3, %v18983_v40, %v8674_v25  ;;  %v8680_v58 = vsel %vm8654_vm1, %v17116_v27, %v8679_v46 }
 0x9c6   :  { %v8756_v24 = vsel %vm8662_vm5, %v17467_v47, %v8755_v55  ;;  %v7077_v14 = vadd.f32 %v18987_v1, %v16809_v53  ;;  %v8161_v33 = vmax.f32 %v8159_v21, %v8160_v23  ;;  %v8676_v32 = vsel %vm8660_vm4, %v18984_v37, %v8675_v60 }
 0x9c7   :  { %v9099_v45 = vpack.c.b16 %v8756_v24, %v8749_v26  ;;  %v8681_v61 = vsel %vm8656_vm2, %v17134_v0, %v8680_v58  ;;  %v8677_v55 = vsel %vm8662_vm5, %v18986_v62, %v8676_v32  ;;  %v7079_v46 = vadd.f32 %v18988_v7, %v16812_v29  ;;  %v18989_v24 = vld [vmem:[#allocation34_spill] sm:$0xff]  ;;  %v18990_v7 = vld [vmem:[#allocation36_spill] sm:$0xff] }
 0x9c8   :  { %v8682_v25 = vsel %vm8658_vm3, %v17143_v35, %v8681_v61  ;;  %v7081_v1 = vadd.f32 %v17098_v6, %v16809_v53  ;;  %v8401_v21 = vmax.f32 %v8161_v33, 0.0  ;;  %v7083_v23 = vadd.f32 %v17100_v63, %v16812_v29 }
 0x9c9   :  { %9575 = vmatprep.mubr.bf16.mxu0 %v9099_v45  ;;  %v8683_v26 = vsel %vm8660_vm4, %v17145_v11, %v8682_v25  ;;  %v7087_v60 = vadd.f32 %v18989_v24, %v16809_v53  ;;  %v7123_v32 = vmax.f32 %v7077_v14, %v7079_v46  ;;  %v7089_v61 = vadd.f32 %v18990_v7, %v16812_v29 }
 0x9ca   :  { %v8684_v58 = vsel %vm8662_vm5, %v17147_v2, %v8683_v26  ;;  %v7091_v6 = vadd.f32 %v17132_v16, %v16809_v53  ;;  %v17550_v33 = vpack.c.bf16 %v8401_v21, %v8401_v21  ;;  %v7124_v25 = vmax.f32 %v7081_v1, %v7083_v23 }
 0x9cb   :  { %v9098_v45 = vpack.c.b16 %v8684_v58, %v8677_v55  ;;  %v7093_v63 = vadd.f32 %v17138_v42, %v16812_v29  ;;  %v7459_v12 = vcombine.high %v7123_v32, %v7123_v32  ;;  %v7466_v24 = vrot.slane %v7123_v32, %v16817_v43 }
 0x9cc   :  { %18991 = vst [vmem:[#allocation24_spill] sm:$0xff] %v17550_v33  ;;  %v17555_v49 = vmax.f32 %v7087_v60, %v7089_v61  ;;  %v17559_v14 = vadd.f32 %v17165_v8, %v16809_v53  ;;  %v7476_v16 = vcombine.high %v7124_v25, %v7124_v25  ;;  %v7483_v21 = vrot.slane %v7124_v25, %v16817_v43 }
 0x9cd   :  { %9576 = vmatmul.mubr.bf16.gmra.mrb[252].mxu0 %v9098_v45  ;;  %v17563_v55 = vmax.f32 %v7091_v6, %v7093_v63  ;;  %v7473_v1 = vrot.slane %v7459_v12, %v16817_v43  ;;  %v7474_v42 = vcombine.high %v7466_v24, %v7466_v24  ;;  %v8162_v26 = vsel %vm7657_vm14, %v7466_v24, -inf }
 0x9ce   :  { %v8163_v60 = vrot.slane %v8162_v26, 4  ;;  %v7490_v8 = vrot.slane %v7476_v16, %v16817_v43  ;;  %v7491_v58 = vcombine.high %v7483_v21, %v7483_v21  ;;  %v8190_v32 = vsel %vm7657_vm14, %v7483_v21, -inf }
 0x9cf   :  { %v7475_v7 = vcombine.high %v7473_v1, %v7473_v1  ;;  %v8169_v61 = vsel %vm7657_vm14, %v7474_v42, -inf  ;;  %v8176_v6 = vsel %vm7657_vm14, %v7473_v1, -inf  ;;  %v8191_v45 = vrot.slane %v8190_v32, 4 }
 0x9d0   :  { %v8164_v25 = vmax.f32 %v8162_v26, %v8163_v60  ;;  %v8170_v12 = vrot.slane %v8169_v61, 4  ;;  %v8177_v63 = vrot.slane %v8176_v6, 4  ;;  %v7492_v46 = vcombine.high %v7490_v8, %v7490_v8 }
 0x9d1   :  { %v8183_v24 = vsel %vm7657_vm14, %v7475_v7, -inf  ;;  %v8192_v33 = vmax.f32 %v8190_v32, %v8191_v45  ;;  %v8197_v23 = vsel %vm7657_vm14, %v7491_v58, -inf  ;;  %v8204_v16 = vsel %vm7657_vm14, %v7490_v8, -inf }
 0x9d2   :  { %v8165_v3 = vrot.slane %v8164_v25, 2  ;;  %v8171_v54 = vmax.f32 %v8169_v61, %v8170_v12  ;;  %v8178_v21 = vmax.f32 %v8176_v6, %v8177_v63  ;;  %v8184_v20 = vrot.slane %v8183_v24, 4 }
 0x9d3   :  { %v8193_v47 = vrot.slane %v8192_v33, 2  ;;  %v8198_v42 = vrot.slane %v8197_v23, 4  ;;  %v8205_v2 = vrot.slane %v8204_v16, 4  ;;  %v8211_v1 = vsel %vm7657_vm14, %v7492_v46, -inf }
 0x9d4   :  { %v8166_v26 = vmax.f32 %v8164_v25, %v8165_v3  ;;  %v8172_v60 = vrot.slane %v8171_v54, 2  ;;  %v8179_v36 = vrot.slane %v8178_v21, 2  ;;  %v8185_v11 = vmax.f32 %v8183_v24, %v8184_v20 }
 0x9d5   :  { %v8194_v30 = vmax.f32 %v8192_v33, %v8193_v47  ;;  %v8199_v7 = vmax.f32 %v8197_v23, %v8198_v42  ;;  %v8206_v32 = vmax.f32 %v8204_v16, %v8205_v2  ;;  %v8212_v45 = vrot.slane %v8211_v1, 4 }
 0x9d6   :  { %v8167_v58 = vrot.slane %v8166_v26, 1  ;;  %v8173_v35 = vmax.f32 %v8171_v54, %v8172_v60  ;;  %v8180_v8 = vmax.f32 %v8178_v21, %v8179_v36  ;;  %v8186_v0 = vrot.slane %v8185_v11, 2 }
 0x9d7   :  { %v8195_v61 = vrot.slane %v8194_v30, 1  ;;  %v8200_v6 = vrot.slane %v8199_v7, 2  ;;  %v8207_v12 = vrot.slane %v8206_v32, 2  ;;  %v8213_v63 = vmax.f32 %v8211_v1, %v8212_v45 }
 0x9d8   :  { %v8168_v27 = vmax.f32 %v8166_v26, %v8167_v58  ;;  %v8174_v18 = vrot.slane %v8173_v35, 1  ;;  %v8181_v62 = vrot.slane %v8180_v8, 1  ;;  %v8187_v46 = vmax.f32 %v8185_v11, %v8186_v0 }
 0x9d9   :  { %v8196_v3 = vmax.f32 %v8194_v30, %v8195_v61  ;;  %v8201_v25 = vmax.f32 %v8199_v7, %v8200_v6  ;;  %v8208_v37 = vmax.f32 %v8206_v32, %v8207_v12  ;;  %v8214_v20 = vrot.slane %v8213_v63, 2 }
 0x9da   :  { %v8175_v47 = vmax.f32 %v8173_v35, %v8174_v18  ;;  %v8182_v33 = vmax.f32 %v8180_v8, %v8181_v62  ;;  %v8188_v2 = vrot.slane %v8187_v46, 1  ;;  %v8402_v23 = vmax.f32 %v8168_v27, 0.0 }
 0x9db   :  { %v8202_v24 = vrot.slane %v8201_v25, 1  ;;  %v8209_v54 = vrot.slane %v8208_v37, 1  ;;  %v8215_v36 = vmax.f32 %v8213_v63, %v8214_v20  ;;  %v8406_v16 = vmax.f32 %v8196_v3, 0.0 }
 0x9dc   :  { %v8189_v21 = vmax.f32 %v8187_v46, %v8188_v2  ;;  %v8403_v42 = vmax.f32 %v8175_v47, 0.0  ;;  %v8404_v60 = vmax.f32 %v8182_v33, 0.0  ;;  %v8498_v1 = vpack.c.bf16 %v8402_v23, %v8402_v23 }
 0x9dd   :  { %v8203_v26 = vmax.f32 %v8201_v25, %v8202_v24  ;;  %v8210_v45 = vmax.f32 %v8208_v37, %v8209_v54  ;;  %v8216_v58 = vrot.slane %v8215_v36, 1  ;;  %v8502_v0 = vpack.c.bf16 %v8406_v16, %v8406_v16 }
 0x9de   :  { %v8405_v30 = vmax.f32 %v8189_v21, 0.0  ;;  %v17577_v11 = vpack.c.bf16 %v8403_v42, %v8403_v42  ;;  %v8500_v7 = vpack.c.bf16 %v8404_v60, %v8404_v60  ;;  %v8634_v35 = vunpack.c.l.b16 %v8498_v1 }
 0x9df   :  { %v8217_v18 = vmax.f32 %v8215_v36, %v8216_v58  ;;  %v8407_v62 = vmax.f32 %v8203_v26, 0.0  ;;  %v8408_v27 = vmax.f32 %v8210_v45, 0.0  ;;  %v17579_v32 = vunpack.c.l.b16 %v8502_v0 }
 0x9e0   :  { %v8501_v8 = vpack.c.bf16 %v8405_v30, %v8405_v30  ;;  %v18768_v61 = vunpack.c.l.b16 %v17577_v11  ;;  %v17582_v6 = vunpack.c.l.b16 %v8500_v7  ;;  %v7500_v37 = vrot.slane %v17555_v49, %v16817_v43 }
 0x9e1   :  { %v8409_v12 = vmax.f32 %v8217_v18, 0.0  ;;  %v8503_v63 = vpack.c.bf16 %v8407_v62, %v8407_v62  ;;  %v8504_v46 = vpack.c.bf16 %v8408_v27, %v8408_v27  ;;  %v18992_v3 = vcombine.high %v17555_v49, %v17555_v49 }
 0x9e2   :  { %v17590_v20 = vunpack.c.l.b16 %v8501_v8  ;;  %v8699_v47 = vsel %vm8650_vm15, %v18768_v61, %v8634_v35  ;;  %v7508_v33 = vcombine.high %v7500_v37, %v7500_v37  ;;  %v8218_v2 = vsel %vm7657_vm14, %v7500_v37, -inf }
 0x9e3   :  { %v7507_v25 = vrot.slane %v18992_v3, %v16817_v43  ;;  %v8700_v23 = vsel %vm8652_vm0, %v17582_v6, %v8699_v47  ;;  %v8505_v24 = vpack.c.bf16 %v8409_v12, %v8409_v12  ;;  %v17598_v54 = vunpack.c.l.b16 %v8503_v63 }
 0x9e4   :  { %v17600_v36 = vunpack.c.l.b16 %v8504_v46  ;;  %v8701_v49 = vsel %vm8654_vm1, %v17590_v20, %v8700_v23  ;;  %v8843_v16 = vsel %vm8650_vm15, %v17590_v20, %v17582_v6  ;;  %v8219_v42 = vrot.slane %v8218_v2, 4 }
 0x9e5   :  { %v7509_v21 = vcombine.high %v7507_v25, %v7507_v25  ;;  %v17607_v60 = vunpack.c.l.b16 %v8505_v24  ;;  %v8702_v1 = vsel %vm8656_vm2, %v17579_v32, %v8701_v49  ;;  %v17613_v26 = vsel %vm8652_vm0, %v17579_v32, %v8843_v16 }
 0x9e6   :  { %18993 = vst [vmem:[#allocation9_spill] sm:$0xff] %v17613_v26  ;;  %v8225_v45 = vsel %vm7657_vm14, %v7508_v33, -inf  ;;  %v17618_v58 = vsel %vm8658_vm3, %v17598_v54, %v8702_v1  ;;  %v8220_v0 = vmax.f32 %v8218_v2, %v8219_v42  ;;  %v8232_v7 = vsel %vm7657_vm14, %v7507_v25, -inf }
 0x9e7   :  { %v8226_v30 = vrot.slane %v8225_v45, 4  ;;  %v8233_v35 = vrot.slane %v8232_v7, 4  ;;  %v8239_v18 = vsel %vm7657_vm14, %v7509_v21, -inf  ;;  %v7510_v62 = vcombine.high %v17563_v55, %v17563_v55 }
 0x9e8   :  { %v7517_v27 = vrot.slane %v17563_v55, %v16817_v43  ;;  %v8221_v8 = vrot.slane %v8220_v0, 2  ;;  %v8240_v12 = vrot.slane %v8239_v18, 4  ;;  %v7099_v63 = vadd.f32 %v17173_v19, %v16812_v29 }
 0x9e9   :  { %v8227_v37 = vmax.f32 %v8225_v45, %v8226_v30  ;;  %v8234_v46 = vmax.f32 %v8232_v7, %v8233_v35  ;;  %v7524_v3 = vrot.slane %v7510_v62, %v16817_v43 }
 0x9ea   :  { %v7525_v47 = vcombine.high %v7517_v27, %v7517_v27  ;;  %v8246_v25 = vsel %vm7657_vm14, %v7517_v27, -inf  ;;  %v8222_v33 = vmax.f32 %v8220_v0, %v8221_v8  ;;  %v8241_v23 = vmax.f32 %v8239_v18, %v8240_v12 }
 0x9eb   :  { %v8228_v2 = vrot.slane %v8227_v37, 2  ;;  %v8247_v24 = vrot.slane %v8246_v25, 4  ;;  %v8235_v49 = vrot.slane %v8234_v46, 2  ;;  %v7526_v16 = vcombine.high %v7524_v3, %v7524_v3 }
 0x9ec   :  { %v8253_v55 = vsel %vm7657_vm14, %v7525_v47, -inf  ;;  %v8260_v21 = vsel %vm7657_vm14, %v7524_v3, -inf  ;;  %v8223_v42 = vrot.slane %v8222_v33, 1  ;;  %v8242_v19 = vrot.slane %v8241_v23, 2 }
 0x9ed   :  { %v17632_v1 = vmax.f32 %v8227_v37, %v8228_v2  ;;  %v8248_v45 = vmax.f32 %v8246_v25, %v8247_v24  ;;  %v17634_v30 = vmax.f32 %v8234_v46, %v8235_v49  ;;  %v8254_v7 = vrot.slane %v8253_v55, 4 }
 0x9ee   :  { %v8261_v35 = vrot.slane %v8260_v21, 4  ;;  %v8267_v0 = vsel %vm7657_vm14, %v7526_v16, -inf  ;;  %v8224_v62 = vmax.f32 %v8222_v33, %v8223_v42  ;;  %v8243_v27 = vmax.f32 %v8241_v23, %v8242_v19 }
 0x9ef   :  { %18994 = vst [vmem:[#allocation19_spill] sm:$0xff] %v17634_v30  ;;  %v8249_v8 = vrot.slane %v8248_v45, 2  ;;  %v8255_v12 = vmax.f32 %v8253_v55, %v8254_v7  ;;  %v8268_v61 = vrot.slane %v8267_v0, 4  ;;  %v7127_v3 = vmax.f32 %v17559_v14, %v7099_v63 }
 0x9f0   :  { %v8262_v47 = vmax.f32 %v8260_v21, %v8261_v35  ;;  %v8244_v37 = vrot.slane %v8243_v27, 1  ;;  %v8410_v2 = vmax.f32 %v8224_v62, 0.0  ;;  %v7101_v46 = vadd.f32 %v17182_v34, %v16809_v53 }
 0x9f1   :  { %v8250_v26 = vmax.f32 %v8248_v45, %v8249_v8  ;;  %v8256_v25 = vrot.slane %v8255_v12, 2  ;;  %v8269_v49 = vmax.f32 %v8267_v0, %v8268_v61  ;;  %v7527_v16 = vcombine.high %v7127_v3, %v7127_v3 }
 0x9f2   :  { %v8263_v24 = vrot.slane %v8262_v47, 2  ;;  %v8245_v33 = vmax.f32 %v8243_v27, %v8244_v37  ;;  %v17641_v42 = vpack.c.bf16 %v8410_v2, %v8410_v2  ;;  %v7534_v55 = vrot.slane %v7127_v3, %v16817_v43 }
 0x9f3   :  { %v8251_v23 = vrot.slane %v8250_v26, 1  ;;  %v8257_v21 = vmax.f32 %v8255_v12, %v8256_v25  ;;  %v8270_v7 = vrot.slane %v8269_v49, 2  ;;  %v7541_v14 = vrot.slane %v7527_v16, %v16817_v43 }
 0x9f4   :  { %v8264_v19 = vmax.f32 %v8262_v47, %v8263_v24  ;;  %v8413_v63 = vmax.f32 %v8245_v33, 0.0  ;;  %v7542_v35 = vcombine.high %v7534_v55, %v7534_v55  ;;  %v8274_v53 = vsel %vm7657_vm14, %v7534_v55, -inf }
 0x9f5   :  { %v8252_v45 = vmax.f32 %v8250_v26, %v8251_v23  ;;  %v8258_v34 = vrot.slane %v8257_v21, 1  ;;  %v8271_v61 = vmax.f32 %v8269_v49, %v8270_v7  ;;  %v7543_v0 = vcombine.high %v7541_v14, %v7541_v14 }
 0x9f6   :  { %v8265_v62 = vrot.slane %v8264_v19, 1  ;;  %v17646_v27 = vpack.c.bf16 %v8413_v63, %v8413_v63  ;;  %v8275_v37 = vrot.slane %v8274_v53, 4  ;;  %v8281_v3 = vsel %vm7657_vm14, %v7542_v35, -inf }
 0x9f7   :  { %v8414_v8 = vmax.f32 %v8252_v45, 0.0  ;;  %v8259_v12 = vmax.f32 %v8257_v21, %v8258_v34  ;;  %v8272_v2 = vrot.slane %v8271_v61, 1  ;;  %v8282_v25 = vrot.slane %v8281_v3, 4 }
 0x9f8   :  { %v8266_v47 = vmax.f32 %v8264_v19, %v8265_v62  ;;  %v8276_v16 = vmax.f32 %v8274_v53, %v8275_v37  ;;  %v8288_v33 = vsel %vm7657_vm14, %v7541_v14, -inf  ;;  %v8295_v30 = vsel %vm7657_vm14, %v7543_v0, -inf }
 0x9f9   :  { %v8510_v26 = vpack.c.bf16 %v8414_v8, %v8414_v8  ;;  %v8273_v23 = vmax.f32 %v8271_v61, %v8272_v2  ;;  %v8415_v55 = vmax.f32 %v8259_v12, 0.0  ;;  %v8283_v7 = vmax.f32 %v8281_v3, %v8282_v25 }
 0x9fa   :  { %v8416_v49 = vmax.f32 %v8266_v47, 0.0  ;;  %v8277_v18 = vrot.slane %v8276_v16, 2  ;;  %v8289_v45 = vrot.slane %v8288_v33, 4  ;;  %v8296_v8 = vrot.slane %v8295_v30, 4 }
 0x9fb   :  { %v8642_v63 = vunpack.c.l.b16 %v8510_v26  ;;  %v8417_v35 = vmax.f32 %v8273_v23, 0.0  ;;  %v17652_v21 = vpack.c.bf16 %v8415_v55, %v8415_v55  ;;  %v8284_v34 = vrot.slane %v8283_v7, 2 }
 0x9fc   :  { %v8512_v19 = vpack.c.bf16 %v8416_v49, %v8416_v49  ;;  %v8278_v62 = vmax.f32 %v8276_v16, %v8277_v18  ;;  %v8290_v24 = vmax.f32 %v8288_v33, %v8289_v45  ;;  %v7103_v14 = vadd.f32 %v17190_v41, %v16812_v29 }
 0x9fd   :  { %v8513_v53 = vpack.c.bf16 %v8417_v35, %v8417_v35  ;;  %v8643_v61 = vunpack.c.l.b16 %v17652_v21  ;;  %v8285_v3 = vmax.f32 %v8283_v7, %v8284_v34  ;;  %v8297_v0 = vmax.f32 %v8295_v30, %v8296_v8 }
 0x9fe   :  { %v17657_v37 = vunpack.c.l.b16 %v8512_v19  ;;  %v8279_v12 = vrot.slane %v8278_v62, 1  ;;  %v8291_v47 = vrot.slane %v8290_v24, 2  ;;  %v7128_v2 = vmax.f32 %v7101_v46, %v7103_v14 }
 0x9ff   :  { %v17659_v25 = vunpack.c.l.b16 %v8513_v53  ;;  %v8706_v18 = vsel %vm8650_vm15, %v8643_v61, %v8642_v63  ;;  %v8286_v26 = vrot.slane %v8285_v3, 1  ;;  %v17665_v16 = vunpack.c.l.b16 %v17383_v38 }
 0xa00   :  { %v8707_v29 = vsel %vm8652_vm0, %v17657_v37, %v8706_v18  ;;  %v8280_v41 = vmax.f32 %v8278_v62, %v8279_v12  ;;  %v8292_v33 = vmax.f32 %v8290_v24, %v8291_v47  ;;  %v8298_v23 = vrot.slane %v8297_v0, 2 }
 0xa01   :  { %v8708_v30 = vsel %vm8654_vm1, %v17659_v25, %v8707_v29  ;;  %v8850_v46 = vsel %vm8650_vm15, %v17659_v25, %v17657_v37  ;;  %v8287_v55 = vmax.f32 %v8285_v3, %v8286_v26  ;;  %v7544_v49 = vcombine.high %v7128_v2, %v7128_v2 }
 0xa02   :  { %v8293_v7 = vrot.slane %v8292_v33, 1  ;;  %v8299_v63 = vmax.f32 %v8297_v0, %v8298_v23  ;;  %v8418_v45 = vmax.f32 %v8280_v41, 0.0  ;;  %v7551_v38 = vrot.slane %v7128_v2, %v16817_v43 }
 0xa03   :  { %v8419_v35 = vmax.f32 %v8287_v55, 0.0  ;;  %v7558_v19 = vrot.slane %v7544_v49, %v16817_v43  ;;  %v17677_v24 = vunpack.c.l.b16 %v17512_v9  ;;  %v18995_v34 = vunpack.c.l.b16 %v17282_v56  ;;  %v19042_v43 = vld [vmem:[#allocation55_spill] sm:$0xff] }
 0xa04   :  { %v8294_v8 = vmax.f32 %v8292_v33, %v8293_v7  ;;  %v8300_v14 = vrot.slane %v8299_v63, 1  ;;  %v8514_v53 = vpack.c.bf16 %v8418_v45, %v8418_v45  ;;  %v7559_v3 = vcombine.high %v7551_v38, %v7551_v38 }
 0xa05   :  { %v8757_v62 = vsel %vm8650_vm15, %v17288_v59, %v18995_v34  ;;  %v8515_v12 = vpack.c.bf16 %v8419_v35, %v8419_v35  ;;  %v7560_v47 = vcombine.high %v7558_v19, %v7558_v19  ;;  %v8302_v0 = vsel %vm7657_vm14, %v7551_v38, -inf }
 0xa06   :  { %v8316_v2 = vsel %vm7657_vm14, %v7558_v19, -inf  ;;  %v8301_v18 = vmax.f32 %v8299_v63, %v8300_v14  ;;  %v8420_v26 = vmax.f32 %v8294_v8, 0.0  ;;  %v17685_v29 = vunpack.c.l.b16 %v8514_v53 }
 0xa07   :  { %v8303_v9 = vrot.slane %v8302_v0, 4  ;;  %v17687_v41 = vunpack.c.l.b16 %v8515_v12  ;;  %v8309_v56 = vsel %vm7657_vm14, %v7559_v3, -inf  ;;  %v8317_v59 = vrot.slane %v8316_v2, 4 }
 0xa08   :  { %v8323_v33 = vsel %vm7657_vm14, %v7560_v47, -inf  ;;  %v8421_v23 = vmax.f32 %v8301_v18, 0.0  ;;  %v8516_v55 = vpack.c.bf16 %v8420_v26, %v8420_v26  ;;  %v8709_v49 = vsel %vm8656_vm2, %v17685_v29, %v8708_v30 }
 0xa09   :  { %v17695_v7 = vsel %vm8652_vm0, %v17685_v29, %v8850_v46  ;;  %v8710_v63 = vsel %vm8658_vm3, %v17687_v41, %v8709_v49  ;;  %v8304_v45 = vmax.f32 %v8302_v0, %v8303_v9  ;;  %v8310_v38 = vrot.slane %v8309_v56, 4 }
 0xa0a   :  { %v8318_v35 = vmax.f32 %v8316_v2, %v8317_v59  ;;  %v8517_v19 = vpack.c.bf16 %v8421_v23, %v8421_v23  ;;  %v17699_v34 = vunpack.c.l.b16 %v8516_v55  ;;  %v8324_v8 = vrot.slane %v8323_v33, 4 }
 0xa0b   :  { %v8758_v14 = vsel %vm8652_vm0, %v17297_v51, %v8757_v62  ;;  %v8305_v53 = vrot.slane %v8304_v45, 2  ;;  %v8311_v3 = vmax.f32 %v8309_v56, %v8310_v38  ;;  %v18996_v2 = vunpack.c.l.b16 %v17404_v44 }
 0xa0c   :  { %v8319_v30 = vrot.slane %v8318_v35, 2  ;;  %v8759_v46 = vsel %vm8654_vm1, %v17309_v15, %v8758_v14  ;;  %v17705_v12 = vunpack.c.l.b16 %v8517_v19  ;;  %v8325_v47 = vmax.f32 %v8323_v33, %v8324_v8 }
 0xa0d   :  { %v8760_v0 = vsel %vm8656_vm2, %v17320_v57, %v8759_v46  ;;  %v8764_v18 = vsel %vm8650_vm15, %v17412_v28, %v18996_v2  ;;  %v8306_v26 = vmax.f32 %v8304_v45, %v8305_v53  ;;  %v8312_v9 = vrot.slane %v8311_v3, 2 }
 0xa0e   :  { %v17713_v62 = vmax.f32 %v8318_v35, %v8319_v30  ;;  %v8761_v56 = vsel %vm8658_vm3, %v17316_v48, %v8760_v0  ;;  %v8326_v59 = vrot.slane %v8325_v47, 2  ;;  %v8765_v33 = vsel %vm8652_vm0, %v17417_v17, %v8764_v18 }
 0xa0f   :  { %v8762_v23 = vsel %vm8660_vm4, %v17322_v31, %v8761_v56  ;;  %v8690_v44 = vsel %vm8660_vm4, %v17316_v48, %v17338_v22  ;;  %v8307_v55 = vrot.slane %v8306_v26, 1  ;;  %v17724_v28 = vmax.f32 %v8311_v3, %v8312_v9 }
 0xa10   :  { %v8763_v49 = vsel %vm8662_vm5, %v17665_v16, %v8762_v23  ;;  %v8766_v45 = vsel %vm8654_vm1, %v17443_v5, %v8765_v33  ;;  %v8327_v38 = vmax.f32 %v8325_v47, %v8326_v59  ;;  %v8691_v19 = vsel %vm8662_vm5, %v17322_v31, %v8690_v44 }
 0xa11   :  { %v8767_v35 = vsel %vm8656_vm2, %v17448_v39, %v8766_v45  ;;  %v8697_v22 = vsel %vm8660_vm4, %v17457_v52, %v17461_v13  ;;  %v8308_v8 = vmax.f32 %v8306_v26, %v8307_v55  ;;  %v17745_v0 = vunpack.c.l.b16 %v17641_v42 }
 0xa12   :  { %v8768_v53 = vsel %vm8658_vm3, %v17457_v52, %v8767_v35  ;;  %v8698_v3 = vsel %vm8662_vm5, %v17473_v10, %v8697_v22  ;;  %v8328_v30 = vrot.slane %v8327_v38, 1  ;;  %v18997_v18 = vunpack.c.l.b16 %v17577_v11 }
 0xa13   :  { %v8769_v46 = vsel %vm8660_vm4, %v17473_v10, %v8768_v53  ;;  %v9103_v47 = vpack.c.b16 %v8698_v3, %v8691_v19  ;;  %v8422_v2 = vmax.f32 %v8308_v8, 0.0  ;;  %v8778_v9 = vsel %vm8650_vm15, %v17657_v37, %v8643_v61 }
 0xa14   :  { %v8770_v13 = vsel %vm8662_vm5, %v17677_v24, %v8769_v46  ;;  %v8771_v26 = vsel %vm8650_vm15, %v17582_v6, %v18997_v18  ;;  %v8329_v56 = vmax.f32 %v8327_v38, %v8328_v30  ;;  %v8779_v23 = vsel %vm8652_vm0, %v17659_v25, %v8778_v9  ;;  %v18998_v46 = vld [vmem:[#allocation22_spill] sm:$0xff]  ;;  %v19000_v18 = vld [vmem:[#allocation25_spill] sm:$0xff]  ;;  %v19001_v9 = vld [vmem:[#allocation11_spill] sm:$0xff] }
 0xa15   :  { %v9104_v59 = vpack.c.b16 %v8770_v13, %v8763_v49  ;;  %v8772_v42 = vsel %vm8652_vm0, %v17590_v20, %v8771_v26  ;;  %v8518_v33 = vpack.c.bf16 %v8422_v2, %v8422_v2  ;;  %v8780_v6 = vsel %vm8654_vm1, %v17685_v29, %v8779_v23  ;;  %v19037_v2 = vld [vmem:[#allocation48_spill] sm:$0xff] }
 0xa16   :  { %v8773_v11 = vsel %vm8654_vm1, %v17579_v32, %v8772_v42  ;;  %v8704_v21 = vsel %vm8660_vm4, %v17600_v36, %v17618_v58  ;;  %v8425_v61 = vmax.f32 %v8329_v56, 0.0  ;;  %v8781_v44 = vsel %vm8656_vm2, %v17687_v41, %v8780_v6  ;;  %v19003_v42 = vld [vmem:[#allocation12_spill] sm:$0xff]  ;;  %v19005_v6 = vld [vmem:[#allocation14_spill] sm:$0xff] }
 0xa17   :  { %9585 = vmatprep.mubr.bf16.mxu0 %v9104_v59  ;;  %v8774_v37 = vsel %vm8656_vm2, %v17598_v54, %v8773_v11  ;;  %v8705_v55 = vsel %vm8662_vm5, %v17607_v60, %v8704_v21  ;;  %v17774_v49 = vunpack.c.l.b16 %v8518_v33  ;;  %v8782_v58 = vsel %vm8658_vm3, %v17699_v34, %v8781_v44  ;;  %v19004_v11 = vld [vmem:[#allocation6_spill] sm:$0xff] }
 0xa18   :  { %9586 = vmatmul.mubr.bf16.gmra.mrb[0].mxu0 %v9103_v47  ;;  %v8775_v45 = vsel %vm8658_vm3, %v17600_v36, %v8774_v37  ;;  %v8711_v38 = vsel %vm8660_vm4, %v17699_v34, %v8710_v63  ;;  %v17782_v35 = vpack.c.bf16 %v8425_v61, %v8425_v61  ;;  %v8783_v22 = vsel %vm8660_vm4, %v17705_v12, %v8782_v58  ;;  %v19006_v61 = vld [vmem:[#allocation5_spill] sm:$0xff]  ;;  %v19007_v37 = vld [vmem:[#allocation7_spill] sm:$0xff]  ;;  %v19008_v58 = vld [vmem:[#allocation20_spill] sm:$0xff] }
 0xa19   :  { %v8776_v19 = vsel %vm8660_vm4, %v17607_v60, %v8775_v45  ;;  %v8712_v8 = vsel %vm8662_vm5, %v17705_v12, %v8711_v38  ;;  %v8784_v3 = vsel %vm8662_vm5, %v17774_v49, %v8783_v22  ;;  %v18999_v63 = vrot.slane %v18998_v46, 1 }
 0xa1a   :  { %v8777_v53 = vsel %vm8662_vm5, %v17745_v0, %v8776_v19  ;;  %v9108_v30 = vpack.c.b16 %v8712_v8, %v8705_v55  ;;  %v7733_v26 = vrot.slane %v19000_v18, 1  ;;  %v19002_v56 = vrot.slane %v19001_v9, 1  ;;  %v19009_v19 = vld [vmem:[#allocation8_spill] sm:$0xff] }
 0xa1b   :  { %v7727_v47 = vmax.f32 %v18998_v46, %v18999_v63  ;;  %v9109_v13 = vpack.c.b16 %v8784_v3, %v8777_v53  ;;  %v7817_v23 = vrot.slane %v19003_v42, 1  ;;  %v8873_v21 = vsel %vm8650_vm15, %v19005_v6, %v19004_v11  ;;  %v19010_v3 = vld [vmem:[#allocation23_spill] sm:$0xff]  ;;  %v19011_v63 = vld [vmem:[#allocation28_spill] sm:$0xff] }
 0xa1c   :  { %v7811_v59 = vmax.f32 %v19001_v9, %v19002_v56  ;;  %v8880_v44 = vsel %vm8650_vm15, %v19007_v37, %v19006_v61  ;;  %v7734_v55 = vmax.f32 %v19000_v18, %v7733_v26  ;;  %v8874_v38 = vsel %vm8652_vm0, %v19008_v58, %v8873_v21  ;;  %v19012_v56 = vld [vmem:[#allocation21_spill] sm:$0xff]  ;;  %v19013_v26 = vld [vmem:[#allocation10_spill] sm:$0xff] }
 0xa1d   :  { %v8339_v33 = vmax.f32 %v7727_v47, 0.0  ;;  %9595 = vmatprep.mubr.bf16.mxu0 %v9109_v13  ;;  %v8881_v22 = vsel %vm8652_vm0, %v19009_v19, %v8880_v44  ;;  %v7818_v8 = vmax.f32 %v19003_v42, %v7817_v23  ;;  %v8875_v46 = vsel %vm8654_vm1, %v19010_v3, %v8874_v38  ;;  %v19014_v61 = vld [vmem:[#allocation38_spill] sm:$0xff]  ;;  %v19015_v23 = vld [vmem:[#allocation39_spill] sm:$0xff] }
 0xa1e   :  { %v8351_v45 = vmax.f32 %v7811_v59, 0.0  ;;  %v8882_v47 = vsel %vm8654_vm1, %v19011_v63, %v8881_v22  ;;  %v8340_v9 = vmax.f32 %v7734_v55, 0.0  ;;  %v8876_v18 = vsel %vm8656_vm2, %v19012_v56, %v8875_v46 }
 0xa1f   :  { %v8435_v53 = vpack.c.bf16 %v8339_v33, %v8339_v33  ;;  %v8883_v59 = vsel %vm8656_vm2, %v19013_v26, %v8882_v47  ;;  %v8352_v11 = vmax.f32 %v7818_v8, 0.0  ;;  %v8877_v42 = vsel %vm8658_vm3, %v19014_v61, %v8876_v18 }
 0xa20   :  { %v8447_v13 = vpack.c.bf16 %v8351_v45, %v8351_v45  ;;  %9596 = vmatmul.mubr.bf16.gmra.mrb[4].mxu0 %v9108_v30  ;;  %v8884_v33 = vsel %vm8658_vm3, %v19015_v23, %v8883_v59  ;;  %v8436_v44 = vpack.c.bf16 %v8340_v9, %v8340_v9  ;;  %v8945_v55 = vsel %vm8650_vm15, %v19008_v58, %v19005_v6 }
 0xa21   :  { %v8793_v21 = vunpack.c.l.b16 %v8435_v53  ;;  %v8952_v45 = vsel %vm8650_vm15, %v19009_v19, %v19007_v37  ;;  %v8448_v22 = vpack.c.bf16 %v8352_v11, %v8352_v11  ;;  %v8946_v8 = vsel %vm8652_vm0, %v19010_v3, %v8945_v55 }
 0xa22   :  { %v8794_v38 = vunpack.c.l.b16 %v8447_v13  ;;  %v8953_v53 = vsel %vm8652_vm0, %v19011_v63, %v8952_v45  ;;  %v8865_v46 = vunpack.c.l.b16 %v8436_v44  ;;  %v8947_v9 = vsel %vm8654_vm1, %v19012_v56, %v8946_v8 }
 0xa23   :  { %v8878_v30 = vsel %vm8660_vm4, %v8793_v21, %v8877_v42  ;;  %v8954_v13 = vsel %vm8654_vm1, %v19013_v26, %v8953_v53  ;;  %v8866_v18 = vunpack.c.l.b16 %v8448_v22  ;;  %v8948_v59 = vsel %vm8656_vm2, %v19014_v61, %v8947_v9  ;;  %v19016_v42 = vld [vmem:[#allocation16_spill] sm:$0xff] }
 0xa24   :  { %v8885_v47 = vsel %vm8660_vm4, %v8794_v38, %v8884_v33  ;;  %v8955_v11 = vsel %vm8656_vm2, %v19015_v23, %v8954_v13  ;;  %v8802_v55 = vsel %vm8652_vm0, %v19005_v6, %v19016_v42  ;;  %v8879_v44 = vsel %vm8662_vm5, %v8865_v46, %v8878_v30 }
 0xa25   :  { %v8949_v33 = vsel %vm8658_vm3, %v8793_v21, %v8948_v59  ;;  %v8956_v45 = vsel %vm8658_vm3, %v8794_v38, %v8955_v11  ;;  %v8803_v8 = vsel %vm8654_vm1, %v19008_v58, %v8802_v55  ;;  %v8886_v22 = vsel %vm8662_vm5, %v8866_v18, %v8885_v47  ;;  %v19017_v59 = vld [vmem:[#allocation27_spill] sm:$0xff]  ;;  %v19018_v58 = vld [vmem:[#allocation32_spill] sm:$0xff]  ;;  %v19020_v55 = vld [vmem:[#allocation33_spill] sm:$0xff] }
 0xa26   :  { %v17857_v53 = vsel %vm8660_vm4, %v8865_v46, %v8949_v33  ;;  %v17860_v9 = vsel %vm8660_vm4, %v8866_v18, %v8956_v45  ;;  %v8804_v6 = vsel %vm8656_vm2, %v19010_v3, %v8803_v8  ;;  %v9096_v13 = vpack.c.b16 %v8886_v22, %v8879_v44  ;;  %v19021_v44 = vld [vmem:[#allocation45_spill] sm:$0xff]  ;;  %v19023_v8 = vld [vmem:[#allocation46_spill] sm:$0xff] }
 0xa27   :  { %v8805_v30 = vsel %vm8658_vm3, %v19012_v56, %v8804_v6  ;;  %v8809_v11 = vsel %vm8652_vm0, %v19007_v37, %v19017_v59  ;;  %v19019_v42 = vrot.slane %v19018_v58, 1  ;;  %v7901_v3 = vrot.slane %v19020_v55, 1 }
 0xa28   :  { %v8806_v46 = vsel %vm8660_vm4, %v19014_v61, %v8805_v30  ;;  %v8810_v18 = vsel %vm8654_vm1, %v19009_v19, %v8809_v11  ;;  %v19022_v33 = vrot.slane %v19021_v44, 1  ;;  %9638 = vmatprep.mubr.bf16.mxu0 %v9096_v13  ;;  %v7985_v22 = vrot.slane %v19023_v8, 1 }
 0xa29   :  { %v7895_v47 = vmax.f32 %v19018_v58, %v19019_v42  ;;  %v8807_v45 = vsel %vm8662_vm5, %v8793_v21, %v8806_v46  ;;  %v8811_v37 = vsel %vm8656_vm2, %v19011_v63, %v8810_v18  ;;  %v7902_v19 = vmax.f32 %v19020_v55, %v7901_v3  ;;  %v19024_v46 = vld [vmem:[#allocation15_spill] sm:$0xff] }
 0xa2a   :  { %v7979_v56 = vmax.f32 %v19021_v44, %v19022_v33  ;;  %v8812_v61 = vsel %vm8658_vm3, %v19013_v26, %v8811_v37  ;;  %v8887_v59 = vsel %vm8650_vm15, %v18981_v4, %v17028_v50  ;;  %v7986_v21 = vmax.f32 %v19023_v8, %v7985_v22  ;;  %v12336_v26 = vld [vmem:[%s18615_s7 + $0x200] ss:$8 sps:$4 sm:$0xff]   ;;  %v19027_v8 = vld [vmem:[#allocation52_spill] sm:$0xff] }
 0xa2b   :  { %v8363_v6 = vmax.f32 %v7895_v47, 0.0  ;;  %v8813_v13 = vsel %vm8660_vm4, %v19015_v23, %v8812_v61  ;;  %v8888_v63 = vsel %vm8652_vm0, %v18983_v40, %v8887_v59  ;;  %v8364_v42 = vmax.f32 %v7902_v19, 0.0  ;;  %v19025_v44 = vld [vmem:[#allocation30_spill] sm:$0xff]  ;;  %v19029_v61 = vld [vmem:[#allocation40_spill] sm:$0xff]  ;;  %v19031_v59 = vld [vmem:[#allocation41_spill] sm:$0xff] }
 0xa2c   :  { %v8375_v30 = vmax.f32 %v7979_v56, 0.0  ;;  %v8814_v58 = vsel %vm8662_vm5, %v8794_v38, %v8813_v13  ;;  %v8889_v18 = vsel %vm8654_vm1, %v19024_v46, %v8888_v63  ;;  %v8376_v3 = vmax.f32 %v7986_v21, 0.0  ;;  %v12341_v38 = vld [vmem:[%s18615_s7 + $0x214] ss:$8 sps:$4 sm:$0xff]   ;;  %v19032_v21 = vld [vmem:[#allocation18_spill] sm:$0xff] }
 0xa2d   :  { %v8459_v11 = vpack.c.bf16 %v8363_v6, %v8363_v6  ;;  %v9095_v55 = vpack.c.b16 %v8814_v58, %v8807_v45  ;;  %v8890_v33 = vsel %vm8656_vm2, %v19025_v44, %v8889_v18  ;;  %v17908_v56 = vpack.c.bf16 %v8364_v42, %v8364_v42  ;;  %v19028_v6 = vld [vmem:[#allocation37_spill] sm:$0xff]  ;;  %v19033_v58 = vld [vmem:[#allocation42_spill] sm:$0xff] }
 0xa2e   :  { %v8471_v47 = vpack.c.bf16 %v8375_v30, %v8375_v30  ;;  %v8891_v22 = vsel %vm8658_vm3, %v19027_v8, %v8890_v33  ;;  %v8894_v45 = vsel %vm8650_vm15, %v19029_v61, %v19028_v6  ;;  %v17917_v19 = vpack.c.bf16 %v8376_v3, %v8376_v3 }
 0xa2f   :  { %v17901_v23 = vunpack.c.l.b16 %v8459_v11  ;;  %19026 = vst [vmem:[#allocation29_spill] sm:$0xff] %v17908_v56  ;;  %9639 = vmatmul.mubr.bf16.vlgmr.msra.gmra.mrb[248].mxu0 %v9095_v55  ;;  %v8895_v13 = vsel %vm8652_vm0, %v19031_v59, %v8894_v45  ;;  %v8815_v11 = vsel %vm8650_vm15, %v17028_v50, %v19032_v21  ;;  %v18770_v63 = vunpack.c.l.b16 %v17908_v56  ;;  %v19034_v55 = vld [vmem:[#allocation35_spill] sm:$0xff]  ;;  %v19036_v21 = vld [vmem:[#allocation53_spill] sm:$0xff] }
 0xa30   :  { %v17910_v37 = vunpack.c.l.b16 %v8471_v47  ;;  %19030 = vst [vmem:[#allocation2_spill] sm:$0xff] %v17917_v19  ;;  %v8896_v42 = vsel %vm8654_vm1, %v19033_v58, %v8895_v13  ;;  %9680 = vmatpush1.bf16.msra.mxu0 %v12336_v26  ;;  %v12339_v47 = vld [vmem:[%s18615_s7 + $0x210] ss:$8 sps:$4 sm:$0xff]   ;;  %v8816_v18 = vsel %vm8652_vm0, %v18981_v4, %v8815_v11  ;;  %v8822_v3 = vsel %vm8650_vm15, %v19028_v6, %v19034_v55  ;;  %v19035_v50 = vld [vmem:[#allocation43_spill] sm:$0xff] }
 0xa31   :  { %v8892_v30 = vsel %vm8660_vm4, %v17901_v23, %v8891_v22  ;;  %v18771_v33 = vunpack.c.l.b16 %v17917_v19  ;;  %v8897_v22 = vsel %vm8656_vm2, %v19035_v50, %v8896_v42  ;;  %9681 = vmatprep.subr.bf16.mxu0 %v12341_v38  ;;  %v8817_v26 = vsel %vm8654_vm1, %v18983_v40, %v8816_v18  ;;  %v12344_v13 = vld [vmem:[%s18615_s7 + $0x224] ss:$8 sps:$4 sm:$0xff]  }
 0xa32   :  { %v8823_v45 = vsel %vm8652_vm0, %v19029_v61, %v8822_v3  ;;  %v8893_v6 = vsel %vm8662_vm5, %v18770_v63, %v8892_v30  ;;  %v8898_v11 = vsel %vm8658_vm3, %v19036_v21, %v8897_v22  ;;  %v8818_v38 = vsel %vm8656_vm2, %v19024_v46, %v8817_v26 }
 0xa33   :  { %v8824_v42 = vsel %vm8654_vm1, %v19031_v59, %v8823_v45  ;;  %v8899_v18 = vsel %vm8660_vm4, %v17910_v37, %v8898_v11  ;;  %v8819_v55 = vsel %vm8658_vm3, %v19025_v44, %v8818_v38  ;;  %v19038_v30 = vrot.slane %v19037_v2, 1  ;;  %v12342_v11 = vld [vmem:[%s18615_s7 + $0x220] ss:$8 sps:$4 sm:$0xff]   ;;  %v19039_v38 = vld [vmem:[#allocation49_spill] sm:$0xff] }
 0xa34   :  { %v8825_v3 = vsel %vm8656_vm2, %v19033_v58, %v8824_v42  ;;  %v8900_v22 = vsel %vm8662_vm5, %v18771_v33, %v8899_v18  ;;  %9682 = vmatpush1.bf16.msra.mxu0 %v12339_v47  ;;  %v8820_v26 = vsel %vm8660_vm4, %v19027_v8, %v8819_v55  ;;  %v8069_v42 = vrot.slane %v19039_v38, 1  ;;  %v19040_v47 = vld [vmem:[#allocation54_spill] sm:$0xff] }
 0xa35   :  { %v8063_v63 = vmax.f32 %v19037_v2, %v19038_v30  ;;  %v8826_v45 = vsel %vm8658_vm3, %v19035_v50, %v8825_v3  ;;  %v9101_v14 = vpack.c.b16 %v8900_v22, %v8893_v6  ;;  %v8821_v2 = vsel %vm8662_vm5, %v17901_v23, %v8820_v26  ;;  %9683 = vmatprep.subr.bf16.mxu0 %v12344_v13  ;;  %v12347_v6 = vld [vmem:[%s18615_s7 + $0x234] ss:$8 sps:$4 sm:$0xff]   ;;  %v19043_v13 = vld [vmem:[#allocation47_spill] sm:$0xff] }
 0xa36   :  { %v8827_v18 = vsel %vm8660_vm4, %v19036_v21, %v8826_v45  ;;  %v19041_v30 = vrot.slane %v19040_v47, 1  ;;  %v8070_v33 = vmax.f32 %v19039_v38, %v8069_v42  ;;  %v8153_v19 = vrot.slane %v19042_v43, 1 }
 0xa37   :  { %v8828_v3 = vsel %vm8662_vm5, %v17910_v37, %v8827_v18  ;;  %v8387_v56 = vmax.f32 %v8063_v63, 0.0  ;;  %9648 = vmatprep.mubr.bf16.mxu0 %v9101_v14  ;;  %v8831_v45 = vsel %vm8654_vm1, %v17320_v57, %v19043_v13  ;;  %v12345_v14 = vld [vmem:[%s18615_s7 + $0x230] ss:$8 sps:$4 sm:$0xff]  }
 0xa38   :  { %v8147_v55 = vmax.f32 %v19040_v47, %v19041_v30  ;;  %v9100_v22 = vpack.c.b16 %v8828_v3, %v8821_v2  ;;  %v19044_v47 = vld [vmem:[#allocation51_spill] sm:$0xff]  ;;  %v8154_v38 = vmax.f32 %v19042_v43, %v8153_v19  ;;  %v8388_v42 = vmax.f32 %v8070_v33, 0.0  ;;  %9684 = vmatpush1.bf16.msra.mxu0 %v12342_v11 }
 0xa39   :  { %v8838_v18 = vsel %vm8654_vm1, %v17448_v39, %v19044_v47  ;;  %v8483_v30 = vpack.c.bf16 %v8387_v56, %v8387_v56  ;;  %v8832_v63 = vsel %vm8656_vm2, %v17316_v48, %v8831_v45  ;;  %v8901_v43 = vsel %vm8650_vm15, %v17309_v15, %v17297_v51  ;;  %v12350_v56 = vld [vmem:[%s18615_s7 + $0x244] ss:$8 sps:$4 sm:$0xff]   ;;  %9685 = vmatprep.subr.bf16.mxu0 %v12347_v6  ;;  %v12348_v6 = vld [vmem:[%s18615_s7 + $0x240] ss:$8 sps:$4 sm:$0xff]  }
 0xa3a   :  { %v8399_v26 = vmax.f32 %v8147_v55, 0.0  ;;  %9649 = vmatmul.mubr.bf16.gmra.mrb[252].mxu0 %v9100_v22  ;;  %v8833_v55 = vsel %vm8658_vm3, %v17322_v31, %v8832_v63  ;;  %v8839_v3 = vsel %vm8656_vm2, %v17457_v52, %v8838_v18  ;;  %v8400_v19 = vmax.f32 %v8154_v38, 0.0 }
 0xa3b   :  { %v8484_v33 = vpack.c.bf16 %v8388_v42, %v8388_v42  ;;  %v8797_v11 = vunpack.c.l.b16 %v8483_v30  ;;  %v8834_v22 = vsel %vm8660_vm4, %v17665_v16, %v8833_v55  ;;  %v8840_v13 = vsel %vm8658_vm3, %v17473_v10, %v8839_v3 }
 0xa3c   :  { %v8495_v2 = vpack.c.bf16 %v8399_v26, %v8399_v26  ;;  %v8902_v45 = vsel %vm8652_vm0, %v17320_v57, %v8901_v43  ;;  %v8908_v51 = vsel %vm8650_vm15, %v17443_v5, %v17417_v17  ;;  %v8496_v47 = vpack.c.bf16 %v8400_v19, %v8400_v19  ;;  %9686 = vmatpush1.bf16.msra.mxu0 %v12345_v14  ;;  %v12353_v14 = vld [vmem:[%s18615_s7 + $0x254] ss:$8 sps:$4 sm:$0xff]  }
 0xa3d   :  { %v8835_v18 = vsel %vm8662_vm5, %v8797_v11, %v8834_v22  ;;  %v8841_v38 = vsel %vm8660_vm4, %v17677_v24, %v8840_v13  ;;  %v8869_v42 = vunpack.c.l.b16 %v8484_v33  ;;  %v8903_v63 = vsel %vm8654_vm1, %v17316_v48, %v8902_v45  ;;  %9687 = vmatprep.subr.bf16.mxu0 %v12350_v56 }
 0xa3e   :  { %v8798_v26 = vunpack.c.l.b16 %v8495_v2  ;;  %v8909_v17 = vsel %vm8652_vm0, %v17448_v39, %v8908_v51  ;;  %v8973_v2 = vsel %vm8650_vm15, %v17320_v57, %v17309_v15  ;;  %v8870_v55 = vunpack.c.l.b16 %v8496_v47 }
 0xa3f   :  { %v8904_v3 = vsel %vm8656_vm2, %v17322_v31, %v8903_v63  ;;  %v8910_v43 = vsel %vm8654_vm1, %v17457_v52, %v8909_v17  ;;  %v8974_v19 = vsel %vm8652_vm0, %v17316_v48, %v8973_v2  ;;  %v8980_v56 = vsel %vm8650_vm15, %v17448_v39, %v17443_v5  ;;  %v19045_v17 = vld [vmem:[#allocation50_spill] sm:$0xff] }
 0xa40   :  { %v8842_v30 = vsel %vm8662_vm5, %v8798_v26, %v8841_v38  ;;  %v8905_v33 = vsel %vm8658_vm3, %v17665_v16, %v8904_v3  ;;  %v8911_v15 = vsel %vm8656_vm2, %v17473_v10, %v8910_v43  ;;  %v8975_v57 = vsel %vm8654_vm1, %v17322_v31, %v8974_v19  ;;  %9688 = vmatpush1.bf16.msra.mxu0 %v12348_v6  ;;  %v12351_v31 = vld [vmem:[%s18615_s7 + $0x250] ss:$8 sps:$4 sm:$0xff]  }
 0xa41   :  { %v8906_v22 = vsel %vm8660_vm4, %v8797_v11, %v8905_v33  ;;  %v8912_v13 = vsel %vm8658_vm3, %v17677_v24, %v8911_v15  ;;  %v8976_v48 = vsel %vm8656_vm2, %v17665_v16, %v8975_v57  ;;  %v8981_v45 = vsel %vm8652_vm0, %v17457_v52, %v8980_v56  ;;  %9689 = vmatprep.subr.bf16.mxu0 %v12353_v14  ;;  %v12356_v16 = vld [vmem:[%s18615_s7 + $0x264] ss:$8 sps:$4 sm:$0xff]  }
 0xa42   :  { %v8907_v51 = vsel %vm8662_vm5, %v8869_v42, %v8906_v22  ;;  %v8913_v5 = vsel %vm8660_vm4, %v8798_v26, %v8912_v13  ;;  %v8977_v39 = vsel %vm8658_vm3, %v8797_v11, %v8976_v48  ;;  %v8982_v47 = vsel %vm8654_vm1, %v17473_v10, %v8981_v45  ;;  %v19048_v33 = vld [vmem:[#allocation19_spill] sm:$0xff]  ;;  %v12359_v13 = vld [vmem:[%s18615_s7 + $0x274] ss:$8 sps:$4 sm:$0xff]  }
 0xa43   :  { %v8914_v52 = vsel %vm8662_vm5, %v8870_v55, %v8913_v5  ;;  %v8978_v38 = vsel %vm8660_vm4, %v8869_v42, %v8977_v39  ;;  %v8983_v6 = vsel %vm8656_vm2, %v17677_v24, %v8982_v47  ;;  %v9105_v63 = vpack.c.b16 %v8842_v30, %v8835_v18  ;;  %v19050_v30 = vld [vmem:[#allocation24_spill] sm:$0xff] }
 0xa44   :  { %v19046_v2 = vunpack.c.l.b16 %v19045_v17  ;;  %v8984_v10 = vsel %vm8658_vm3, %v8798_v26, %v8983_v6  ;;  %v9106_v14 = vpack.c.b16 %v8914_v52, %v8907_v51  ;;  %v19047_v3 = vrot.slane %v17632_v1, 1  ;;  %9690 = vmatpush1.bf16.msra.mxu0 %v12351_v31  ;;  %v12354_v26 = vld [vmem:[%s18615_s7 + $0x260] ss:$8 sps:$4 sm:$0xff]  }
 0xa45   :  { %v8985_v19 = vsel %vm8660_vm4, %v8870_v55, %v8984_v10  ;;  %v8237_v42 = vrot.slane %v19048_v33, 1  ;;  %v19049_v15 = vrot.slane %v17724_v28, 1  ;;  %v8321_v18 = vrot.slane %v17713_v62, 1  ;;  %v19052_v55 = vld [vmem:[#allocation9_spill] sm:$0xff]  ;;  %9691 = vmatprep.subr.bf16.mxu0 %v12356_v16 }
 0xa46   :  { %v18078_v11 = vsel %vm8662_vm5, %v19046_v2, %v8978_v38  ;;  %v8231_v43 = vmax.f32 %v17632_v1, %v19047_v3  ;;  %v19051_v57 = vunpack.c.l.b16 %v19050_v30  ;;  %9658 = vmatprep.mubr.bf16.mxu0 %v9106_v14  ;;  %v8845_v22 = vsel %vm8654_vm1, %v17598_v54, %v19052_v55 }
 0xa47   :  { %v8315_v24 = vmax.f32 %v17724_v28, %v19049_v15  ;;  %v8852_v28 = vsel %vm8654_vm1, %v17687_v41, %v17695_v7  ;;  %9659 = vmatmul.mubr.bf16.gmra.mrb[0].mxu0 %v9105_v63  ;;  %v8238_v45 = vmax.f32 %v19048_v33, %v8237_v42  ;;  %v8322_v31 = vmax.f32 %v17713_v62, %v8321_v18  ;;  %v12357_v62 = vld [vmem:[%s18615_s7 + $0x270] ss:$8 sps:$4 sm:$0xff]  }
 0xa48   :  { %v18096_v56 = vsel %vm8662_vm5, %v19051_v57, %v8985_v19  ;;  %v8411_v1 = vmax.f32 %v8231_v43, 0.0  ;;  %v8846_v39 = vsel %vm8656_vm2, %v17600_v36, %v8845_v22  ;;  %v8853_v7 = vsel %vm8656_vm2, %v17699_v34, %v8852_v28  ;;  %9692 = vmatpush1.bf16.msra.mxu0 %v12354_v26 }
 0xa49   :  { %v9107_v48 = vpack.c.b16 %v18096_v56, %v18078_v11  ;;  %v8423_v51 = vmax.f32 %v8315_v24, 0.0  ;;  %v8915_v47 = vsel %vm8650_vm15, %v17579_v32, %v17590_v20  ;;  %v8412_v16 = vmax.f32 %v8238_v45, 0.0  ;;  %9693 = vmatprep.subr.bf16.mxu0 %v12359_v13  ;;  %v12361_v11 = vld [vmem:[%s18617_s9 + $0x80] sm:$0xff]   ;;  %v12362_v56 = vld [vmem:[%s18617_s9 + $0x48] sm:$0xff]  }
 0xa4a   :  { %v8507_v5 = vpack.c.bf16 %v8411_v1, %v8411_v1  ;;  %v8424_v52 = vmax.f32 %v8322_v31, 0.0  ;;  %v8847_v6 = vsel %vm8658_vm3, %v17607_v60, %v8846_v39  ;;  %v8854_v2 = vsel %vm8658_vm3, %v17705_v12, %v8853_v7 }
 0xa4b   :  { %v8519_v38 = vpack.c.bf16 %v8423_v51, %v8423_v51  ;;  %v8848_v17 = vsel %vm8660_vm4, %v17745_v0, %v8847_v6  ;;  %v8916_v20 = vsel %vm8652_vm0, %v17598_v54, %v8915_v47  ;;  %v8508_v10 = vpack.c.bf16 %v8412_v16, %v8412_v16 }
 0xa4c   :  { %v8799_v63 = vunpack.c.l.b16 %v8507_v5  ;;  %v8520_v14 = vpack.c.bf16 %v8424_v52, %v8424_v52  ;;  %v8855_v43 = vsel %vm8660_vm4, %v17774_v49, %v8854_v2  ;;  %v8917_v33 = vsel %vm8654_vm1, %v17600_v36, %v8916_v20  ;;  %9694 = vmatpush1.bf16.msra.mxu0 %v12357_v62 }
 0xa4d   :  { %v8800_v3 = vunpack.c.l.b16 %v8519_v38  ;;  %v8922_v42 = vsel %vm8650_vm15, %v17685_v29, %v17659_v25  ;;  %v8987_v15 = vsel %vm8650_vm15, %v17598_v54, %v17579_v32  ;;  %v8871_v18 = vunpack.c.l.b16 %v8508_v10  ;;  %v19056_v38 = vld [vmem:[#allocation13_spill] sm:$0xff] }
 0xa4e   :  { %v8849_v19 = vsel %vm8662_vm5, %v8799_v63, %v8848_v17  ;;  %v8872_v26 = vunpack.c.l.b16 %v8520_v14  ;;  %v8918_v30 = vsel %vm8656_vm2, %v17607_v60, %v8917_v33  ;;  %v8923_v1 = vsel %vm8652_vm0, %v17687_v41, %v8922_v42 }
 0xa4f   :  { %v8856_v24 = vsel %vm8662_vm5, %v8800_v3, %v8855_v43  ;;  %v8919_v57 = vsel %vm8658_vm3, %v17745_v0, %v8918_v30  ;;  %v8988_v25 = vsel %vm8652_vm0, %v17600_v36, %v8987_v15  ;;  %v8994_v32 = vsel %vm8650_vm15, %v17687_v41, %v17685_v29 }
 0xa50   :  { %v8920_v54 = vsel %vm8660_vm4, %v8799_v63, %v8919_v57  ;;  %v8924_v55 = vsel %vm8654_vm1, %v17699_v34, %v8923_v1  ;;  %v8989_v22 = vsel %vm8654_vm1, %v17607_v60, %v8988_v25  ;;  %v8995_v28 = vsel %vm8652_vm0, %v17699_v34, %v8994_v32  ;;  %v19064_v57 = vld [vmem:[#allocation29_spill] sm:$0xff]  ;;  %v19066_v25 = vld [vmem:[#allocation2_spill] sm:$0xff] }
 0xa51   :  { %v8921_v13 = vsel %vm8662_vm5, %v8871_v18, %v8920_v54  ;;  %v8925_v36 = vsel %vm8656_vm2, %v17705_v12, %v8924_v55  ;;  %v8990_v45 = vsel %vm8656_vm2, %v17745_v0, %v8989_v22  ;;  %v8996_v29 = vsel %vm8654_vm1, %v17705_v12, %v8995_v28  ;;  %v19053_v0 = vld [vmem:[#allocation26_spill] sm:$0xff] }
 0xa52   :  { %v8926_v41 = vsel %vm8658_vm3, %v17774_v49, %v8925_v36  ;;  %v8991_v31 = vsel %vm8658_vm3, %v8799_v63, %v8990_v45  ;;  %v8997_v60 = vsel %vm8656_vm2, %v17774_v49, %v8996_v29  ;;  %v9110_v34 = vpack.c.b16 %v8856_v24, %v8849_v19  ;;  %v12360_v45 = vld [vmem:[%s18617_s9 + $0x40] sm:$0xff]   ;;  %v12364_v29 = vld [vmem:[%s18617_s9 + $0x50] sm:$0xff]  }
 0xa53   :  { %v8927_v51 = vsel %vm8660_vm4, %v8800_v3, %v8926_v41  ;;  %v8992_v5 = vsel %vm8660_vm4, %v8871_v18, %v8991_v31  ;;  %v8998_v39 = vsel %vm8658_vm3, %v8800_v3, %v8997_v60  ;;  %v19054_v7 = vunpack.c.l.b16 %v19053_v0  ;;  %v19061_v3 = vld [vmem:[#allocation44_spill] sm:$0xff]  ;;  %v12366_v31 = vld [vmem:[%s18617_s9 + $0x58] sm:$0xff]   ;;  %v9081_v60 = vld [vmem:[%s18618_s8] sm:$0x3] }
 0xa54   :  { %v8928_v47 = vsel %vm8662_vm5, %v8872_v26, %v8927_v51  ;;  %v19055_v16 = vunpack.c.l.b16 %v17646_v27  ;;  %v8999_v49 = vsel %vm8660_vm4, %v8872_v26, %v8998_v39  ;;  %v19057_v6 = vunpack.c.l.b16 %v19056_v38  ;;  %v12365_v41 = vld [vmem:[%s18617_s9 + $0x90] sm:$0xff]   ;;  %v12368_v51 = vld [vmem:[%s18617_s9 + $0x60] sm:$0xff]  }
 0xa55   :  { %v8951_v12 = vsel %vm8662_vm5, %v19054_v7, %v17857_v53  ;;  %v19058_v63 = vunpack.c.l.b16 %v17782_v35  ;;  %v9111_v2 = vpack.c.b16 %v8928_v47, %v8921_v13  ;;  %v19059_v53 = vld [vmem:[#allocation31_spill] sm:$0xff]  ;;  %v19062_v43 = vrot.slane %v19061_v3, 2  ;;  %v19069_v0 = vld [vmem:[#allocation4_spill] sm:$0xff] }
 0xa56   :  { %v8993_v52 = vsel %vm8662_vm5, %v19055_v16, %v8992_v5  ;;  %v8958_v62 = vsel %vm8662_vm5, %v19057_v6, %v17860_v9  ;;  %v19060_v10 = vrot.slane %v19059_v53, 2  ;;  %v8959_v33 = vsel %vm8650_vm15, %v18983_v40, %v18981_v4  ;;  %v19068_v5 = vld [vmem:[#allocation3_spill] sm:$0xff] }
 0xa57   :  { %v9000_v17 = vsel %vm8662_vm5, %v19058_v63, %v8999_v49  ;;  %v9097_v20 = vpack.c.b16 %v8958_v62, %v8951_v12  ;;  %v7991_v19 = vmax.f32 %v19061_v3, %v19062_v43  ;;  %v8966_v35 = vsel %vm8650_vm15, %v19031_v59, %v19029_v61  ;;  %9668 = vmatprep.mubr.bf16.mxu0 %v9111_v2  ;;  %v12369_v12 = vld [vmem:[%s18617_s9 + $0xa0] sm:$0xff]   ;;  %v12370_v16 = vld [vmem:[%s18617_s9 + $0x68] sm:$0xff]  }
 0xa58   :  { %v7907_v14 = vmax.f32 %v19059_v53, %v19060_v10  ;;  %v9112_v27 = vpack.c.b16 %v9000_v17, %v8993_v52  ;;  %v8960_v42 = vsel %vm8652_vm0, %v19024_v46, %v8959_v33  ;;  %v8967_v15 = vsel %vm8652_vm0, %v19033_v58, %v8966_v35  ;;  %9669 = vmatmul.mubr.bf16.gmra.mrb[4].mxu0 %v9110_v34  ;;  %v12367_v34 = vld [vmem:[%s18617_s9 + $0x98] sm:$0xff]   ;;  %v12371_v17 = vld [vmem:[%s18617_s9 + $0xa8] sm:$0xff]   ;;  %v12372_v53 = vld [vmem:[%s18617_s9 + $0x70] sm:$0xff]  }
 0xa59   :  { %v7992_v24 = vrot.slane %v7991_v19, 1  ;;  %v8961_v18 = vsel %vm8654_vm1, %v19025_v44, %v8960_v42  ;;  %v8968_v4 = vsel %vm8654_vm1, %v19035_v50, %v8967_v15  ;;  %v19063_v40 = vmov 0   ;;  %v12373_v42 = vld [vmem:[%s18617_s9 + $0xb0] sm:$0xff]   ;;  %v12374_v15 = vld [vmem:[%s18617_s9 + $0x78] sm:$0xff]  }
 0xa5a   :  { %v7908_v9 = vrot.slane %v7907_v14, 1  ;;  %9711 = vmatprep.mubr.bf16.mxu0 %v19063_v40  ;;  %v8962_v61 = vsel %vm8656_vm2, %v19027_v8, %v8961_v18  ;;  %v8969_v46 = vsel %vm8656_vm2, %v19036_v21, %v8968_v4  ;;  %v19065_v1 = vunpack.c.l.b16 %v19064_v57 }
 0xa5b   :  { %v7993_v59 = vmax.f32 %v7991_v19, %v7992_v24  ;;  %v8963_v58 = vsel %vm8658_vm3, %v17901_v23, %v8962_v61  ;;  %v8970_v30 = vsel %vm8658_vm3, %v17910_v37, %v8969_v46  ;;  %v19067_v32 = vunpack.c.l.b16 %v19066_v25 }
 0xa5c   :  { %v7909_v26 = vmax.f32 %v7907_v14, %v7908_v9  ;;  %v8964_v50 = vsel %vm8660_vm4, %v19065_v1, %v8963_v58  ;;  %v12574_v36 = vmov 0.0   ;;  %v18275_v39 = vrot.slane %v9081_v60, %v19068_v5  ;;  %v19070_v14 = vld [vmem:[#allocation17_spill] sm:$0xff] }
 0xa5d   :  { %v8971_v54 = vsel %vm8660_vm4, %v19067_v32, %v8970_v30  ;;  %v8377_v8 = vmax.f32 %v7993_v59, 0.0  ;;  %11486 = vmatprep.subr.bf16.mxu0 %v12574_v36  ;;  %11526 = vmatprep.subr.bf16.mxu1 %v12574_v36  ;;  %v18280_v7 = vrot.slane %v9081_v60, %v19069_v0 }
 0xa5e   :  { %v8365_v44 = vmax.f32 %v7909_v26, 0.0  ;;  %11542 = vmatprep.mubr.msk.bf16.mxu1 %vm12575_vm6, %v12574_v36  ;;  %11527 = vmatpush3.bf16.msra.mxu1 %v12361_v11 }
 0xa5f   :  { %v8473_v22 = vpack.c.bf16 %v8377_v8, %v8377_v8  ;;  %11528 = vmatprep.subr.bf16.mxu1 %v12574_v36 }
 0xa60   :  { %v8461_v55 = vpack.c.bf16 %v8365_v44, %v8365_v44  ;;  %9712 = vmatmul.mubr.bf16.vlgmr.msra.gmra.mrb[248].mxu0 %v9097_v20 }
 0xa61   :  { %v8940_v28 = vunpack.c.l.b16 %v8473_v22  ;;  %9721 = vmatprep.mubr.bf16.mxu0 %v19063_v40  ;;  %11487 = vmatpush3.bf16.msra.mxu0 %v12360_v45 }
 0xa62   :  { %v8939_v21 = vunpack.c.l.b16 %v8461_v55  ;;  %11488 = vmatprep.subr.bf16.mxu0 %v12574_v36  ;;  %v12375_v55 = vld [vmem:[%s18617_s9 + $0xb8] sm:$0xff]  }
 0xa63   :  { %v8972_v37 = vsel %vm8662_vm5, %v8940_v28, %v8971_v54 }
 0xa64   :  { %v8965_v23 = vsel %vm8662_vm5, %v8939_v21, %v8964_v50 }
 0xa65   :  { %v9102_v13 = vpack.c.b16 %v8972_v37, %v8965_v23  ;;  %11489 = vmatpush3.bf16.msra.mxu0 %v12362_v56 }
 0xa66   :  { %11490 = vmatprep.subr.bf16.mxu0 %v12574_v36 }
 0xa68   :  { %9722 = vmatmul.mubr.bf16.gmra.mrb[252].mxu0 %v9102_v13 }
 0xa69   :  { %9731 = vmatprep.mubr.bf16.mxu0 %v19063_v40  ;;  %11491 = vmatpush3.bf16.msra.mxu0 %v12364_v29 }
 0xa6a   :  { %11492 = vmatprep.subr.bf16.mxu0 %v12574_v36 }
 0xa6d   :  { %11493 = vmatpush3.bf16.msra.mxu0 %v12366_v31 }
 0xa6e   :  { %11494 = vmatprep.subr.bf16.mxu0 %v12574_v36 }
 0xa70   :  { %9732 = vmatmul.mubr.bf16.gmra.mrb[0].mxu0 %v9107_v48  ;;  %v12363_v48 = vld [vmem:[%s18617_s9 + $0x88] sm:$0xff]  }
 0xa71   :  { %9741 = vmatprep.mubr.bf16.mxu0 %v19063_v40  ;;  %11529 = vmatpush3.bf16.msra.mxu1 %v12363_v48 }
 0xa72   :  { %11530 = vmatprep.subr.bf16.mxu1 %v12574_v36  ;;  %11495 = vmatpush3.bf16.msra.mxu0 %v12368_v51 }
 0xa73   :  { %11496 = vmatprep.subr.bf16.mxu0 %v12574_v36 }
 0xa75   :  { %11531 = vmatpush3.bf16.msra.mxu1 %v12365_v41 }
 0xa76   :  { %11532 = vmatprep.subr.bf16.mxu1 %v12574_v36  ;;  %11497 = vmatpush3.bf16.msra.mxu0 %v12370_v16 }
 0xa77   :  { %11498 = vmatprep.subr.bf16.mxu0 %v12574_v36 }
 0xa78   :  { %9742 = vmatmul.mubr.bf16.gmra.mrb[4].mxu0 %v9112_v27 }
 0xa79   :  { %11502 = vmatprep.mubr.msk.bf16.mxu0 %vm12575_vm6, %v12574_v36  ;;  %11533 = vmatpush3.bf16.msra.mxu1 %v12367_v34 }
 0xa7a   :  { %11534 = vmatprep.subr.bf16.mxu1 %v12574_v36  ;;  %11499 = vmatpush3.bf16.msra.mxu0 %v12372_v53 }
 0xa7b   :  { %11500 = vmatprep.subr.bf16.mxu0 %v12574_v36 }
 0xa7d   :  { %11535 = vmatpush3.bf16.msra.mxu1 %v12369_v12 }
 0xa7e   :  { %11536 = vmatprep.subr.bf16.mxu1 %v12574_v36  ;;  %11501 = vmatpush3.bf16.msra.mxu0 %v12374_v15 }
 0xa7f   :  { %11506 = vmatprep.subr.bf16.mxu0 %v12574_v36 }
 0xa81   :  { %11537 = vmatpush3.bf16.msra.mxu1 %v12371_v17 }
 0xa82   :  { %11538 = vmatprep.subr.bf16.mxu1 %v12574_v36 }
 0xa85   :  { %11539 = vmatpush3.bf16.msra.mxu1 %v12373_v42 }
 0xa86   :  { %11540 = vmatprep.subr.bf16.mxu1 %v12574_v36 }
 0xa89   :  { %11541 = vmatpush3.bf16.msra.mxu1 %v12375_v55 }
 0xa8a   :  { %11566 = vmatprep.subr.bf16.mxu1 %v12574_v36 }
 0xb33   :  { %v9713_v47 = vpop.f32.mrb[248].mxu0 }
 0xb34   :  { %v11586_v52 = vadd.f32 %v9713_v47, %v18275_v39  ;;  %v9715_v49 = vpop.f32.mrb[249].mxu0 }
 0xb35   :  { %v11587_v38 = vadd.f32 %v9715_v49, %v18280_v7  ;;  %v9717_v6 = vpop.f32.mrb[250].mxu0 }
 0xb36   :  { %v11588_v62 = vadd.f32 %v9717_v6, %v18275_v39  ;;  %v9719_v63 = vpop.f32.mrb[251].mxu0 }
 0xb37   :  { %v9752_v2 = vmax.f32 %v11586_v52, %v11587_v38  ;;  %v11589_v20 = vadd.f32 %v9719_v63, %v18280_v7 }
 0xb39   :  { %v9768_v10 = vcombine.high %v9752_v2, %v9752_v2  ;;  %v9775_v27 = vrot.slane %v9752_v2, %v19070_v14  ;;  %v9753_v3 = vmax.f32 %v11588_v62, %v11589_v20 }
 0xb3b   :  { %v9782_v43 = vrot.slane %v9768_v10, %v19070_v14  ;;  %v9783_v19 = vcombine.high %v9775_v27, %v9775_v27  ;;  %v9936_v33 = vsel %vm7657_vm14, %v9775_v27, -inf  ;;  %v9785_v35 = vcombine.high %v9753_v3, %v9753_v3  ;;  %v9723_v9 = vpop.f32.mrb[252].mxu0 }
 0xb3c   :  { %v9937_v24 = vrot.slane %v9936_v33, 4  ;;  %v9792_v18 = vrot.slane %v9753_v3, %v19070_v14  ;;  %v18313_v4 = vadd.f32 %v9723_v9, %v18275_v39  ;;  %v18315_v40 = vpop.f32.mrb[253].mxu0 }
 0xb3d   :  { %v9784_v26 = vcombine.high %v9782_v43, %v9782_v43  ;;  %v9943_v61 = vsel %vm7657_vm14, %v9783_v19, -inf  ;;  %v9950_v46 = vsel %vm7657_vm14, %v9782_v43, -inf  ;;  %v9799_v59 = vrot.slane %v9785_v35, %v19070_v14  ;;  %v18322_v58 = vpop.f32.mrb[254].mxu0 }
 0xb3e   :  { %v9938_v30 = vmax.f32 %v9936_v33, %v9937_v24  ;;  %v9944_v44 = vrot.slane %v9943_v61, 4  ;;  %v9951_v57 = vrot.slane %v9950_v46, 4  ;;  %v9800_v1 = vcombine.high %v9792_v18, %v9792_v18  ;;  %v18324_v50 = vpop.f32.mrb[255].mxu0 }
 0xb3f   :  { %v9957_v25 = vsel %vm7657_vm14, %v9784_v26, -inf  ;;  %v9801_v32 = vcombine.high %v9799_v59, %v9799_v59  ;;  %v9964_v54 = vsel %vm7657_vm14, %v9792_v18, -inf  ;;  %v9978_v8 = vsel %vm7657_vm14, %v9799_v59, -inf }
 0xb40   :  { %v9939_v22 = vrot.slane %v9938_v30, 2  ;;  %v9945_v21 = vmax.f32 %v9943_v61, %v9944_v44  ;;  %v9952_v28 = vmax.f32 %v9950_v46, %v9951_v57  ;;  %v9958_v23 = vrot.slane %v9957_v25, 4 }
 0xb41   :  { %v9965_v37 = vrot.slane %v9964_v54, 4  ;;  %v9971_v13 = vsel %vm7657_vm14, %v9800_v1, -inf  ;;  %v9979_v45 = vrot.slane %v9978_v8, 4  ;;  %v9985_v11 = vsel %vm7657_vm14, %v9801_v32, -inf }
 0xb42   :  { %v9940_v56 = vmax.f32 %v9938_v30, %v9939_v22  ;;  %v9946_v48 = vrot.slane %v9945_v21, 2  ;;  %v9953_v29 = vrot.slane %v9952_v28, 2  ;;  %v9959_v41 = vmax.f32 %v9957_v25, %v9958_v23 }
 0xb43   :  { %v9966_v31 = vmax.f32 %v9964_v54, %v9965_v37  ;;  %v9972_v60 = vrot.slane %v9971_v13, 4  ;;  %v9980_v34 = vmax.f32 %v9978_v8, %v9979_v45  ;;  %v9986_v51 = vrot.slane %v9985_v11, 4  ;;  %v18336_v5 = vpop.f32.mrb[0].mxu0 }
 0xb44   :  { %v9941_v0 = vrot.slane %v9940_v56, 1  ;;  %v9947_v12 = vmax.f32 %v9945_v21, %v9946_v48  ;;  %v9954_v47 = vmax.f32 %v9952_v28, %v9953_v29  ;;  %v9960_v16 = vrot.slane %v9959_v41, 2  ;;  %v18338_v52 = vpop.f32.mrb[1].mxu0 }
 0xb45   :  { %v9967_v49 = vrot.slane %v9966_v31, 2  ;;  %v9973_v38 = vmax.f32 %v9971_v13, %v9972_v60  ;;  %v9981_v6 = vrot.slane %v9980_v34, 2  ;;  %v9987_v62 = vmax.f32 %v9985_v11, %v9986_v51  ;;  %v18341_v63 = vpop.f32.mrb[2].mxu0 }
 0xb46   :  { %v9942_v17 = vmax.f32 %v9940_v56, %v9941_v0  ;;  %v9948_v2 = vrot.slane %v9947_v12, 1  ;;  %v9955_v20 = vrot.slane %v9954_v47, 1  ;;  %v9961_v53 = vmax.f32 %v9959_v41, %v9960_v16  ;;  %v18343_v10 = vpop.f32.mrb[3].mxu0 }
 0xb47   :  { %v9968_v27 = vmax.f32 %v9966_v31, %v9967_v49  ;;  %v9974_v3 = vrot.slane %v9973_v38, 2  ;;  %v9982_v43 = vmax.f32 %v9980_v34, %v9981_v6  ;;  %v9988_v19 = vrot.slane %v9987_v62, 2 }
 0xb48   :  { %v9949_v33 = vmax.f32 %v9947_v12, %v9948_v2  ;;  %v9956_v35 = vmax.f32 %v9954_v47, %v9955_v20  ;;  %v9962_v9 = vrot.slane %v9961_v53, 1  ;;  %v10160_v42 = vmax.f32 %v9942_v17, 0.0 }
 0xb49   :  { %v9969_v15 = vrot.slane %v9968_v27, 1  ;;  %v9975_v24 = vmax.f32 %v9973_v38, %v9974_v3  ;;  %v9983_v18 = vrot.slane %v9982_v43, 1  ;;  %v9989_v26 = vmax.f32 %v9987_v62, %v9988_v19 }
 0xb4a   :  { %v9963_v61 = vmax.f32 %v9961_v53, %v9962_v9  ;;  %v10161_v46 = vmax.f32 %v9949_v33, 0.0  ;;  %v10162_v59 = vmax.f32 %v9956_v35, 0.0  ;;  %v10192_v30 = vpack.c.bf16 %v10160_v42, %v10160_v42 }
 0xb4b   :  { %v9970_v44 = vmax.f32 %v9968_v27, %v9969_v15  ;;  %v9976_v57 = vrot.slane %v9975_v24, 1  ;;  %v9984_v1 = vmax.f32 %v9982_v43, %v9983_v18  ;;  %v9990_v25 = vrot.slane %v9989_v26, 1  ;;  %v18345_v32 = vpop.f32.mrb[4].mxu0 }
 0xb4c   :  { %v10163_v54 = vmax.f32 %v9963_v61, 0.0  ;;  %v10193_v8 = vpack.c.bf16 %v10161_v46, %v10161_v46  ;;  %v10194_v55 = vpack.c.bf16 %v10162_v59, %v10162_v59  ;;  %v10378_v22 = vunpack.c.l.b16 %v10192_v30  ;;  %v18347_v21 = vpop.f32.mrb[5].mxu0 }
 0xb4d   :  { %v9977_v28 = vmax.f32 %v9975_v24, %v9976_v57  ;;  %v9991_v23 = vmax.f32 %v9989_v26, %v9990_v25  ;;  %v10164_v37 = vmax.f32 %v9970_v44, 0.0  ;;  %v10166_v13 = vmax.f32 %v9984_v1, 0.0  ;;  %v18349_v45 = vpop.f32.mrb[6].mxu0 }
 0xb4e   :  { %v10195_v11 = vpack.c.bf16 %v10163_v54, %v10163_v54  ;;  %v10265_v56 = vunpack.c.l.b16 %v10193_v8  ;;  %v10508_v48 = vunpack.c.l.b16 %v10194_v55  ;;  %v11591_v29 = vadd.f32 %v18315_v40, %v18280_v7  ;;  %v18353_v41 = vpop.f32.mrb[7].mxu0 }
 0xb4f   :  { %v10165_v31 = vmax.f32 %v9977_v28, 0.0  ;;  %v10167_v60 = vmax.f32 %v9991_v23, 0.0  ;;  %v10196_v34 = vpack.c.bf16 %v10164_v37, %v10164_v37  ;;  %v10198_v51 = vpack.c.bf16 %v10166_v13, %v10166_v13 }
 0xb50   :  { %v10639_v0 = vunpack.c.l.b16 %v10195_v11  ;;  %v9754_v12 = vmax.f32 %v18313_v4, %v11591_v29  ;;  %v11592_v47 = vadd.f32 %v18322_v58, %v18275_v39  ;;  %v11593_v16 = vadd.f32 %v18324_v50, %v18280_v7 }
 0xb51   :  { %v10197_v49 = vpack.c.bf16 %v10165_v31, %v10165_v31  ;;  %v10199_v38 = vpack.c.bf16 %v10167_v60, %v10167_v60  ;;  %v10379_v6 = vunpack.c.l.b16 %v10196_v34  ;;  %v10509_v62 = vunpack.c.l.b16 %v10198_v51 }
 0xb52   :  { %v9802_v40 = vcombine.high %v9754_v12, %v9754_v12  ;;  %v9809_v17 = vrot.slane %v9754_v12, %v19070_v14  ;;  %v9755_v2 = vmax.f32 %v11592_v47, %v11593_v16  ;;  %v18363_v20 = vadd.f32 %v18336_v5, %v18275_v39 }
 0xb53   :  { %v10266_v53 = vunpack.c.l.b16 %v10197_v49  ;;  %v18366_v4 = vsel %vm8650_vm15, %v10379_v6, %v10378_v22  ;;  %v18369_v58 = vsel %vm8650_vm15, %v10509_v62, %v10508_v48  ;;  %v10640_v50 = vunpack.c.l.b16 %v10199_v38 }
 0xb54   :  { %v9816_v27 = vrot.slane %v9802_v40, %v19070_v14  ;;  %v9817_v3 = vcombine.high %v9809_v17, %v9809_v17  ;;  %v9992_v43 = vsel %vm7657_vm14, %v9809_v17, -inf  ;;  %v9819_v19 = vcombine.high %v9755_v2, %v9755_v2 }
 0xb55   :  { %v18374_v33 = vsel %vm8650_vm15, %v10266_v53, %v10265_v56  ;;  %v18377_v5 = vsel %vm8650_vm15, %v10640_v50, %v10639_v0  ;;  %v9993_v35 = vrot.slane %v9992_v43, 4  ;;  %v9826_v9 = vrot.slane %v9755_v2, %v19070_v14 }
 0xb56   :  { %v9818_v42 = vcombine.high %v9816_v27, %v9816_v27  ;;  %v9999_v15 = vsel %vm7657_vm14, %v9817_v3, -inf  ;;  %v10006_v24 = vsel %vm7657_vm14, %v9816_v27, -inf  ;;  %v9833_v18 = vrot.slane %v9819_v19, %v19070_v14 }
 0xb57   :  { %v9994_v26 = vmax.f32 %v9992_v43, %v9993_v35  ;;  %v10000_v61 = vrot.slane %v9999_v15, 4  ;;  %v10007_v46 = vrot.slane %v10006_v24, 4  ;;  %v9834_v59 = vcombine.high %v9826_v9, %v9826_v9 }
 0xb58   :  { %v10013_v30 = vsel %vm7657_vm14, %v9818_v42, -inf  ;;  %v9835_v44 = vcombine.high %v9833_v18, %v9833_v18  ;;  %v10020_v57 = vsel %vm7657_vm14, %v9826_v9, -inf  ;;  %v10034_v1 = vsel %vm7657_vm14, %v9833_v18, -inf }
 0xb59   :  { %v9995_v25 = vrot.slane %v9994_v26, 2  ;;  %v10001_v54 = vmax.f32 %v9999_v15, %v10000_v61  ;;  %v10008_v8 = vmax.f32 %v10006_v24, %v10007_v46  ;;  %v10014_v55 = vrot.slane %v10013_v30, 4 }
 0xb5a   :  { %v10021_v22 = vrot.slane %v10020_v57, 4  ;;  %v10027_v28 = vsel %vm7657_vm14, %v9834_v59, -inf  ;;  %v10035_v23 = vrot.slane %v10034_v1, 4  ;;  %v10041_v37 = vsel %vm7657_vm14, %v9835_v44, -inf }
 0xb5b   :  { %v9996_v13 = vmax.f32 %v9994_v26, %v9995_v25  ;;  %v10002_v11 = vrot.slane %v10001_v54, 2  ;;  %v10009_v56 = vrot.slane %v10008_v8, 2  ;;  %v10015_v48 = vmax.f32 %v10013_v30, %v10014_v55 }
 0xb5c   :  { %v10022_v29 = vmax.f32 %v10020_v57, %v10021_v22  ;;  %v10028_v31 = vrot.slane %v10027_v28, 4  ;;  %v10036_v60 = vmax.f32 %v10034_v1, %v10035_v23  ;;  %v10042_v34 = vrot.slane %v10041_v37, 4 }
 0xb5d   :  { %v9997_v51 = vrot.slane %v9996_v13, 1  ;;  %v10003_v0 = vmax.f32 %v10001_v54, %v10002_v11  ;;  %v10010_v12 = vmax.f32 %v10008_v8, %v10009_v56  ;;  %v10016_v47 = vrot.slane %v10015_v48, 2 }
 0xb5e   :  { %v10023_v16 = vrot.slane %v10022_v29, 2  ;;  %v10029_v49 = vmax.f32 %v10027_v28, %v10028_v31  ;;  %v10037_v38 = vrot.slane %v10036_v60, 2  ;;  %v10043_v6 = vmax.f32 %v10041_v37, %v10042_v34 }
 0xb5f   :  { %v9998_v62 = vmax.f32 %v9996_v13, %v9997_v51  ;;  %v10004_v40 = vrot.slane %v10003_v0, 1  ;;  %v10011_v17 = vrot.slane %v10010_v12, 1  ;;  %v10017_v2 = vmax.f32 %v10015_v48, %v10016_v47 }
 0xb60   :  { %v10024_v53 = vmax.f32 %v10022_v29, %v10023_v16  ;;  %v10030_v50 = vrot.slane %v10029_v49, 2  ;;  %v10038_v27 = vmax.f32 %v10036_v60, %v10037_v38  ;;  %v10044_v3 = vrot.slane %v10043_v6, 2 }
 0xb61   :  { %v10005_v43 = vmax.f32 %v10003_v0, %v10004_v40  ;;  %v10012_v19 = vmax.f32 %v10010_v12, %v10011_v17  ;;  %v10018_v35 = vrot.slane %v10017_v2, 1  ;;  %v10168_v9 = vmax.f32 %v9998_v62, 0.0 }
 0xb62   :  { %v10025_v42 = vrot.slane %v10024_v53, 1  ;;  %v10031_v15 = vmax.f32 %v10029_v49, %v10030_v50  ;;  %v10039_v24 = vrot.slane %v10038_v27, 1  ;;  %v10045_v18 = vmax.f32 %v10043_v6, %v10044_v3 }
 0xb63   :  { %v10019_v26 = vmax.f32 %v10017_v2, %v10018_v35  ;;  %v10169_v61 = vmax.f32 %v10005_v43, 0.0  ;;  %v10170_v46 = vmax.f32 %v10012_v19, 0.0  ;;  %v10200_v59 = vpack.c.bf16 %v10168_v9, %v10168_v9 }
 0xb64   :  { %v10026_v30 = vmax.f32 %v10024_v53, %v10025_v42  ;;  %v10032_v44 = vrot.slane %v10031_v15, 1  ;;  %v10040_v57 = vmax.f32 %v10038_v27, %v10039_v24  ;;  %v10046_v1 = vrot.slane %v10045_v18, 1 }
 0xb65   :  { %v10171_v25 = vmax.f32 %v10019_v26, 0.0  ;;  %v10201_v54 = vpack.c.bf16 %v10169_v61, %v10169_v61  ;;  %v10202_v8 = vpack.c.bf16 %v10170_v46, %v10170_v46  ;;  %v10380_v55 = vunpack.c.l.b16 %v10200_v59 }
 0xb66   :  { %v10033_v22 = vmax.f32 %v10031_v15, %v10032_v44  ;;  %v10047_v28 = vmax.f32 %v10045_v18, %v10046_v1  ;;  %v10172_v23 = vmax.f32 %v10026_v30, 0.0  ;;  %v10174_v37 = vmax.f32 %v10040_v57, 0.0 }
 0xb67   :  { %v10203_v13 = vpack.c.bf16 %v10171_v25, %v10171_v25  ;;  %v10267_v11 = vunpack.c.l.b16 %v10201_v54  ;;  %v10387_v56 = vsel %vm8652_vm0, %v10380_v55, %v18366_v4  ;;  %v10510_v48 = vunpack.c.l.b16 %v10202_v8 }
 0xb68   :  { %v10173_v29 = vmax.f32 %v10033_v22, 0.0  ;;  %v10175_v31 = vmax.f32 %v10047_v28, 0.0  ;;  %v10204_v60 = vpack.c.bf16 %v10172_v23, %v10172_v23  ;;  %v10206_v34 = vpack.c.bf16 %v10174_v37, %v10174_v37 }
 0xb69   :  { %v10274_v51 = vsel %vm8652_vm0, %v10267_v11, %v18374_v33  ;;  %v10517_v0 = vsel %vm8652_vm0, %v10510_v48, %v18369_v58  ;;  %v10641_v12 = vunpack.c.l.b16 %v10203_v13  ;;  %v11595_v47 = vadd.f32 %v18338_v52, %v18280_v7 }
 0xb6a   :  { %v10205_v16 = vpack.c.bf16 %v10173_v29, %v10173_v29  ;;  %v10207_v49 = vpack.c.bf16 %v10175_v31, %v10175_v31  ;;  %v10381_v38 = vunpack.c.l.b16 %v10204_v60  ;;  %v10511_v6 = vunpack.c.l.b16 %v10206_v34 }
 0xb6b   :  { %v10648_v4 = vsel %vm8652_vm0, %v10641_v12, %v18377_v5  ;;  %v9756_v62 = vmax.f32 %v18363_v20, %v11595_v47  ;;  %v11596_v40 = vadd.f32 %v18341_v63, %v18275_v39  ;;  %v11597_v33 = vadd.f32 %v18343_v10, %v18280_v7 }
 0xb6c   :  { %v10268_v58 = vunpack.c.l.b16 %v10205_v16  ;;  %v18404_v17 = vsel %vm8654_vm1, %v10381_v38, %v10387_v56  ;;  %v18407_v52 = vsel %vm8654_vm1, %v10511_v6, %v10517_v0  ;;  %v10642_v2 = vunpack.c.l.b16 %v10207_v49 }
 0xb6d   :  { %v9836_v53 = vcombine.high %v9756_v62, %v9756_v62  ;;  %v9843_v50 = vrot.slane %v9756_v62, %v19070_v14  ;;  %v9757_v5 = vmax.f32 %v11596_v40, %v11597_v33  ;;  %v11598_v20 = vadd.f32 %v18345_v32, %v18275_v39 }
 0xb6e   :  { %v18413_v63 = vsel %vm8654_vm1, %v10268_v58, %v10274_v51  ;;  %v18416_v10 = vsel %vm8654_vm1, %v10642_v2, %v10648_v4  ;;  %v11599_v27 = vadd.f32 %v18347_v21, %v18280_v7  ;;  %v18422_v3 = vadd.f32 %v18349_v45, %v18275_v39 }
 0xb6f   :  { %v9850_v43 = vrot.slane %v9836_v53, %v19070_v14  ;;  %v9851_v19 = vcombine.high %v9843_v50, %v9843_v50  ;;  %v10048_v35 = vsel %vm7657_vm14, %v9843_v50, -inf  ;;  %v9853_v9 = vcombine.high %v9757_v5, %v9757_v5 }
 0xb70   :  { %v10049_v32 = vrot.slane %v10048_v35, 4  ;;  %v9860_v42 = vrot.slane %v9757_v5, %v19070_v14  ;;  %v18427_v15 = vmax.f32 %v11598_v20, %v11599_v27  ;;  %v18431_v24 = vadd.f32 %v18353_v41, %v18280_v7 }
 0xb71   :  { %v9852_v21 = vcombine.high %v9850_v43, %v9850_v43  ;;  %v10055_v18 = vsel %vm7657_vm14, %v9851_v19, -inf  ;;  %v10062_v39 = vsel %vm7657_vm14, %v9850_v43, -inf  ;;  %v9867_v45 = vrot.slane %v9853_v9, %v19070_v14 }
 0xb72   :  { %v10050_v26 = vmax.f32 %v10048_v35, %v10049_v32  ;;  %v10056_v61 = vrot.slane %v10055_v18, 4  ;;  %v10063_v46 = vrot.slane %v10062_v39, 4  ;;  %v9868_v59 = vcombine.high %v9860_v42, %v9860_v42 }
 0xb73   :  { %v10069_v30 = vsel %vm7657_vm14, %v9852_v21, -inf  ;;  %v9869_v44 = vcombine.high %v9867_v45, %v9867_v45  ;;  %v10076_v57 = vsel %vm7657_vm14, %v9860_v42, -inf  ;;  %v10090_v1 = vsel %vm7657_vm14, %v9867_v45, -inf }
 0xb74   :  { %v10051_v7 = vrot.slane %v10050_v26, 2  ;;  %v10057_v41 = vmax.f32 %v10055_v18, %v10056_v61  ;;  %v10064_v25 = vmax.f32 %v10062_v39, %v10063_v46  ;;  %v10070_v54 = vrot.slane %v10069_v30, 4 }
 0xb75   :  { %v10077_v8 = vrot.slane %v10076_v57, 4  ;;  %v10083_v55 = vsel %vm7657_vm14, %v9868_v59, -inf  ;;  %v10091_v22 = vrot.slane %v10090_v1, 4  ;;  %v10097_v28 = vsel %vm7657_vm14, %v9869_v44, -inf }
 0xb76   :  { %v10052_v23 = vmax.f32 %v10050_v26, %v10051_v7  ;;  %v10058_v37 = vrot.slane %v10057_v41, 2  ;;  %v10065_v13 = vrot.slane %v10064_v25, 2  ;;  %v10071_v11 = vmax.f32 %v10069_v30, %v10070_v54 }
 0xb77   :  { %v10078_v56 = vmax.f32 %v10076_v57, %v10077_v8  ;;  %v10084_v48 = vrot.slane %v10083_v55, 4  ;;  %v10092_v29 = vmax.f32 %v10090_v1, %v10091_v22  ;;  %v10098_v31 = vrot.slane %v10097_v28, 4 }
 0xb78   :  { %v10053_v60 = vrot.slane %v10052_v23, 1  ;;  %v10059_v34 = vmax.f32 %v10057_v41, %v10058_v37  ;;  %v10066_v51 = vmax.f32 %v10064_v25, %v10065_v13  ;;  %v10072_v0 = vrot.slane %v10071_v11, 2 }
 0xb79   :  { %v10079_v12 = vrot.slane %v10078_v56, 2  ;;  %v10085_v47 = vmax.f32 %v10083_v55, %v10084_v48  ;;  %v10093_v16 = vrot.slane %v10092_v29, 2  ;;  %v10099_v49 = vmax.f32 %v10097_v28, %v10098_v31 }
 0xb7a   :  { %v10054_v38 = vmax.f32 %v10052_v23, %v10053_v60  ;;  %v10060_v6 = vrot.slane %v10059_v34, 1  ;;  %v10067_v4 = vrot.slane %v10066_v51, 1  ;;  %v10073_v62 = vmax.f32 %v10071_v11, %v10072_v0 }
 0xb7b   :  { %v10080_v40 = vmax.f32 %v10078_v56, %v10079_v12  ;;  %v10086_v33 = vrot.slane %v10085_v47, 2  ;;  %v10094_v58 = vmax.f32 %v10092_v29, %v10093_v16  ;;  %v10100_v2 = vrot.slane %v10099_v49, 2 }
 0xb7c   :  { %v10061_v53 = vmax.f32 %v10059_v34, %v10060_v6  ;;  %v10068_v50 = vmax.f32 %v10066_v51, %v10067_v4  ;;  %v10074_v5 = vrot.slane %v10073_v62, 1  ;;  %v10176_v20 = vmax.f32 %v10054_v38, 0.0 }
 0xb7d   :  { %v10081_v27 = vrot.slane %v10080_v40, 1  ;;  %v10087_v43 = vmax.f32 %v10085_v47, %v10086_v33  ;;  %v10095_v19 = vrot.slane %v10094_v58, 1  ;;  %v10101_v35 = vmax.f32 %v10099_v49, %v10100_v2 }
 0xb7e   :  { %v10075_v9 = vmax.f32 %v10073_v62, %v10074_v5  ;;  %v10177_v32 = vmax.f32 %v10061_v53, 0.0  ;;  %v10178_v42 = vmax.f32 %v10068_v50, 0.0  ;;  %v10208_v21 = vpack.c.bf16 %v10176_v20, %v10176_v20 }
 0xb7f   :  { %v10082_v18 = vmax.f32 %v10080_v40, %v10081_v27  ;;  %v10088_v39 = vrot.slane %v10087_v43, 1  ;;  %v10096_v45 = vmax.f32 %v10094_v58, %v10095_v19  ;;  %v10102_v26 = vrot.slane %v10101_v35, 1 }
 0xb80   :  { %v10179_v61 = vmax.f32 %v10075_v9, 0.0  ;;  %v10209_v46 = vpack.c.bf16 %v10177_v32, %v10177_v32  ;;  %v10210_v59 = vpack.c.bf16 %v10178_v42, %v10178_v42  ;;  %v10382_v30 = vunpack.c.l.b16 %v10208_v21 }
 0xb81   :  { %v10089_v44 = vmax.f32 %v10087_v43, %v10088_v39  ;;  %v10103_v57 = vmax.f32 %v10101_v35, %v10102_v26  ;;  %v10180_v1 = vmax.f32 %v10082_v18, 0.0  ;;  %v10182_v7 = vmax.f32 %v10096_v45, 0.0 }
 0xb82   :  { %v10211_v41 = vpack.c.bf16 %v10179_v61, %v10179_v61  ;;  %v10269_v25 = vunpack.c.l.b16 %v10209_v46  ;;  %v10389_v54 = vsel %vm8656_vm2, %v10382_v30, %v18404_v17  ;;  %v10512_v8 = vunpack.c.l.b16 %v10210_v59 }
 0xb83   :  { %v10181_v55 = vmax.f32 %v10089_v44, 0.0  ;;  %v10183_v22 = vmax.f32 %v10103_v57, 0.0  ;;  %v10212_v28 = vpack.c.bf16 %v10180_v1, %v10180_v1  ;;  %v18443_v23 = vpack.c.bf16 %v10182_v7, %v10182_v7 }
 0xb84   :  { %v10276_v37 = vsel %vm8656_vm2, %v10269_v25, %v18413_v63  ;;  %v10643_v13 = vunpack.c.l.b16 %v10211_v41  ;;  %v9870_v11 = vcombine.high %v18427_v15, %v18427_v15  ;;  %v9877_v56 = vrot.slane %v18427_v15, %v19070_v14 }
 0xb85   :  { %v10213_v48 = vpack.c.bf16 %v10181_v55, %v10181_v55  ;;  %v10215_v29 = vpack.c.bf16 %v10183_v22, %v10183_v22  ;;  %v10383_v31 = vunpack.c.l.b16 %v10212_v28  ;;  %v10513_v17 = vunpack.c.l.b16 %v18443_v23 }
 0xb86   :  { %v10650_v60 = vsel %vm8656_vm2, %v10643_v13, %v18416_v10  ;;  %v9884_v34 = vrot.slane %v9870_v11, %v19070_v14  ;;  %v9885_v51 = vcombine.high %v9877_v56, %v9877_v56  ;;  %v10104_v63 = vsel %vm7657_vm14, %v9877_v56, -inf }
 0xb87   :  { %v10270_v0 = vunpack.c.l.b16 %v10213_v48  ;;  %v18457_v12 = vsel %vm8658_vm3, %v10383_v31, %v10389_v54  ;;  %v10644_v47 = vunpack.c.l.b16 %v10215_v29  ;;  %v10105_v16 = vrot.slane %v10104_v63, 4 }
 0xb88   :  { %v9886_v15 = vcombine.high %v9884_v34, %v9884_v34  ;;  %v10111_v49 = vsel %vm7657_vm14, %v9885_v51, -inf  ;;  %v10118_v38 = vsel %vm7657_vm14, %v9884_v34, -inf  ;;  %v9759_v6 = vmax.f32 %v18422_v3, %v18431_v24 }
 0xb89   :  { %v18464_v10 = vsel %vm8658_vm3, %v10270_v0, %v10276_v37  ;;  %v18467_v4 = vsel %vm8658_vm3, %v10644_v47, %v10650_v60  ;;  %v10106_v62 = vmax.f32 %v10104_v63, %v10105_v16  ;;  %v10112_v40 = vrot.slane %v10111_v49, 4 }
 0xb8a   :  { %v10119_v33 = vrot.slane %v10118_v38, 4  ;;  %v10125_v58 = vsel %vm7657_vm14, %v9886_v15, -inf  ;;  %v9887_v2 = vcombine.high %v9759_v6, %v9759_v6  ;;  %v9894_v53 = vrot.slane %v9759_v6, %v19070_v14 }
 0xb8b   :  { %v10107_v50 = vrot.slane %v10106_v62, 2  ;;  %v10113_v5 = vmax.f32 %v10111_v49, %v10112_v40  ;;  %v10126_v20 = vrot.slane %v10125_v58, 4  ;;  %v18473_v3 = vsel %vm8656_vm2, %v10512_v8, %v18407_v52 }
 0xb8c   :  { %v10120_v24 = vmax.f32 %v10118_v38, %v10119_v33  ;;  %v9901_v27 = vrot.slane %v9887_v2, %v19070_v14  ;;  %v9902_v43 = vcombine.high %v9894_v53, %v9894_v53  ;;  %v10132_v19 = vsel %vm7657_vm14, %v9894_v53, -inf }
 0xb8d   :  { %v10108_v35 = vmax.f32 %v10106_v62, %v10107_v50  ;;  %v10114_v9 = vrot.slane %v10113_v5, 2  ;;  %v10127_v32 = vmax.f32 %v10125_v58, %v10126_v20  ;;  %v10133_v42 = vrot.slane %v10132_v19, 4 }
 0xb8e   :  { %v10121_v21 = vrot.slane %v10120_v24, 2  ;;  %v9903_v18 = vcombine.high %v9901_v27, %v9901_v27  ;;  %v10139_v39 = vsel %vm7657_vm14, %v9902_v43, -inf  ;;  %v10146_v45 = vsel %vm7657_vm14, %v9901_v27, -inf }
 0xb8f   :  { %v10109_v26 = vrot.slane %v10108_v35, 1  ;;  %v10115_v61 = vmax.f32 %v10113_v5, %v10114_v9  ;;  %v10128_v52 = vrot.slane %v10127_v32, 2  ;;  %v10134_v46 = vmax.f32 %v10132_v19, %v10133_v42 }
 0xb90   :  { %v10122_v59 = vmax.f32 %v10120_v24, %v10121_v21  ;;  %v10140_v30 = vrot.slane %v10139_v39, 4  ;;  %v10147_v14 = vrot.slane %v10146_v45, 4  ;;  %v10153_v44 = vsel %vm7657_vm14, %v9903_v18, -inf }
 0xb91   :  { %v10110_v57 = vmax.f32 %v10108_v35, %v10109_v26  ;;  %v10116_v1 = vrot.slane %v10115_v61, 1  ;;  %v10129_v7 = vmax.f32 %v10127_v32, %v10128_v52  ;;  %v10135_v41 = vrot.slane %v10134_v46, 2 }
 0xb92   :  { %v10123_v25 = vrot.slane %v10122_v59, 1  ;;  %v10141_v54 = vmax.f32 %v10139_v39, %v10140_v30  ;;  %v10148_v8 = vmax.f32 %v10146_v45, %v10147_v14  ;;  %v10154_v55 = vrot.slane %v10153_v44, 4 }
 0xb93   :  { %v10117_v22 = vmax.f32 %v10115_v61, %v10116_v1  ;;  %v10130_v28 = vrot.slane %v10129_v7, 1  ;;  %v10184_v37 = vmax.f32 %v10110_v57, 0.0  ;;  %v10136_v13 = vmax.f32 %v10134_v46, %v10135_v41  ;;  %v12377_v1 = vld [vmem:[%s18617_s9 + $0x8] sm:$0xff]   ;;  %v12379_v41 = vld [vmem:[%s18617_s9 + $0x18] sm:$0xff]  }
 0xb94   :  { %v10124_v11 = vmax.f32 %v10122_v59, %v10123_v25  ;;  %v10142_v56 = vrot.slane %v10141_v54, 2  ;;  %v10149_v48 = vrot.slane %v10148_v8, 2  ;;  %v10155_v29 = vmax.f32 %v10153_v44, %v10154_v55  ;;  %v12380_v25 = vld [vmem:[%s18617_s9 + $0x20] sm:$0xff]   ;;  %v12383_v55 = vld [vmem:[%s18617_s9 + $0x38] sm:$0xff]  }
 0xb95   :  { %v10131_v31 = vmax.f32 %v10129_v7, %v10130_v28  ;;  %v10185_v60 = vmax.f32 %v10117_v22, 0.0  ;;  %v10216_v34 = vpack.c.bf16 %v10184_v37, %v10184_v37  ;;  %v10137_v51 = vrot.slane %v10136_v13, 1  ;;  %v12378_v7 = vld [vmem:[%s18617_s9 + $0x10] sm:$0xff]   ;;  %v12384_v22 = vld [vmem:[%s18617_s9 + $0xc0] sm:$0xff]   ;;  %v12385_v37 = vld [vmem:[%s18617_s9 + $0xc8] sm:$0xff]  }
 0xb96   :  { %v10186_v63 = vmax.f32 %v10124_v11, 0.0  ;;  %v10143_v0 = vmax.f32 %v10141_v54, %v10142_v56  ;;  %v10150_v47 = vmax.f32 %v10148_v8, %v10149_v48  ;;  %v10156_v16 = vrot.slane %v10155_v29, 2  ;;  %v12381_v54 = vld [vmem:[%s18617_s9 + $0x28] sm:$0xff]   ;;  %v12382_v8 = vld [vmem:[%s18617_s9 + $0x30] sm:$0xff]   ;;  %v12387_v11 = vld [vmem:[%s18617_s9 + $0xd8] sm:$0xff]  }
 0xb97   :  { %v10187_v15 = vmax.f32 %v10131_v31, 0.0  ;;  %v10217_v49 = vpack.c.bf16 %v10185_v60, %v10185_v60  ;;  %v10384_v38 = vunpack.c.l.b16 %v10216_v34  ;;  %v10138_v6 = vmax.f32 %v10136_v13, %v10137_v51  ;;  %v12386_v13 = vld [vmem:[%s18617_s9 + $0xd0] sm:$0xff]   ;;  %v12388_v56 = vld [vmem:[%s18617_s9 + $0xe0] sm:$0xff]   ;;  %v12389_v48 = vld [vmem:[%s18617_s9 + $0xe8] sm:$0xff]  }
 0xb98   :  { %v10218_v62 = vpack.c.bf16 %v10186_v63, %v10186_v63  ;;  %v10144_v40 = vrot.slane %v10143_v0, 1  ;;  %v10151_v33 = vrot.slane %v10150_v47, 1  ;;  %v10157_v58 = vmax.f32 %v10155_v29, %v10156_v16  ;;  %v12390_v29 = vld [vmem:[%s18617_s9 + $0xf0] sm:$0xff]   ;;  %v12391_v31 = vld [vmem:[%s18617_s9 + $0xf8] sm:$0xff]   ;;  %v12392_v34 = vld [vmem:[%s18619_s11] sm:$0xff]  }
 0xb99   :  { %v10219_v2 = vpack.c.bf16 %v10187_v15, %v10187_v15  ;;  %v10271_v53 = vunpack.c.l.b16 %v10217_v49  ;;  %v10391_v50 = vsel %vm8660_vm4, %v10384_v38, %v18457_v12  ;;  %v10188_v5 = vmax.f32 %v10138_v6, 0.0  ;;  %v12393_v51 = vld [vmem:[%s18619_s11 + $0x8] sm:$0xff]   ;;  %v12394_v63 = vld [vmem:[%s18619_s11 + $0x10] sm:$0xff]   ;;  %v12399_v49 = vld [vmem:[%s18619_s11 + $0x38] sm:$0xff]  }
 0xb9a   :  { %v10514_v20 = vunpack.c.l.b16 %v10218_v62  ;;  %v10145_v24 = vmax.f32 %v10143_v0, %v10144_v40  ;;  %v10152_v27 = vmax.f32 %v10150_v47, %v10151_v33  ;;  %v10158_v43 = vrot.slane %v10157_v58, 1  ;;  %v12395_v0 = vld [vmem:[%s18619_s11 + $0x18] sm:$0xff]   ;;  %v12396_v47 = vld [vmem:[%s18619_s11 + $0x20] sm:$0xff]   ;;  %v12397_v16 = vld [vmem:[%s18619_s11 + $0x28] sm:$0xff]  }
 0xb9b   :  { %v10278_v19 = vsel %vm8660_vm4, %v10271_v53, %v18464_v10  ;;  %v10645_v35 = vunpack.c.l.b16 %v10219_v2  ;;  %v10220_v9 = vpack.c.bf16 %v10188_v5, %v10188_v5  ;;  %v10520_v32 = vsel %vm8658_vm3, %v10513_v17, %v18473_v3  ;;  %v12376_v3 = vld [vmem:[%s18617_s9] sm:$0xff]   ;;  %v12398_v15 = vld [vmem:[%s18619_s11 + $0x30] sm:$0xff]  }
 0xb9c   :  { %v10159_v42 = vmax.f32 %v10157_v58, %v10158_v43  ;;  %v10189_v21 = vmax.f32 %v10145_v24, 0.0  ;;  %v10190_v18 = vmax.f32 %v10152_v27, 0.0  ;;  %v10521_v12 = vsel %vm8660_vm4, %v10514_v20, %v10520_v32 }
 0xb9d   :  { %v10652_v39 = vsel %vm8660_vm4, %v10645_v35, %v18467_v4  ;;  %v10385_v45 = vunpack.c.l.b16 %v10220_v9 }
 0xb9e   :  { %v10191_v26 = vmax.f32 %v10159_v42, 0.0  ;;  %v10221_v61 = vpack.c.bf16 %v10189_v21, %v10189_v21  ;;  %v10222_v52 = vpack.c.bf16 %v10190_v18, %v10190_v18 }
 0xb9f   :  { %v10392_v10 = vsel %vm8662_vm5, %v10385_v45, %v10391_v50 }
 0xba0   :  { %v10223_v46 = vpack.c.bf16 %v10191_v26, %v10191_v26  ;;  %v10272_v59 = vunpack.c.l.b16 %v10221_v61  ;;  %v10515_v30 = vunpack.c.l.b16 %v10222_v52  ;;  %v10393_v28 = vpack.c.b16 %v10392_v10, %v10392_v10 }
 0xba2   :  { %v10279_v23 = vsel %vm8662_vm5, %v10272_v59, %v10278_v19  ;;  %v10646_v17 = vunpack.c.l.b16 %v10223_v46  ;;  %v10522_v14 = vsel %vm8662_vm5, %v10515_v30, %v10521_v12 }
 0xba3   :  { %v10280_v44 = vpack.c.b16 %v10279_v23, %v10279_v23  ;;  %v10523_v4 = vpack.c.b16 %v10522_v14, %v10522_v14 }
 0xba4   :  { %v10653_v57 = vsel %vm8662_vm5, %v10646_v17, %v10652_v39  ;;  %v11432_v39 = vld [vmem:[%s18621_s12] ss:$0 sm:$0xff] }
 0xba5   :  { %11503 = vmatmul.mubr.bf16.vlgmr.msra.gmra.mrb[8].mxu0 %v10280_v44  ;;  %11543 = vmatmul.mubr.bf16.vlgmr.msra.gmra.mrb[144].mxu1 %v10523_v4  ;;  %v10654_v60 = vpack.c.b16 %v10653_v57, %v10653_v57 }
 0xba6   :  { %11507 = vmatpush3.bf16.msra.mxu0 %v12376_v3  ;;  %11522 = vmatprep.mubr.msk.bf16.mxu0 %vm12575_vm6, %v12574_v36 }
 0xba7   :  { %11508 = vmatprep.subr.bf16.mxu0 %v12574_v36  ;;  %11582 = vmatprep.mubr.msk.bf16.mxu1 %vm12575_vm6, %v12574_v36 }
 0xba8   :  { %11567 = vmatpush3.bf16.msra.mxu1 %v12392_v34 }
 0xba9   :  { %11568 = vmatprep.subr.bf16.mxu1 %v12574_v36 }
 0xbaa   :  { %11509 = vmatpush3.bf16.msra.mxu0 %v12377_v1 }
 0xbab   :  { %11510 = vmatprep.subr.bf16.mxu0 %v12574_v36 }
 0xbac   :  { %11569 = vmatpush3.bf16.msra.mxu1 %v12393_v51 }
 0xbad   :  { %11570 = vmatprep.subr.bf16.mxu1 %v12574_v36 }
 0xbae   :  { %11511 = vmatpush3.bf16.msra.mxu0 %v12378_v7 }
 0xbaf   :  { %11512 = vmatprep.subr.bf16.mxu0 %v12574_v36 }
 0xbb0   :  { %11571 = vmatpush3.bf16.msra.mxu1 %v12394_v63 }
 0xbb1   :  { %11572 = vmatprep.subr.bf16.mxu1 %v12574_v36 }
 0xbb2   :  { %11513 = vmatpush3.bf16.msra.mxu0 %v12379_v41 }
 0xbb3   :  { %11514 = vmatprep.subr.bf16.mxu0 %v12574_v36 }
 0xbb4   :  { %11573 = vmatpush3.bf16.msra.mxu1 %v12395_v0 }
 0xbb5   :  { %11574 = vmatprep.subr.bf16.mxu1 %v12574_v36 }
 0xbb6   :  { %11515 = vmatpush3.bf16.msra.mxu0 %v12380_v25 }
 0xbb7   :  { %11516 = vmatprep.subr.bf16.mxu0 %v12574_v36 }
 0xbb8   :  { %11575 = vmatpush3.bf16.msra.mxu1 %v12396_v47 }
 0xbb9   :  { %11576 = vmatprep.subr.bf16.mxu1 %v12574_v36 }
 0xbba   :  { %11517 = vmatpush3.bf16.msra.mxu0 %v12381_v54 }
 0xbbb   :  { %11518 = vmatprep.subr.bf16.mxu0 %v12574_v36 }
 0xbbc   :  { %11577 = vmatpush3.bf16.msra.mxu1 %v12397_v16 }
 0xbbd   :  { %11578 = vmatprep.subr.bf16.mxu1 %v12574_v36 }
 0xbbe   :  { %11519 = vmatpush3.bf16.msra.mxu0 %v12382_v8 }
 0xbbf   :  { %11520 = vmatprep.subr.bf16.mxu0 %v12574_v36 }
 0xbc0   :  { %11579 = vmatpush3.bf16.msra.mxu1 %v12398_v15 }
 0xbc1   :  { %11580 = vmatprep.subr.bf16.mxu1 %v12574_v36 }
 0xbc2   :  { %11521 = vmatpush3.bf16.msra.mxu0 %v12383_v55 }
 0xbc3   :  { %11546 = vmatprep.subr.bf16.mxu0 %v12574_v36 }
 0xbc4   :  { %11581 = vmatpush3.bf16.msra.mxu1 %v12399_v49 }
 0xbc5   :  { %11523 = vmatmul.mubr.bf16.vlgmr.msra.gmra.mrb[12].mxu0 %v10393_v28 }
 0xbc6   :  { %11547 = vmatpush3.bf16.msra.mxu0 %v12384_v22  ;;  %11562 = vmatprep.mubr.msk.bf16.mxu0 %vm12575_vm6, %v12574_v36 }
 0xbc7   :  { %11548 = vmatprep.subr.bf16.mxu0 %v12574_v36 }
 0xbca   :  { %11549 = vmatpush3.bf16.msra.mxu0 %v12385_v37 }
 0xbcb   :  { %11550 = vmatprep.subr.bf16.mxu0 %v12574_v36 }
 0xbce   :  { %11551 = vmatpush3.bf16.msra.mxu0 %v12386_v13 }
 0xbcf   :  { %11552 = vmatprep.subr.bf16.mxu0 %v12574_v36 }
 0xbd2   :  { %11553 = vmatpush3.bf16.msra.mxu0 %v12387_v11 }
 0xbd3   :  { %11554 = vmatprep.subr.bf16.mxu0 %v12574_v36 }
 0xbd6   :  { %11555 = vmatpush3.bf16.msra.mxu0 %v12388_v56 }
 0xbd7   :  { %11556 = vmatprep.subr.bf16.mxu0 %v12574_v36 }
 0xbda   :  { %11557 = vmatpush3.bf16.msra.mxu0 %v12389_v48 }
 0xbdb   :  { %11558 = vmatprep.subr.bf16.mxu0 %v12574_v36 }
 0xbde   :  { %11559 = vmatpush3.bf16.msra.mxu0 %v12390_v29 }
 0xbdf   :  { %11560 = vmatprep.subr.bf16.mxu0 %v12574_v36  ;;  %v11431_v36 = vld [vmem:[%s18620_s10] ss:$0 sm:$0xff] }
 0xbe2   :  { %11561 = vmatpush3.bf16.msra.mxu0 %v12391_v31 }
 0xbe5   :  { %11563 = vmatmul.mubr.bf16.vlgmr.msra.gmra.mrb[16].mxu0 %v10654_v60 }
 0xc78   :  { %v10364_v38 = vpop.f32.mrb[8].mxu0  ;;  %v10607_v6 = vpop.f32.mrb[144].mxu1 }
 0xc79   :  { %v11504_v62 = vpop.f32.mrb[9].mxu0  ;;  %v11544_v40 = vpop.f32.mrb[145].mxu1 }
 0xc7a   :  { %v10367_v33 = vpop.f32.mrb[10].mxu0  ;;  %v10610_v58 = vpop.f32.mrb[146].mxu1 }
 0xc7b   :  { %v11505_v2 = vpop.f32.mrb[11].mxu0  ;;  %v11545_v53 = vpop.f32.mrb[147].mxu1 }
 0xc98   :  { %v10477_v50 = vpop.f32.mrb[12].mxu0 }
 0xc99   :  { %v10478_v5 = vadd.f32 %v10477_v50, %v10364_v38  ;;  %v11524_v20 = vpop.f32.mrb[13].mxu0 }
 0xc9a   :  { %v10480_v24 = vpop.f32.mrb[14].mxu0 }
 0xc9b   :  { %v11525_v27 = vpop.f32.mrb[15].mxu0  ;;  %v10613_v43 = vadd.f32 %v10607_v6, %v10478_v5 }
 0xcb8   :  { %v10738_v19 = vpop.f32.mrb[16].mxu0 }
 0xcb9   :  { %v10744_v35 = vadd.f32 %v10738_v19, %v10613_v43  ;;  %v11564_v9 = vpop.f32.mrb[17].mxu0 }
 0xcba   :  { %v10741_v32 = vpop.f32.mrb[18].mxu0 }
 0xcbb   :  { %v10752_v42 = vadd.f32 %v11431_v36, %v10744_v35  ;;  %v11565_v21 = vpop.f32.mrb[19].mxu0 }
 0xcbd   :  { %v10753_v18 = vmax.f32 %v10752_v42, 0.0 }
 0xcbf   :  { %v10754_v12 = vpack.c.bf16 %v10753_v18, %v10753_v18 }
 0xcc1   :  { %11583 = vmatmul.mubr.bf16.vlgmr.msra.gmra.mrb[148].mxu1 %v10754_v12 }
 0xd94   :  { %v10860_v45 = vpop.f32.mrb[148].mxu1 }
 0xd95   :  { %v10861_v26 = vadd.f32 %v11432_v39, %v10860_v45  ;;  %v11584_v61 = vpop.f32.mrb[149].mxu1 }
 0xd96   :  { %v10863_v52 = vpop.f32.mrb[150].mxu1 }
 0xd97   :  { %v11585_v10 = vpop.f32.mrb[151].mxu1  ;;  %v10867_v46 = vsel %vm10866_vm7, %v10861_v26, -inf }
 0xd98   :  { %10868 = vmax.xlane.f32.xlu0 %v10867_v46 }
 0xe25   :  { %v10869_v59 = vpop.xlane.xlu0 %10868 }
 0xe26   :  { %v10870_v30 = vsub.f32 %v10861_v26, %v10869_v59 }
 0xe28   :  { %v10871_v23 = vmul.f32 1.442695, %v10870_v30 }
 0xe2a   :  { %12528 = vpow2.f32 %v10871_v23 }
 0xe34   :  { %v12529_v17 = vpop.eup %12528 }
 0xe35   :  { %v10873_v3 = vsel %vm10866_vm7, %v12529_v17, 0.0 }
 0xe36   :  { %10874 = vadd.xlane.f32.xlu1 %v10873_v3 }
 0xec3   :  { %v10875_v14 = vpop.xlane.xlu1 %10874 }
 0xec4   :  { %12530 = vlog2.f32 %v10875_v14 }
 0xece   :  { %v12531_v44 = vpop.eup %12530 }
 0xecf   :  { %v10877_v4 = vmul.f32 0.6931472, %v12531_v44 }
 0xed1   :  { %v10878_v57 = vsub.f32 %v10870_v30, %v10877_v4 }
 0xed3   :  { %10879 = vst.msk [vmem:[%s18622_s13] sm:$0xff] %vm10866_vm7, %v10878_v57 }

</bundles_post_ra>
